<compile_context>
chip_gen: v5e
topology: v5e:2x2
jax: 0.10.0
libtpu: 0.0.40
codegen_flags: <defaults>
</compile_context>

<pallas_src>
import numpy as np
import jax
import jax.numpy as jnp
from jax.experimental import pallas as pl
from jax.experimental.pallas import tpu as pltpu

BN_EPS = 1e-5


# ----------------------------------------------------------------------------
# Fused Pallas kernel
# ----------------------------------------------------------------------------

def _simple_resnet_kernel(
    # inputs
    x_ref,
    w1_ref, s1_ref, b1_ref,
    w2_ref, s2_ref, b2_ref,
    w3_ref, s3_ref, b3_ref,
    w4_ref, s4_ref, b4_ref,
    wfc_ref, bfc_ref,
    # outputs
    out_ref, feat_ref,
    # VMEM scratch (all activations stay on-chip)
    pad1_ref, c1_ref,
    pad2_ref, c2_ref,
    pad3_ref, c3_ref,
):
    f32 = jnp.float32

    def zero_border(pad_ref, w_real):
        """Zero only the padding ring (and any over-allocated right columns)."""
        B, Hp, Wp, C = pad_ref.shape
        pad_ref[:, 0:1, :, :] = jnp.zeros((B, 1, Wp, C), f32)
        pad_ref[:, Hp - 1:Hp, :, :] = jnp.zeros((B, 1, Wp, C), f32)
        pad_ref[:, :, 0:1, :] = jnp.zeros((B, Hp, 1, C), f32)
        pad_ref[:, :, w_real + 1:Wp, :] = jnp.zeros((B, Hp, Wp - w_real - 1, C), f32)

    def conv_bn_relu(pad_ref, w_ref, s_ref, b_ref, out_scr, kh, kw):
        """Stride-1 conv over zero-padded scratch + folded BN + ReLU.

        All kh*kw taps are concatenated along the K (lane) axis so the layer is
        a single (M, kh*kw*Cin) @ (kh*kw*Cin, Cout) MXU matmul with the batch
        and all spatial output positions folded into M.  `Wl` (out_scr width)
        may be over-allocated; junk columns are never read downstream.
        """
        Cin = pad_ref.shape[3]
        Cout = w_ref.shape[1]
        B, Hout, Wl, _ = out_scr.shape
        M = B * Hout * Wl
        taps = [pad_ref[:, i:i + Hout, j:j + Wl, :].reshape(M, Cin)
                for i in range(kh) for j in range(kw)]
        lhs = jnp.concatenate(taps, axis=-1)              # (M, kh*kw*Cin)
        acc = jnp.dot(lhs, w_ref[...], preferred_element_type=f32)
        y = jnp.maximum(acc * s_ref[...] + b_ref[...], 0.0)   # folded BN + ReLU
        out_scr[...] = y.reshape(B, Hout, Wl, Cout)

    def maxpool2x2(src, real_w):
        """MaxPool2d(2,2) of the first `real_w` columns of a (B,Hc,Wc,C) value."""
        B, Hc, Wc, C = src.shape
        Ho, Wo = Hc // 2, real_w // 2
        a = src.reshape(B, Ho, 2, Wc, C)
        rows = jnp.maximum(a[:, :, 0], a[:, :, 1])                  # (B,Ho,Wc,C)
        cols = rows[:, :, :real_w, :].reshape(B, Ho, Wo, 2, C)
        return jnp.maximum(cols[:, :, :, 0, :], cols[:, :, :, 1, :])  # (B,Ho,Wo,C)

    B, H, W, _ = x_ref.shape
    H2, W2 = H // 2, W // 2
    H3, W3 = H // 4, W // 4

    # ---- block 1: pad -> conv3x3 + BN + ReLU -> maxpool -> padded scratch ----
    zero_border(pad1_ref, W)
    pad1_ref[:, 1:H + 1, 1:W + 1, :] = x_ref[...]
    conv_bn_relu(pad1_ref, w1_ref, s1_ref, b1_ref, c1_ref, 3, 3)
    zero_border(pad2_ref, W2)
    pad2_ref[:, 1:H2 + 1, 1:W2 + 1, :] = maxpool2x2(c1_ref[...], W)

    # ---- block 2 --------------------------------------------------------------
    conv_bn_relu(pad2_ref, w2_ref, s2_ref, b2_ref, c2_ref, 3, 3)
    zero_border(pad3_ref, W3)
    pad3_ref[:, 1:H3 + 1, 1:W3 + 1, :] = maxpool2x2(c2_ref[...], W2)

    # ---- block 3 (c3 width over-allocated to a full sublane tile; junk cols
    #      beyond W3 are never read by the pool below) --------------------------
    conv_bn_relu(pad3_ref, w3_ref, s3_ref, b3_ref, c3_ref, 3, 3)
    p3 = maxpool2x2(c3_ref[...], W3)                     # (B, 2, 2, Ch), registers

    # ---- block 4: 2x2 valid conv (-> 1x1) + BN + ReLU + FC + sigmoid,
    #      vectorised over batch (one K=4*Ch matmul + one FC matmul) ------------
    p3_flat = jnp.concatenate(
        [p3[:, 0, 0, :], p3[:, 0, 1, :], p3[:, 1, 0, :], p3[:, 1, 1, :]],
        axis=-1)                                          # (B, 4*Ch), (i,j,c) order
    feats = jnp.maximum(
        jnp.dot(p3_flat, w4_ref[...], preferred_element_type=f32)
        * s4_ref[...] + b4_ref[...], 0.0)                 # (B, Ch)
    feat_ref[...] = feats
    logits = jnp.dot(feats, wfc_ref[...], preferred_element_type=f32) + bfc_ref[...]
    z = jnp.exp(-jnp.abs(logits))                         # numerically stable sigmoid
    out_ref[...] = jnp.where(logits >= 0.0, 1.0 / (1.0 + z), z / (1.0 + z))


# ----------------------------------------------------------------------------
# Wrapper (single pallas_call for the whole forward pass)
# ----------------------------------------------------------------------------

def simple_resnet_forward(x_nchw, params):
    """Pallas SimpleResNet.forward. Returns (sigmoid(fc(features)), features)."""
    x = jnp.transpose(x_nchw, (0, 2, 3, 1)).astype(jnp.float32)   # NCHW -> NHWC
    B, H, W, Cin = x.shape                                        # 16x16 spatial
    Ch = params["w4"].shape[-1]
    num_classes = params["w_fc_t"].shape[-1]

    H2, W2 = H // 2, W // 2          # after pool 1
    H3, W3 = H // 4, W // 4          # after pool 2
    W3L = -(-W3 // 8) * 8            # layer-3 output width padded to sublane tile

    f32 = jnp.float32
    vmem = pl.BlockSpec(memory_space=pltpu.MemorySpace.VMEM)
    scratch = [
        pltpu.VMEM((B, H + 2, W + 2, Cin), f32),    # pad1 : zero-padded input
        pltpu.VMEM((B, H, W, Ch), f32),             # c1   : conv1 output
        pltpu.VMEM((B, H2 + 2, W2 + 2, Ch), f32),   # pad2 : zero-padded pool1
        pltpu.VMEM((B, H2, W2, Ch), f32),           # c2   : conv2 output
        pltpu.VMEM((B, H3 + 2, W3L + 2, Ch), f32),  # pad3 : zero-padded pool2 (wide)
        pltpu.VMEM((B, H3, W3L, Ch), f32),          # c3   : conv3 output (wide)
    ]

    out, feats = pl.pallas_call(
        _simple_resnet_kernel,
        out_shape=(jax.ShapeDtypeStruct((B, num_classes), f32),
                   jax.ShapeDtypeStruct((B, Ch), f32)),
        in_specs=[vmem] * 15,
        out_specs=(vmem, vmem),
        scratch_shapes=scratch,
    )(x,
      params["w1"], params["scale1"], params["bias1"],
      params["w2"], params["scale2"], params["bias2"],
      params["w3"], params["scale3"], params["bias3"],
      params["w4"], params["scale4"], params["bias4"],
      params["w_fc_t"], params["b_fc"])
    return out, feats


# ----------------------------------------------------------------------------
# Deterministic parameter construction (synthetic, no checkpoint load)
# ----------------------------------------------------------------------------

def init_raw_params(key, in_ch, hidden, num_classes):
    ks = jax.random.split(key, 32)
    raw = {}
    conv_shapes = {
        1: (hidden, in_ch, 3, 3),
        2: (hidden, hidden, 3, 3),
        3: (hidden, hidden, 3, 3),
        4: (hidden, hidden, 2, 2),
    }
    i = 0
    for k, shp in conv_shapes.items():
        raw[f"conv{k}_w"] = 0.1 * jax.random.normal(ks[i], shp, jnp.float32); i += 1
        raw[f"conv{k}_b"] = 0.1 * jax.random.normal(ks[i], (shp[0],), jnp.float32); i += 1
        raw[f"bn{k}_gamma"] = 1.0 + 0.1 * jax.random.normal(ks[i], (shp[0],), jnp.float32); i += 1
        raw[f"bn{k}_beta"] = 0.1 * jax.random.normal(ks[i], (shp[0],), jnp.float32); i += 1
        raw[f"bn{k}_mean"] = 0.1 * jax.random.normal(ks[i], (shp[0],), jnp.float32); i += 1
        raw[f"bn{k}_var"] = jax.random.uniform(ks[i], (shp[0],), jnp.float32, 0.5, 1.5); i += 1
    raw["fc_w"] = 0.1 * jax.random.normal(ks[i], (num_classes, hidden), jnp.float32); i += 1
    raw["fc_b"] = 0.1 * jax.random.normal(ks[i], (num_classes,), jnp.float32); i += 1
    return raw


def prepare_kernel_params(raw):
    """Fold conv-bias + eval-mode BN into per-channel scale/bias.

    Conv weights are pre-flattened to (KH*KW*Cin, Cout) in (i, j, c) order to
    match the in-kernel tap concatenation; the FC weight is pre-transposed.
    """
    params = {}
    for k in (1, 2, 3, 4):
        w = raw[f"conv{k}_w"]                                 # (Cout, Cin, KH, KW)
        cout, cin, kh, kw = w.shape
        w_hwio = jnp.transpose(w, (2, 3, 1, 0))               # (KH, KW, Cin, Cout)
        params[f"w{k}"] = w_hwio.reshape(kh * kw * cin, cout).astype(jnp.float32)
        scale = raw[f"bn{k}_gamma"] / jnp.sqrt(raw[f"bn{k}_var"] + BN_EPS)
        bias = (raw[f"conv{k}_b"] - raw[f"bn{k}_mean"]) * scale + raw[f"bn{k}_beta"]
        params[f"scale{k}"] = scale.reshape(1, cout).astype(jnp.float32)
        params[f"bias{k}"] = bias.reshape(1, cout).astype(jnp.float32)
    params["w_fc_t"] = raw["fc_w"].T.astype(jnp.float32)       # (hidden, num_classes)
    params["b_fc"] = raw["fc_b"].reshape(1, -1).astype(jnp.float32)
    return params


# ----------------------------------------------------------------------------
# Pure-JAX reference (NCHW, eval-mode BN) for validation
# ----------------------------------------------------------------------------

def reference_forward(x, raw):
    def conv(x, w, b, pad):
        y = jax.lax.conv_general_dilated(
            x, w, window_strides=(1, 1), padding=[(pad, pad), (pad, pad)],
            dimension_numbers=("NCHW", "OIHW", "NCHW"),
            precision=jax.lax.Precision.HIGHEST)
        return y + b[None, :, None, None]

    def bn(x, g, bta, m, v):
        return (x - m[None, :, None, None]) / jnp.sqrt(v[None, :, None, None] + BN_EPS) \
            * g[None, :, None, None] + bta[None, :, None, None]

    def pool(x):
        return jax.lax.reduce_window(x, -jnp.inf, jax.lax.max,
                                     (1, 1, 2, 2), (1, 1, 2, 2), "VALID")

    for k in (1, 2, 3):
        x = conv(x, raw[f"conv{k}_w"], raw[f"conv{k}_b"], 1)
        x = jnp.maximum(bn(x, raw[f"bn{k}_gamma"], raw[f"bn{k}_beta"],
                           raw[f"bn{k}_mean"], raw[f"bn{k}_var"]), 0.0)
        x = pool(x)
    x = conv(x, raw["conv4_w"], raw["conv4_b"], 0)
    x = jnp.maximum(bn(x, raw["bn4_gamma"], raw["bn4_beta"],
                       raw["bn4_mean"], raw["bn4_var"]), 0.0)
    feats = x.reshape(x.shape[0], -1)
    logits = feats @ raw["fc_w"].T + raw["fc_b"][None, :]
    return jax.nn.sigmoid(logits), feats


# ----------------------------------------------------------------------------

if __name__ == "__main__":
    B, Cin, H, W = 2, 4, 16, 16          # small shapes consistent with the module
    hidden, num_classes = 32, 1

    key = jax.random.PRNGKey(0)
    kx, kp = jax.random.split(key)
    x = jax.random.normal(kx, (B, Cin, H, W), dtype=jnp.float32)

    raw = init_raw_params(kp, Cin, hidden, num_classes)
    params = prepare_kernel_params(raw)

    fwd = jax.jit(simple_resnet_forward)
    out, features = fwd(x, params)
    out = jax.block_until_ready(out)
    features = jax.block_until_ready(features)

    ref_out, ref_feat = reference_forward(x, raw)
    np.testing.assert_allclose(np.asarray(out), np.asarray(ref_out),
                               rtol=1e-3, atol=1e-3)
    np.testing.assert_allclose(np.asarray(features), np.asarray(ref_feat),
                               rtol=1e-3, atol=1e-3)

    print("KERNEL_OK")
</pallas_src>

<mosaic_0001>
module attributes {stable_mosaic.version = 11 : i64} {
  func.func @_simple_resnet_kernel(%arg0: memref<2x16x16x4xf32, #tpu.memory_space<vmem>>, %arg1: memref<36x32xf32, #tpu.memory_space<vmem>>, %arg2: memref<1x32xf32, #tpu.memory_space<vmem>>, %arg3: memref<1x32xf32, #tpu.memory_space<vmem>>, %arg4: memref<288x32xf32, #tpu.memory_space<vmem>>, %arg5: memref<1x32xf32, #tpu.memory_space<vmem>>, %arg6: memref<1x32xf32, #tpu.memory_space<vmem>>, %arg7: memref<288x32xf32, #tpu.memory_space<vmem>>, %arg8: memref<1x32xf32, #tpu.memory_space<vmem>>, %arg9: memref<1x32xf32, #tpu.memory_space<vmem>>, %arg10: memref<128x32xf32, #tpu.memory_space<vmem>>, %arg11: memref<1x32xf32, #tpu.memory_space<vmem>>, %arg12: memref<1x32xf32, #tpu.memory_space<vmem>>, %arg13: memref<32x1xf32, #tpu.memory_space<vmem>>, %arg14: memref<1x1xf32, #tpu.memory_space<vmem>>, %arg15: memref<2x1xf32, #tpu.memory_space<vmem>>, %arg16: memref<2x32xf32, #tpu.memory_space<vmem>>, %arg17: memref<2x18x18x4xf32, #tpu.memory_space<vmem>>, %arg18: memref<2x16x16x32xf32, #tpu.memory_space<vmem>>, %arg19: memref<2x10x10x32xf32, #tpu.memory_space<vmem>>, %arg20: memref<2x8x8x32xf32, #tpu.memory_space<vmem>>, %arg21: memref<2x6x10x32xf32, #tpu.memory_space<vmem>>, %arg22: memref<2x4x8x32xf32, #tpu.memory_space<vmem>>) attributes {dimension_semantics = [], scalar_prefetch = 0 : i64, scratch_operands = 6 : i64, tpu.core_type = #tpu.core_type<tc>} {
    %cst = arith.constant 0.000000e+00 : f32
    %0 = vector.broadcast %cst : f32 to vector<2x1x18x4xf32>
    %c0 = arith.constant 0 : index
    %c0_0 = arith.constant 0 : index
    %c0_1 = arith.constant 0 : index
    %c0_2 = arith.constant 0 : index
    %1 = vector.load %arg17[%c0, %c0_0, %c0_1, %c0_2] : memref<2x18x18x4xf32, #tpu.memory_space<vmem>>, vector<2x1x18x4xf32>
    tpu.vector_store %arg17[%c0, %c0_0, %c0_1, %c0_2], %0 {strides = array<i32>} : memref<2x18x18x4xf32, #tpu.memory_space<vmem>>, vector<2x1x18x4xf32>,
    %cst_3 = arith.constant 0.000000e+00 : f32
    %2 = vector.broadcast %cst_3 : f32 to vector<2x1x18x4xf32>
    %c0_4 = arith.constant 0 : index
    %c17 = arith.constant 17 : index
    %c0_5 = arith.constant 0 : index
    %c0_6 = arith.constant 0 : index
    %3 = vector.load %arg17[%c0_4, %c17, %c0_5, %c0_6] : memref<2x18x18x4xf32, #tpu.memory_space<vmem>>, vector<2x1x18x4xf32>
    tpu.vector_store %arg17[%c0_4, %c17, %c0_5, %c0_6], %2 {strides = array<i32>} : memref<2x18x18x4xf32, #tpu.memory_space<vmem>>, vector<2x1x18x4xf32>,
    %cst_7 = arith.constant 0.000000e+00 : f32
    %4 = vector.broadcast %cst_7 : f32 to vector<2x18x1x4xf32>
    %c0_8 = arith.constant 0 : index
    %c0_9 = arith.constant 0 : index
    %c0_10 = arith.constant 0 : index
    %c0_11 = arith.constant 0 : index
    %5 = vector.load %arg17[%c0_8, %c0_9, %c0_10, %c0_11] : memref<2x18x18x4xf32, #tpu.memory_space<vmem>>, vector<2x18x1x4xf32>
    tpu.vector_store %arg17[%c0_8, %c0_9, %c0_10, %c0_11], %4 {strides = array<i32>} : memref<2x18x18x4xf32, #tpu.memory_space<vmem>>, vector<2x18x1x4xf32>,
    %cst_12 = arith.constant 0.000000e+00 : f32
    %6 = vector.broadcast %cst_12 : f32 to vector<2x18x1x4xf32>
    %c0_13 = arith.constant 0 : index
    %c0_14 = arith.constant 0 : index
    %c17_15 = arith.constant 17 : index
    %c0_16 = arith.constant 0 : index
    %7 = vector.load %arg17[%c0_13, %c0_14, %c17_15, %c0_16] : memref<2x18x18x4xf32, #tpu.memory_space<vmem>>, vector<2x18x1x4xf32>
    tpu.vector_store %arg17[%c0_13, %c0_14, %c17_15, %c0_16], %6 {strides = array<i32>} : memref<2x18x18x4xf32, #tpu.memory_space<vmem>>, vector<2x18x1x4xf32>,
    %c0_17 = arith.constant 0 : index
    %c0_18 = arith.constant 0 : index
    %c0_19 = arith.constant 0 : index
    %c0_20 = arith.constant 0 : index
    %8 = vector.load %arg0[%c0_17, %c0_18, %c0_19, %c0_20] : memref<2x16x16x4xf32, #tpu.memory_space<vmem>>, vector<2x16x16x4xf32>
    %c0_21 = arith.constant 0 : index
    %c1 = arith.constant 1 : index
    %c1_22 = arith.constant 1 : index
    %c0_23 = arith.constant 0 : index
    %9 = vector.load %arg17[%c0_21, %c1, %c1_22, %c0_23] : memref<2x18x18x4xf32, #tpu.memory_space<vmem>>, vector<2x16x16x4xf32>
    tpu.vector_store %arg17[%c0_21, %c1, %c1_22, %c0_23], %8 {strides = array<i32>} : memref<2x18x18x4xf32, #tpu.memory_space<vmem>>, vector<2x16x16x4xf32>,
    %c0_24 = arith.constant 0 : index
    %c0_25 = arith.constant 0 : index
    %c0_26 = arith.constant 0 : index
    %c0_27 = arith.constant 0 : index
    %10 = vector.load %arg17[%c0_24, %c0_25, %c0_26, %c0_27] : memref<2x18x18x4xf32, #tpu.memory_space<vmem>>, vector<2x16x16x4xf32>
    %11 = vector.shape_cast %10 : vector<2x16x16x4xf32> to vector<512x4xf32>
    %c0_28 = arith.constant 0 : index
    %c0_29 = arith.constant 0 : index
    %c1_30 = arith.constant 1 : index
    %c0_31 = arith.constant 0 : index
    %12 = vector.load %arg17[%c0_28, %c0_29, %c1_30, %c0_31] : memref<2x18x18x4xf32, #tpu.memory_space<vmem>>, vector<2x16x16x4xf32>
    %13 = vector.shape_cast %12 : vector<2x16x16x4xf32> to vector<512x4xf32>
    %c0_32 = arith.constant 0 : index
    %c0_33 = arith.constant 0 : index
    %c2 = arith.constant 2 : index
    %c0_34 = arith.constant 0 : index
    %14 = vector.load %arg17[%c0_32, %c0_33, %c2, %c0_34] : memref<2x18x18x4xf32, #tpu.memory_space<vmem>>, vector<2x16x16x4xf32>
    %15 = vector.shape_cast %14 : vector<2x16x16x4xf32> to vector<512x4xf32>
    %c0_35 = arith.constant 0 : index
    %c1_36 = arith.constant 1 : index
    %c0_37 = arith.constant 0 : index
    %c0_38 = arith.constant 0 : index
    %16 = vector.load %arg17[%c0_35, %c1_36, %c0_37, %c0_38] : memref<2x18x18x4xf32, #tpu.memory_space<vmem>>, vector<2x16x16x4xf32>
    %17 = vector.shape_cast %16 : vector<2x16x16x4xf32> to vector<512x4xf32>
    %c0_39 = arith.constant 0 : index
    %c1_40 = arith.constant 1 : index
    %c1_41 = arith.constant 1 : index
    %c0_42 = arith.constant 0 : index
    %18 = vector.load %arg17[%c0_39, %c1_40, %c1_41, %c0_42] : memref<2x18x18x4xf32, #tpu.memory_space<vmem>>, vector<2x16x16x4xf32>
    %19 = vector.shape_cast %18 : vector<2x16x16x4xf32> to vector<512x4xf32>
    %c0_43 = arith.constant 0 : index
    %c1_44 = arith.constant 1 : index
    %c2_45 = arith.constant 2 : index
    %c0_46 = arith.constant 0 : index
    %20 = vector.load %arg17[%c0_43, %c1_44, %c2_45, %c0_46] : memref<2x18x18x4xf32, #tpu.memory_space<vmem>>, vector<2x16x16x4xf32>
    %21 = vector.shape_cast %20 : vector<2x16x16x4xf32> to vector<512x4xf32>
    %c0_47 = arith.constant 0 : index
    %c2_48 = arith.constant 2 : index
    %c0_49 = arith.constant 0 : index
    %c0_50 = arith.constant 0 : index
    %22 = vector.load %arg17[%c0_47, %c2_48, %c0_49, %c0_50] : memref<2x18x18x4xf32, #tpu.memory_space<vmem>>, vector<2x16x16x4xf32>
    %23 = vector.shape_cast %22 : vector<2x16x16x4xf32> to vector<512x4xf32>
    %c0_51 = arith.constant 0 : index
    %c2_52 = arith.constant 2 : index
    %c1_53 = arith.constant 1 : index
    %c0_54 = arith.constant 0 : index
    %24 = vector.load %arg17[%c0_51, %c2_52, %c1_53, %c0_54] : memref<2x18x18x4xf32, #tpu.memory_space<vmem>>, vector<2x16x16x4xf32>
    %25 = vector.shape_cast %24 : vector<2x16x16x4xf32> to vector<512x4xf32>
    %c0_55 = arith.constant 0 : index
    %c2_56 = arith.constant 2 : index
    %c2_57 = arith.constant 2 : index
    %c0_58 = arith.constant 0 : index
    %26 = vector.load %arg17[%c0_55, %c2_56, %c2_57, %c0_58] : memref<2x18x18x4xf32, #tpu.memory_space<vmem>>, vector<2x16x16x4xf32>
    %27 = vector.shape_cast %26 : vector<2x16x16x4xf32> to vector<512x4xf32>
    %28 = tpu.concatenate %11, %13, %15, %17, %19, %21, %23, %25, %27 in 1 : vector<512x4xf32>, vector<512x4xf32>, vector<512x4xf32>, vector<512x4xf32>, vector<512x4xf32>, vector<512x4xf32>, vector<512x4xf32>, vector<512x4xf32>, vector<512x4xf32> -> vector<512x36xf32>
    %c0_59 = arith.constant 0 : index
    %c0_60 = arith.constant 0 : index
    %29 = vector.load %arg1[%c0_59, %c0_60] : memref<36x32xf32, #tpu.memory_space<vmem>>, vector<36x32xf32>
    %cst_61 = arith.constant dense<0.000000e+00> : vector<512x32xf32>
    %30 = tpu.matmul %28, %29, %cst_61 {dimension_numbers = #tpu.dot_dimension_numbers<[1], [0], [0], [1], [0, 0, 1, 1], [], []>} : vector<512x36xf32>, vector<36x32xf32>, vector<512x32xf32> -> vector<512x32xf32>
    %c0_62 = arith.constant 0 : index
    %c0_63 = arith.constant 0 : index
    %31 = vector.load %arg2[%c0_62, %c0_63] : memref<1x32xf32, #tpu.memory_space<vmem>>, vector<1x32xf32>
    %32 = vector.broadcast %31 : vector<1x32xf32> to vector<512x32xf32>
    %33 = arith.mulf %30, %32 : vector<512x32xf32>
    %c0_64 = arith.constant 0 : index
    %c0_65 = arith.constant 0 : index
    %34 = vector.load %arg3[%c0_64, %c0_65] : memref<1x32xf32, #tpu.memory_space<vmem>>, vector<1x32xf32>
    %35 = vector.broadcast %34 : vector<1x32xf32> to vector<512x32xf32>
    %36 = arith.addf %33, %35 : vector<512x32xf32>
    %cst_66 = arith.constant 0.000000e+00 : f32
    %37 = vector.broadcast %cst_66 : f32 to vector<512x32xf32>
    %38 = arith.maximumf %36, %37 : vector<512x32xf32>
    %39 = vector.shape_cast %38 : vector<512x32xf32> to vector<2x16x16x32xf32>
    %c0_67 = arith.constant 0 : index
    %c0_68 = arith.constant 0 : index
    %c0_69 = arith.constant 0 : index
    %c0_70 = arith.constant 0 : index
    %40 = vector.load %arg18[%c0_67, %c0_68, %c0_69, %c0_70] : memref<2x16x16x32xf32, #tpu.memory_space<vmem>>, vector<2x16x16x32xf32>
    tpu.vector_store %arg18[%c0_67, %c0_68, %c0_69, %c0_70], %39 {strides = array<i32>} : memref<2x16x16x32xf32, #tpu.memory_space<vmem>>, vector<2x16x16x32xf32>,
    %cst_71 = arith.constant 0.000000e+00 : f32
    %41 = vector.broadcast %cst_71 : f32 to vector<2x1x10x32xf32>
    %c0_72 = arith.constant 0 : index
    %c0_73 = arith.constant 0 : index
    %c0_74 = arith.constant 0 : index
    %c0_75 = arith.constant 0 : index
    %42 = vector.load %arg19[%c0_72, %c0_73, %c0_74, %c0_75] : memref<2x10x10x32xf32, #tpu.memory_space<vmem>>, vector<2x1x10x32xf32>
    tpu.vector_store %arg19[%c0_72, %c0_73, %c0_74, %c0_75], %41 {strides = array<i32>} : memref<2x10x10x32xf32, #tpu.memory_space<vmem>>, vector<2x1x10x32xf32>,
    %cst_76 = arith.constant 0.000000e+00 : f32
    %43 = vector.broadcast %cst_76 : f32 to vector<2x1x10x32xf32>
    %c0_77 = arith.constant 0 : index
    %c9 = arith.constant 9 : index
    %c0_78 = arith.constant 0 : index
    %c0_79 = arith.constant 0 : index
    %44 = vector.load %arg19[%c0_77, %c9, %c0_78, %c0_79] : memref<2x10x10x32xf32, #tpu.memory_space<vmem>>, vector<2x1x10x32xf32>
    tpu.vector_store %arg19[%c0_77, %c9, %c0_78, %c0_79], %43 {strides = array<i32>} : memref<2x10x10x32xf32, #tpu.memory_space<vmem>>, vector<2x1x10x32xf32>,
    %cst_80 = arith.constant 0.000000e+00 : f32
    %45 = vector.broadcast %cst_80 : f32 to vector<2x10x1x32xf32>
    %c0_81 = arith.constant 0 : index
    %c0_82 = arith.constant 0 : index
    %c0_83 = arith.constant 0 : index
    %c0_84 = arith.constant 0 : index
    %46 = vector.load %arg19[%c0_81, %c0_82, %c0_83, %c0_84] : memref<2x10x10x32xf32, #tpu.memory_space<vmem>>, vector<2x10x1x32xf32>
    tpu.vector_store %arg19[%c0_81, %c0_82, %c0_83, %c0_84], %45 {strides = array<i32>} : memref<2x10x10x32xf32, #tpu.memory_space<vmem>>, vector<2x10x1x32xf32>,
    %cst_85 = arith.constant 0.000000e+00 : f32
    %47 = vector.broadcast %cst_85 : f32 to vector<2x10x1x32xf32>
    %c0_86 = arith.constant 0 : index
    %c0_87 = arith.constant 0 : index
    %c9_88 = arith.constant 9 : index
    %c0_89 = arith.constant 0 : index
    %48 = vector.load %arg19[%c0_86, %c0_87, %c9_88, %c0_89] : memref<2x10x10x32xf32, #tpu.memory_space<vmem>>, vector<2x10x1x32xf32>
    tpu.vector_store %arg19[%c0_86, %c0_87, %c9_88, %c0_89], %47 {strides = array<i32>} : memref<2x10x10x32xf32, #tpu.memory_space<vmem>>, vector<2x10x1x32xf32>,
    %c0_90 = arith.constant 0 : index
    %c0_91 = arith.constant 0 : index
    %c0_92 = arith.constant 0 : index
    %c0_93 = arith.constant 0 : index
    %49 = vector.load %arg18[%c0_90, %c0_91, %c0_92, %c0_93] : memref<2x16x16x32xf32, #tpu.memory_space<vmem>>, vector<2x16x16x32xf32>
    %50 = vector.shape_cast %49 : vector<2x16x16x32xf32> to vector<2x8x2x16x32xf32>
    %51 = vector.extract_strided_slice %50 {offsets = [0, 0, 0, 0, 0], sizes = [2, 8, 1, 16, 32], strides = [1, 1, 1, 1, 1]} : vector<2x8x2x16x32xf32> to vector<2x8x1x16x32xf32>
    %52 = vector.shape_cast %51 : vector<2x8x1x16x32xf32> to vector<2x8x16x32xf32>
    %53 = vector.extract_strided_slice %50 {offsets = [0, 0, 1, 0, 0], sizes = [2, 8, 1, 16, 32], strides = [1, 1, 1, 1, 1]} : vector<2x8x2x16x32xf32> to vector<2x8x1x16x32xf32>
    %54 = vector.shape_cast %53 : vector<2x8x1x16x32xf32> to vector<2x8x16x32xf32>
    %55 = arith.maximumf %52, %54 : vector<2x8x16x32xf32>
    %56 = vector.shape_cast %55 : vector<2x8x16x32xf32> to vector<2x8x8x2x32xf32>
    %57 = vector.extract_strided_slice %56 {offsets = [0, 0, 0, 0, 0], sizes = [2, 8, 8, 1, 32], strides = [1, 1, 1, 1, 1]} : vector<2x8x8x2x32xf32> to vector<2x8x8x1x32xf32>
    %58 = vector.shape_cast %57 : vector<2x8x8x1x32xf32> to vector<2x8x8x32xf32>
    %59 = vector.extract_strided_slice %56 {offsets = [0, 0, 0, 1, 0], sizes = [2, 8, 8, 1, 32], strides = [1, 1, 1, 1, 1]} : vector<2x8x8x2x32xf32> to vector<2x8x8x1x32xf32>
    %60 = vector.shape_cast %59 : vector<2x8x8x1x32xf32> to vector<2x8x8x32xf32>
    %61 = arith.maximumf %58, %60 : vector<2x8x8x32xf32>
    %c0_94 = arith.constant 0 : index
    %c1_95 = arith.constant 1 : index
    %c1_96 = arith.constant 1 : index
    %c0_97 = arith.constant 0 : index
    %62 = vector.load %arg19[%c0_94, %c1_95, %c1_96, %c0_97] : memref<2x10x10x32xf32, #tpu.memory_space<vmem>>, vector<2x8x8x32xf32>
    tpu.vector_store %arg19[%c0_94, %c1_95, %c1_96, %c0_97], %61 {strides = array<i32>} : memref<2x10x10x32xf32, #tpu.memory_space<vmem>>, vector<2x8x8x32xf32>,
    %c0_98 = arith.constant 0 : index
    %c0_99 = arith.constant 0 : index
    %c0_100 = arith.constant 0 : index
    %c0_101 = arith.constant 0 : index
    %63 = vector.load %arg19[%c0_98, %c0_99, %c0_100, %c0_101] : memref<2x10x10x32xf32, #tpu.memory_space<vmem>>, vector<2x8x8x32xf32>
    %64 = vector.shape_cast %63 : vector<2x8x8x32xf32> to vector<128x32xf32>
    %c0_102 = arith.constant 0 : index
    %c0_103 = arith.constant 0 : index
    %c1_104 = arith.constant 1 : index
    %c0_105 = arith.constant 0 : index
    %65 = vector.load %arg19[%c0_102, %c0_103, %c1_104, %c0_105] : memref<2x10x10x32xf32, #tpu.memory_space<vmem>>, vector<2x8x8x32xf32>
    %66 = vector.shape_cast %65 : vector<2x8x8x32xf32> to vector<128x32xf32>
    %c0_106 = arith.constant 0 : index
    %c0_107 = arith.constant 0 : index
    %c2_108 = arith.constant 2 : index
    %c0_109 = arith.constant 0 : index
    %67 = vector.load %arg19[%c0_106, %c0_107, %c2_108, %c0_109] : memref<2x10x10x32xf32, #tpu.memory_space<vmem>>, vector<2x8x8x32xf32>
    %68 = vector.shape_cast %67 : vector<2x8x8x32xf32> to vector<128x32xf32>
    %c0_110 = arith.constant 0 : index
    %c1_111 = arith.constant 1 : index
    %c0_112 = arith.constant 0 : index
    %c0_113 = arith.constant 0 : index
    %69 = vector.load %arg19[%c0_110, %c1_111, %c0_112, %c0_113] : memref<2x10x10x32xf32, #tpu.memory_space<vmem>>, vector<2x8x8x32xf32>
    %70 = vector.shape_cast %69 : vector<2x8x8x32xf32> to vector<128x32xf32>
    %c0_114 = arith.constant 0 : index
    %c1_115 = arith.constant 1 : index
    %c1_116 = arith.constant 1 : index
    %c0_117 = arith.constant 0 : index
    %71 = vector.load %arg19[%c0_114, %c1_115, %c1_116, %c0_117] : memref<2x10x10x32xf32, #tpu.memory_space<vmem>>, vector<2x8x8x32xf32>
    %72 = vector.shape_cast %71 : vector<2x8x8x32xf32> to vector<128x32xf32>
    %c0_118 = arith.constant 0 : index
    %c1_119 = arith.constant 1 : index
    %c2_120 = arith.constant 2 : index
    %c0_121 = arith.constant 0 : index
    %73 = vector.load %arg19[%c0_118, %c1_119, %c2_120, %c0_121] : memref<2x10x10x32xf32, #tpu.memory_space<vmem>>, vector<2x8x8x32xf32>
    %74 = vector.shape_cast %73 : vector<2x8x8x32xf32> to vector<128x32xf32>
    %c0_122 = arith.constant 0 : index
    %c2_123 = arith.constant 2 : index
    %c0_124 = arith.constant 0 : index
    %c0_125 = arith.constant 0 : index
    %75 = vector.load %arg19[%c0_122, %c2_123, %c0_124, %c0_125] : memref<2x10x10x32xf32, #tpu.memory_space<vmem>>, vector<2x8x8x32xf32>
    %76 = vector.shape_cast %75 : vector<2x8x8x32xf32> to vector<128x32xf32>
    %c0_126 = arith.constant 0 : index
    %c2_127 = arith.constant 2 : index
    %c1_128 = arith.constant 1 : index
    %c0_129 = arith.constant 0 : index
    %77 = vector.load %arg19[%c0_126, %c2_127, %c1_128, %c0_129] : memref<2x10x10x32xf32, #tpu.memory_space<vmem>>, vector<2x8x8x32xf32>
    %78 = vector.shape_cast %77 : vector<2x8x8x32xf32> to vector<128x32xf32>
    %c0_130 = arith.constant 0 : index
    %c2_131 = arith.constant 2 : index
    %c2_132 = arith.constant 2 : index
    %c0_133 = arith.constant 0 : index
    %79 = vector.load %arg19[%c0_130, %c2_131, %c2_132, %c0_133] : memref<2x10x10x32xf32, #tpu.memory_space<vmem>>, vector<2x8x8x32xf32>
    %80 = vector.shape_cast %79 : vector<2x8x8x32xf32> to vector<128x32xf32>
    %81 = tpu.concatenate %64, %66, %68, %70, %72, %74, %76, %78, %80 in 1 : vector<128x32xf32>, vector<128x32xf32>, vector<128x32xf32>, vector<128x32xf32>, vector<128x32xf32>, vector<128x32xf32>, vector<128x32xf32>, vector<128x32xf32>, vector<128x32xf32> -> vector<128x288xf32>
    %c0_134 = arith.constant 0 : index
    %c0_135 = arith.constant 0 : index
    %82 = vector.load %arg4[%c0_134, %c0_135] : memref<288x32xf32, #tpu.memory_space<vmem>>, vector<288x32xf32>
    %cst_136 = arith.constant dense<0.000000e+00> : vector<128x32xf32>
    %83 = tpu.matmul %81, %82, %cst_136 {dimension_numbers = #tpu.dot_dimension_numbers<[1], [0], [0], [1], [0, 0, 1, 1], [], []>} : vector<128x288xf32>, vector<288x32xf32>, vector<128x32xf32> -> vector<128x32xf32>
    %c0_137 = arith.constant 0 : index
    %c0_138 = arith.constant 0 : index
    %84 = vector.load %arg5[%c0_137, %c0_138] : memref<1x32xf32, #tpu.memory_space<vmem>>, vector<1x32xf32>
    %85 = vector.broadcast %84 : vector<1x32xf32> to vector<128x32xf32>
    %86 = arith.mulf %83, %85 : vector<128x32xf32>
    %c0_139 = arith.constant 0 : index
    %c0_140 = arith.constant 0 : index
    %87 = vector.load %arg6[%c0_139, %c0_140] : memref<1x32xf32, #tpu.memory_space<vmem>>, vector<1x32xf32>
    %88 = vector.broadcast %87 : vector<1x32xf32> to vector<128x32xf32>
    %89 = arith.addf %86, %88 : vector<128x32xf32>
    %cst_141 = arith.constant 0.000000e+00 : f32
    %90 = vector.broadcast %cst_141 : f32 to vector<128x32xf32>
    %91 = arith.maximumf %89, %90 : vector<128x32xf32>
    %92 = vector.shape_cast %91 : vector<128x32xf32> to vector<2x8x8x32xf32>
    %c0_142 = arith.constant 0 : index
    %c0_143 = arith.constant 0 : index
    %c0_144 = arith.constant 0 : index
    %c0_145 = arith.constant 0 : index
    %93 = vector.load %arg20[%c0_142, %c0_143, %c0_144, %c0_145] : memref<2x8x8x32xf32, #tpu.memory_space<vmem>>, vector<2x8x8x32xf32>
    tpu.vector_store %arg20[%c0_142, %c0_143, %c0_144, %c0_145], %92 {strides = array<i32>} : memref<2x8x8x32xf32, #tpu.memory_space<vmem>>, vector<2x8x8x32xf32>,
    %cst_146 = arith.constant 0.000000e+00 : f32
    %94 = vector.broadcast %cst_146 : f32 to vector<2x1x10x32xf32>
    %c0_147 = arith.constant 0 : index
    %c0_148 = arith.constant 0 : index
    %c0_149 = arith.constant 0 : index
    %c0_150 = arith.constant 0 : index
    %95 = vector.load %arg21[%c0_147, %c0_148, %c0_149, %c0_150] : memref<2x6x10x32xf32, #tpu.memory_space<vmem>>, vector<2x1x10x32xf32>
    tpu.vector_store %arg21[%c0_147, %c0_148, %c0_149, %c0_150], %94 {strides = array<i32>} : memref<2x6x10x32xf32, #tpu.memory_space<vmem>>, vector<2x1x10x32xf32>,
    %cst_151 = arith.constant 0.000000e+00 : f32
    %96 = vector.broadcast %cst_151 : f32 to vector<2x1x10x32xf32>
    %c0_152 = arith.constant 0 : index
    %c5 = arith.constant 5 : index
    %c0_153 = arith.constant 0 : index
    %c0_154 = arith.constant 0 : index
    %97 = vector.load %arg21[%c0_152, %c5, %c0_153, %c0_154] : memref<2x6x10x32xf32, #tpu.memory_space<vmem>>, vector<2x1x10x32xf32>
    tpu.vector_store %arg21[%c0_152, %c5, %c0_153, %c0_154], %96 {strides = array<i32>} : memref<2x6x10x32xf32, #tpu.memory_space<vmem>>, vector<2x1x10x32xf32>,
    %cst_155 = arith.constant 0.000000e+00 : f32
    %98 = vector.broadcast %cst_155 : f32 to vector<2x6x1x32xf32>
    %c0_156 = arith.constant 0 : index
    %c0_157 = arith.constant 0 : index
    %c0_158 = arith.constant 0 : index
    %c0_159 = arith.constant 0 : index
    %99 = vector.load %arg21[%c0_156, %c0_157, %c0_158, %c0_159] : memref<2x6x10x32xf32, #tpu.memory_space<vmem>>, vector<2x6x1x32xf32>
    tpu.vector_store %arg21[%c0_156, %c0_157, %c0_158, %c0_159], %98 {strides = array<i32>} : memref<2x6x10x32xf32, #tpu.memory_space<vmem>>, vector<2x6x1x32xf32>,
    %cst_160 = arith.constant 0.000000e+00 : f32
    %100 = vector.broadcast %cst_160 : f32 to vector<2x6x5x32xf32>
    %c0_161 = arith.constant 0 : index
    %c0_162 = arith.constant 0 : index
    %c5_163 = arith.constant 5 : index
    %c0_164 = arith.constant 0 : index
    %101 = vector.load %arg21[%c0_161, %c0_162, %c5_163, %c0_164] : memref<2x6x10x32xf32, #tpu.memory_space<vmem>>, vector<2x6x5x32xf32>
    tpu.vector_store %arg21[%c0_161, %c0_162, %c5_163, %c0_164], %100 {strides = array<i32>} : memref<2x6x10x32xf32, #tpu.memory_space<vmem>>, vector<2x6x5x32xf32>,
    %c0_165 = arith.constant 0 : index
    %c0_166 = arith.constant 0 : index
    %c0_167 = arith.constant 0 : index
    %c0_168 = arith.constant 0 : index
    %102 = vector.load %arg20[%c0_165, %c0_166, %c0_167, %c0_168] : memref<2x8x8x32xf32, #tpu.memory_space<vmem>>, vector<2x8x8x32xf32>
    %103 = vector.shape_cast %102 : vector<2x8x8x32xf32> to vector<2x4x2x8x32xf32>
    %104 = vector.extract_strided_slice %103 {offsets = [0, 0, 0, 0, 0], sizes = [2, 4, 1, 8, 32], strides = [1, 1, 1, 1, 1]} : vector<2x4x2x8x32xf32> to vector<2x4x1x8x32xf32>
    %105 = vector.shape_cast %104 : vector<2x4x1x8x32xf32> to vector<2x4x8x32xf32>
    %106 = vector.extract_strided_slice %103 {offsets = [0, 0, 1, 0, 0], sizes = [2, 4, 1, 8, 32], strides = [1, 1, 1, 1, 1]} : vector<2x4x2x8x32xf32> to vector<2x4x1x8x32xf32>
    %107 = vector.shape_cast %106 : vector<2x4x1x8x32xf32> to vector<2x4x8x32xf32>
    %108 = arith.maximumf %105, %107 : vector<2x4x8x32xf32>
    %109 = vector.shape_cast %108 : vector<2x4x8x32xf32> to vector<2x4x4x2x32xf32>
    %110 = vector.extract_strided_slice %109 {offsets = [0, 0, 0, 0, 0], sizes = [2, 4, 4, 1, 32], strides = [1, 1, 1, 1, 1]} : vector<2x4x4x2x32xf32> to vector<2x4x4x1x32xf32>
    %111 = vector.shape_cast %110 : vector<2x4x4x1x32xf32> to vector<2x4x4x32xf32>
    %112 = vector.extract_strided_slice %109 {offsets = [0, 0, 0, 1, 0], sizes = [2, 4, 4, 1, 32], strides = [1, 1, 1, 1, 1]} : vector<2x4x4x2x32xf32> to vector<2x4x4x1x32xf32>
    %113 = vector.shape_cast %112 : vector<2x4x4x1x32xf32> to vector<2x4x4x32xf32>
    %114 = arith.maximumf %111, %113 : vector<2x4x4x32xf32>
    %c0_169 = arith.constant 0 : index
    %c1_170 = arith.constant 1 : index
    %c1_171 = arith.constant 1 : index
    %c0_172 = arith.constant 0 : index
    %115 = vector.load %arg21[%c0_169, %c1_170, %c1_171, %c0_172] : memref<2x6x10x32xf32, #tpu.memory_space<vmem>>, vector<2x4x4x32xf32>
    tpu.vector_store %arg21[%c0_169, %c1_170, %c1_171, %c0_172], %114 {strides = array<i32>} : memref<2x6x10x32xf32, #tpu.memory_space<vmem>>, vector<2x4x4x32xf32>,
    %c0_173 = arith.constant 0 : index
    %c0_174 = arith.constant 0 : index
    %c0_175 = arith.constant 0 : index
    %c0_176 = arith.constant 0 : index
    %116 = vector.load %arg21[%c0_173, %c0_174, %c0_175, %c0_176] : memref<2x6x10x32xf32, #tpu.memory_space<vmem>>, vector<2x4x8x32xf32>
    %117 = vector.shape_cast %116 : vector<2x4x8x32xf32> to vector<64x32xf32>
    %c0_177 = arith.constant 0 : index
    %c0_178 = arith.constant 0 : index
    %c1_179 = arith.constant 1 : index
    %c0_180 = arith.constant 0 : index
    %118 = vector.load %arg21[%c0_177, %c0_178, %c1_179, %c0_180] : memref<2x6x10x32xf32, #tpu.memory_space<vmem>>, vector<2x4x8x32xf32>
    %119 = vector.shape_cast %118 : vector<2x4x8x32xf32> to vector<64x32xf32>
    %c0_181 = arith.constant 0 : index
    %c0_182 = arith.constant 0 : index
    %c2_183 = arith.constant 2 : index
    %c0_184 = arith.constant 0 : index
    %120 = vector.load %arg21[%c0_181, %c0_182, %c2_183, %c0_184] : memref<2x6x10x32xf32, #tpu.memory_space<vmem>>, vector<2x4x8x32xf32>
    %121 = vector.shape_cast %120 : vector<2x4x8x32xf32> to vector<64x32xf32>
    %c0_185 = arith.constant 0 : index
    %c1_186 = arith.constant 1 : index
    %c0_187 = arith.constant 0 : index
    %c0_188 = arith.constant 0 : index
    %122 = vector.load %arg21[%c0_185, %c1_186, %c0_187, %c0_188] : memref<2x6x10x32xf32, #tpu.memory_space<vmem>>, vector<2x4x8x32xf32>
    %123 = vector.shape_cast %122 : vector<2x4x8x32xf32> to vector<64x32xf32>
    %c0_189 = arith.constant 0 : index
    %c1_190 = arith.constant 1 : index
    %c1_191 = arith.constant 1 : index
    %c0_192 = arith.constant 0 : index
    %124 = vector.load %arg21[%c0_189, %c1_190, %c1_191, %c0_192] : memref<2x6x10x32xf32, #tpu.memory_space<vmem>>, vector<2x4x8x32xf32>
    %125 = vector.shape_cast %124 : vector<2x4x8x32xf32> to vector<64x32xf32>
    %c0_193 = arith.constant 0 : index
    %c1_194 = arith.constant 1 : index
    %c2_195 = arith.constant 2 : index
    %c0_196 = arith.constant 0 : index
    %126 = vector.load %arg21[%c0_193, %c1_194, %c2_195, %c0_196] : memref<2x6x10x32xf32, #tpu.memory_space<vmem>>, vector<2x4x8x32xf32>
    %127 = vector.shape_cast %126 : vector<2x4x8x32xf32> to vector<64x32xf32>
    %c0_197 = arith.constant 0 : index
    %c2_198 = arith.constant 2 : index
    %c0_199 = arith.constant 0 : index
    %c0_200 = arith.constant 0 : index
    %128 = vector.load %arg21[%c0_197, %c2_198, %c0_199, %c0_200] : memref<2x6x10x32xf32, #tpu.memory_space<vmem>>, vector<2x4x8x32xf32>
    %129 = vector.shape_cast %128 : vector<2x4x8x32xf32> to vector<64x32xf32>
    %c0_201 = arith.constant 0 : index
    %c2_202 = arith.constant 2 : index
    %c1_203 = arith.constant 1 : index
    %c0_204 = arith.constant 0 : index
    %130 = vector.load %arg21[%c0_201, %c2_202, %c1_203, %c0_204] : memref<2x6x10x32xf32, #tpu.memory_space<vmem>>, vector<2x4x8x32xf32>
    %131 = vector.shape_cast %130 : vector<2x4x8x32xf32> to vector<64x32xf32>
    %c0_205 = arith.constant 0 : index
    %c2_206 = arith.constant 2 : index
    %c2_207 = arith.constant 2 : index
    %c0_208 = arith.constant 0 : index
    %132 = vector.load %arg21[%c0_205, %c2_206, %c2_207, %c0_208] : memref<2x6x10x32xf32, #tpu.memory_space<vmem>>, vector<2x4x8x32xf32>
    %133 = vector.shape_cast %132 : vector<2x4x8x32xf32> to vector<64x32xf32>
    %134 = tpu.concatenate %117, %119, %121, %123, %125, %127, %129, %131, %133 in 1 : vector<64x32xf32>, vector<64x32xf32>, vector<64x32xf32>, vector<64x32xf32>, vector<64x32xf32>, vector<64x32xf32>, vector<64x32xf32>, vector<64x32xf32>, vector<64x32xf32> -> vector<64x288xf32>
    %c0_209 = arith.constant 0 : index
    %c0_210 = arith.constant 0 : index
    %135 = vector.load %arg7[%c0_209, %c0_210] : memref<288x32xf32, #tpu.memory_space<vmem>>, vector<288x32xf32>
    %cst_211 = arith.constant dense<0.000000e+00> : vector<64x32xf32>
    %136 = tpu.matmul %134, %135, %cst_211 {dimension_numbers = #tpu.dot_dimension_numbers<[1], [0], [0], [1], [0, 0, 1, 1], [], []>} : vector<64x288xf32>, vector<288x32xf32>, vector<64x32xf32> -> vector<64x32xf32>
    %c0_212 = arith.constant 0 : index
    %c0_213 = arith.constant 0 : index
    %137 = vector.load %arg8[%c0_212, %c0_213] : memref<1x32xf32, #tpu.memory_space<vmem>>, vector<1x32xf32>
    %138 = vector.broadcast %137 : vector<1x32xf32> to vector<64x32xf32>
    %139 = arith.mulf %136, %138 : vector<64x32xf32>
    %c0_214 = arith.constant 0 : index
    %c0_215 = arith.constant 0 : index
    %140 = vector.load %arg9[%c0_214, %c0_215] : memref<1x32xf32, #tpu.memory_space<vmem>>, vector<1x32xf32>
    %141 = vector.broadcast %140 : vector<1x32xf32> to vector<64x32xf32>
    %142 = arith.addf %139, %141 : vector<64x32xf32>
    %cst_216 = arith.constant 0.000000e+00 : f32
    %143 = vector.broadcast %cst_216 : f32 to vector<64x32xf32>
    %144 = arith.maximumf %142, %143 : vector<64x32xf32>
    %145 = vector.shape_cast %144 : vector<64x32xf32> to vector<2x4x8x32xf32>
    %c0_217 = arith.constant 0 : index
    %c0_218 = arith.constant 0 : index
    %c0_219 = arith.constant 0 : index
    %c0_220 = arith.constant 0 : index
    %146 = vector.load %arg22[%c0_217, %c0_218, %c0_219, %c0_220] : memref<2x4x8x32xf32, #tpu.memory_space<vmem>>, vector<2x4x8x32xf32>
    tpu.vector_store %arg22[%c0_217, %c0_218, %c0_219, %c0_220], %145 {strides = array<i32>} : memref<2x4x8x32xf32, #tpu.memory_space<vmem>>, vector<2x4x8x32xf32>,
    %c0_221 = arith.constant 0 : index
    %c0_222 = arith.constant 0 : index
    %c0_223 = arith.constant 0 : index
    %c0_224 = arith.constant 0 : index
    %147 = vector.load %arg22[%c0_221, %c0_222, %c0_223, %c0_224] : memref<2x4x8x32xf32, #tpu.memory_space<vmem>>, vector<2x4x8x32xf32>
    %148 = vector.shape_cast %147 : vector<2x4x8x32xf32> to vector<2x2x2x8x32xf32>
    %149 = vector.extract_strided_slice %148 {offsets = [0, 0, 0, 0, 0], sizes = [2, 2, 1, 8, 32], strides = [1, 1, 1, 1, 1]} : vector<2x2x2x8x32xf32> to vector<2x2x1x8x32xf32>
    %150 = vector.shape_cast %149 : vector<2x2x1x8x32xf32> to vector<2x2x8x32xf32>
    %151 = vector.extract_strided_slice %148 {offsets = [0, 0, 1, 0, 0], sizes = [2, 2, 1, 8, 32], strides = [1, 1, 1, 1, 1]} : vector<2x2x2x8x32xf32> to vector<2x2x1x8x32xf32>
    %152 = vector.shape_cast %151 : vector<2x2x1x8x32xf32> to vector<2x2x8x32xf32>
    %153 = arith.maximumf %150, %152 : vector<2x2x8x32xf32>
    %154 = vector.extract_strided_slice %153 {offsets = [0, 0, 0, 0], sizes = [2, 2, 4, 32], strides = [1, 1, 1, 1]} : vector<2x2x8x32xf32> to vector<2x2x4x32xf32>
    %155 = vector.shape_cast %154 : vector<2x2x4x32xf32> to vector<2x2x2x2x32xf32>
    %156 = vector.extract_strided_slice %155 {offsets = [0, 0, 0, 0, 0], sizes = [2, 2, 2, 1, 32], strides = [1, 1, 1, 1, 1]} : vector<2x2x2x2x32xf32> to vector<2x2x2x1x32xf32>
    %157 = vector.shape_cast %156 : vector<2x2x2x1x32xf32> to vector<2x2x2x32xf32>
    %158 = vector.extract_strided_slice %155 {offsets = [0, 0, 0, 1, 0], sizes = [2, 2, 2, 1, 32], strides = [1, 1, 1, 1, 1]} : vector<2x2x2x2x32xf32> to vector<2x2x2x1x32xf32>
    %159 = vector.shape_cast %158 : vector<2x2x2x1x32xf32> to vector<2x2x2x32xf32>
    %160 = arith.maximumf %157, %159 : vector<2x2x2x32xf32>
    %161 = vector.extract_strided_slice %160 {offsets = [0, 0, 0, 0], sizes = [2, 1, 1, 32], strides = [1, 1, 1, 1]} : vector<2x2x2x32xf32> to vector<2x1x1x32xf32>
    %162 = vector.shape_cast %161 : vector<2x1x1x32xf32> to vector<2x32xf32>
    %163 = vector.extract_strided_slice %160 {offsets = [0, 0, 1, 0], sizes = [2, 1, 1, 32], strides = [1, 1, 1, 1]} : vector<2x2x2x32xf32> to vector<2x1x1x32xf32>
    %164 = vector.shape_cast %163 : vector<2x1x1x32xf32> to vector<2x32xf32>
    %165 = vector.extract_strided_slice %160 {offsets = [0, 1, 0, 0], sizes = [2, 1, 1, 32], strides = [1, 1, 1, 1]} : vector<2x2x2x32xf32> to vector<2x1x1x32xf32>
    %166 = vector.shape_cast %165 : vector<2x1x1x32xf32> to vector<2x32xf32>
    %167 = vector.extract_strided_slice %160 {offsets = [0, 1, 1, 0], sizes = [2, 1, 1, 32], strides = [1, 1, 1, 1]} : vector<2x2x2x32xf32> to vector<2x1x1x32xf32>
    %168 = vector.shape_cast %167 : vector<2x1x1x32xf32> to vector<2x32xf32>
    %169 = tpu.concatenate %162, %164, %166, %168 in 1 : vector<2x32xf32>, vector<2x32xf32>, vector<2x32xf32>, vector<2x32xf32> -> vector<2x128xf32>
    %c0_225 = arith.constant 0 : index
    %c0_226 = arith.constant 0 : index
    %170 = vector.load %arg10[%c0_225, %c0_226] : memref<128x32xf32, #tpu.memory_space<vmem>>, vector<128x32xf32>
    %cst_227 = arith.constant dense<0.000000e+00> : vector<2x32xf32>
    %171 = tpu.matmul %169, %170, %cst_227 {dimension_numbers = #tpu.dot_dimension_numbers<[1], [0], [0], [1], [0, 0, 1, 1], [], []>} : vector<2x128xf32>, vector<128x32xf32>, vector<2x32xf32> -> vector<2x32xf32>
    %c0_228 = arith.constant 0 : index
    %c0_229 = arith.constant 0 : index
    %172 = vector.load %arg11[%c0_228, %c0_229] : memref<1x32xf32, #tpu.memory_space<vmem>>, vector<1x32xf32>
    %173 = vector.broadcast %172 : vector<1x32xf32> to vector<2x32xf32>
    %174 = arith.mulf %171, %173 : vector<2x32xf32>
    %c0_230 = arith.constant 0 : index
    %c0_231 = arith.constant 0 : index
    %175 = vector.load %arg12[%c0_230, %c0_231] : memref<1x32xf32, #tpu.memory_space<vmem>>, vector<1x32xf32>
    %176 = vector.broadcast %175 : vector<1x32xf32> to vector<2x32xf32>
    %177 = arith.addf %174, %176 : vector<2x32xf32>
    %cst_232 = arith.constant 0.000000e+00 : f32
    %178 = vector.broadcast %cst_232 : f32 to vector<2x32xf32>
    %179 = arith.maximumf %177, %178 : vector<2x32xf32>
    %c0_233 = arith.constant 0 : index
    %c0_234 = arith.constant 0 : index
    %180 = vector.load %arg16[%c0_233, %c0_234] : memref<2x32xf32, #tpu.memory_space<vmem>>, vector<2x32xf32>
    tpu.vector_store %arg16[%c0_233, %c0_234], %179 {strides = array<i32>} : memref<2x32xf32, #tpu.memory_space<vmem>>, vector<2x32xf32>,
    %c0_235 = arith.constant 0 : index
    %c0_236 = arith.constant 0 : index
    %181 = vector.load %arg13[%c0_235, %c0_236] : memref<32x1xf32, #tpu.memory_space<vmem>>, vector<32x1xf32>
    %cst_237 = arith.constant dense<0.000000e+00> : vector<2x1xf32>
    %182 = tpu.matmul %179, %181, %cst_237 {dimension_numbers = #tpu.dot_dimension_numbers<[1], [0], [0], [1], [0, 0, 1, 1], [], []>} : vector<2x32xf32>, vector<32x1xf32>, vector<2x1xf32> -> vector<2x1xf32>
    %c0_238 = arith.constant 0 : index
    %c0_239 = arith.constant 0 : index
    %183 = vector.load %arg14[%c0_238, %c0_239] : memref<1x1xf32, #tpu.memory_space<vmem>>, vector<1x1xf32>
    %184 = vector.broadcast %183 : vector<1x1xf32> to vector<2x1xf32>
    %185 = arith.addf %182, %184 : vector<2x1xf32>
    %186 = math.absf %185 : vector<2x1xf32>
    %cst_240 = arith.constant 0.000000e+00 : f32
    %187 = vector.broadcast %cst_240 : f32 to vector<2x1xf32>
    %188 = arith.subf %187, %186 : vector<2x1xf32>
    %189 = math.exp %188 : vector<2x1xf32>
    %cst_241 = arith.constant 0.000000e+00 : f32
    %190 = vector.broadcast %cst_241 : f32 to vector<2x1xf32>
    %191 = arith.cmpf oge, %185, %190 : vector<2x1xf32>
    %cst_242 = arith.constant 1.000000e+00 : f32
    %192 = vector.broadcast %cst_242 : f32 to vector<2x1xf32>
    %193 = arith.addf %192, %189 : vector<2x1xf32>
    %cst_243 = arith.constant 1.000000e+00 : f32
    %194 = vector.broadcast %cst_243 : f32 to vector<2x1xf32>
    %195 = arith.divf %194, %193 : vector<2x1xf32>
    %cst_244 = arith.constant 1.000000e+00 : f32
    %196 = vector.broadcast %cst_244 : f32 to vector<2x1xf32>
    %197 = arith.addf %196, %189 : vector<2x1xf32>
    %198 = arith.divf %189, %197 : vector<2x1xf32>
    %199 = arith.select %191, %195, %198 : vector<2x1xi1>, vector<2x1xf32>
    %c0_245 = arith.constant 0 : index
    %c0_246 = arith.constant 0 : index
    %200 = vector.load %arg15[%c0_245, %c0_246] : memref<2x1xf32, #tpu.memory_space<vmem>>, vector<2x1xf32>
    tpu.vector_store %arg15[%c0_245, %c0_246], %199 {strides = array<i32>} : memref<2x1xf32, #tpu.memory_space<vmem>>, vector<2x1xf32>,
    return
  }
}

</mosaic_0001>

<bundles_post_ra>
// kernel: simple_resnet_forward.1
= control target key start
LH: loop header
LB: loop body
LE: loop exit
PB: predicated region body
PF: predicated region fallthrough
CT: control target
= control target key end

     0   :  { %s12549_s0 = inlined_call_operand.vmem [shape: f32[2,16,16,4], index: 0, kind: input, shape index: {}]   ;;  %s12550_s1 = inlined_call_operand.vmem [shape: f32[36,32], index: 1, kind: input, shape index: {}]   ;;  %s12551_s2 = inlined_call_operand.vmem [shape: f32[1,32], index: 2, kind: input, shape index: {}]   ;;  %s12552_s3 = inlined_call_operand.vmem [shape: f32[1,32], index: 3, kind: input, shape index: {}]   ;;  %s12553_s4 = inlined_call_operand.vmem [shape: f32[288,32], index: 4, kind: input, shape index: {}]   ;;  %s12554_s5 = inlined_call_operand.vmem [shape: f32[1,32], index: 5, kind: input, shape index: {}]   ;;  %s12555_s6 = inlined_call_operand.vmem [shape: f32[1,32], index: 6, kind: input, shape index: {}]   ;;  %s12556_s7 = inlined_call_operand.vmem [shape: f32[288,32], index: 7, kind: input, shape index: {}]   ;;  %s12557_s8 = inlined_call_operand.vmem [shape: f32[1,32], index: 8, kind: input, shape index: {}]   ;;  %s12558_s9 = inlined_call_operand.vmem [shape: f32[1,32], index: 9, kind: input, shape index: {}]   ;;  %s12559_s10 = inlined_call_operand.vmem [shape: f32[128,32], index: 10, kind: input, shape index: {}]   ;;  %s12560_s11 = inlined_call_operand.vmem [shape: f32[1,32], index: 11, kind: input, shape index: {}]   ;;  %s12561_s12 = inlined_call_operand.vmem [shape: f32[1,32], index: 12, kind: input, shape index: {}]   ;;  %s12562_s13 = inlined_call_operand.vmem [shape: f32[32,1], index: 13, kind: input, shape index: {}]   ;;  %s12563_s14 = inlined_call_operand.<no memory space> [shape: f32[1,1], index: 14, kind: input, shape index: {}]   ;;  %s12564_s15 = inlined_call_operand.vmem [shape: f32[2,1], index: 15, kind: output, shape index: {0}]   ;;  %s12565_s16 = inlined_call_operand.hbm [shape: f32[2,32], index: 16, kind: output, shape index: {1}]  }
   0x1   :  { %12573 = sst [smem:[#allocation170_spill]] %s12549_s0  ;;  %v22_v0 = vstv %s12563_s14 }
   0x2   :  { %23 = vst [vmem:[#allocation8] sm:$0x1] %v22_v0 }
   0x3   :  { %vm55_vm0 = vcmask 31744   ;;  %s12574_s25 = sld [smem:[#allocation170_spill]]  ;;  %v12567_v3 = vmov 0.0  }
   0x4   :  { %56 = vst.msk [vmem:[#allocation2] sm:$0xff] %vm55_vm0, %v12567_v3 }
   0x5   :  { %57 = vst.msk [vmem:[#allocation2 + $0x8] sm:$0xff] %vm55_vm0, %v12567_v3 }
   0x6   :  { %60 = vst.msk [vmem:[#allocation2 + $0x1b0] sm:$0xff] %vm55_vm0, %v12567_v3 }
   0x7   :  { %61 = vst.msk [vmem:[#allocation2 + $0x1b8] sm:$0xff] %vm55_vm0, %v12567_v3 }
   0x8   :  { %64 = vst.msk [vmem:[#allocation2 + $0x198] sm:$0xff] %vm55_vm0, %v12567_v3 }
   0x9   :  { %v145_v1 = vld [vmem:[%s12574_s25 + $0x10] sm:$0xff]  ;;  %v143_v2 = vld [vmem:[%s12574_s25] sm:$0xff]  ;;  %v146_v4 = vld [vmem:[%s12574_s25 + $0x18] sm:$0xff]  ;;  %65 = vst.msk [vmem:[#allocation2 + $0x1a0] sm:$0xff] %vm55_vm0, %v12567_v3 }
   0xa   :  { %210 = vst.msk [vmem:[#allocation2 + $0x31] sm:$0xff] %vm55_vm0, %v145_v1 }
   0xb   :  { %208 = vst.msk [vmem:[#allocation2 + $0x19] sm:$0xff] %vm55_vm0, %v143_v2 }
  0x11   :  { %v340_v5 = vld [vmem:[#allocation2 + $0x31] sm:$0xff] }
  0x12   :  { %24 = vsyncpa [#allocation10], 0  ;;  %s8162_s29 = smov 4   ;;  %v338_v6 = vld [vmem:[#allocation2 + $0x19] sm:$0xff]  ;;  %67 = vst.msk [vmem:[#allocation2 + $0x348] sm:$0xff] %vm55_vm0, %v12567_v3  ;;  %v144_v7 = vld [vmem:[%s12574_s25 + $0x8] sm:$0xff] }
  0x13   :  { %921 = vrot.lane.b32.xlu2 %v340_v5, %s8162_s29  ;;  %917 = vrot.lane.b32.xlu1 %v338_v6, %s8162_s29  ;;  %68 = vst.msk [vmem:[#allocation2 + $0x350] sm:$0xff] %vm55_vm0, %v12567_v3  ;;  %vm58_vm1 = vcmask 25600   ;;  %v336_v8 = vld [vmem:[#allocation2 + $0x1] sm:$0xff]  ;;  %v149_v9 = vld [vmem:[%s12574_s25 + $0x30] sm:$0xff]  ;;  %v150_v16 = vld [vmem:[%s12574_s25 + $0x38] sm:$0xff]  ;;  %vm70_vm2 = vcmask 24576  }
  0x14   :  { %211 = vst.msk [vmem:[#allocation2 + $0x39] sm:$0xff] %vm55_vm0, %v146_v4  ;;  %913 = vrot.lane.b32.xlu0 %v336_v8, %s8162_s29  ;;  %v148_v10 = vld [vmem:[%s12574_s25 + $0x28] sm:$0xff]  ;;  %v147_v11 = vld [vmem:[%s12574_s25 + $0x20] sm:$0xff]  ;;  %v154_v19 = vld [vmem:[%s12574_s25 + $0x58] sm:$0xff]  ;;  %s8163_s17 = smov 8   ;;  %s8166_s27 = smov 20  }
  0x15   :  { %209 = vst.msk [vmem:[#allocation2 + $0x21] sm:$0xff] %vm55_vm0, %v144_v7  ;;  %v152_v12 = vld [vmem:[%s12574_s25 + $0x48] sm:$0xff]  ;;  %v151_v14 = vld [vmem:[%s12574_s25 + $0x40] sm:$0xff]  ;;  %v153_v20 = vld [vmem:[%s12574_s25 + $0x50] sm:$0xff]  ;;  %s8167_s14 = smov 24   ;;  %s8168_s28 = smov 32  }
  0x16   :  { %59 = vst.msk [vmem:[#allocation2 + $0x10] sm:$0x3] %vm58_vm1, %v12567_v3  ;;  %v155_v18 = vld [vmem:[%s12574_s25 + $0x60] sm:$0xff]  ;;  %v158_v21 = vld [vmem:[%s12574_s25 + $0x78] sm:$0xff]  ;;  %v157_v23 = vld [vmem:[%s12574_s25 + $0x70] sm:$0xff]  ;;  %s8169_s30 = smov 28  }
  0x17   :  { %62 = vst.msk [vmem:[#allocation2 + $0x1c0] sm:$0x3] %vm58_vm1, %v12567_v3  ;;  %v156_v25 = vld [vmem:[%s12574_s25 + $0x68] sm:$0xff]  ;;  %v161_v27 = vld [vmem:[%s12574_s25 + $0x90] sm:$0xff]  ;;  %v159_v29 = vld [vmem:[%s12574_s25 + $0x80] sm:$0xff]  ;;  %vm3614_vm3 = vcmask 1043456  }
  0x18   :  { %66 = vst.msk [vmem:[#allocation2 + $0x1a8] sm:$0x3] %vm58_vm1, %v12567_v3  ;;  %v160_v28 = vld [vmem:[%s12574_s25 + $0x88] sm:$0xff]  ;;  %v163_v31 = vld [vmem:[%s12574_s25 + $0xa0] sm:$0xff]  ;;  %v162_v32 = vld [vmem:[%s12574_s25 + $0x98] sm:$0xff]  ;;  %vm3351_vm4 = vcmask 261120  }
  0x19   :  { %69 = vst.msk [vmem:[#allocation2 + $0x358] sm:$0x3] %vm58_vm1, %v12567_v3  ;;  %v164_v30 = vld [vmem:[%s12574_s25 + $0xa8] sm:$0xff]  ;;  %v167_v36 = vld [vmem:[%s12574_s25 + $0xc0] sm:$0xff]  ;;  %v166_v37 = vld [vmem:[%s12574_s25 + $0xb8] sm:$0xff]  ;;  %vm3026_vm5 = vcmask 97280  }
  0x1a   :  { %214 = vst.msk [vmem:[#allocation2 + $0x61] sm:$0xff] %vm55_vm0, %v149_v9  ;;  %v165_v38 = vld [vmem:[%s12574_s25 + $0xb0] sm:$0xff]  ;;  %v170_v42 = vld [vmem:[%s12574_s25 + $0xd8] sm:$0xff]  ;;  %v168_v44 = vld [vmem:[%s12574_s25 + $0xc8] sm:$0xff]  ;;  %vm2961_vm6 = vcmask 64512   ;;  %vm3091_vm7 = vcmask 130048  }
  0x1b   :  { %v341_v13 = vld [vmem:[#allocation2 + $0x39] sm:$0xff]  ;;  %213 = vst.msk [vmem:[#allocation2 + $0x51] sm:$0xff] %vm55_vm0, %v148_v10  ;;  %v169_v43 = vld [vmem:[%s12574_s25 + $0xd0] sm:$0xff]  ;;  %v172_v48 = vld [vmem:[%s12574_s25 + $0xe8] sm:$0xff]  ;;  %vm3156_vm8 = vcmask 162816   ;;  %vm3221_vm9 = vcmask 195584  }
  0x1c   :  { %923 = vrot.lane.b32.xlu2 %v341_v13, %s8162_s29  ;;  %v339_v15 = vld [vmem:[#allocation2 + $0x21] sm:$0xff]  ;;  %212 = vst.msk [vmem:[#allocation2 + $0x49] sm:$0xff] %vm55_vm0, %v147_v11  ;;  %v178_v58 = vld [vmem:[%s12574_s25 + $0x118] sm:$0xff]  ;;  %v177_v13 = vld [vmem:[%s12574_s25 + $0x110] sm:$0xff]  ;;  %vm3286_vm10 = vcmask 228352   ;;  %vm3421_vm11 = vcmask 293888  }
  0x1d   :  { %919 = vrot.lane.b32.xlu1 %v339_v15, %s8162_s29  ;;  %v337_v17 = vld [vmem:[#allocation2 + $0x9] sm:$0xff]  ;;  %217 = vst.msk [vmem:[#allocation2 + $0x81] sm:$0xff] %vm55_vm0, %v152_v12  ;;  %v171_v49 = vld [vmem:[%s12574_s25 + $0xe0] sm:$0xff]  ;;  %v368_v1 = vld [vmem:[#allocation2 + $0x1b1] sm:$0xff]  ;;  %vm12572_vm12 = vcmask 254976   ;;  %vm4101_vm13 = vcmask 253952  }
  0x1e   :  { %915 = vrot.lane.b32.xlu0 %v337_v17, %s8162_s29  ;;  %216 = vst.msk [vmem:[#allocation2 + $0x79] sm:$0xff] %vm55_vm0, %v151_v14  ;;  %v175_v53 = vld [vmem:[%s12574_s25 + $0x100] sm:$0xff]  ;;  %v176_v54 = vld [vmem:[%s12574_s25 + $0x108] sm:$0xff]  ;;  %v181_v15 = vld [vmem:[%s12574_s25 + $0x130] sm:$0xff]  ;;  %vm5230_vm14 = vcmask 1041409   ;;  %vm12570_vm15 = vcmask 1042434  }
  0x1f   :  { %215 = vst.msk [vmem:[#allocation2 + $0x69] sm:$0xff] %vm55_vm0, %v150_v16  ;;  %v369_v7 = vld [vmem:[#allocation2 + $0x1b9] sm:$0xff]  ;;  %v180_v17 = vld [vmem:[%s12574_s25 + $0x128] sm:$0xff]  ;;  %vm12571_vm1 = vcmask 1043459  }
  0x20   :  { %220 = vst.msk [vmem:[#allocation2 + $0xa9] sm:$0xff] %vm55_vm0, %v155_v18  ;;  %v179_v12 = vld [vmem:[%s12574_s25 + $0x120] sm:$0xff]  ;;  %v182_v16 = vld [vmem:[%s12574_s25 + $0x138] sm:$0xff]  ;;  %v184_v18 = vld [vmem:[%s12574_s25 + $0x148] sm:$0xff] }
  0x21   :  { %v344_v22 = vld [vmem:[#allocation2 + $0x61] sm:$0xff]  ;;  %219 = vst.msk [vmem:[#allocation2 + $0x99] sm:$0xff] %vm55_vm0, %v154_v19  ;;  %v185_v19 = vld [vmem:[%s12574_s25 + $0x150] sm:$0xff] }
  0x22   :  { %v343_v24 = vld [vmem:[#allocation2 + $0x51] sm:$0xff]  ;;  %218 = vst.msk [vmem:[#allocation2 + $0x91] sm:$0xff] %vm55_vm0, %v153_v20 }
  0x23   :  { %v342_v26 = vld [vmem:[#allocation2 + $0x49] sm:$0xff]  ;;  %223 = vst.msk [vmem:[#allocation2 + $0xc9] sm:$0xff] %vm55_vm0, %v158_v21  ;;  %v183_v21 = vld [vmem:[%s12574_s25 + $0x140] sm:$0xff] }
  0x24   :  { %929 = vrot.lane.b32.xlu2 %v344_v22, %s8162_s29  ;;  %222 = vst.msk [vmem:[#allocation2 + $0xc1] sm:$0xff] %vm55_vm0, %v157_v23  ;;  %v347_v33 = vld [vmem:[#allocation2 + $0x81] sm:$0xff] }
  0x25   :  { %927 = vrot.lane.b32.xlu1 %v343_v24, %s8162_s29  ;;  %221 = vst.msk [vmem:[#allocation2 + $0xb1] sm:$0xff] %vm55_vm0, %v156_v25  ;;  %v346_v34 = vld [vmem:[#allocation2 + $0x79] sm:$0xff]  ;;  %v188_v24 = vld [vmem:[%s12574_s25 + $0x168] sm:$0xff] }
  0x26   :  { %925 = vrot.lane.b32.xlu0 %v342_v26, %s8162_s29  ;;  %226 = vst.msk [vmem:[#allocation2 + $0xf1] sm:$0xff] %vm55_vm0, %v161_v27  ;;  %v345_v35 = vld [vmem:[#allocation2 + $0x69] sm:$0xff]  ;;  %v187_v23 = vld [vmem:[%s12574_s25 + $0x160] sm:$0xff]  ;;  %v186_v26 = vld [vmem:[%s12574_s25 + $0x158] sm:$0xff] }
  0x27   :  { %225 = vst.msk [vmem:[#allocation2 + $0xe1] sm:$0xff] %vm55_vm0, %v160_v28  ;;  %v350_v39 = vld [vmem:[#allocation2 + $0xa9] sm:$0xff] }
  0x28   :  { %224 = vst.msk [vmem:[#allocation2 + $0xd9] sm:$0xff] %vm55_vm0, %v159_v29  ;;  %v349_v40 = vld [vmem:[#allocation2 + $0x99] sm:$0xff] }
  0x29   :  { %229 = vst.msk [vmem:[#allocation2 + $0x111] sm:$0xff] %vm55_vm0, %v164_v30  ;;  %v348_v41 = vld [vmem:[#allocation2 + $0x91] sm:$0xff] }
  0x2a   :  { %228 = vst.msk [vmem:[#allocation2 + $0x109] sm:$0xff] %vm55_vm0, %v163_v31  ;;  %v353_v45 = vld [vmem:[#allocation2 + $0xc9] sm:$0xff]  ;;  %v190_v29 = vld [vmem:[%s12574_s25 + $0x178] sm:$0xff]  ;;  %v191_v31 = vld [vmem:[%s12574_s25 + $0x180] sm:$0xff] }
  0x2b   :  { %227 = vst.msk [vmem:[#allocation2 + $0xf9] sm:$0xff] %vm55_vm0, %v162_v32  ;;  %v352_v46 = vld [vmem:[#allocation2 + $0xc1] sm:$0xff]  ;;  %v189_v32 = vld [vmem:[%s12574_s25 + $0x170] sm:$0xff] }
  0x2c   :  { %935 = vrot.lane.b32.xlu2 %v347_v33, %s8162_s29  ;;  %232 = vst.msk [vmem:[#allocation2 + $0x139] sm:$0xff] %vm55_vm0, %v167_v36  ;;  %v351_v47 = vld [vmem:[#allocation2 + $0xb1] sm:$0xff] }
  0x2d   :  { %933 = vrot.lane.b32.xlu1 %v346_v34, %s8162_s29  ;;  %231 = vst.msk [vmem:[#allocation2 + $0x129] sm:$0xff] %vm55_vm0, %v166_v37  ;;  %v356_v50 = vld [vmem:[#allocation2 + $0xf1] sm:$0xff]  ;;  %v192_v37 = vld [vmem:[%s12574_s25 + $0x188] sm:$0xff] }
  0x2e   :  { %931 = vrot.lane.b32.xlu0 %v345_v35, %s8162_s29  ;;  %230 = vst.msk [vmem:[#allocation2 + $0x121] sm:$0xff] %vm55_vm0, %v165_v38  ;;  %v355_v51 = vld [vmem:[#allocation2 + $0xe1] sm:$0xff]  ;;  %v193_v33 = vld [vmem:[%s12574_s25 + $0x190] sm:$0xff]  ;;  %v194_v34 = vld [vmem:[%s12574_s25 + $0x198] sm:$0xff] }
  0x2f   :  { %235 = vst.msk [vmem:[#allocation2 + $0x159] sm:$0xff] %vm55_vm0, %v170_v42  ;;  %v354_v52 = vld [vmem:[#allocation2 + $0xd9] sm:$0xff]  ;;  %v197_v42 = vld [vmem:[%s12574_s25 + $0x1b0] sm:$0xff] }
  0x30   :  { %234 = vst.msk [vmem:[#allocation2 + $0x151] sm:$0xff] %vm55_vm0, %v169_v43  ;;  %v359_v55 = vld [vmem:[#allocation2 + $0x111] sm:$0xff] }
  0x31   :  { %233 = vst.msk [vmem:[#allocation2 + $0x141] sm:$0xff] %vm55_vm0, %v168_v44  ;;  %v358_v56 = vld [vmem:[#allocation2 + $0x109] sm:$0xff]  ;;  %v195_v44 = vld [vmem:[%s12574_s25 + $0x1a0] sm:$0xff] }
  0x32   :  { %237 = vst.msk [vmem:[#allocation2 + $0x171] sm:$0xff] %vm55_vm0, %v172_v48  ;;  %v357_v57 = vld [vmem:[#allocation2 + $0xf9] sm:$0xff] }
  0x33   :  { %236 = vst.msk [vmem:[#allocation2 + $0x169] sm:$0xff] %vm55_vm0, %v171_v49  ;;  %v362_v59 = vld [vmem:[#allocation2 + $0x139] sm:$0xff] }
  0x34   :  { %941 = vrot.lane.b32.xlu2 %v350_v39, %s8162_s29  ;;  %240 = vst.msk [vmem:[#allocation2 + $0x1c9] sm:$0xff] %vm55_vm0, %v175_v53  ;;  %v361_v60 = vld [vmem:[#allocation2 + $0x129] sm:$0xff] }
  0x35   :  { %939 = vrot.lane.b32.xlu1 %v349_v40, %s8162_s29  ;;  %241 = vst.msk [vmem:[#allocation2 + $0x1d1] sm:$0xff] %vm55_vm0, %v176_v54  ;;  %v360_v61 = vld [vmem:[#allocation2 + $0x121] sm:$0xff] }
  0x36   :  { %937 = vrot.lane.b32.xlu0 %v348_v41, %s8162_s29  ;;  %243 = vst.msk [vmem:[#allocation2 + $0x1e9] sm:$0xff] %vm55_vm0, %v178_v58  ;;  %v365_v62 = vld [vmem:[#allocation2 + $0x159] sm:$0xff]  ;;  %v196_v41 = vld [vmem:[%s12574_s25 + $0x1a8] sm:$0xff] }
  0x37   :  { %73 = vst.msk [vmem:[#allocation2 + $0x30] sm:$0x1] %vm70_vm2, %v12567_v3  ;;  %v364_v63 = vld [vmem:[#allocation2 + $0x151] sm:$0xff]  ;;  %v203_v58 = vld [vmem:[%s12574_s25 + $0x1e0] sm:$0xff] }
  0x38   :  { %71 = vst.msk [vmem:[#allocation2] sm:$0x1] %vm70_vm2, %v12567_v3  ;;  %v363_v0 = vld [vmem:[#allocation2 + $0x141] sm:$0xff] }
  0x39   :  { %72 = vst.msk [vmem:[#allocation2 + $0x18] sm:$0x1] %vm70_vm2, %v12567_v3  ;;  %v367_v2 = vld [vmem:[#allocation2 + $0x171] sm:$0xff] }
  0x3a   :  { %74 = vst.msk [vmem:[#allocation2 + $0x48] sm:$0x1] %vm70_vm2, %v12567_v3  ;;  %v366_v4 = vld [vmem:[#allocation2 + $0x169] sm:$0xff] }
  0x3b   :  { %75 = vst.msk [vmem:[#allocation2 + $0x60] sm:$0x1] %vm70_vm2, %v12567_v3  ;;  %v370_v6 = vld [vmem:[#allocation2 + $0x1c9] sm:$0xff] }
  0x3c   :  { %947 = vrot.lane.b32.xlu2 %v353_v45, %s8162_s29  ;;  %76 = vst.msk [vmem:[#allocation2 + $0x78] sm:$0x1] %vm70_vm2, %v12567_v3  ;;  %v371_v5 = vld [vmem:[#allocation2 + $0x1d1] sm:$0xff] }
  0x3d   :  { %945 = vrot.lane.b32.xlu1 %v352_v46, %s8162_s29  ;;  %77 = vst.msk [vmem:[#allocation2 + $0x90] sm:$0x1] %vm70_vm2, %v12567_v3  ;;  %v373_v8 = vld [vmem:[#allocation2 + $0x1e9] sm:$0xff] }
  0x3e   :  { %943 = vrot.lane.b32.xlu0 %v351_v47, %s8162_s29  ;;  %78 = vst.msk [vmem:[#allocation2 + $0xa8] sm:$0x1] %vm70_vm2, %v12567_v3 }
  0x3f   :  { %79 = vst.msk [vmem:[#allocation2 + $0xc0] sm:$0x1] %vm70_vm2, %v12567_v3 }
  0x40   :  { %80 = vst.msk [vmem:[#allocation2 + $0xd8] sm:$0x1] %vm70_vm2, %v12567_v3 }
  0x41   :  { %81 = vst.msk [vmem:[#allocation2 + $0xf0] sm:$0x1] %vm70_vm2, %v12567_v3 }
  0x42   :  { %82 = vst.msk [vmem:[#allocation2 + $0x108] sm:$0x1] %vm70_vm2, %v12567_v3 }
  0x43   :  { %83 = vst.msk [vmem:[#allocation2 + $0x120] sm:$0x1] %vm70_vm2, %v12567_v3 }
  0x44   :  { %953 = vrot.lane.b32.xlu2 %v356_v50, %s8162_s29  ;;  %84 = vst.msk [vmem:[#allocation2 + $0x138] sm:$0x1] %vm70_vm2, %v12567_v3  ;;  %v199_v50 = vld [vmem:[%s12574_s25 + $0x1c0] sm:$0xff] }
  0x45   :  { %951 = vrot.lane.b32.xlu1 %v355_v51, %s8162_s29  ;;  %85 = vst.msk [vmem:[#allocation2 + $0x150] sm:$0x1] %vm70_vm2, %v12567_v3  ;;  %v200_v51 = vld [vmem:[%s12574_s25 + $0x1c8] sm:$0xff] }
  0x46   :  { %949 = vrot.lane.b32.xlu0 %v354_v52, %s8162_s29  ;;  %86 = vst.msk [vmem:[#allocation2 + $0x168] sm:$0x1] %vm70_vm2, %v12567_v3  ;;  %v198_v52 = vld [vmem:[%s12574_s25 + $0x1b8] sm:$0xff] }
  0x47   :  { %87 = vst.msk [vmem:[#allocation2 + $0x180] sm:$0x1] %vm70_vm2, %v12567_v3 }
  0x48   :  { %88 = vst.msk [vmem:[#allocation2 + $0x198] sm:$0x1] %vm70_vm2, %v12567_v3 }
  0x49   :  { %89 = vst.msk [vmem:[#allocation2 + $0x1b0] sm:$0x1] %vm70_vm2, %v12567_v3 }
  0x4a   :  { %90 = vst.msk [vmem:[#allocation2 + $0x1c8] sm:$0x1] %vm70_vm2, %v12567_v3 }
  0x4b   :  { %91 = vst.msk [vmem:[#allocation2 + $0x1e0] sm:$0x1] %vm70_vm2, %v12567_v3 }
  0x4c   :  { %959 = vrot.lane.b32.xlu2 %v359_v55, %s8162_s29  ;;  %92 = vst.msk [vmem:[#allocation2 + $0x1f8] sm:$0x1] %vm70_vm2, %v12567_v3 }
  0x4d   :  { %957 = vrot.lane.b32.xlu1 %v358_v56, %s8162_s29  ;;  %93 = vst.msk [vmem:[#allocation2 + $0x210] sm:$0x1] %vm70_vm2, %v12567_v3 }
  0x4e   :  { %955 = vrot.lane.b32.xlu0 %v357_v57, %s8162_s29  ;;  %94 = vst.msk [vmem:[#allocation2 + $0x228] sm:$0x1] %vm70_vm2, %v12567_v3  ;;  %v202_v57 = vld [vmem:[%s12574_s25 + $0x1d8] sm:$0xff] }
  0x4f   :  { %95 = vst.msk [vmem:[#allocation2 + $0x240] sm:$0x1] %vm70_vm2, %v12567_v3 }
  0x50   :  { %96 = vst.msk [vmem:[#allocation2 + $0x258] sm:$0x1] %vm70_vm2, %v12567_v3 }
  0x51   :  { %97 = vst.msk [vmem:[#allocation2 + $0x270] sm:$0x1] %vm70_vm2, %v12567_v3 }
  0x52   :  { %98 = vst.msk [vmem:[#allocation2 + $0x288] sm:$0x1] %vm70_vm2, %v12567_v3 }
  0x53   :  { %99 = vst.msk [vmem:[#allocation2 + $0x2a0] sm:$0x1] %vm70_vm2, %v12567_v3 }
  0x54   :  { %965 = vrot.lane.b32.xlu2 %v362_v59, %s8162_s29  ;;  %100 = vst.msk [vmem:[#allocation2 + $0x2b8] sm:$0x1] %vm70_vm2, %v12567_v3 }
  0x55   :  { %963 = vrot.lane.b32.xlu1 %v361_v60, %s8162_s29  ;;  %101 = vst.msk [vmem:[#allocation2 + $0x2d0] sm:$0x1] %vm70_vm2, %v12567_v3 }
  0x56   :  { %961 = vrot.lane.b32.xlu0 %v360_v61, %s8162_s29  ;;  %102 = vst.msk [vmem:[#allocation2 + $0x2e8] sm:$0x1] %vm70_vm2, %v12567_v3  ;;  %v201_v61 = vld [vmem:[%s12574_s25 + $0x1d0] sm:$0xff] }
  0x57   :  { %103 = vst.msk [vmem:[#allocation2 + $0x300] sm:$0x1] %vm70_vm2, %v12567_v3 }
  0x58   :  { %104 = vst.msk [vmem:[#allocation2 + $0x318] sm:$0x1] %vm70_vm2, %v12567_v3 }
  0x59   :  { %105 = vst.msk [vmem:[#allocation2 + $0x330] sm:$0x1] %vm70_vm2, %v12567_v3 }
  0x5a   :  { %106 = vst.msk [vmem:[#allocation2 + $0x348] sm:$0x1] %vm70_vm2, %v12567_v3 }
  0x5b   :  { %107 = vst.msk [vmem:[#allocation2 + $0x11] sm:$0x1] %vm70_vm2, %v12567_v3 }
  0x5c   :  { %971 = vrot.lane.b32.xlu2 %v365_v62, %s8162_s29  ;;  %108 = vst.msk [vmem:[#allocation2 + $0x29] sm:$0x1] %vm70_vm2, %v12567_v3 }
  0x5d   :  { %969 = vrot.lane.b32.xlu1 %v364_v63, %s8162_s29  ;;  %109 = vst.msk [vmem:[#allocation2 + $0x41] sm:$0x1] %vm70_vm2, %v12567_v3 }
  0x5e   :  { %967 = vrot.lane.b32.xlu0 %v363_v0, %s8162_s29  ;;  %110 = vst.msk [vmem:[#allocation2 + $0x59] sm:$0x1] %vm70_vm2, %v12567_v3 }
  0x5f   :  { %111 = vst.msk [vmem:[#allocation2 + $0x71] sm:$0x1] %vm70_vm2, %v12567_v3 }
  0x60   :  { %112 = vst.msk [vmem:[#allocation2 + $0x89] sm:$0x1] %vm70_vm2, %v12567_v3 }
  0x61   :  { %113 = vst.msk [vmem:[#allocation2 + $0xa1] sm:$0x1] %vm70_vm2, %v12567_v3 }
  0x62   :  { %114 = vst.msk [vmem:[#allocation2 + $0xb9] sm:$0x1] %vm70_vm2, %v12567_v3 }
  0x63   :  { %115 = vst.msk [vmem:[#allocation2 + $0xd1] sm:$0x1] %vm70_vm2, %v12567_v3 }
  0x64   :  { %977 = vrot.lane.b32.xlu2 %v368_v1, %s8162_s29  ;;  %116 = vst.msk [vmem:[#allocation2 + $0xe9] sm:$0x1] %vm70_vm2, %v12567_v3 }
  0x65   :  { %975 = vrot.lane.b32.xlu1 %v367_v2, %s8162_s29  ;;  %117 = vst.msk [vmem:[#allocation2 + $0x101] sm:$0x1] %vm70_vm2, %v12567_v3  ;;  %v204_v2 = vld [vmem:[%s12574_s25 + $0x1e8] sm:$0xff] }
  0x66   :  { %973 = vrot.lane.b32.xlu0 %v366_v4, %s8162_s29  ;;  %118 = vst.msk [vmem:[#allocation2 + $0x119] sm:$0x1] %vm70_vm2, %v12567_v3 }
  0x67   :  { %119 = vst.msk [vmem:[#allocation2 + $0x131] sm:$0x1] %vm70_vm2, %v12567_v3 }
  0x68   :  { %120 = vst.msk [vmem:[#allocation2 + $0x149] sm:$0x1] %vm70_vm2, %v12567_v3 }
  0x69   :  { %121 = vst.msk [vmem:[#allocation2 + $0x161] sm:$0x1] %vm70_vm2, %v12567_v3 }
  0x6a   :  { %122 = vst.msk [vmem:[#allocation2 + $0x179] sm:$0x1] %vm70_vm2, %v12567_v3 }
  0x6b   :  { %123 = vst.msk [vmem:[#allocation2 + $0x191] sm:$0x1] %vm70_vm2, %v12567_v3 }
  0x6c   :  { %983 = vrot.lane.b32.xlu2 %v371_v5, %s8162_s29  ;;  %124 = vst.msk [vmem:[#allocation2 + $0x1a9] sm:$0x1] %vm70_vm2, %v12567_v3 }
  0x6d   :  { %981 = vrot.lane.b32.xlu1 %v370_v6, %s8162_s29  ;;  %v8550_v9 = vpop.permute.xlu2 %921  ;;  %125 = vst.msk [vmem:[#allocation2 + $0x1c1] sm:$0x1] %vm70_vm2, %v12567_v3 }
  0x6e   :  { %979 = vrot.lane.b32.xlu0 %v369_v7, %s8162_s29  ;;  %126 = vst.msk [vmem:[#allocation2 + $0x1d9] sm:$0x1] %vm70_vm2, %v12567_v3 }
  0x6f   :  { %127 = vst.msk [vmem:[#allocation2 + $0x1f1] sm:$0x1] %vm70_vm2, %v12567_v3 }
  0x70   :  { %128 = vst.msk [vmem:[#allocation2 + $0x209] sm:$0x1] %vm70_vm2, %v12567_v3 }
  0x71   :  { %129 = vst.msk [vmem:[#allocation2 + $0x221] sm:$0x1] %vm70_vm2, %v12567_v3 }
  0x72   :  { %130 = vst.msk [vmem:[#allocation2 + $0x239] sm:$0x1] %vm70_vm2, %v12567_v3 }
  0x73   :  { %131 = vst.msk [vmem:[#allocation2 + $0x251] sm:$0x1] %vm70_vm2, %v12567_v3 }
  0x74   :  { %132 = vst.msk [vmem:[#allocation2 + $0x269] sm:$0x1] %vm70_vm2, %v12567_v3 }
  0x75   :  { %987 = vrot.lane.b32.xlu1 %v373_v8, %s8162_s29  ;;  %133 = vst.msk [vmem:[#allocation2 + $0x281] sm:$0x1] %vm70_vm2, %v12567_v3 }
  0x76   :  { %v8574_v10 = vpop.permute.xlu2 %923  ;;  %134 = vst.msk [vmem:[#allocation2 + $0x299] sm:$0x1] %vm70_vm2, %v12567_v3 }
  0x77   :  { %135 = vst.msk [vmem:[#allocation2 + $0x2b1] sm:$0x1] %vm70_vm2, %v12567_v3 }
  0x78   :  { %136 = vst.msk [vmem:[#allocation2 + $0x2c9] sm:$0x1] %vm70_vm2, %v12567_v3 }
  0x79   :  { %137 = vst.msk [vmem:[#allocation2 + $0x2e1] sm:$0x1] %vm70_vm2, %v12567_v3 }
  0x7a   :  { %138 = vst.msk [vmem:[#allocation2 + $0x2f9] sm:$0x1] %vm70_vm2, %v12567_v3 }
  0x7b   :  { %139 = vst.msk [vmem:[#allocation2 + $0x311] sm:$0x1] %vm70_vm2, %v12567_v3 }
  0x7c   :  { %140 = vst.msk [vmem:[#allocation2 + $0x329] sm:$0x1] %vm70_vm2, %v12567_v3 }
  0x7d   :  { %141 = vst.msk [vmem:[#allocation2 + $0x341] sm:$0x1] %vm70_vm2, %v12567_v3 }
  0x7e   :  { %v8604_v14 = vpop.permute.xlu2 %929  ;;  %142 = vst.msk [vmem:[#allocation2 + $0x359] sm:$0x1] %vm70_vm2, %v12567_v3  ;;  %vm5236_vm2 = vcmask 1044484  }
  0x7f   :  { %244 = vst.msk [vmem:[#allocation2 + $0x1f9] sm:$0xff] %vm55_vm0, %v179_v12 }
  0x80   :  { %242 = vst.msk [vmem:[#allocation2 + $0x1e1] sm:$0xff] %vm55_vm0, %v177_v13 }
  0x81   :  { %246 = vst.msk [vmem:[#allocation2 + $0x211] sm:$0xff] %vm55_vm0, %v181_v15 }
  0x82   :  { %247 = vst.msk [vmem:[#allocation2 + $0x219] sm:$0xff] %vm55_vm0, %v182_v16 }
  0x83   :  { %245 = vst.msk [vmem:[#allocation2 + $0x201] sm:$0xff] %vm55_vm0, %v180_v17 }
  0x84   :  { %249 = vst.msk [vmem:[#allocation2 + $0x231] sm:$0xff] %vm55_vm0, %v184_v18 }
  0x85   :  { %v8588_v11 = vpop.permute.xlu1 %917  ;;  %250 = vst.msk [vmem:[#allocation2 + $0x241] sm:$0xff] %vm55_vm0, %v185_v19 }
  0x86   :  { %v8627_v20 = vpop.permute.xlu0 %913  ;;  %v374_v25 = vld [vmem:[#allocation2 + $0x1f9] sm:$0xff]  ;;  %248 = vst.msk [vmem:[#allocation2 + $0x229] sm:$0xff] %vm55_vm0, %v183_v21  ;;  %v8648_v28 = vpop.permute.xlu2 %935 }
  0x87   :  { %989 = vrot.lane.b32.xlu2 %v374_v25, %s8162_s29  ;;  %v372_v27 = vld [vmem:[#allocation2 + $0x1e1] sm:$0xff]  ;;  %252 = vst.msk [vmem:[#allocation2 + $0x259] sm:$0xff] %vm55_vm0, %v187_v23 }
  0x88   :  { %985 = vrot.lane.b32.xlu0 %v372_v27, %s8162_s29  ;;  %v376_v30 = vld [vmem:[#allocation2 + $0x211] sm:$0xff]  ;;  %253 = vst.msk [vmem:[#allocation2 + $0x261] sm:$0xff] %vm55_vm0, %v188_v24  ;;  %v436_v3 = vld [vmem:[#allocation2 + $0x1e2] sm:$0xff] }
  0x89   :  { %993 = vrot.lane.b32.xlu1 %v376_v30, %s8162_s29  ;;  %251 = vst.msk [vmem:[#allocation2 + $0x249] sm:$0xff] %vm55_vm0, %v186_v26  ;;  %v377_v35 = vld [vmem:[#allocation2 + $0x219] sm:$0xff] }
  0x8a   :  { %255 = vst.msk [vmem:[#allocation2 + $0x279] sm:$0xff] %vm55_vm0, %v190_v29  ;;  %v375_v38 = vld [vmem:[#allocation2 + $0x201] sm:$0xff] }
  0x8b   :  { %256 = vst.msk [vmem:[#allocation2 + $0x289] sm:$0xff] %vm55_vm0, %v191_v31  ;;  %v379_v40 = vld [vmem:[#allocation2 + $0x231] sm:$0xff]  ;;  %v400_v31 = vld [vmem:[#allocation2 + $0x2] sm:$0xff] }
  0x8c   :  { %254 = vst.msk [vmem:[#allocation2 + $0x271] sm:$0xff] %vm55_vm0, %v189_v32  ;;  %v380_v45 = vld [vmem:[#allocation2 + $0x241] sm:$0xff] }
  0x8d   :  { %258 = vst.msk [vmem:[#allocation2 + $0x2a1] sm:$0xff] %vm55_vm0, %v193_v33  ;;  %v378_v46 = vld [vmem:[#allocation2 + $0x229] sm:$0xff] }
  0x8e   :  { %259 = vst.msk [vmem:[#allocation2 + $0x2a9] sm:$0xff] %vm55_vm0, %v194_v34  ;;  %v8693_v43 = vpop.permute.xlu2 %941  ;;  %v382_v47 = vld [vmem:[#allocation2 + $0x259] sm:$0xff]  ;;  %v401_v34 = vld [vmem:[#allocation2 + $0xa] sm:$0xff] }
  0x8f   :  { %v8633_v22 = vpop.permute.xlu1 %919  ;;  %995 = vrot.lane.b32.xlu2 %v377_v35, %s8162_s29  ;;  %257 = vst.msk [vmem:[#allocation2 + $0x291] sm:$0xff] %vm55_vm0, %v192_v37  ;;  %v383_v54 = vld [vmem:[#allocation2 + $0x261] sm:$0xff] }
  0x90   :  { %v8672_v36 = vpop.permute.xlu0 %915  ;;  %991 = vrot.lane.b32.xlu0 %v375_v38, %s8162_s29  ;;  %261 = vst.msk [vmem:[#allocation2 + $0x2c1] sm:$0xff] %vm55_vm0, %v196_v41  ;;  %v381_v55 = vld [vmem:[#allocation2 + $0x249] sm:$0xff] }
  0x91   :  { %999 = vrot.lane.b32.xlu1 %v379_v40, %s8162_s29  ;;  %12575 = vst [vmem:[#allocation12_spill] sm:$0xff] %v8693_v43  ;;  %v385_v56 = vld [vmem:[#allocation2 + $0x279] sm:$0xff]  ;;  %v403_v38 = vld [vmem:[#allocation2 + $0x22] sm:$0xff] }
  0x92   :  { %262 = vst.msk [vmem:[#allocation2 + $0x2d1] sm:$0xff] %vm55_vm0, %v197_v42  ;;  %v386_v62 = vld [vmem:[#allocation2 + $0x289] sm:$0xff]  ;;  %v404_v42 = vld [vmem:[#allocation2 + $0x32] sm:$0xff] }
  0x93   :  { %260 = vst.msk [vmem:[#allocation2 + $0x2b9] sm:$0xff] %vm55_vm0, %v195_v44  ;;  %v384_v63 = vld [vmem:[#allocation2 + $0x271] sm:$0xff]  ;;  %v402_v44 = vld [vmem:[#allocation2 + $0x1a] sm:$0xff]  ;;  %v659_v43 = vld [vmem:[#allocation2 + $0x48] sm:$0xff] }
  0x94   :  { %264 = vst.msk [vmem:[#allocation2 + $0x2e9] sm:$0xff] %vm55_vm0, %v199_v50  ;;  %v388_v1 = vld [vmem:[#allocation2 + $0x2a1] sm:$0xff] }
  0x95   :  { %265 = vst.msk [vmem:[#allocation2 + $0x2f1] sm:$0xff] %vm55_vm0, %v200_v51  ;;  %v389_v6 = vld [vmem:[#allocation2 + $0x2a9] sm:$0xff]  ;;  %v405_v51 = vld [vmem:[#allocation2 + $0x3a] sm:$0xff] }
  0x96   :  { %263 = vst.msk [vmem:[#allocation2 + $0x2d9] sm:$0xff] %vm55_vm0, %v198_v52  ;;  %v8719_v53 = vpop.permute.xlu2 %947  ;;  %v387_v7 = vld [vmem:[#allocation2 + $0x291] sm:$0xff] }
  0x97   :  { %v8678_v39 = vpop.permute.xlu1 %927  ;;  %1001 = vrot.lane.b32.xlu2 %v380_v45, %s8162_s29  ;;  %12576 = vst [vmem:[#allocation13_spill] sm:$0xff] %v8719_v53  ;;  %v391_v8 = vld [vmem:[#allocation2 + $0x2c1] sm:$0xff]  ;;  %v406_v45 = vld [vmem:[#allocation2 + $0x4a] sm:$0xff] }
  0x98   :  { %v8700_v48 = vpop.permute.xlu0 %925  ;;  %997 = vrot.lane.b32.xlu0 %v378_v46, %s8162_s29  ;;  %267 = vst.msk [vmem:[#allocation2 + $0x309] sm:$0xff] %vm55_vm0, %v202_v57  ;;  %v408_v57 = vld [vmem:[#allocation2 + $0x62] sm:$0xff] }
  0x99   :  { %1005 = vrot.lane.b32.xlu1 %v382_v47, %s8162_s29  ;;  %268 = vst.msk [vmem:[#allocation2 + $0x319] sm:$0xff] %vm55_vm0, %v203_v58  ;;  %v392_v13 = vld [vmem:[#allocation2 + $0x2d1] sm:$0xff] }
  0x9a   :  { %266 = vst.msk [vmem:[#allocation2 + $0x301] sm:$0xff] %vm55_vm0, %v201_v61  ;;  %v390_v16 = vld [vmem:[#allocation2 + $0x2b9] sm:$0xff] }
  0x9b   :  { %269 = vst.msk [vmem:[#allocation2 + $0x321] sm:$0xff] %vm55_vm0, %v204_v2  ;;  %v394_v18 = vld [vmem:[#allocation2 + $0x2e9] sm:$0xff]  ;;  %v407_v47 = vld [vmem:[#allocation2 + $0x52] sm:$0xff] }
  0x9c   :  { %v395_v21 = vld [vmem:[#allocation2 + $0x2f1] sm:$0xff]  ;;  %v411_v2 = vld [vmem:[#allocation2 + $0x82] sm:$0xff] }
  0x9d   :  { %v393_v23 = vld [vmem:[#allocation2 + $0x2d9] sm:$0xff] }
  0x9e   :  { %v8740_v0 = vpop.permute.xlu2 %953  ;;  %v412_v61 = vld [vmem:[#allocation2 + $0x92] sm:$0xff] }
  0x9f   :  { %v8703_v49 = vpop.permute.xlu1 %933  ;;  %1007 = vrot.lane.b32.xlu2 %v383_v54, %s8162_s29  ;;  %12578 = vst [vmem:[#allocation15_spill] sm:$0xff] %v8740_v0  ;;  %v397_v24 = vld [vmem:[#allocation2 + $0x309] sm:$0xff]  ;;  %v326_v0 = vld [vmem:[#allocation2 + $0x2b8] sm:$0xff] }
  0xa0   :  { %1003 = vrot.lane.b32.xlu0 %v381_v55, %s8162_s29  ;;  %v8729_v59 = vpop.permute.xlu0 %931  ;;  %v398_v29 = vld [vmem:[#allocation2 + $0x319] sm:$0xff]  ;;  %v409_v54 = vld [vmem:[#allocation2 + $0x6a] sm:$0xff] }
  0xa1   :  { %1011 = vrot.lane.b32.xlu1 %v385_v56, %s8162_s29  ;;  %v396_v30 = vld [vmem:[#allocation2 + $0x301] sm:$0xff] }
  0xa2   :  { %v399_v35 = vld [vmem:[#allocation2 + $0x321] sm:$0xff] }
  0xa3   :  { %v410_v56 = vld [vmem:[#allocation2 + $0x7a] sm:$0xff] }
  0xa6   :  { %v8754_v12 = vpop.permute.xlu2 %959 }
  0xa7   :  { %v8733_v60 = vpop.permute.xlu1 %939  ;;  %1013 = vrot.lane.b32.xlu2 %v386_v62, %s8162_s29  ;;  %12581 = vst [vmem:[#allocation18_spill] sm:$0xff] %v8754_v12  ;;  %v311_v12 = vld [vmem:[#allocation2 + $0x200] sm:$0xff] }
  0xa8   :  { %12577 = vst [vmem:[#allocation14_spill] sm:$0xff] %v8733_v60  ;;  %1009 = vrot.lane.b32.xlu0 %v384_v63, %s8162_s29  ;;  %v8749_v4 = vpop.permute.xlu0 %937  ;;  %v272_v60 = vld [vmem:[#allocation2] sm:$0xff] }
  0xa9   :  { %1017 = vrot.lane.b32.xlu1 %v388_v1, %s8162_s29  ;;  %12579 = vst [vmem:[#allocation16_spill] sm:$0xff] %v8749_v4  ;;  %v413_v1 = vld [vmem:[#allocation2 + $0x9a] sm:$0xff] }
  0xae   :  { %v8765_v19 = vpop.permute.xlu2 %965 }
  0xaf   :  { %v8751_v5 = vpop.permute.xlu1 %945  ;;  %1019 = vrot.lane.b32.xlu2 %v389_v6, %s8162_s29  ;;  %12584 = vst [vmem:[#allocation21_spill] sm:$0xff] %v8765_v19  ;;  %v415_v6 = vld [vmem:[#allocation2 + $0xb2] sm:$0xff]  ;;  %v280_v19 = vld [vmem:[#allocation2 + $0x60] sm:$0xff] }
  0xb0   :  { %12580 = vst [vmem:[#allocation17_spill] sm:$0xff] %v8751_v5  ;;  %1015 = vrot.lane.b32.xlu0 %v387_v7, %s8162_s29  ;;  %v8758_v15 = vpop.permute.xlu0 %943  ;;  %v592_v5 = vld [vmem:[#allocation2 + $0x1a] sm:$0xff] }
  0xb1   :  { %1023 = vrot.lane.b32.xlu1 %v391_v8, %s8162_s29  ;;  %12582 = vst [vmem:[#allocation19_spill] sm:$0xff] %v8758_v15 }
  0xb6   :  { %v8774_v27 = vpop.permute.xlu2 %971 }
  0xb7   :  { %v8760_v17 = vpop.permute.xlu1 %951  ;;  %1025 = vrot.lane.b32.xlu2 %v392_v13, %s8162_s29  ;;  %12587 = vst [vmem:[#allocation24_spill] sm:$0xff] %v8774_v27 }
  0xb8   :  { %12583 = vst [vmem:[#allocation20_spill] sm:$0xff] %v8760_v17  ;;  %1021 = vrot.lane.b32.xlu0 %v390_v16, %s8162_s29  ;;  %v8767_v25 = vpop.permute.xlu0 %949  ;;  %v416_v16 = vld [vmem:[#allocation2 + $0xc2] sm:$0xff] }
  0xb9   :  { %1029 = vrot.lane.b32.xlu1 %v394_v18, %s8162_s29  ;;  %12585 = vst [vmem:[#allocation22_spill] sm:$0xff] %v8767_v25  ;;  %v414_v18 = vld [vmem:[#allocation2 + $0xaa] sm:$0xff] }
  0xbe   :  { %v8783_v37 = vpop.permute.xlu2 %977 }
  0xbf   :  { %1031 = vrot.lane.b32.xlu2 %v395_v21, %s8162_s29  ;;  %v8770_v26 = vpop.permute.xlu1 %957  ;;  %12590 = vst [vmem:[#allocation27_spill] sm:$0xff] %v8783_v37  ;;  %v418_v21 = vld [vmem:[#allocation2 + $0xda] sm:$0xff]  ;;  %v453_v37 = vld [vmem:[#allocation2 + $0x2aa] sm:$0xff] }
  0xc0   :  { %12586 = vst [vmem:[#allocation23_spill] sm:$0xff] %v8770_v26  ;;  %1027 = vrot.lane.b32.xlu0 %v393_v23, %s8162_s29  ;;  %v8778_v32 = vpop.permute.xlu0 %955 }
  0xc1   :  { %1035 = vrot.lane.b32.xlu1 %v397_v24, %s8162_s29  ;;  %12588 = vst [vmem:[#allocation25_spill] sm:$0xff] %v8778_v32  ;;  %v323_v32 = vld [vmem:[#allocation2 + $0x290] sm:$0xff] }
  0xc6   :  { %v8793_v46 = vpop.permute.xlu2 %983 }
  0xc7   :  { %1037 = vrot.lane.b32.xlu2 %v398_v29, %s8162_s29  ;;  %v8781_v33 = vpop.permute.xlu1 %963  ;;  %12593 = vst [vmem:[#allocation30_spill] sm:$0xff] %v8793_v46  ;;  %v441_v46 = vld [vmem:[#allocation2 + $0x21a] sm:$0xff] }
  0xc8   :  { %1033 = vrot.lane.b32.xlu0 %v396_v30, %s8162_s29  ;;  %12589 = vst [vmem:[#allocation26_spill] sm:$0xff] %v8781_v33  ;;  %v8788_v40 = vpop.permute.xlu0 %961  ;;  %v419_v30 = vld [vmem:[#allocation2 + $0xe2] sm:$0xff] }
  0xc9   :  { %1169 = vrot.lane.b32.xlu1 %v400_v31, %s8163_s17  ;;  %12591 = vst [vmem:[#allocation28_spill] sm:$0xff] %v8788_v40  ;;  %v417_v31 = vld [vmem:[#allocation2 + $0xca] sm:$0xff] }
  0xca   :  { %v281_v40 = vld [vmem:[#allocation2 + $0x68] sm:$0xff] }
  0xcf   :  { %1171 = vrot.lane.b32.xlu2 %v401_v34, %s8163_s17  ;;  %v8790_v41 = vpop.permute.xlu1 %969  ;;  %v421_v34 = vld [vmem:[#allocation2 + $0xfa] sm:$0xff] }
  0xd0   :  { %1039 = vrot.lane.b32.xlu0 %v399_v35, %s8162_s29  ;;  %12592 = vst [vmem:[#allocation29_spill] sm:$0xff] %v8790_v41  ;;  %v8797_v50 = vpop.permute.xlu0 %967  ;;  %v8970_v41 = vld [vmem:[#allocation2 + $0x30] sm:$0xff]  ;;  %s8164_s29 = smov 12  }
  0xd1   :  { %1175 = vrot.lane.b32.xlu1 %v403_v38, %s8163_s17  ;;  %12594 = vst [vmem:[#allocation31_spill] sm:$0xff] %v8797_v50  ;;  %v8985_v50 = vld [vmem:[#allocation2 + $0x20] sm:$0xff] }
  0xd7   :  { %1177 = vrot.lane.b32.xlu2 %v404_v42, %s8163_s17  ;;  %v8799_v52 = vpop.permute.xlu1 %975 }
  0xd8   :  { %1173 = vrot.lane.b32.xlu0 %v402_v44, %s8163_s17  ;;  %12595 = vst [vmem:[#allocation32_spill] sm:$0xff] %v8799_v52  ;;  %v8806_v58 = vpop.permute.xlu0 %973  ;;  %v422_v44 = vld [vmem:[#allocation2 + $0x10a] sm:$0xff]  ;;  %v456_v52 = vld [vmem:[#allocation2 + $0x2d2] sm:$0xff] }
  0xd9   :  { %1181 = vrot.lane.b32.xlu1 %v406_v45, %s8163_s17  ;;  %12597 = vst [vmem:[#allocation34_spill] sm:$0xff] %v8806_v58  ;;  %v420_v45 = vld [vmem:[#allocation2 + $0xf2] sm:$0xff] }
  0xdf   :  { %1183 = vrot.lane.b32.xlu2 %v407_v47, %s8163_s17  ;;  %v8809_v62 = vpop.permute.xlu1 %981  ;;  %v424_v47 = vld [vmem:[#allocation2 + $0x122] sm:$0xff] }
  0xe0   :  { %1179 = vrot.lane.b32.xlu0 %v405_v51, %s8163_s17  ;;  %12598 = vst [vmem:[#allocation35_spill] sm:$0xff] %v8809_v62  ;;  %v8817_v7 = vpop.permute.xlu0 %979 }
  0xe1   :  { %v8803_v55 = vpop.permute.xlu2 %989  ;;  %1187 = vrot.lane.b32.xlu1 %v409_v54, %s8163_s17  ;;  %12600 = vst [vmem:[#allocation37_spill] sm:$0xff] %v8817_v7  ;;  %v450_v7 = vld [vmem:[#allocation2 + $0x28a] sm:$0xff] }
  0xe2   :  { %12596 = vst [vmem:[#allocation33_spill] sm:$0xff] %v8803_v55 }
  0xe7   :  { %1189 = vrot.lane.b32.xlu2 %v410_v56, %s8163_s17  ;;  %v8822_v13 = vpop.permute.xlu1 %987 }
  0xe8   :  { %1185 = vrot.lane.b32.xlu0 %v408_v57, %s8163_s17  ;;  %12602 = vst [vmem:[#allocation39_spill] sm:$0xff] %v8822_v13  ;;  %v425_v57 = vld [vmem:[#allocation2 + $0x12a] sm:$0xff] }
  0xe9   :  { %v8812_v63 = vpop.permute.xlu2 %995  ;;  %1193 = vrot.lane.b32.xlu1 %v412_v61, %s8163_s17  ;;  %v423_v61 = vld [vmem:[#allocation2 + $0x112] sm:$0xff] }
  0xea   :  { %12599 = vst [vmem:[#allocation36_spill] sm:$0xff] %v8812_v63  ;;  %v279_v63 = vld [vmem:[#allocation2 + $0x50] sm:$0xff] }
  0xeb   :  { %v284_v13 = vld [vmem:[#allocation2 + $0x90] sm:$0xff] }
  0xef   :  { %1195 = vrot.lane.b32.xlu2 %v413_v1, %s8163_s17  ;;  %v427_v1 = vld [vmem:[#allocation2 + $0x142] sm:$0xff] }
  0xf0   :  { %1191 = vrot.lane.b32.xlu0 %v411_v2, %s8163_s17 }
  0xf1   :  { %v8819_v8 = vpop.permute.xlu2 %1001  ;;  %1199 = vrot.lane.b32.xlu1 %v415_v6, %s8163_s17 }
  0xf2   :  { %12601 = vst [vmem:[#allocation38_spill] sm:$0xff] %v8819_v8  ;;  %v459_v8 = vld [vmem:[#allocation2 + $0x2f2] sm:$0xff] }
  0xf7   :  { %1201 = vrot.lane.b32.xlu2 %v416_v16, %s8163_s17 }
  0xf8   :  { %1197 = vrot.lane.b32.xlu0 %v414_v18, %s8163_s17  ;;  %v428_v18 = vld [vmem:[#allocation2 + $0x152] sm:$0xff] }
  0xf9   :  { %v8826_v23 = vpop.permute.xlu2 %1007  ;;  %1205 = vrot.lane.b32.xlu1 %v418_v21, %s8163_s17  ;;  %v426_v21 = vld [vmem:[#allocation2 + $0x13a] sm:$0xff] }
  0xfa   :  { %12603 = vst [vmem:[#allocation40_spill] sm:$0xff] %v8826_v23  ;;  %v8829_v24 = vpop.permute.xlu0 %985  ;;  %v454_v23 = vld [vmem:[#allocation2 + $0x2ba] sm:$0xff] }
  0xfb   :  { %12604 = vst [vmem:[#allocation41_spill] sm:$0xff] %v8829_v24  ;;  %v8831_v29 = vpop.permute.xlu1 %993  ;;  %v317_v24 = vld [vmem:[#allocation2 + $0x248] sm:$0xff] }
  0xfc   :  { %12605 = vst [vmem:[#allocation42_spill] sm:$0xff] %v8831_v29 }
  0xff   :  { %1207 = vrot.lane.b32.xlu2 %v419_v30, %s8163_s17  ;;  %v430_v30 = vld [vmem:[#allocation2 + $0x16a] sm:$0xff] }
 0x100   :  { %1203 = vrot.lane.b32.xlu0 %v417_v31, %s8163_s17 }
 0x101   :  { %v8835_v35 = vpop.permute.xlu2 %1013  ;;  %1211 = vrot.lane.b32.xlu1 %v421_v34, %s8163_s17 }
 0x102   :  { %12606 = vst [vmem:[#allocation43_spill] sm:$0xff] %v8835_v35  ;;  %v8838_v38 = vpop.permute.xlu0 %991  ;;  %v438_v35 = vld [vmem:[#allocation2 + $0x1fa] sm:$0xff] }
 0x103   :  { %12607 = vst [vmem:[#allocation44_spill] sm:$0xff] %v8838_v38  ;;  %v8840_v42 = vpop.permute.xlu1 %999  ;;  %v8998_v38 = vld [vmem:[#allocation2 + $0x48] sm:$0xff] }
 0x104   :  { %12608 = vst [vmem:[#allocation45_spill] sm:$0xff] %v8840_v42  ;;  %v463_v42 = vld [vmem:[#allocation2 + $0x322] sm:$0xff] }
 0x107   :  { %1213 = vrot.lane.b32.xlu2 %v422_v44, %s8163_s17 }
 0x108   :  { %1209 = vrot.lane.b32.xlu0 %v420_v45, %s8163_s17  ;;  %v431_v45 = vld [vmem:[#allocation2 + $0x172] sm:$0xff] }
 0x109   :  { %v8844_v51 = vpop.permute.xlu2 %1019  ;;  %1217 = vrot.lane.b32.xlu1 %v424_v47, %s8163_s17  ;;  %v429_v47 = vld [vmem:[#allocation2 + $0x15a] sm:$0xff] }
 0x10a   :  { %12609 = vst [vmem:[#allocation46_spill] sm:$0xff] %v8844_v51  ;;  %v8847_v54 = vpop.permute.xlu0 %997 }
 0x10b   :  { %12610 = vst [vmem:[#allocation47_spill] sm:$0xff] %v8847_v54  ;;  %v8849_v56 = vpop.permute.xlu1 %1005  ;;  %v8968_v54 = vld [vmem:[#allocation2 + $0x18] sm:$0xff] }
 0x10c   :  { %12611 = vst [vmem:[#allocation48_spill] sm:$0xff] %v8849_v56  ;;  %v457_v56 = vld [vmem:[#allocation2 + $0x2da] sm:$0xff] }
 0x10f   :  { %1219 = vrot.lane.b32.xlu2 %v425_v57, %s8163_s17  ;;  %v433_v57 = vld [vmem:[#allocation2 + $0x1ba] sm:$0xff] }
 0x110   :  { %1215 = vrot.lane.b32.xlu0 %v423_v61, %s8163_s17 }
 0x111   :  { %v8853_v2 = vpop.permute.xlu2 %1025  ;;  %1223 = vrot.lane.b32.xlu1 %v427_v1, %s8163_s17 }
 0x112   :  { %12612 = vst [vmem:[#allocation49_spill] sm:$0xff] %v8853_v2  ;;  %v8856_v6 = vpop.permute.xlu0 %1003 }
 0x113   :  { %12613 = vst [vmem:[#allocation50_spill] sm:$0xff] %v8856_v6  ;;  %v8858_v16 = vpop.permute.xlu1 %1011  ;;  %v460_v6 = vld [vmem:[#allocation2 + $0x302] sm:$0xff] }
 0x114   :  { %12614 = vst [vmem:[#allocation51_spill] sm:$0xff] %v8858_v16  ;;  %v445_v16 = vld [vmem:[#allocation2 + $0x24a] sm:$0xff] }
 0x117   :  { %1225 = vrot.lane.b32.xlu2 %v428_v18, %s8163_s17 }
 0x118   :  { %1221 = vrot.lane.b32.xlu0 %v426_v21, %s8163_s17  ;;  %v434_v21 = vld [vmem:[#allocation2 + $0x1ca] sm:$0xff] }
 0x119   :  { %v8862_v31 = vpop.permute.xlu2 %1031  ;;  %1229 = vrot.lane.b32.xlu1 %v430_v30, %s8163_s17  ;;  %v432_v30 = vld [vmem:[#allocation2 + $0x1b2] sm:$0xff] }
 0x11a   :  { %12615 = vst [vmem:[#allocation52_spill] sm:$0xff] %v8862_v31  ;;  %v8865_v34 = vpop.permute.xlu0 %1009  ;;  %v442_v31 = vld [vmem:[#allocation2 + $0x22a] sm:$0xff] }
 0x11b   :  { %12616 = vst [vmem:[#allocation53_spill] sm:$0xff] %v8865_v34  ;;  %v8867_v44 = vpop.permute.xlu1 %1017  ;;  %v447_v34 = vld [vmem:[#allocation2 + $0x262] sm:$0xff] }
 0x11c   :  { %12617 = vst [vmem:[#allocation54_spill] sm:$0xff] %v8867_v44  ;;  %v439_v44 = vld [vmem:[#allocation2 + $0x202] sm:$0xff] }
 0x11f   :  { %1231 = vrot.lane.b32.xlu2 %v431_v45, %s8163_s17 }
 0x120   :  { %1227 = vrot.lane.b32.xlu0 %v429_v47, %s8163_s17 }
 0x121   :  { %v8871_v61 = vpop.permute.xlu2 %1037  ;;  %1235 = vrot.lane.b32.xlu1 %v433_v57, %s8163_s17  ;;  %v437_v57 = vld [vmem:[#allocation2 + $0x1ea] sm:$0xff] }
 0x122   :  { %12618 = vst [vmem:[#allocation55_spill] sm:$0xff] %v8871_v61  ;;  %v8874_v1 = vpop.permute.xlu0 %1015  ;;  %v435_v61 = vld [vmem:[#allocation2 + $0x1d2] sm:$0xff] }
 0x123   :  { %12619 = vst [vmem:[#allocation56_spill] sm:$0xff] %v8874_v1  ;;  %v8876_v18 = vpop.permute.xlu1 %1023 }
 0x124   :  { %12620 = vst [vmem:[#allocation57_spill] sm:$0xff] %v8876_v18 }
 0x127   :  { %1237 = vrot.lane.b32.xlu2 %v434_v21, %s8163_s17 }
 0x128   :  { %1233 = vrot.lane.b32.xlu0 %v432_v30, %s8163_s17 }
 0x129   :  { %v8880_v51 = vpop.permute.xlu2 %1171  ;;  %1241 = vrot.lane.b32.xlu1 %v436_v3, %s8163_s17  ;;  %v440_v3 = vld [vmem:[#allocation2 + $0x212] sm:$0xff] }
 0x12a   :  { %v8883_v45 = vpop.permute.xlu0 %1021 }
 0x12b   :  { %12621 = vst [vmem:[#allocation58_spill] sm:$0xff] %v8883_v45  ;;  %v8885_v47 = vpop.permute.xlu1 %1029 }
 0x12c   :  { %12622 = vst [vmem:[#allocation59_spill] sm:$0xff] %v8885_v47 }
 0x12f   :  { %1243 = vrot.lane.b32.xlu2 %v437_v57, %s8163_s17 }
 0x130   :  { %1239 = vrot.lane.b32.xlu0 %v435_v61, %s8163_s17 }
 0x131   :  { %v8889_v1 = vpop.permute.xlu2 %1177  ;;  %1247 = vrot.lane.b32.xlu1 %v439_v44, %s8163_s17  ;;  %v443_v44 = vld [vmem:[#allocation2 + $0x232] sm:$0xff] }
 0x132   :  { %v8892_v21 = vpop.permute.xlu0 %1027 }
 0x133   :  { %12623 = vst [vmem:[#allocation60_spill] sm:$0xff] %v8892_v21  ;;  %v8894_v30 = vpop.permute.xlu1 %1035  ;;  %v444_v21 = vld [vmem:[#allocation2 + $0x242] sm:$0xff] }
 0x134   :  { %12624 = vst [vmem:[#allocation61_spill] sm:$0xff] %v8894_v30 }
 0x137   :  { %1249 = vrot.lane.b32.xlu2 %v440_v3, %s8163_s17 }
 0x138   :  { %1245 = vrot.lane.b32.xlu0 %v438_v35, %s8163_s17 }
 0x139   :  { %v8898_v47 = vpop.permute.xlu2 %1183  ;;  %1253 = vrot.lane.b32.xlu1 %v442_v31, %s8163_s17  ;;  %v446_v31 = vld [vmem:[#allocation2 + $0x25a] sm:$0xff] }
 0x13a   :  { %v8901_v61 = vpop.permute.xlu0 %1033 }
 0x13b   :  { %12625 = vst [vmem:[#allocation62_spill] sm:$0xff] %v8901_v61  ;;  %v8903_v57 = vpop.permute.xlu1 %1169  ;;  %v448_v61 = vld [vmem:[#allocation2 + $0x272] sm:$0xff] }
 0x13f   :  { %1255 = vrot.lane.b32.xlu2 %v443_v44, %s8163_s17 }
 0x140   :  { %1251 = vrot.lane.b32.xlu0 %v441_v46, %s8163_s17 }
 0x141   :  { %v8907_v30 = vpop.permute.xlu2 %1189  ;;  %1259 = vrot.lane.b32.xlu1 %v445_v16, %s8163_s17  ;;  %v449_v16 = vld [vmem:[#allocation2 + $0x27a] sm:$0xff] }
 0x142   :  { %v8910_v35 = vpop.permute.xlu0 %1039 }
 0x143   :  { %12626 = vst [vmem:[#allocation63_spill] sm:$0xff] %v8910_v35  ;;  %v8912_v3 = vpop.permute.xlu1 %1175  ;;  %v451_v35 = vld [vmem:[#allocation2 + $0x292] sm:$0xff] }
 0x147   :  { %1261 = vrot.lane.b32.xlu2 %v446_v31, %s8163_s17 }
 0x148   :  { %1257 = vrot.lane.b32.xlu0 %v444_v21, %s8163_s17 }
 0x149   :  { %v8916_v62 = vpop.permute.xlu2 %1195  ;;  %1265 = vrot.lane.b32.xlu1 %v448_v61, %s8163_s17  ;;  %v452_v61 = vld [vmem:[#allocation2 + $0x2a2] sm:$0xff] }
 0x14a   :  { %12627 = vst [vmem:[#allocation64_spill] sm:$0xff] %v8916_v62  ;;  %v8919_v46 = vpop.permute.xlu0 %1173  ;;  %v731_v62 = vld [vmem:[#allocation2 + $0xa9] sm:$0xff] }
 0x14b   :  { %v8921_v44 = vpop.permute.xlu1 %1181 }
 0x14f   :  { %1267 = vrot.lane.b32.xlu2 %v449_v16, %s8163_s17 }
 0x150   :  { %1263 = vrot.lane.b32.xlu0 %v447_v34, %s8163_s17 }
 0x151   :  { %v8925_v2 = vpop.permute.xlu2 %1201  ;;  %1271 = vrot.lane.b32.xlu1 %v451_v35, %s8163_s17  ;;  %v455_v35 = vld [vmem:[#allocation2 + $0x2c2] sm:$0xff] }
 0x152   :  { %12628 = vst [vmem:[#allocation65_spill] sm:$0xff] %v8925_v2  ;;  %v8928_v21 = vpop.permute.xlu0 %1179  ;;  %v335_v2 = vld [vmem:[#allocation2 + $0x320] sm:$0xff] }
 0x153   :  { %v8930_v31 = vpop.permute.xlu1 %1187 }
 0x157   :  { %1273 = vrot.lane.b32.xlu2 %v452_v61, %s8163_s17 }
 0x158   :  { %1269 = vrot.lane.b32.xlu0 %v450_v7, %s8163_s17 }
 0x159   :  { %v8934_v18 = vpop.permute.xlu2 %1207  ;;  %1277 = vrot.lane.b32.xlu1 %v454_v23, %s8163_s17  ;;  %v458_v23 = vld [vmem:[#allocation2 + $0x2ea] sm:$0xff] }
 0x15a   :  { %12629 = vst [vmem:[#allocation66_spill] sm:$0xff] %v8934_v18  ;;  %v8937_v34 = vpop.permute.xlu0 %1185  ;;  %v330_v18 = vld [vmem:[#allocation2 + $0x2e8] sm:$0xff] }
 0x15b   :  { %v8939_v16 = vpop.permute.xlu1 %1193 }
 0x15c   :  { %12630 = vst [vmem:[#allocation67_spill] sm:$0xff] %v8939_v16 }
 0x15f   :  { %1279 = vrot.lane.b32.xlu2 %v455_v35, %s8163_s17 }
 0x160   :  { %1275 = vrot.lane.b32.xlu0 %v453_v37, %s8163_s17 }
 0x161   :  { %v8943_v45 = vpop.permute.xlu2 %1213  ;;  %1283 = vrot.lane.b32.xlu1 %v457_v56, %s8163_s17  ;;  %v461_v56 = vld [vmem:[#allocation2 + $0x30a] sm:$0xff] }
 0x162   :  { %12631 = vst [vmem:[#allocation68_spill] sm:$0xff] %v8943_v45  ;;  %v8946_v7 = vpop.permute.xlu0 %1191  ;;  %v320_v45 = vld [vmem:[#allocation2 + $0x270] sm:$0xff] }
 0x163   :  { %12632 = vst [vmem:[#allocation69_spill] sm:$0xff] %v8946_v7  ;;  %v8948_v61 = vpop.permute.xlu1 %1199 }
 0x164   :  { %12633 = vst [vmem:[#allocation70_spill] sm:$0xff] %v8948_v61 }
 0x167   :  { %1285 = vrot.lane.b32.xlu2 %v458_v23, %s8163_s17 }
 0x168   :  { %1281 = vrot.lane.b32.xlu0 %v456_v52, %s8163_s17 }
 0x169   :  { %v8952_v58 = vpop.permute.xlu2 %1219  ;;  %1289 = vrot.lane.b32.xlu1 %v460_v6, %s8163_s17  ;;  %v462_v6 = vld [vmem:[#allocation2 + $0x31a] sm:$0xff] }
 0x16a   :  { %12634 = vst [vmem:[#allocation71_spill] sm:$0xff] %v8952_v58  ;;  %v8955_v37 = vpop.permute.xlu0 %1197  ;;  %v282_v58 = vld [vmem:[#allocation2 + $0x78] sm:$0xff] }
 0x16b   :  { %12635 = vst [vmem:[#allocation72_spill] sm:$0xff] %v8955_v37  ;;  %v8957_v35 = vpop.permute.xlu1 %1205  ;;  %v658_v37 = vld [vmem:[#allocation2 + $0x38] sm:$0xff] }
 0x16c   :  { %12636 = vst [vmem:[#allocation73_spill] sm:$0xff] %v8957_v35  ;;  %v333_v35 = vld [vmem:[#allocation2 + $0x308] sm:$0xff] }
 0x16f   :  { %1291 = vrot.lane.b32.xlu2 %v461_v56, %s8163_s17 }
 0x170   :  { %1287 = vrot.lane.b32.xlu0 %v459_v8, %s8163_s17 }
 0x171   :  { %v8961_v27 = vpop.permute.xlu2 %1225  ;;  %1295 = vrot.lane.b32.xlu1 %v463_v42, %s8163_s17 }
 0x172   :  { %12637 = vst [vmem:[#allocation74_spill] sm:$0xff] %v8961_v27  ;;  %v8964_v52 = vpop.permute.xlu0 %1203  ;;  %v8983_v27 = vld [vmem:[#allocation2 + $0x38] sm:$0xff] }
 0x173   :  { %12638 = vst [vmem:[#allocation75_spill] sm:$0xff] %v8964_v52  ;;  %v8966_v23 = vpop.permute.xlu1 %1211  ;;  %v332_v52 = vld [vmem:[#allocation2 + $0x300] sm:$0xff] }
 0x174   :  { %12639 = vst [vmem:[#allocation76_spill] sm:$0xff] %v8966_v23  ;;  %v325_v23 = vld [vmem:[#allocation2 + $0x2a8] sm:$0xff] }
 0x177   :  { %1425 = vrot.lane.b32.xlu2 %v8968_v54, %s8164_s29 }
 0x178   :  { %1293 = vrot.lane.b32.xlu0 %v462_v6, %s8163_s17 }
 0x179   :  { %v8975_v8 = vpop.permute.xlu2 %1231  ;;  %1429 = vrot.lane.b32.xlu1 %v8970_v41, %s8164_s29 }
 0x17a   :  { %12640 = vst [vmem:[#allocation77_spill] sm:$0xff] %v8975_v8  ;;  %v8979_v42 = vpop.permute.xlu0 %1209 }
 0x17b   :  { %12641 = vst [vmem:[#allocation78_spill] sm:$0xff] %v8979_v42  ;;  %v8981_v56 = vpop.permute.xlu1 %1217  ;;  %v327_v42 = vld [vmem:[#allocation2 + $0x2c0] sm:$0xff] }
 0x17c   :  { %12642 = vst [vmem:[#allocation79_spill] sm:$0xff] %v8981_v56  ;;  %v283_v56 = vld [vmem:[#allocation2 + $0x80] sm:$0xff] }
 0x17f   :  { %1431 = vrot.lane.b32.xlu2 %v8983_v27, %s8164_s29 }
 0x180   :  { %1427 = vrot.lane.b32.xlu0 %v8985_v50, %s8164_s29 }
 0x181   :  { %v8991_v6 = vpop.permute.xlu2 %1237  ;;  %1435 = vrot.lane.b32.xlu1 %v279_v63, %s8164_s29 }
 0x182   :  { %12643 = vst [vmem:[#allocation80_spill] sm:$0xff] %v8991_v6  ;;  %v8994_v8 = vpop.permute.xlu0 %1215 }
 0x183   :  { %12644 = vst [vmem:[#allocation81_spill] sm:$0xff] %v8994_v8  ;;  %v8996_v29 = vpop.permute.xlu1 %1223  ;;  %v294_v8 = vld [vmem:[#allocation2 + $0x108] sm:$0xff] }
 0x184   :  { %12645 = vst [vmem:[#allocation82_spill] sm:$0xff] %v8996_v29  ;;  %v285_v29 = vld [vmem:[#allocation2 + $0x98] sm:$0xff] }
 0x187   :  { %1437 = vrot.lane.b32.xlu2 %v280_v19, %s8164_s29 }
 0x188   :  { %1433 = vrot.lane.b32.xlu0 %v8998_v38, %s8164_s29 }
 0x189   :  { %v9003_v33 = vpop.permute.xlu2 %1243  ;;  %1441 = vrot.lane.b32.xlu1 %v282_v58, %s8164_s29  ;;  %v286_v58 = vld [vmem:[#allocation2 + $0xa8] sm:$0xff] }
 0x18a   :  { %12646 = vst [vmem:[#allocation83_spill] sm:$0xff] %v9003_v33  ;;  %v9006_v6 = vpop.permute.xlu0 %1221 }
 0x18b   :  { %12647 = vst [vmem:[#allocation84_spill] sm:$0xff] %v9006_v6  ;;  %v9008_v63 = vpop.permute.xlu1 %1229 }
 0x18c   :  { %12648 = vst [vmem:[#allocation85_spill] sm:$0xff] %v9008_v63  ;;  %v288_v63 = vld [vmem:[#allocation2 + $0xc0] sm:$0xff] }
 0x18f   :  { %1443 = vrot.lane.b32.xlu2 %v283_v56, %s8164_s29 }
 0x190   :  { %1439 = vrot.lane.b32.xlu0 %v281_v40, %s8164_s29 }
 0x191   :  { %v9012_v19 = vpop.permute.xlu2 %1249  ;;  %1447 = vrot.lane.b32.xlu1 %v285_v29, %s8164_s29  ;;  %v289_v29 = vld [vmem:[#allocation2 + $0xc8] sm:$0xff] }
 0x192   :  { %12649 = vst [vmem:[#allocation86_spill] sm:$0xff] %v9012_v19  ;;  %v9015_v55 = vpop.permute.xlu0 %1227  ;;  %v287_v19 = vld [vmem:[#allocation2 + $0xb0] sm:$0xff] }
 0x193   :  { %12650 = vst [vmem:[#allocation87_spill] sm:$0xff] %v9015_v55  ;;  %v9017_v33 = vpop.permute.xlu1 %1235  ;;  %v290_v55 = vld [vmem:[#allocation2 + $0xd8] sm:$0xff] }
 0x194   :  { %12651 = vst [vmem:[#allocation88_spill] sm:$0xff] %v9017_v33  ;;  %v173_v33 = vld [vmem:[%s12574_s25 + $0xf0] sm:$0xff] }
 0x195   :  { %238 = vst.msk [vmem:[#allocation2 + $0x181] sm:$0xff] %vm55_vm0, %v173_v33 }
 0x197   :  { %1449 = vrot.lane.b32.xlu2 %v286_v58, %s8164_s29  ;;  %v291_v58 = vld [vmem:[#allocation2 + $0xe0] sm:$0xff] }
 0x198   :  { %1445 = vrot.lane.b32.xlu0 %v284_v13, %s8164_s29 }
 0x199   :  { %v9021_v6 = vpop.permute.xlu2 %1255  ;;  %1453 = vrot.lane.b32.xlu1 %v288_v63, %s8164_s29 }
 0x19a   :  { %12652 = vst [vmem:[#allocation89_spill] sm:$0xff] %v9021_v6  ;;  %v9024_v40 = vpop.permute.xlu0 %1233  ;;  %v292_v6 = vld [vmem:[#allocation2 + $0xf0] sm:$0xff] }
 0x19b   :  { %12653 = vst [vmem:[#allocation90_spill] sm:$0xff] %v9024_v40  ;;  %v9026_v56 = vpop.permute.xlu1 %1241 }
 0x19c   :  { %12654 = vst [vmem:[#allocation91_spill] sm:$0xff] %v9026_v56  ;;  %v314_v56 = vld [vmem:[#allocation2 + $0x228] sm:$0xff] }
 0x19f   :  { %1455 = vrot.lane.b32.xlu2 %v289_v29, %s8164_s29  ;;  %v174_v29 = vld [vmem:[%s12574_s25 + $0xf8] sm:$0xff] }
 0x1a0   :  { %1451 = vrot.lane.b32.xlu0 %v287_v19, %s8164_s29  ;;  %239 = vst.msk [vmem:[#allocation2 + $0x189] sm:$0xff] %vm55_vm0, %v174_v29 }
 0x1a1   :  { %v9034_v13 = vpop.permute.xlu2 %1261  ;;  %1459 = vrot.lane.b32.xlu1 %v291_v58, %s8164_s29 }
 0x1a2   :  { %12655 = vst [vmem:[#allocation92_spill] sm:$0xff] %v9034_v13  ;;  %v9037_v63 = vpop.permute.xlu0 %1239  ;;  %v293_v13 = vld [vmem:[#allocation2 + $0xf8] sm:$0xff] }
 0x1a3   :  { %12656 = vst [vmem:[#allocation93_spill] sm:$0xff] %v9037_v63  ;;  %v9039_v40 = vpop.permute.xlu1 %1247  ;;  %v295_v63 = vld [vmem:[#allocation2 + $0x110] sm:$0xff] }
 0x1a4   :  { %12657 = vst [vmem:[#allocation94_spill] sm:$0xff] %v9039_v40 }
 0x1a7   :  { %1461 = vrot.lane.b32.xlu2 %v292_v6, %s8164_s29  ;;  %v297_v6 = vld [vmem:[#allocation2 + $0x128] sm:$0xff] }
 0x1a8   :  { %1457 = vrot.lane.b32.xlu0 %v290_v55, %s8164_s29 }
 0x1a9   :  { %v9047_v33 = vpop.permute.xlu2 %1267  ;;  %1465 = vrot.lane.b32.xlu1 %v294_v8, %s8164_s29  ;;  %v298_v8 = vld [vmem:[#allocation2 + $0x138] sm:$0xff] }
 0x1aa   :  { %12658 = vst [vmem:[#allocation95_spill] sm:$0xff] %v9047_v33  ;;  %v9050_v19 = vpop.permute.xlu0 %1245  ;;  %v296_v33 = vld [vmem:[#allocation2 + $0x120] sm:$0xff] }
 0x1ab   :  { %12659 = vst [vmem:[#allocation96_spill] sm:$0xff] %v9050_v19  ;;  %v9052_v58 = vpop.permute.xlu1 %1253 }
 0x1ac   :  { %12660 = vst [vmem:[#allocation97_spill] sm:$0xff] %v9052_v58  ;;  %v300_v58 = vld [vmem:[#allocation2 + $0x150] sm:$0xff] }
 0x1af   :  { %1467 = vrot.lane.b32.xlu2 %v295_v63, %s8164_s29 }
 0x1b0   :  { %1463 = vrot.lane.b32.xlu0 %v293_v13, %s8164_s29 }
 0x1b1   :  { %v9056_v40 = vpop.permute.xlu2 %1273  ;;  %1471 = vrot.lane.b32.xlu1 %v297_v6, %s8164_s29  ;;  %v301_v6 = vld [vmem:[#allocation2 + $0x158] sm:$0xff] }
 0x1b2   :  { %12661 = vst [vmem:[#allocation98_spill] sm:$0xff] %v9056_v40  ;;  %v9059_v55 = vpop.permute.xlu0 %1251  ;;  %v299_v40 = vld [vmem:[#allocation2 + $0x140] sm:$0xff] }
 0x1b3   :  { %12662 = vst [vmem:[#allocation99_spill] sm:$0xff] %v9059_v55  ;;  %v9061_v29 = vpop.permute.xlu1 %1259 }
 0x1b4   :  { %12663 = vst [vmem:[#allocation100_spill] sm:$0xff] %v9061_v29  ;;  %v303_v29 = vld [vmem:[#allocation2 + $0x170] sm:$0xff] }
 0x1b7   :  { %1473 = vrot.lane.b32.xlu2 %v298_v8, %s8164_s29 }
 0x1b8   :  { %1469 = vrot.lane.b32.xlu0 %v296_v33, %s8164_s29 }
 0x1b9   :  { %v9065_v19 = vpop.permute.xlu2 %1279  ;;  %1477 = vrot.lane.b32.xlu1 %v300_v58, %s8164_s29  ;;  %v494_v58 = vld [vmem:[#allocation2 + $0x180] sm:$0xff] }
 0x1ba   :  { %12664 = vst [vmem:[#allocation101_spill] sm:$0xff] %v9065_v19  ;;  %v9068_v13 = vpop.permute.xlu0 %1257  ;;  %v302_v19 = vld [vmem:[#allocation2 + $0x168] sm:$0xff] }
 0x1bb   :  { %12665 = vst [vmem:[#allocation102_spill] sm:$0xff] %v9068_v13  ;;  %v9070_v63 = vpop.permute.xlu1 %1265 }
 0x1bc   :  { %12666 = vst [vmem:[#allocation103_spill] sm:$0xff] %v9070_v63  ;;  %v306_v63 = vld [vmem:[#allocation2 + $0x1c8] sm:$0xff] }
 0x1bf   :  { %1479 = vrot.lane.b32.xlu2 %v301_v6, %s8164_s29 }
 0x1c0   :  { %1475 = vrot.lane.b32.xlu0 %v299_v40, %s8164_s29 }
 0x1c1   :  { %v9074_v55 = vpop.permute.xlu2 %1285  ;;  %1483 = vrot.lane.b32.xlu1 %v303_v29, %s8164_s29  ;;  %v495_v29 = vld [vmem:[#allocation2 + $0x188] sm:$0xff] }
 0x1c2   :  { %12667 = vst [vmem:[#allocation104_spill] sm:$0xff] %v9074_v55  ;;  %v9077_v33 = vpop.permute.xlu0 %1263  ;;  %v307_v55 = vld [vmem:[#allocation2 + $0x1d0] sm:$0xff] }
 0x1c3   :  { %12668 = vst [vmem:[#allocation105_spill] sm:$0xff] %v9077_v33  ;;  %v9079_v8 = vpop.permute.xlu1 %1271 }
 0x1c4   :  { %12669 = vst [vmem:[#allocation106_spill] sm:$0xff] %v9079_v8  ;;  %v309_v8 = vld [vmem:[#allocation2 + $0x1e8] sm:$0xff] }
 0x1c7   :  { %1485 = vrot.lane.b32.xlu2 %v494_v58, %s8164_s29 }
 0x1c8   :  { %1481 = vrot.lane.b32.xlu0 %v302_v19, %s8164_s29 }
 0x1c9   :  { %v9083_v13 = vpop.permute.xlu2 %1291  ;;  %1489 = vrot.lane.b32.xlu1 %v306_v63, %s8164_s29  ;;  %v310_v63 = vld [vmem:[#allocation2 + $0x1f8] sm:$0xff] }
 0x1ca   :  { %12670 = vst [vmem:[#allocation107_spill] sm:$0xff] %v9083_v13  ;;  %v9086_v40 = vpop.permute.xlu0 %1269  ;;  %v308_v13 = vld [vmem:[#allocation2 + $0x1e0] sm:$0xff] }
 0x1cb   :  { %12671 = vst [vmem:[#allocation108_spill] sm:$0xff] %v9086_v40  ;;  %v9088_v6 = vpop.permute.xlu1 %1277  ;;  %v312_v40 = vld [vmem:[#allocation2 + $0x210] sm:$0xff] }
 0x1cc   :  { %12672 = vst [vmem:[#allocation109_spill] sm:$0xff] %v9088_v6 }
 0x1cf   :  { %1491 = vrot.lane.b32.xlu2 %v307_v55, %s8164_s29 }
 0x1d0   :  { %1487 = vrot.lane.b32.xlu0 %v495_v29, %s8164_s29 }
 0x1d1   :  { %v9092_v33 = vpop.permute.xlu2 %1425  ;;  %1495 = vrot.lane.b32.xlu1 %v309_v8, %s8164_s29  ;;  %v313_v8 = vld [vmem:[#allocation2 + $0x218] sm:$0xff] }
 0x1d2   :  { %v9095_v19 = vpop.permute.xlu0 %1275 }
 0x1d3   :  { %12673 = vst [vmem:[#allocation110_spill] sm:$0xff] %v9095_v19  ;;  %v9097_v58 = vpop.permute.xlu1 %1283  ;;  %v315_v19 = vld [vmem:[#allocation2 + $0x230] sm:$0xff] }
 0x1d4   :  { %12674 = vst [vmem:[#allocation111_spill] sm:$0xff] %v9097_v58 }
 0x1d7   :  { %1497 = vrot.lane.b32.xlu2 %v310_v63, %s8164_s29 }
 0x1d8   :  { %1493 = vrot.lane.b32.xlu0 %v308_v13, %s8164_s29 }
 0x1d9   :  { %v9101_v6 = vpop.permute.xlu2 %1431  ;;  %1501 = vrot.lane.b32.xlu1 %v312_v40, %s8164_s29  ;;  %v316_v40 = vld [vmem:[#allocation2 + $0x240] sm:$0xff] }
 0x1da   :  { %v9104_v55 = vpop.permute.xlu0 %1281 }
 0x1db   :  { %12675 = vst [vmem:[#allocation112_spill] sm:$0xff] %v9104_v55  ;;  %v9106_v29 = vpop.permute.xlu1 %1289 }
 0x1dc   :  { %12676 = vst [vmem:[#allocation113_spill] sm:$0xff] %v9106_v29  ;;  %v318_v29 = vld [vmem:[#allocation2 + $0x258] sm:$0xff] }
 0x1df   :  { %1503 = vrot.lane.b32.xlu2 %v313_v8, %s8164_s29 }
 0x1e0   :  { %1499 = vrot.lane.b32.xlu0 %v311_v12, %s8164_s29 }
 0x1e1   :  { %v9110_v58 = vpop.permute.xlu2 %1437  ;;  %1507 = vrot.lane.b32.xlu1 %v315_v19, %s8164_s29  ;;  %v319_v19 = vld [vmem:[#allocation2 + $0x260] sm:$0xff] }
 0x1e2   :  { %v9113_v13 = vpop.permute.xlu0 %1287 }
 0x1e3   :  { %12677 = vst [vmem:[#allocation114_spill] sm:$0xff] %v9113_v13  ;;  %v9115_v63 = vpop.permute.xlu1 %1295 }
 0x1e4   :  { %12678 = vst [vmem:[#allocation115_spill] sm:$0xff] %v9115_v63  ;;  %v321_v63 = vld [vmem:[#allocation2 + $0x278] sm:$0xff] }
 0x1e7   :  { %1509 = vrot.lane.b32.xlu2 %v316_v40, %s8164_s29 }
 0x1e8   :  { %1505 = vrot.lane.b32.xlu0 %v314_v56, %s8164_s29 }
 0x1e9   :  { %v9119_v55 = vpop.permute.xlu2 %1443  ;;  %1513 = vrot.lane.b32.xlu1 %v318_v29, %s8164_s29  ;;  %v322_v29 = vld [vmem:[#allocation2 + $0x288] sm:$0xff] }
 0x1ea   :  { %v9122_v12 = vpop.permute.xlu0 %1293 }
 0x1eb   :  { %12679 = vst [vmem:[#allocation116_spill] sm:$0xff] %v9122_v12  ;;  %v9124_v8 = vpop.permute.xlu1 %1429  ;;  %v205_v12 = vld [vmem:[%s12574_s25 + $0x1f0] sm:$0xff] }
 0x1ec   :  { %270 = vst.msk [vmem:[#allocation2 + $0x331] sm:$0xff] %vm55_vm0, %v205_v12 }
 0x1ef   :  { %1515 = vrot.lane.b32.xlu2 %v319_v19, %s8164_s29  ;;  %v324_v19 = vld [vmem:[#allocation2 + $0x2a0] sm:$0xff] }
 0x1f0   :  { %1511 = vrot.lane.b32.xlu0 %v317_v24, %s8164_s29  ;;  %v206_v24 = vld [vmem:[%s12574_s25 + $0x1f8] sm:$0xff]  ;;  %s8165_s25 = smov 16  }
 0x1f1   :  { %v9128_v13 = vpop.permute.xlu2 %1449  ;;  %1519 = vrot.lane.b32.xlu1 %v321_v63, %s8164_s29  ;;  %271 = vst.msk [vmem:[#allocation2 + $0x339] sm:$0xff] %vm55_vm0, %v206_v24  ;;  %v328_v24 = vld [vmem:[#allocation2 + $0x2d0] sm:$0xff] }
 0x1f2   :  { %12680 = vst [vmem:[#allocation117_spill] sm:$0xff] %v9128_v13  ;;  %v9131_v56 = vpop.permute.xlu0 %1427 }
 0x1f3   :  { %v9133_v40 = vpop.permute.xlu1 %1435 }
 0x1f7   :  { %1521 = vrot.lane.b32.xlu2 %v322_v29, %s8164_s29 }
 0x1f8   :  { %1517 = vrot.lane.b32.xlu0 %v320_v45, %s8164_s29 }
 0x1f9   :  { %v9144_v63 = vpop.permute.xlu2 %1455  ;;  %1525 = vrot.lane.b32.xlu1 %v324_v19, %s8164_s29 }
 0x1fa   :  { %12681 = vst [vmem:[#allocation118_spill] sm:$0xff] %v9144_v63  ;;  %v9148_v29 = vpop.permute.xlu0 %1433 }
 0x1fb   :  { %v9150_v26 = vpop.permute.xlu1 %1441 }
 0x1ff   :  { %1527 = vrot.lane.b32.xlu2 %v325_v23, %s8164_s29 }
 0x200   :  { %1523 = vrot.lane.b32.xlu0 %v323_v32, %s8164_s29 }
 0x201   :  { %v9154_v45 = vpop.permute.xlu2 %1461  ;;  %1531 = vrot.lane.b32.xlu1 %v327_v42, %s8164_s29  ;;  %v331_v42 = vld [vmem:[#allocation2 + $0x2f0] sm:$0xff] }
 0x202   :  { %12682 = vst [vmem:[#allocation119_spill] sm:$0xff] %v9154_v45  ;;  %v9157_v12 = vpop.permute.xlu0 %1439  ;;  %v329_v45 = vld [vmem:[#allocation2 + $0x2d8] sm:$0xff] }
 0x203   :  { %v9159_v19 = vpop.permute.xlu1 %1447 }
 0x204   :  { %12683 = vst [vmem:[#allocation120_spill] sm:$0xff] %v9159_v19 }
 0x207   :  { %1533 = vrot.lane.b32.xlu2 %v328_v24, %s8164_s29 }
 0x208   :  { %1529 = vrot.lane.b32.xlu0 %v326_v0, %s8164_s29 }
 0x209   :  { %v9163_v17 = vpop.permute.xlu2 %1467  ;;  %1537 = vrot.lane.b32.xlu1 %v330_v18, %s8164_s29  ;;  %v334_v18 = vld [vmem:[#allocation2 + $0x318] sm:$0xff] }
 0x20a   :  { %12684 = vst [vmem:[#allocation121_spill] sm:$0xff] %v9163_v17  ;;  %v9166_v32 = vpop.permute.xlu0 %1445  ;;  %v526_v17 = vld [vmem:[#allocation2 + $0x330] sm:$0xff] }
 0x20b   :  { %v9168_v23 = vpop.permute.xlu1 %1453 }
 0x20c   :  { %12685 = vst [vmem:[#allocation122_spill] sm:$0xff] %v9168_v23  ;;  %v786_v23 = vld [vmem:[#allocation2 + $0x3a] sm:$0xff] }
 0x20f   :  { %1539 = vrot.lane.b32.xlu2 %v331_v42, %s8164_s29 }
 0x210   :  { %1535 = vrot.lane.b32.xlu0 %v329_v45, %s8164_s29 }
 0x211   :  { %v9172_v25 = vpop.permute.xlu2 %1473  ;;  %1543 = vrot.lane.b32.xlu1 %v333_v35, %s8164_s29  ;;  %v527_v35 = vld [vmem:[#allocation2 + $0x338] sm:$0xff] }
 0x212   :  { %12686 = vst [vmem:[#allocation123_spill] sm:$0xff] %v9172_v25  ;;  %v9175_v0 = vpop.permute.xlu0 %1451  ;;  %v529_v25 = vld [vmem:[#allocation2 + $0x21] sm:$0xff] }
 0x213   :  { %12687 = vst [vmem:[#allocation124_spill] sm:$0xff] %v9175_v0  ;;  %v9177_v24 = vpop.permute.xlu1 %1459 }
 0x214   :  { %12688 = vst [vmem:[#allocation125_spill] sm:$0xff] %v9177_v24 }
 0x217   :  { %1545 = vrot.lane.b32.xlu2 %v334_v18, %s8164_s29 }
 0x218   :  { %1541 = vrot.lane.b32.xlu0 %v332_v52, %s8164_s29 }
 0x219   :  { %v9181_v53 = vpop.permute.xlu2 %1479  ;;  %1549 = vrot.lane.b32.xlu1 %v526_v17, %s8164_s29  ;;  %v530_v17 = vld [vmem:[#allocation2 + $0x31] sm:$0xff] }
 0x21a   :  { %12689 = vst [vmem:[#allocation126_spill] sm:$0xff] %v9181_v53  ;;  %v9184_v45 = vpop.permute.xlu0 %1457  ;;  %v528_v53 = vld [vmem:[#allocation2 + $0x19] sm:$0xff] }
 0x21b   :  { %12690 = vst [vmem:[#allocation127_spill] sm:$0xff] %v9184_v45  ;;  %v9186_v42 = vpop.permute.xlu1 %1465  ;;  %v532_v45 = vld [vmem:[#allocation2 + $0x49] sm:$0xff] }
 0x21c   :  { %12691 = vst [vmem:[#allocation128_spill] sm:$0xff] %v9186_v42 }
 0x21f   :  { %1551 = vrot.lane.b32.xlu2 %v527_v35, %s8164_s29 }
 0x220   :  { %1547 = vrot.lane.b32.xlu0 %v335_v2, %s8164_s29 }
 0x221   :  { %v9190_v24 = vpop.permute.xlu2 %1485  ;;  %1683 = vrot.lane.b32.xlu1 %v529_v25, %s8165_s25  ;;  %v533_v25 = vld [vmem:[#allocation2 + $0x51] sm:$0xff] }
 0x222   :  { %12692 = vst [vmem:[#allocation129_spill] sm:$0xff] %v9190_v24  ;;  %v9193_v52 = vpop.permute.xlu0 %1463  ;;  %v531_v24 = vld [vmem:[#allocation2 + $0x39] sm:$0xff] }
 0x223   :  { %12693 = vst [vmem:[#allocation130_spill] sm:$0xff] %v9193_v52  ;;  %v9195_v18 = vpop.permute.xlu1 %1471  ;;  %v9206_v52 = vld [vmem:[#allocation2 + $0x69] sm:$0xff] }
 0x224   :  { %12694 = vst [vmem:[#allocation131_spill] sm:$0xff] %v9195_v18 }
 0x227   :  { %1685 = vrot.lane.b32.xlu2 %v530_v17, %s8165_s25 }
 0x228   :  { %1681 = vrot.lane.b32.xlu0 %v528_v53, %s8165_s25 }
 0x229   :  { %v9199_v42 = vpop.permute.xlu2 %1491  ;;  %1689 = vrot.lane.b32.xlu1 %v532_v45, %s8165_s25 }
 0x22a   :  { %12695 = vst [vmem:[#allocation132_spill] sm:$0xff] %v9199_v42  ;;  %v9202_v2 = vpop.permute.xlu0 %1469 }
 0x22b   :  { %12696 = vst [vmem:[#allocation133_spill] sm:$0xff] %v9202_v2  ;;  %v9204_v35 = vpop.permute.xlu1 %1477  ;;  %v9218_v2 = vld [vmem:[#allocation2 + $0x79] sm:$0xff] }
 0x22c   :  { %12697 = vst [vmem:[#allocation134_spill] sm:$0xff] %v9204_v35  ;;  %v534_v35 = vld [vmem:[#allocation2 + $0x61] sm:$0xff] }
 0x22f   :  { %1691 = vrot.lane.b32.xlu2 %v533_v25, %s8165_s25 }
 0x230   :  { %1687 = vrot.lane.b32.xlu0 %v531_v24, %s8165_s25 }
 0x231   :  { %v9210_v18 = vpop.permute.xlu2 %1497  ;;  %1695 = vrot.lane.b32.xlu1 %v9206_v52, %s8165_s25 }
 0x232   :  { %12698 = vst [vmem:[#allocation135_spill] sm:$0xff] %v9210_v18  ;;  %v9214_v53 = vpop.permute.xlu0 %1475 }
 0x233   :  { %12699 = vst [vmem:[#allocation136_spill] sm:$0xff] %v9214_v53  ;;  %v9216_v42 = vpop.permute.xlu1 %1483  ;;  %v9230_v53 = vld [vmem:[#allocation2 + $0x81] sm:$0xff] }
 0x234   :  { %12700 = vst [vmem:[#allocation137_spill] sm:$0xff] %v9216_v42  ;;  %v785_v42 = vld [vmem:[#allocation2 + $0x32] sm:$0xff] }
 0x237   :  { %1697 = vrot.lane.b32.xlu2 %v9218_v2, %s8165_s25 }
 0x238   :  { %1693 = vrot.lane.b32.xlu0 %v534_v35, %s8165_s25 }
 0x239   :  { %v9223_v63 = vpop.permute.xlu2 %1503  ;;  %1937 = vrot.lane.b32.xlu1 %v592_v5, %s8166_s27 }
 0x23a   :  { %12701 = vst [vmem:[#allocation138_spill] sm:$0xff] %v9223_v63  ;;  %v9226_v18 = vpop.permute.xlu0 %1481 }
 0x23b   :  { %12702 = vst [vmem:[#allocation139_spill] sm:$0xff] %v9226_v18  ;;  %v9228_v61 = vpop.permute.xlu1 %1489 }
 0x23c   :  { %12703 = vst [vmem:[#allocation140_spill] sm:$0xff] %v9228_v61  ;;  %v593_v61 = vld [vmem:[#allocation2 + $0x22] sm:$0xff] }
 0x23f   :  { %2193 = vrot.lane.b32.xlu2 %v8970_v41, %s8167_s14 }
 0x240   :  { %1699 = vrot.lane.b32.xlu0 %v9230_v53, %s8165_s25 }
 0x241   :  { %v9236_v15 = vpop.permute.xlu2 %1509  ;;  %2705 = vrot.lane.b32.xlu1 %v785_v42, %s8168_s28 }
 0x242   :  { %12704 = vst [vmem:[#allocation141_spill] sm:$0xff] %v9236_v15  ;;  %v9239_v5 = vpop.permute.xlu0 %1487 }
 0x243   :  { %12705 = vst [vmem:[#allocation142_spill] sm:$0xff] %v9239_v5  ;;  %v9241_v18 = vpop.permute.xlu1 %1495 }
 0x244   :  { %12706 = vst [vmem:[#allocation143_spill] sm:$0xff] %v9241_v18 }
 0x247   :  { %1939 = vrot.lane.b32.xlu2 %v593_v61, %s8166_s27 }
 0x248   :  { %2449 = vrot.lane.b32.xlu0 %v530_v17, %s8169_s30 }
 0x249   :  { %v9245_v63 = vpop.permute.xlu2 %1515  ;;  %2451 = vrot.lane.b32.xlu1 %v531_v24, %s8169_s30 }
 0x24a   :  { %12707 = vst [vmem:[#allocation144_spill] sm:$0xff] %v9245_v63  ;;  %v9248_v41 = vpop.permute.xlu0 %1493  ;;  %v788_v63 = vld [vmem:[#allocation2 + $0x52] sm:$0xff] }
 0x24b   :  { %12708 = vst [vmem:[#allocation145_spill] sm:$0xff] %v9248_v41  ;;  %v9250_v15 = vpop.permute.xlu1 %1501 }
 0x24c   :  { %12709 = vst [vmem:[#allocation146_spill] sm:$0xff] %v9250_v15 }
 0x24f   :  { %2707 = vrot.lane.b32.xlu2 %v786_v23, %s8168_s28 }
 0x250   :  { %2195 = vrot.lane.b32.xlu0 %v658_v37, %s8167_s14  ;;  %v660_v37 = vld [vmem:[#allocation2 + $0x50] sm:$0xff] }
 0x251   :  { %v9254_v18 = vpop.permute.xlu2 %1521  ;;  %2197 = vrot.lane.b32.xlu1 %v659_v43, %s8167_s14 }
 0x252   :  { %12710 = vst [vmem:[#allocation147_spill] sm:$0xff] %v9254_v18  ;;  %v9257_v61 = vpop.permute.xlu0 %1499  ;;  %v787_v18 = vld [vmem:[#allocation2 + $0x4a] sm:$0xff] }
 0x253   :  { %12711 = vst [vmem:[#allocation148_spill] sm:$0xff] %v9257_v61  ;;  %v9259_v17 = vpop.permute.xlu1 %1507 }
 0x254   :  { %12712 = vst [vmem:[#allocation149_spill] sm:$0xff] %v9259_v17  ;;  %v662_v17 = vld [vmem:[#allocation2 + $0x68] sm:$0xff] }
 0x257   :  { %2453 = vrot.lane.b32.xlu2 %v532_v45, %s8169_s30 }
 0x258   :  { %1941 = vrot.lane.b32.xlu0 %v785_v42, %s8166_s27 }
 0x259   :  { %v9263_v24 = vpop.permute.xlu2 %1527  ;;  %1943 = vrot.lane.b32.xlu1 %v786_v23, %s8166_s27 }
 0x25a   :  { %12713 = vst [vmem:[#allocation150_spill] sm:$0xff] %v9263_v24  ;;  %v9266_v41 = vpop.permute.xlu0 %1505 }
 0x25b   :  { %12714 = vst [vmem:[#allocation151_spill] sm:$0xff] %v9266_v41  ;;  %v9268_v5 = vpop.permute.xlu1 %1513  ;;  %v667_v41 = vld [vmem:[#allocation2 + $0xa8] sm:$0xff] }
 0x25c   :  { %12715 = vst [vmem:[#allocation152_spill] sm:$0xff] %v9268_v5  ;;  %v789_v5 = vld [vmem:[#allocation2 + $0x62] sm:$0xff] }
 0x25f   :  { %2199 = vrot.lane.b32.xlu2 %v660_v37, %s8167_s14 }
 0x260   :  { %2709 = vrot.lane.b32.xlu0 %v787_v18, %s8168_s28 }
 0x261   :  { %v9272_v43 = vpop.permute.xlu2 %1533  ;;  %2711 = vrot.lane.b32.xlu1 %v788_v63, %s8168_s28 }
 0x262   :  { %12716 = vst [vmem:[#allocation153_spill] sm:$0xff] %v9272_v43  ;;  %v9275_v45 = vpop.permute.xlu0 %1511  ;;  %v661_v43 = vld [vmem:[#allocation2 + $0x60] sm:$0xff] }
 0x263   :  { %12717 = vst [vmem:[#allocation154_spill] sm:$0xff] %v9275_v45  ;;  %v9277_v42 = vpop.permute.xlu1 %1519  ;;  %v793_v45 = vld [vmem:[#allocation2 + $0x92] sm:$0xff] }
 0x264   :  { %12718 = vst [vmem:[#allocation155_spill] sm:$0xff] %v9277_v42 }
 0x267   :  { %1945 = vrot.lane.b32.xlu2 %v787_v18, %s8166_s27 }
 0x268   :  { %2455 = vrot.lane.b32.xlu0 %v533_v25, %s8169_s30 }
 0x269   :  { %v9281_v23 = vpop.permute.xlu2 %1539  ;;  %2457 = vrot.lane.b32.xlu1 %v534_v35, %s8169_s30 }
 0x26a   :  { %12719 = vst [vmem:[#allocation156_spill] sm:$0xff] %v9281_v23  ;;  %v9284_v24 = vpop.permute.xlu0 %1517  ;;  %v790_v23 = vld [vmem:[#allocation2 + $0x6a] sm:$0xff] }
 0x26b   :  { %12720 = vst [vmem:[#allocation157_spill] sm:$0xff] %v9284_v24  ;;  %v9286_v37 = vpop.permute.xlu1 %1525  ;;  %v12733_v24 = vmov 0.0  }
 0x26c   :  { %12721 = vst [vmem:[#allocation158_spill] sm:$0xff] %v9286_v37 }
 0x26d   :  { %4091 = vst.msk [vmem:[#allocation4] sm:$0xff] %vm3351_vm4, %v12733_v24 }
 0x26e   :  { %4094 = vst.msk [vmem:[#allocation4 + $0xa0] sm:$0xff] %vm3351_vm4, %v12733_v24 }
 0x26f   :  { %2713 = vrot.lane.b32.xlu2 %v789_v5, %s8168_s28  ;;  %4097 = vst.msk [vmem:[#allocation4 + $0x90] sm:$0xff] %vm3351_vm4, %v12733_v24 }
 0x270   :  { %2201 = vrot.lane.b32.xlu0 %v661_v43, %s8167_s14  ;;  %4099 = vst.msk [vmem:[#allocation4 + $0x130] sm:$0xff] %vm3351_vm4, %v12733_v24 }
 0x271   :  { %v9290_v42 = vpop.permute.xlu2 %1545  ;;  %2203 = vrot.lane.b32.xlu1 %v662_v17, %s8167_s14  ;;  %v791_v17 = vld [vmem:[#allocation2 + $0x7a] sm:$0xff]  ;;  %6360 = vst.msk [vmem:[#allocation6] sm:$0xff] %vm3351_vm4, %v12733_v24 }
 0x272   :  { %12722 = vst [vmem:[#allocation159_spill] sm:$0xff] %v9290_v42  ;;  %v9293_v18 = vpop.permute.xlu0 %1523  ;;  %v663_v42 = vld [vmem:[#allocation2 + $0x78] sm:$0xff] }
 0x273   :  { %12723 = vst [vmem:[#allocation160_spill] sm:$0xff] %v9293_v18  ;;  %v9295_v25 = vpop.permute.xlu1 %1531  ;;  %v664_v18 = vld [vmem:[#allocation2 + $0x80] sm:$0xff] }
 0x274   :  { %12724 = vst [vmem:[#allocation161_spill] sm:$0xff] %v9295_v25 }
 0x275   :  { %6362 = vst.msk [vmem:[#allocation6 + $0x60] sm:$0xff] %vm3351_vm4, %v12733_v24 }
 0x276   :  { %6365 = vst.msk [vmem:[#allocation6 + $0x50] sm:$0xff] %vm3351_vm4, %v12733_v24 }
 0x277   :  { %2459 = vrot.lane.b32.xlu2 %v9206_v52, %s8169_s30  ;;  %6367 = vst.msk [vmem:[#allocation6 + $0xb0] sm:$0xff] %vm3351_vm4, %v12733_v24  ;;  %v2897_v24 = vsel %vm55_vm0, %v272_v60, %v8627_v20 }
 0x278   :  { %1947 = vrot.lane.b32.xlu0 %v788_v63, %s8166_s27  ;;  %v2962_v16 = vsel %vm2961_vm6, %v2897_v24, %v8903_v57  ;;  %v668_v24 = vld [vmem:[#allocation2 + $0xb0] sm:$0xff] }
 0x279   :  { %v9300_v35 = vpop.permute.xlu2 %1551  ;;  %1949 = vrot.lane.b32.xlu1 %v789_v5, %s8166_s27  ;;  %v3027_v4 = vsel %vm3026_vm5, %v2962_v16, %v9092_v33 }
 0x27a   :  { %12725 = vst [vmem:[#allocation162_spill] sm:$0xff] %v9300_v35  ;;  %v9303_v37 = vpop.permute.xlu0 %1529 }
 0x27b   :  { %12726 = vst [vmem:[#allocation163_spill] sm:$0xff] %v9303_v37  ;;  %v9305_v43 = vpop.permute.xlu1 %1537  ;;  %v792_v37 = vld [vmem:[#allocation2 + $0x82] sm:$0xff] }
 0x27c   :  { %12727 = vst [vmem:[#allocation164_spill] sm:$0xff] %v9305_v43  ;;  %v665_v43 = vld [vmem:[#allocation2 + $0x90] sm:$0xff] }
 0x27f   :  { %2205 = vrot.lane.b32.xlu2 %v663_v42, %s8167_s14 }
 0x280   :  { %2715 = vrot.lane.b32.xlu0 %v790_v23, %s8168_s28 }
 0x281   :  { %v9309_v25 = vpop.permute.xlu2 %1685  ;;  %2717 = vrot.lane.b32.xlu1 %v791_v17, %s8168_s28 }
 0x282   :  { %v9312_v63 = vpop.permute.xlu0 %1535 }
 0x283   :  { %12728 = vst [vmem:[#allocation165_spill] sm:$0xff] %v9312_v63  ;;  %v9314_v52 = vpop.permute.xlu1 %1543 }
 0x284   :  { %12729 = vst [vmem:[#allocation166_spill] sm:$0xff] %v9314_v52 }
 0x287   :  { %1951 = vrot.lane.b32.xlu2 %v790_v23, %s8166_s27 }
 0x288   :  { %2461 = vrot.lane.b32.xlu0 %v9218_v2, %s8169_s30 }
 0x289   :  { %v9319_v5 = vpop.permute.xlu2 %1691  ;;  %2463 = vrot.lane.b32.xlu1 %v9230_v53, %s8169_s30  ;;  %v3420_v53 = vld [vmem:[%s12550_s1 + $0x20] sm:$0xf] }
 0x28a   :  { %v9323_v42 = vpop.permute.xlu0 %1541  ;;  %7457 = vmatpush.msk.msra.mxu0 %vm3614_vm3, %v3420_v53  ;;  %7715 = vmatpush.msk.msra.mxu1 %vm3614_vm3, %v3420_v53 }
 0x28b   :  { %12730 = vst [vmem:[#allocation167_spill] sm:$0xff] %v9323_v42  ;;  %v9325_v35 = vpop.permute.xlu1 %1549  ;;  %v729_v42 = vld [vmem:[#allocation2 + $0x91] sm:$0xff]  ;;  %7716 = vmatpush.msk.msra.mxu3 %vm3614_vm3, %v3420_v53  ;;  %vm5238_vm3 = vcmask 1045509  }
 0x28c   :  { %12731 = vst [vmem:[#allocation168_spill] sm:$0xff] %v9325_v35  ;;  %v3419_v35 = vld [vmem:[%s12550_s1 + $0x18] sm:$0xff] }
 0x28d   :  { %3630 = vmatpush.msra.mxu0 %v3419_v35  ;;  %7717 = vmatpush.msra.mxu1 %v3419_v35 }
 0x28e   :  { %7718 = vmatpush.msra.mxu3 %v3419_v35  ;;  %v3416_v35 = vld [vmem:[%s12550_s1] sm:$0xff] }
 0x28f   :  { %2719 = vrot.lane.b32.xlu2 %v792_v37, %s8168_s28 }
 0x290   :  { %2207 = vrot.lane.b32.xlu0 %v664_v18, %s8167_s14  ;;  %v3418_v18 = vld [vmem:[%s12550_s1 + $0x10] sm:$0xff] }
 0x291   :  { %v9329_v23 = vpop.permute.xlu2 %1697  ;;  %2209 = vrot.lane.b32.xlu1 %v665_v43, %s8167_s14  ;;  %3631 = vmatpush.msra.mxu0 %v3418_v18  ;;  %v3417_v43 = vld [vmem:[%s12550_s1 + $0x8] sm:$0xff]  ;;  %s7446_s1 = sshll.u32 %s12565_s16, 4  ;;  %s7447_s1 = int_to_ptr.hbm [resolvable:$true] %s7446_s1 }
 0x292   :  { %v9332_v2 = vpop.permute.xlu0 %1547  ;;  %7719 = vmatpush.msra.mxu1 %v3418_v18  ;;  %7720 = vmatpush.msra.mxu3 %v3418_v18 }
 0x293   :  { %12732 = vst [vmem:[#allocation169_spill] sm:$0xff] %v9332_v2  ;;  %v9334_v52 = vpop.permute.xlu1 %1683  ;;  %3632 = vmatpush.msra.mxu0 %v3417_v43 }
 0x294   :  { %7721 = vmatpush.msra.mxu1 %v3417_v43  ;;  %7722 = vmatpush.msra.mxu3 %v3417_v43 }
 0x295   :  { %3633 = vmatpush.msra.mxu0 %v3416_v35 }
 0x296   :  { %7723 = vmatpush.msra.mxu1 %v3416_v35  ;;  %7724 = vmatpush.msra.mxu3 %v3416_v35 }
 0x297   :  { %2465 = vrot.lane.b32.xlu2 %v729_v42, %s8169_s30 }
 0x298   :  { %1953 = vrot.lane.b32.xlu0 %v791_v17, %s8166_s27  ;;  %v666_v17 = vld [vmem:[#allocation2 + $0x98] sm:$0xff] }
 0x299   :  { %v9350_v2 = vpop.permute.xlu2 %2193  ;;  %1955 = vrot.lane.b32.xlu1 %v792_v37, %s8166_s27  ;;  %v794_v37 = vld [vmem:[#allocation2 + $0x9a] sm:$0xff] }
 0x29a   :  { %v1682_v63 = vpop.permute.xlu0 %1681 }
 0x29b   :  { %v9353_v53 = vpop.permute.xlu1 %1689  ;;  %v3092_v19 = vsel %vm3091_vm7, %v3027_v4, %v1682_v63  ;;  %v273_v4 = vld [vmem:[#allocation2 + $0x8] sm:$0xff] }
 0x29c   :  { %v2898_v63 = vsel %vm55_vm0, %v273_v4, %v8672_v36 }
 0x29f   :  { %2211 = vrot.lane.b32.xlu2 %v666_v17, %s8167_s14  ;;  %v730_v17 = vld [vmem:[#allocation2 + $0x99] sm:$0xff] }
 0x2a0   :  { %2721 = vrot.lane.b32.xlu0 %v793_v45, %s8168_s28 }
 0x2a1   :  { %v1940_v18 = vpop.permute.xlu2 %1939  ;;  %2723 = vrot.lane.b32.xlu1 %v794_v37, %s8168_s28 }
 0x2a2   :  { %v9373_v43 = vpop.permute.xlu0 %1687 }
 0x2a3   :  { %v9377_v35 = vpop.permute.xlu1 %1695 }
 0x2a7   :  { %1701 = vrot.lane.b32.xlu2 %v729_v42, %s8165_s25 }
 0x2a8   :  { %2467 = vrot.lane.b32.xlu0 %v730_v17, %s8169_s30 }
 0x2a9   :  { %v2708_v15 = vpop.permute.xlu2 %2707  ;;  %2213 = vrot.lane.b32.xlu1 %v667_v41, %s8167_s14 }
 0x2aa   :  { %v9384_v61 = vpop.permute.xlu0 %1693 }
 0x2ab   :  { %v1938_v0 = vpop.permute.xlu1 %1937 }
 0x2ac   :  { %v3157_v7 = vsel %vm3156_vm8, %v3092_v19, %v1938_v0  ;;  %v796_v0 = vld [vmem:[#allocation2 + $0xb2] sm:$0xff] }
 0x2ad   :  { %v3222_v57 = vsel %vm3221_vm9, %v3157_v7, %v9350_v2 }
 0x2af   :  { %2469 = vrot.lane.b32.xlu2 %v731_v62, %s8169_s30 }
 0x2b0   :  { %1957 = vrot.lane.b32.xlu0 %v793_v45, %s8166_s27  ;;  %v795_v45 = vld [vmem:[#allocation2 + $0xaa] sm:$0xff] }
 0x2b1   :  { %v9388_v13 = vpop.permute.xlu2 %2453  ;;  %1703 = vrot.lane.b32.xlu1 %v730_v17, %s8165_s25  ;;  %v732_v17 = vld [vmem:[#allocation2 + $0xb1] sm:$0xff] }
 0x2b2   :  { %v9391_v42 = vpop.permute.xlu0 %1699 }
 0x2b3   :  { %v2706_v41 = vpop.permute.xlu1 %2705 }
 0x2b7   :  { %1959 = vrot.lane.b32.xlu2 %v794_v37, %s8166_s27  ;;  %v2963_v37 = vsel %vm2961_vm6, %v2898_v63, %v8880_v51 }
 0x2b8   :  { %2725 = vrot.lane.b32.xlu0 %v795_v45, %s8168_s28  ;;  %v3028_v7 = vsel %vm3026_vm5, %v2963_v37, %v9131_v56  ;;  %v797_v56 = vld [vmem:[#allocation2 + $0xc2] sm:$0xff] }
 0x2b9   :  { %v9403_v20 = vpop.permute.xlu2 %2199  ;;  %2471 = vrot.lane.b32.xlu1 %v732_v17, %s8169_s30  ;;  %v3093_v2 = vsel %vm3091_vm7, %v3028_v7, %v9334_v52  ;;  %v2899_v52 = vsel %vm55_vm0, %v8968_v54, %v8588_v11  ;;  %v733_v7 = vld [vmem:[#allocation2 + $0xc1] sm:$0xff] }
 0x2ba   :  { %v2450_v60 = vpop.permute.xlu0 %2449  ;;  %v670_v11 = vld [vmem:[#allocation2 + $0xc8] sm:$0xff] }
 0x2bb   :  { %v3287_v16 = vsel %vm3286_vm10, %v3222_v57, %v2450_v60  ;;  %v2452_v33 = vpop.permute.xlu1 %2451  ;;  %v3158_v60 = vsel %vm3156_vm8, %v3093_v2, %v1940_v18  ;;  %v2964_v18 = vsel %vm2961_vm6, %v2899_v52, %v8919_v46  ;;  %v735_v52 = vld [vmem:[#allocation2 + $0xd9] sm:$0xff] }
 0x2bc   :  { %v3352_v19 = vsel %vm3351_vm4, %v3287_v16, %v2706_v41  ;;  %v669_v16 = vld [vmem:[#allocation2 + $0xc0] sm:$0xff] }
 0x2bd   :  { %7458 = vmatmul.msk.f32.vlgmr.msra.gmra.mxu0 %vm3421_vm11, %v3352_v19 }
 0x2bf   :  { %2727 = vrot.lane.b32.xlu2 %v796_v0, %s8168_s28 }
 0x2c0   :  { %2215 = vrot.lane.b32.xlu0 %v668_v24, %s8167_s14 }
 0x2c1   :  { %v1946_v41 = vpop.permute.xlu2 %1945  ;;  %1961 = vrot.lane.b32.xlu1 %v795_v45, %s8166_s27 }
 0x2c2   :  { %v2196_v57 = vpop.permute.xlu0 %2195 }
 0x2c3   :  { %v3223_v36 = vsel %vm3221_vm9, %v3158_v60, %v2196_v57  ;;  %v2198_v4 = vpop.permute.xlu1 %2197  ;;  %v734_v57 = vld [vmem:[#allocation2 + $0xc9] sm:$0xff] }
 0x2c4   :  { %v3288_v51 = vsel %vm3286_vm10, %v3223_v36, %v2452_v33 }
 0x2c5   :  { %v3353_v19 = vsel %vm3351_vm4, %v3288_v51, %v2708_v15  ;;  %v3029_v15 = vsel %vm3026_vm5, %v2964_v18, %v9124_v8  ;;  %v276_v51 = vld [vmem:[#allocation2 + $0x30] sm:$0xff] }
 0x2c6   :  { %7459 = vmatmul.msk.f32.gmra.mxu0 %vm3421_vm11, %v3353_v19  ;;  %v3094_v24 = vsel %vm3091_vm7, %v3029_v15, %v9309_v25  ;;  %v2900_v25 = vsel %vm55_vm0, %v8985_v50, %v8633_v22  ;;  %v798_v19 = vld [vmem:[#allocation2 + $0xca] sm:$0xff] }
 0x2c7   :  { %2217 = vrot.lane.b32.xlu2 %v669_v16, %s8167_s14 }
 0x2c8   :  { %1705 = vrot.lane.b32.xlu0 %v731_v62, %s8165_s25 }
 0x2c9   :  { %v2714_v45 = vpop.permute.xlu2 %2713  ;;  %2729 = vrot.lane.b32.xlu1 %v797_v56, %s8168_s28 }
 0x2ca   :  { %v1942_v33 = vpop.permute.xlu0 %1941 }
 0x2cb   :  { %v1944_v63 = vpop.permute.xlu1 %1943  ;;  %v3159_v37 = vsel %vm3156_vm8, %v3094_v24, %v1942_v33 }
 0x2cc   :  { %v3224_v62 = vsel %vm3221_vm9, %v3159_v37, %v2198_v4 }
 0x2cd   :  { %v3289_v8 = vsel %vm3286_vm10, %v3224_v62, %v9388_v13 }
 0x2cf   :  { %1707 = vrot.lane.b32.xlu2 %v732_v17, %s8165_s25  ;;  %v2965_v17 = vsel %vm2961_vm6, %v2900_v25, %v8912_v3 }
 0x2d0   :  { %2473 = vrot.lane.b32.xlu0 %v733_v7, %s8169_s30  ;;  %v3030_v36 = vsel %vm3026_vm5, %v2965_v17, %v9101_v6 }
 0x2d1   :  { %v9443_v54 = vpop.permute.xlu2 %2459  ;;  %2219 = vrot.lane.b32.xlu1 %v670_v11, %s8167_s14  ;;  %v3095_v4 = vsel %vm3091_vm7, %v3030_v36, %v9373_v43 }
 0x2d2   :  { %v2710_v46 = vpop.permute.xlu0 %2709  ;;  %v3160_v13 = vsel %vm3156_vm8, %v3095_v4, %v1944_v63 }
 0x2d3   :  { %v3354_v2 = vsel %vm3351_vm4, %v3289_v8, %v2710_v46  ;;  %v2712_v60 = vpop.permute.xlu1 %2711  ;;  %v3225_v50 = vsel %vm3221_vm9, %v3160_v13, %v9403_v20  ;;  %v736_v13 = vld [vmem:[#allocation2 + $0xe1] sm:$0xff] }
 0x2d4   :  { %7460 = vmatmul.msk.f32.gmra.mxu0 %vm3421_vm11, %v3354_v2  ;;  %v672_v2 = vld [vmem:[#allocation2 + $0xe0] sm:$0xff] }
 0x2d7   :  { %2475 = vrot.lane.b32.xlu2 %v734_v57, %s8169_s30 }
 0x2d8   :  { %1963 = vrot.lane.b32.xlu0 %v796_v0, %s8166_s27  ;;  %v2901_v0 = vsel %vm55_vm0, %v276_v51, %v8550_v9 }
 0x2d9   :  { %v9462_v22 = vpop.permute.xlu2 %2205  ;;  %1709 = vrot.lane.b32.xlu1 %v733_v7, %s8165_s25  ;;  %v2966_v18 = vsel %vm2961_vm6, %v2901_v0, %v8889_v1 }
 0x2da   :  { %v2456_v3 = vpop.permute.xlu0 %2455  ;;  %v3031_v20 = vsel %vm3026_vm5, %v2966_v18, %v9148_v29  ;;  %v671_v29 = vld [vmem:[#allocation2 + $0xd8] sm:$0xff] }
 0x2db   :  { %v3290_v6 = vsel %vm3286_vm10, %v3225_v50, %v2456_v3  ;;  %v2458_v16 = vpop.permute.xlu1 %2457  ;;  %v3096_v15 = vsel %vm3091_vm7, %v3031_v20, %v9353_v53  ;;  %v2902_v53 = vsel %vm55_vm0, %v8983_v27, %v8574_v10  ;;  %v800_v10 = vld [vmem:[#allocation2 + $0xe2] sm:$0xff] }
 0x2dc   :  { %v3355_v43 = vsel %vm3351_vm4, %v3290_v6, %v2712_v60  ;;  %v3161_v24 = vsel %vm3156_vm8, %v3096_v15, %v1946_v41  ;;  %v2967_v41 = vsel %vm2961_vm6, %v2902_v53, %v8928_v21  ;;  %v737_v6 = vld [vmem:[#allocation2 + $0xf1] sm:$0xff] }
 0x2dd   :  { %7461 = vmatmul.msk.f32.gmra.mxu0 %vm3421_vm11, %v3355_v43 }
 0x2df   :  { %1965 = vrot.lane.b32.xlu2 %v797_v56, %s8166_s27  ;;  %v799_v56 = vld [vmem:[#allocation2 + $0xda] sm:$0xff] }
 0x2e0   :  { %2731 = vrot.lane.b32.xlu0 %v798_v19, %s8168_s28 }
 0x2e1   :  { %v1952_v33 = vpop.permute.xlu2 %1951  ;;  %2477 = vrot.lane.b32.xlu1 %v735_v52, %s8169_s30 }
 0x2e2   :  { %v2202_v9 = vpop.permute.xlu0 %2201 }
 0x2e3   :  { %v3226_v63 = vsel %vm3221_vm9, %v3161_v24, %v2202_v9  ;;  %v2204_v37 = vpop.permute.xlu1 %2203  ;;  %v738_v9 = vld [vmem:[#allocation2 + $0xf9] sm:$0xff] }
 0x2e4   :  { %v3291_v1 = vsel %vm3286_vm10, %v3226_v63, %v2458_v16  ;;  %v8070_v16 = vld [vmem:[#allocation2 + $0x50] sm:$0xff] }
 0x2e5   :  { %v3356_v7 = vsel %vm3351_vm4, %v3291_v1, %v2714_v45  ;;  %v3032_v45 = vsel %vm3026_vm5, %v2967_v41, %v9133_v40  ;;  %v2904_v43 = vsel %vm55_vm0, %v8070_v16, %v8678_v39  ;;  %v802_v41 = vld [vmem:[#allocation2 + $0xfa] sm:$0xff] }
 0x2e6   :  { %7462 = vmatmul.msk.f32.gmra.mxu0 %vm3421_vm11, %v3356_v7  ;;  %v3097_v46 = vsel %vm3091_vm7, %v3032_v45, %v9319_v5  ;;  %v2903_v5 = vsel %vm55_vm0, %v8998_v38, %v8700_v48  ;;  %v8074_v16 = vld [vmem:[#allocation2 + $0x80] sm:$0xff] }
 0x2e7   :  { %2733 = vrot.lane.b32.xlu2 %v799_v56, %s8168_s28  ;;  %v2968_v4 = vsel %vm2961_vm6, %v2903_v5, %v8921_v44 }
 0x2e8   :  { %2221 = vrot.lane.b32.xlu0 %v671_v29, %s8167_s14 }
 0x2e9   :  { %v2720_v11 = vpop.permute.xlu2 %2719  ;;  %1967 = vrot.lane.b32.xlu1 %v798_v19, %s8166_s27  ;;  %v2969_v19 = vsel %vm2961_vm6, %v2904_v43, %v8898_v47  ;;  %v2908_v43 = vsel %vm55_vm0, %v8074_v16, %v8648_v28  ;;  %v693_v16 = vld [vmem:[#allocation2 + $0x210] sm:$0xff] }
 0x2ea   :  { %v1948_v62 = vpop.permute.xlu0 %1947 }
 0x2eb   :  { %v1950_v8 = vpop.permute.xlu1 %1949  ;;  %v3162_v25 = vsel %vm3156_vm8, %v3097_v46, %v1948_v62  ;;  %v8072_v62 = vld [vmem:[#allocation2 + $0x68] sm:$0xff] }
 0x2ec   :  { %v3227_v27 = vsel %vm3221_vm9, %v3162_v25, %v2204_v37 }
 0x2ed   :  { %v3292_v60 = vsel %vm3286_vm10, %v3227_v27, %v9443_v54  ;;  %v673_v54 = vld [vmem:[#allocation2 + $0xf0] sm:$0xff] }
 0x2ef   :  { %2223 = vrot.lane.b32.xlu2 %v672_v2, %s8167_s14  ;;  %v675_v2 = vld [vmem:[#allocation2 + $0x108] sm:$0xff] }
 0x2f0   :  { %1711 = vrot.lane.b32.xlu0 %v734_v57, %s8165_s25  ;;  %v3033_v57 = vsel %vm3026_vm5, %v2968_v4, %v9110_v58  ;;  %v8073_v4 = vld [vmem:[#allocation2 + $0x78] sm:$0xff] }
 0x2f1   :  { %v9502_v21 = vpop.permute.xlu2 %2465  ;;  %2735 = vrot.lane.b32.xlu1 %v800_v10, %s8168_s28  ;;  %v3098_v50 = vsel %vm3091_vm7, %v3033_v57, %v9384_v61  ;;  %v2907_v57 = vsel %vm55_vm0, %v8073_v4, %v8703_v49  ;;  %v740_v49 = vld [vmem:[#allocation2 + $0x111] sm:$0xff] }
 0x2f2   :  { %v2716_v40 = vpop.permute.xlu0 %2715  ;;  %v3163_v3 = vsel %vm3156_vm8, %v3098_v50, %v1950_v8  ;;  %v8076_v4 = vld [vmem:[#allocation2 + $0x98] sm:$0xff] }
 0x2f3   :  { %v3357_v17 = vsel %vm3351_vm4, %v3292_v60, %v2716_v40  ;;  %v2718_v36 = vpop.permute.xlu1 %2717  ;;  %v3228_v38 = vsel %vm3221_vm9, %v3163_v3, %v9462_v22  ;;  %v3034_v22 = vsel %vm3026_vm5, %v2969_v19, %v9157_v12  ;;  %v801_v12 = vld [vmem:[#allocation2 + $0xf2] sm:$0xff] }
 0x2f4   :  { %7463 = vmatmul.msk.f32.gmra.mxu0 %vm3421_vm11, %v3357_v17  ;;  %v3099_v0 = vsel %vm3091_vm7, %v3034_v22, %v9377_v35  ;;  %v8071_v35 = vld [vmem:[#allocation2 + $0x60] sm:$0xff]  ;;  %v12734_v19 = vld [vmem:[#allocation69_spill] sm:$0xff] }
 0x2f5   :  { %v3164_v18 = vsel %vm3156_vm8, %v3099_v0, %v1952_v33  ;;  %v2905_v63 = vsel %vm55_vm0, %v8071_v35, %v8604_v14  ;;  %v674_v14 = vld [vmem:[#allocation2 + $0xf8] sm:$0xff]  ;;  %v2973_v22 = vsel %vm2961_vm6, %v2908_v43, %v12734_v19  ;;  %v805_v35 = vld [vmem:[#allocation2 + $0x122] sm:$0xff] }
 0x2f6   :  { %v2970_v33 = vsel %vm2961_vm6, %v2905_v63, %v8937_v34  ;;  %v804_v0 = vld [vmem:[#allocation2 + $0x112] sm:$0xff] }
 0x2f7   :  { %1713 = vrot.lane.b32.xlu2 %v735_v52, %s8165_s25  ;;  %v3035_v1 = vsel %vm3026_vm5, %v2970_v33, %v9150_v26  ;;  %v677_v33 = vld [vmem:[#allocation2 + $0x120] sm:$0xff] }
 0x2f8   :  { %2479 = vrot.lane.b32.xlu0 %v736_v13, %s8169_s30  ;;  %v3100_v7 = vsel %vm3091_vm7, %v3035_v1, %v9329_v23  ;;  %v2906_v23 = vsel %vm55_vm0, %v8072_v62, %v8729_v59  ;;  %v8075_v1 = vld [vmem:[#allocation2 + $0x90] sm:$0xff] }
 0x2f9   :  { %v9521_v48 = vpop.permute.xlu2 %2211  ;;  %2225 = vrot.lane.b32.xlu1 %v673_v54, %s8167_s14  ;;  %v2971_v25 = vsel %vm2961_vm6, %v2906_v23, %v8930_v31 }
 0x2fa   :  { %v2462_v44 = vpop.permute.xlu0 %2461 }
 0x2fb   :  { %v3293_v58 = vsel %vm3286_vm10, %v3228_v38, %v2462_v44  ;;  %v2464_v51 = vpop.permute.xlu1 %2463 }
 0x2fc   :  { %v3358_v61 = vsel %vm3351_vm4, %v3293_v58, %v2718_v36  ;;  %v676_v36 = vld [vmem:[#allocation2 + $0x110] sm:$0xff] }
 0x2fd   :  { %7464 = vmatmul.msk.f32.gmra.mxu0 %vm3421_vm11, %v3358_v61 }
 0x2ff   :  { %2481 = vrot.lane.b32.xlu2 %v737_v6, %s8169_s30 }
 0x300   :  { %1969 = vrot.lane.b32.xlu0 %v799_v56, %s8166_s27 }
 0x301   :  { %v9539_v52 = vpop.permute.xlu2 %1701  ;;  %1715 = vrot.lane.b32.xlu1 %v736_v13, %s8165_s25  ;;  %v2972_v13 = vsel %vm2961_vm6, %v2907_v57, %v8907_v30  ;;  %v12739_v57 = vld [vmem:[#allocation14_spill] sm:$0xff] }
 0x302   :  { %v2208_v39 = vpop.permute.xlu0 %2207  ;;  %v3037_v54 = vsel %vm3026_vm5, %v2972_v13, %v9166_v32  ;;  %v2910_v13 = vsel %vm55_vm0, %v8076_v4, %v12739_v57 }
 0x303   :  { %v3229_v20 = vsel %vm3221_vm9, %v3164_v18, %v2208_v39  ;;  %v2210_v47 = vpop.permute.xlu1 %2209  ;;  %v741_v39 = vld [vmem:[#allocation2 + $0x121] sm:$0xff] }
 0x304   :  { %v3294_v15 = vsel %vm3286_vm10, %v3229_v20, %v2464_v51 }
 0x305   :  { %v3359_v24 = vsel %vm3351_vm4, %v3294_v15, %v2720_v11 }
 0x306   :  { %7465 = vmatmul.msk.f32.gmra.mxu0 %vm3421_vm11, %v3359_v24 }
 0x307   :  { %1971 = vrot.lane.b32.xlu2 %v800_v10, %s8166_s27  ;;  %v3036_v10 = vsel %vm3026_vm5, %v2971_v25, %v9119_v55 }
 0x308   :  { %2737 = vrot.lane.b32.xlu0 %v801_v12, %s8168_s28  ;;  %v3101_v27 = vsel %vm3091_vm7, %v3036_v10, %v9391_v42  ;;  %v739_v42 = vld [vmem:[#allocation2 + $0x109] sm:$0xff] }
 0x309   :  { %v2470_v37 = vpop.permute.xlu2 %2469  ;;  %2483 = vrot.lane.b32.xlu1 %v738_v9, %s8169_s30 }
 0x30a   :  { %v1954_v56 = vpop.permute.xlu0 %1953 }
 0x30b   :  { %v1956_v29 = vpop.permute.xlu1 %1955  ;;  %v3165_v53 = vsel %vm3156_vm8, %v3100_v7, %v1954_v56  ;;  %v12736_v56 = vld [vmem:[#allocation16_spill] sm:$0xff] }
 0x30c   :  { %v3230_v11 = vsel %vm3221_vm9, %v3165_v53, %v2210_v47  ;;  %v3166_v40 = vsel %vm3156_vm8, %v3101_v27, %v1956_v29  ;;  %v2909_v7 = vsel %vm55_vm0, %v8075_v1, %v12736_v56  ;;  %v9638_v53 = vld [vmem:[%s12552_s3] ss:$0 sm:$0xff] }
 0x30d   :  { %v3295_v26 = vsel %vm3286_vm10, %v3230_v11, %v9502_v21  ;;  %v803_v21 = vld [vmem:[#allocation2 + $0x10a] sm:$0xff]  ;;  %v3231_v31 = vsel %vm3221_vm9, %v3166_v40, %v9521_v48  ;;  %v3102_v48 = vsel %vm3091_vm7, %v3037_v54, %v9539_v52  ;;  %v9703_v56 = vld [vmem:[#allocation2 + $0x13a] sm:$0xff] }
 0x30e   :  { %v12735_v52 = vld [vmem:[#allocation120_spill] sm:$0xff] }
 0x30f   :  { %2739 = vrot.lane.b32.xlu2 %v802_v41, %s8168_s28  ;;  %v3038_v18 = vsel %vm3026_vm5, %v2973_v22, %v12735_v52  ;;  %v12740_v54 = vld [vmem:[#allocation64_spill] sm:$0xff] }
 0x310   :  { %2227 = vrot.lane.b32.xlu0 %v674_v14, %s8167_s14 }
 0x311   :  { %v1960_v34 = vpop.permute.xlu2 %1959  ;;  %1973 = vrot.lane.b32.xlu1 %v801_v12, %s8166_s27 }
 0x312   :  { %v2722_v45 = vpop.permute.xlu0 %2721 }
 0x313   :  { %v3360_v46 = vsel %vm3351_vm4, %v3295_v26, %v2722_v45  ;;  %v2724_v8 = vpop.permute.xlu1 %2723  ;;  %v12738_v45 = vld [vmem:[#allocation117_spill] sm:$0xff] }
 0x314   :  { %7466 = vmatmul.msk.f32.gmra.mxu0 %vm3421_vm11, %v3360_v46 }
 0x317   :  { %2229 = vrot.lane.b32.xlu2 %v675_v2, %s8167_s14  ;;  %v9648_v2 = vld [vmem:[#allocation2 + $0x12a] sm:$0xff] }
 0x318   :  { %1717 = vrot.lane.b32.xlu0 %v737_v6, %s8165_s25 }
 0x319   :  { %v2728_v59 = vpop.permute.xlu2 %2727  ;;  %2741 = vrot.lane.b32.xlu1 %v803_v21, %s8168_s28 }
 0x31a   :  { %v2468_v60 = vpop.permute.xlu0 %2467 }
 0x31b   :  { %v3296_v5 = vsel %vm3286_vm10, %v3231_v31, %v2468_v60  ;;  %v2214_v55 = vpop.permute.xlu1 %2213 }
 0x31c   :  { %v3361_v17 = vsel %vm3351_vm4, %v3296_v5, %v2724_v8  ;;  %v678_v8 = vld [vmem:[#allocation2 + $0x128] sm:$0xff] }
 0x31d   :  { %7467 = vmatmul.msk.f32.gmra.mxu0 %vm3421_vm11, %v3361_v17 }
 0x31f   :  { %1719 = vrot.lane.b32.xlu2 %v738_v9, %s8165_s25 }
 0x320   :  { %2485 = vrot.lane.b32.xlu0 %v739_v42, %s8169_s30 }
 0x321   :  { %v9590_v50 = vpop.permute.xlu2 %2217  ;;  %2231 = vrot.lane.b32.xlu1 %v676_v36, %s8167_s14 }
 0x322   :  { %v1958_v3 = vpop.permute.xlu0 %1957 }
 0x323   :  { %v1704_v38 = vpop.permute.xlu1 %1703  ;;  %v3167_v44 = vsel %vm3156_vm8, %v3102_v48, %v1958_v3  ;;  %v2975_v3 = vsel %vm2961_vm6, %v2910_v13, %v12740_v54 }
 0x324   :  { %v3232_v58 = vsel %vm3221_vm9, %v3167_v44, %v2214_v55  ;;  %v3103_v20 = vsel %vm3091_vm7, %v3038_v18, %v1704_v38  ;;  %v12741_v38 = vld [vmem:[#allocation124_spill] sm:$0xff] }
 0x325   :  { %v3297_v32 = vsel %vm3286_vm10, %v3232_v58, %v2470_v37  ;;  %v3168_v28 = vsel %vm3156_vm8, %v3103_v20, %v1960_v34  ;;  %v9628_v37 = vld [vmem:[%s12551_s2] ss:$0 sm:$0xff]  ;;  %v3040_v44 = vsel %vm3026_vm5, %v2975_v3, %v12741_v38  ;;  %v8077_v20 = vld [vmem:[#allocation2 + $0xa8] sm:$0xff]  ;;  %v12748_v38 = vld [vmem:[#allocation118_spill] sm:$0xff] }
 0x327   :  { %2487 = vrot.lane.b32.xlu2 %v740_v49, %s8169_s30 }
 0x328   :  { %1975 = vrot.lane.b32.xlu0 %v802_v41, %s8166_s27  ;;  %v12737_v41 = vld [vmem:[#allocation67_spill] sm:$0xff] }
 0x329   :  { %v9601_v30 = vpop.permute.xlu2 %1707  ;;  %1721 = vrot.lane.b32.xlu1 %v739_v42, %s8165_s25  ;;  %v2974_v14 = vsel %vm2961_vm6, %v2909_v7, %v12737_v41  ;;  %v9664_v42 = vld [vmem:[#allocation2 + $0x129] sm:$0xff] }
 0x32a   :  { %v2726_v51 = vpop.permute.xlu0 %2725  ;;  %v3039_v26 = vsel %vm3026_vm5, %v2974_v14, %v12738_v45  ;;  %v3105_v58 = vsel %vm3091_vm7, %v3040_v44, %v9601_v30  ;;  %v12745_v14 = vmov 0.0  }
 0x32b   :  { %v3362_v61 = vsel %vm3351_vm4, %v3297_v32, %v2726_v51  ;;  %v2472_v6 = vpop.permute.xlu1 %2471  ;;  %4093 = vst.msk [vmem:[#allocation4 + $0x8] sm:$0x3] %vm12572_vm12, %v12745_v14 }
 0x32c   :  { %7468 = vmatmul.msk.f32.gmra.mxu0 %vm3421_vm11, %v3362_v61  ;;  %v628_v61 = vld [vmem:[#allocation2 + $0x1fa] sm:$0xff]  ;;  %4123 = vst.msk [vmem:[#allocation4 + $0x19] sm:$0x1] %vm4101_vm13, %v12745_v14 }
 0x32d   :  { %4095 = vst.msk [vmem:[#allocation4 + $0xa8] sm:$0x3] %vm12572_vm12, %v12745_v14 }
 0x32e   :  { %4098 = vst.msk [vmem:[#allocation4 + $0x98] sm:$0x3] %vm12572_vm12, %v12745_v14 }
 0x32f   :  { %1977 = vrot.lane.b32.xlu2 %v803_v21, %s8166_s27  ;;  %4100 = vst.msk [vmem:[#allocation4 + $0x138] sm:$0x3] %vm12572_vm12, %v12745_v14 }
 0x330   :  { %2743 = vrot.lane.b32.xlu0 %v804_v0, %s8168_s28  ;;  %4102 = vst.msk [vmem:[#allocation4] sm:$0x1] %vm4101_vm13, %v12745_v14 }
 0x331   :  { %v9616_v47 = vpop.permute.xlu2 %2475  ;;  %2489 = vrot.lane.b32.xlu1 %v741_v39, %s8169_s30  ;;  %4103 = vst.msk [vmem:[#allocation4 + $0x10] sm:$0x1] %vm4101_vm13, %v12745_v14 }
 0x332   :  { %v2216_v15 = vpop.permute.xlu0 %2215  ;;  %4104 = vst.msk [vmem:[#allocation4 + $0x20] sm:$0x1] %vm4101_vm13, %v12745_v14 }
 0x333   :  { %v3233_v24 = vsel %vm3221_vm9, %v3168_v28, %v2216_v15  ;;  %v1962_v12 = vpop.permute.xlu1 %1961  ;;  %v12742_v28 = vld [vmem:[#allocation12_spill] sm:$0xff]  ;;  %4105 = vst.msk [vmem:[#allocation4 + $0x30] sm:$0x1] %vm4101_vm13, %v12745_v14 }
 0x334   :  { %v3298_v9 = vsel %vm3286_vm10, %v3233_v24, %v2472_v6  ;;  %v564_v6 = vld [vmem:[#allocation2 + $0x1f9] sm:$0xff]  ;;  %v2911_v15 = vsel %vm55_vm0, %v8077_v20, %v12742_v28  ;;  %4106 = vst.msk [vmem:[#allocation4 + $0x40] sm:$0x1] %vm4101_vm13, %v12745_v14 }
 0x335   :  { %v3363_v63 = vsel %vm3351_vm4, %v3298_v9, %v2728_v59  ;;  %v12743_v9 = vld [vmem:[#allocation72_spill] sm:$0xff]  ;;  %4107 = vst.msk [vmem:[#allocation4 + $0x50] sm:$0x1] %vm4101_vm13, %v12745_v14 }
 0x336   :  { %7469 = vmatmul.msk.f32.gmra.mxu0 %vm3421_vm11, %v3363_v63  ;;  %v679_v63 = vld [vmem:[#allocation2 + $0x138] sm:$0xff]  ;;  %4108 = vst.msk [vmem:[#allocation4 + $0x60] sm:$0x1] %vm4101_vm13, %v12745_v14 }
 0x337   :  { %2745 = vrot.lane.b32.xlu2 %v805_v35, %s8168_s28  ;;  %4109 = vst.msk [vmem:[#allocation4 + $0x70] sm:$0x1] %vm4101_vm13, %v12745_v14 }
 0x338   :  { %2233 = vrot.lane.b32.xlu0 %v677_v33, %s8167_s14  ;;  %v12744_v33 = vld [vmem:[#allocation122_spill] sm:$0xff]  ;;  %4110 = vst.msk [vmem:[#allocation4 + $0x80] sm:$0x1] %vm4101_vm13, %v12745_v14 }
 0x339   :  { %v9633_v29 = vpop.permute.xlu2 %1965  ;;  %1979 = vrot.lane.b32.xlu1 %v804_v0, %s8166_s27  ;;  %4111 = vst.msk [vmem:[#allocation4 + $0x90] sm:$0x1] %vm4101_vm13, %v12745_v14 }
 0x33a   :  { %v1706_v11 = vpop.permute.xlu0 %1705  ;;  %v3635_v34 = vpop.f32.mrf.mxu0  ;;  %4112 = vst.msk [vmem:[#allocation4 + $0xa0] sm:$0x1] %vm4101_vm13, %v12745_v14 }
 0x33b   :  { %v3831_v62 = vmul.f32 %v9628_v37, %v3635_v34  ;;  %v2730_v23 = vpop.permute.xlu1 %2729  ;;  %v3104_v46 = vsel %vm3091_vm7, %v3039_v26, %v1706_v11  ;;  %4113 = vst.msk [vmem:[#allocation4 + $0xb0] sm:$0x1] %vm4101_vm13, %v12745_v14 }
 0x33c   :  { %v3169_v10 = vsel %vm3156_vm8, %v3104_v46, %v1962_v12  ;;  %v9697_v12 = vld [vmem:[#allocation2 + $0x139] sm:$0xff]  ;;  %4114 = vst.msk [vmem:[#allocation4 + $0xc0] sm:$0x1] %vm4101_vm13, %v12745_v14 }
 0x33d   :  { %v3899_v25 = vadd.f32 %v9638_v53, %v3831_v62  ;;  %v3234_v40 = vsel %vm3221_vm9, %v3169_v10, %v9590_v50  ;;  %v9732_v10 = vld [vmem:[#allocation2 + $0x211] sm:$0xff]  ;;  %4115 = vst.msk [vmem:[#allocation4 + $0xd0] sm:$0x1] %vm4101_vm13, %v12745_v14 }
 0x33e   :  { %4116 = vst.msk [vmem:[#allocation4 + $0xe0] sm:$0x1] %vm4101_vm13, %v12745_v14 }
 0x33f   :  { %v3963_v27 = vmax.f32 %v3899_v25, 0.0  ;;  %2235 = vrot.lane.b32.xlu2 %v678_v8, %s8167_s14  ;;  %v9725_v8 = vld [vmem:[#allocation2 + $0x212] sm:$0xff]  ;;  %4117 = vst.msk [vmem:[#allocation4 + $0xf0] sm:$0x1] %vm4101_vm13, %v12745_v14 }
 0x340   :  { %1723 = vrot.lane.b32.xlu0 %v740_v49, %s8165_s25  ;;  %4118 = vst.msk [vmem:[#allocation4 + $0x100] sm:$0x1] %vm4101_vm13, %v12745_v14 }
 0x341   :  { %4027 = vst.msk [vmem:[#allocation3] sm:$0xff] %vm3351_vm4, %v3963_v27  ;;  %v9654_v21 = vpop.permute.xlu2 %2733  ;;  %2747 = vrot.lane.b32.xlu1 %v9648_v2, %s8168_s28  ;;  %v565_v27 = vld [vmem:[#allocation2 + $0x201] sm:$0xff] }
 0x342   :  { %v2474_v59 = vpop.permute.xlu0 %2473  ;;  %4119 = vst.msk [vmem:[#allocation4 + $0x110] sm:$0x1] %vm4101_vm13, %v12745_v14 }
 0x343   :  { %v3299_v31 = vsel %vm3286_vm10, %v3234_v40, %v2474_v59  ;;  %v3638_v60 = vpop.f32.mrf.mxu0  ;;  %v2220_v5 = vpop.permute.xlu1 %2219  ;;  %4120 = vst.msk [vmem:[#allocation4 + $0x120] sm:$0x1] %vm4101_vm13, %v12745_v14 }
 0x344   :  { %v3832_v55 = vmul.f32 %v9628_v37, %v3638_v60  ;;  %v3364_v17 = vsel %vm3351_vm4, %v3299_v31, %v2730_v23  ;;  %v12746_v60 = vld [vmem:[#allocation19_spill] sm:$0xff]  ;;  %4121 = vst.msk [vmem:[#allocation4 + $0x130] sm:$0x1] %vm4101_vm13, %v12745_v14 }
 0x345   :  { %7470 = vmatmul.msk.f32.gmra.mxu0 %vm3421_vm11, %v3364_v17  ;;  %v12747_v17 = vld [vmem:[#allocation70_spill] sm:$0xff]  ;;  %4122 = vst.msk [vmem:[#allocation4 + $0x9] sm:$0x1] %vm4101_vm13, %v12745_v14 }
 0x346   :  { %v3900_v36 = vadd.f32 %v9638_v53, %v3832_v55  ;;  %4124 = vst.msk [vmem:[#allocation4 + $0x29] sm:$0x1] %vm4101_vm13, %v12745_v14 }
 0x347   :  { %1725 = vrot.lane.b32.xlu2 %v741_v39, %s8165_s25  ;;  %4125 = vst.msk [vmem:[#allocation4 + $0x39] sm:$0x1] %vm4101_vm13, %v12745_v14 }
 0x348   :  { %v3964_v50 = vmax.f32 %v3900_v36, 0.0  ;;  %2491 = vrot.lane.b32.xlu0 %v9664_v42, %s8169_s30  ;;  %v4142_v40 = vld [vmem:[#allocation3] sm:$0xff]  ;;  %4126 = vst.msk [vmem:[#allocation4 + $0x49] sm:$0x1] %vm4101_vm13, %v12745_v14 }
 0x349   :  { %v9674_v48 = vpop.permute.xlu2 %2223  ;;  %1981 = vrot.lane.b32.xlu1 %v805_v35, %s8166_s27  ;;  %v2976_v35 = vsel %vm2961_vm6, %v2911_v15, %v12743_v9  ;;  %4127 = vst.msk [vmem:[#allocation4 + $0x59] sm:$0x1] %vm4101_vm13, %v12745_v14 }
 0x34a   :  { %4028 = vst.msk [vmem:[#allocation3 + $0x8] sm:$0xff] %vm3351_vm4, %v3964_v50  ;;  %v1964_v49 = vpop.permute.xlu0 %1963 }
 0x34b   :  { %v1710_v51 = vpop.permute.xlu1 %1709  ;;  %v3170_v32 = vsel %vm3156_vm8, %v3105_v58, %v1964_v49  ;;  %4128 = vst.msk [vmem:[#allocation4 + $0x69] sm:$0x1] %vm4101_vm13, %v12745_v14 }
 0x34c   :  { %v3235_v43 = vsel %vm3221_vm9, %v3170_v32, %v2220_v5  ;;  %4129 = vst.msk [vmem:[#allocation4 + $0x79] sm:$0x1] %vm4101_vm13, %v12745_v14 }
 0x34d   :  { %v3300_v52 = vsel %vm3286_vm10, %v3235_v43, %v9616_v47  ;;  %v3041_v47 = vsel %vm3026_vm5, %v2976_v35, %v12744_v33  ;;  %4130 = vst.msk [vmem:[#allocation4 + $0x89] sm:$0x1] %vm4101_vm13, %v12745_v14 }
 0x34e   :  { %v3106_v7 = vsel %vm3091_vm7, %v3041_v47, %v1710_v51  ;;  %4133 = vst.msk [vmem:[#allocation4 + $0xb9] sm:$0x1] %vm4101_vm13, %v12745_v14 }
 0x34f   :  { %2009 = vrot.lane.b32.xlu2 %v628_v61, %s8166_s27  ;;  %v3171_v11 = vsel %vm3156_vm8, %v3106_v7, %v9633_v29  ;;  %4134 = vst.msk [vmem:[#allocation4 + $0xc9] sm:$0x1] %vm4101_vm13, %v12745_v14 }
 0x350   :  { %1753 = vrot.lane.b32.xlu0 %v564_v6, %s8165_s25  ;;  %4135 = vst.msk [vmem:[#allocation4 + $0xd9] sm:$0x1] %vm4101_vm13, %v12745_v14 }
 0x351   :  { %v3641_v19 = vpop.f32.mrf.mxu0  ;;  %v9686_v22 = vpop.permute.xlu2 %1713  ;;  %2265 = vrot.lane.b32.xlu1 %v693_v16, %s8167_s14  ;;  %4136 = vst.msk [vmem:[#allocation4 + $0xe9] sm:$0x1] %vm4101_vm13, %v12745_v14 }
 0x352   :  { %v3833_v0 = vmul.f32 %v9628_v37, %v3641_v19  ;;  %v2732_v30 = vpop.permute.xlu0 %2731  ;;  %4137 = vst.msk [vmem:[#allocation4 + $0xf9] sm:$0x1] %vm4101_vm13, %v12745_v14 }
 0x353   :  { %v3365_v18 = vsel %vm3351_vm4, %v3300_v52, %v2732_v30  ;;  %v2478_v39 = vpop.permute.xlu1 %2477  ;;  %v680_v30 = vld [vmem:[#allocation2 + $0x140] sm:$0xff]  ;;  %4138 = vst.msk [vmem:[#allocation4 + $0x109] sm:$0x1] %vm4101_vm13, %v12745_v14 }
 0x354   :  { %v3901_v24 = vadd.f32 %v9638_v53, %v3833_v0  ;;  %7471 = vmatmul.msk.f32.gmra.mxu0 %vm3421_vm11, %v3365_v18  ;;  %4139 = vst.msk [vmem:[#allocation4 + $0x119] sm:$0x1] %vm4101_vm13, %v12745_v14 }
 0x355   :  { %4140 = vst.msk [vmem:[#allocation4 + $0x129] sm:$0x1] %vm4101_vm13, %v12745_v14 }
 0x356   :  { %v3965_v1 = vmax.f32 %v3901_v24, 0.0  ;;  %6361 = vst.msk [vmem:[#allocation6 + $0x8] sm:$0x3] %vm12572_vm12, %v12745_v14 }
 0x357   :  { %2493 = vrot.lane.b32.xlu2 %v9697_v12, %s8169_s30  ;;  %6363 = vst.msk [vmem:[#allocation6 + $0x68] sm:$0x3] %vm12572_vm12, %v12745_v14 }
 0x358   :  { %4029 = vst.msk [vmem:[#allocation3 + $0x10] sm:$0xff] %vm3351_vm4, %v3965_v1  ;;  %2237 = vrot.lane.b32.xlu0 %v679_v63, %s8167_s14 }
 0x359   :  { %v9710_v41 = vpop.permute.xlu2 %2481  ;;  %2749 = vrot.lane.b32.xlu1 %v9703_v56, %s8168_s28  ;;  %6366 = vst.msk [vmem:[#allocation6 + $0x58] sm:$0x3] %vm12572_vm12, %v12745_v14 }
 0x35a   :  { %v2222_v34 = vpop.permute.xlu0 %2221  ;;  %v3644_v45 = vpop.f32.mrf.mxu0  ;;  %6368 = vst.msk [vmem:[#allocation6 + $0xb8] sm:$0x3] %vm12572_vm12, %v12745_v14  ;;  %vm12758_vm12 = vcmask 1042434  }
 0x35b   :  { %v3236_v26 = vsel %vm3221_vm9, %v3171_v11, %v2222_v34  ;;  %v3834_v62 = vmul.f32 %v9628_v37, %v3644_v45  ;;  %v1968_v23 = vpop.permute.xlu1 %1967  ;;  %6369 = vst.msk [vmem:[#allocation6] sm:$0x1] %vm4101_vm13, %v12745_v14 }
 0x35c   :  { %v3301_v46 = vsel %vm3286_vm10, %v3236_v26, %v2478_v39  ;;  %v4143_v39 = vld [vmem:[#allocation3 + $0x8] sm:$0xff]  ;;  %6370 = vst.msk [vmem:[#allocation6 + $0x10] sm:$0x1] %vm4101_vm13, %v12745_v14 }
 0x35d   :  { %v3902_v29 = vadd.f32 %v9638_v53, %v3834_v62  ;;  %v3366_v25 = vsel %vm3351_vm4, %v3301_v46, %v9654_v21  ;;  %v8078_v21 = vld [vmem:[#allocation2 + $0xb0] sm:$0xff]  ;;  %v694_v62 = vld [vmem:[#allocation2 + $0x218] sm:$0xff]  ;;  %v629_v46 = vld [vmem:[#allocation2 + $0x202] sm:$0xff]  ;;  %6371 = vst.msk [vmem:[#allocation6 + $0x20] sm:$0x1] %vm4101_vm13, %v12745_v14 }
 0x35e   :  { %7472 = vmatmul.msk.f32.gmra.mxu0 %vm3421_vm11, %v3366_v25  ;;  %v2912_v5 = vsel %vm55_vm0, %v8078_v21, %v12746_v60  ;;  %v8079_v21 = vld [vmem:[#allocation2 + $0xc0] sm:$0xff]  ;;  %v12749_v60 = vld [vmem:[#allocation17_spill] sm:$0xff]  ;;  %6372 = vst.msk [vmem:[#allocation6 + $0x30] sm:$0x1] %vm4101_vm13, %v12745_v14 }
 0x35f   :  { %v4144_v59 = vld [vmem:[#allocation3 + $0x10] sm:$0xff]  ;;  %v3966_v31 = vmax.f32 %v3902_v29, 0.0  ;;  %2777 = vrot.lane.b32.xlu2 %v9725_v8, %s8168_s28  ;;  %v2977_v36 = vsel %vm2961_vm6, %v2912_v5, %v12747_v17  ;;  %v2913_v5 = vsel %vm55_vm0, %v8079_v21, %v12749_v60  ;;  %6373 = vst.msk [vmem:[#allocation6 + $0x40] sm:$0x1] %vm4101_vm13, %v12745_v14 }
 0x360   :  { %v4206_v55 = vmax.f32 %v4142_v40, %v4144_v59  ;;  %2521 = vrot.lane.b32.xlu0 %v9732_v10, %s8169_s30  ;;  %v3042_v44 = vsel %vm3026_vm5, %v2977_v36, %v12748_v38  ;;  %v9798_v59 = vld [vmem:[#allocation2 + $0x219] sm:$0xff]  ;;  %v681_v60 = vld [vmem:[#allocation2 + $0x150] sm:$0xff]  ;;  %6374 = vst.msk [vmem:[#allocation6 + $0x50] sm:$0x1] %vm4101_vm13, %v12745_v14 }
 0x361   :  { %4030 = vst.msk [vmem:[#allocation3 + $0x18] sm:$0xff] %vm3351_vm4, %v3966_v31  ;;  %v9752_v4 = vpop.permute.xlu2 %1971  ;;  %1755 = vrot.lane.b32.xlu1 %v565_v27, %s8165_s25 }
 0x362   :  { %v4270_v57 = vrot.slane %v4206_v55, 2  ;;  %v4271_v13 = vrot.slane %v4206_v55, 4  ;;  %v4272_v50 = vrot.slane %v4206_v55, 6  ;;  %v7522_v54 = vrot.slane %v4206_v55, 9  ;;  %v1712_v3 = vpop.permute.xlu0 %1711  ;;  %6375 = vst.msk [vmem:[#allocation6 + $0x60] sm:$0x1] %vm4101_vm13, %v12745_v14 }
 0x363   :  { %v3647_v49 = vpop.f32.mrf.mxu0  ;;  %v2736_v58 = vpop.permute.xlu1 %2735  ;;  %v3107_v6 = vsel %vm3091_vm7, %v3042_v44, %v1712_v3  ;;  %6376 = vst.msk [vmem:[#allocation6 + $0x70] sm:$0x1] %vm4101_vm13, %v12745_v14 }
 0x364   :  { %v7523_v51 = vrot.slane %v4270_v57, 9  ;;  %v7524_v32 = vrot.slane %v4271_v13, 9  ;;  %v4846_v61 = vmax.f32 %v4206_v55, %v7522_v54  ;;  %v3835_v16 = vmul.f32 %v9628_v37, %v3647_v49  ;;  %6377 = vst.msk [vmem:[#allocation6 + $0x80] sm:$0x1] %vm4101_vm13, %v12745_v14 }
 0x365   :  { %v7525_v43 = vrot.slane %v4272_v50, 9  ;;  %v3172_v52 = vsel %vm3156_vm8, %v3107_v6, %v1968_v23  ;;  %6378 = vst.msk [vmem:[#allocation6 + $0x90] sm:$0x1] %vm4101_vm13, %v12745_v14 }
 0x366   :  { %v4847_v19 = vmax.f32 %v4270_v57, %v7523_v51  ;;  %v4848_v0 = vmax.f32 %v4271_v13, %v7524_v32  ;;  %v3903_v18 = vadd.f32 %v9638_v53, %v3835_v16  ;;  %v5102_v20 = vperm.slane %v4846_v61, 0  ;;  %v12750_v57 = vld [vmem:[#allocation65_spill] sm:$0xff]  ;;  %v12751_v51 = vld [vmem:[#allocation127_spill] sm:$0xff]  ;;  %6379 = vst.msk [vmem:[#allocation6 + $0xa0] sm:$0x1] %vm4101_vm13, %v12745_v14 }
 0x367   :  { %1983 = vrot.lane.b32.xlu2 %v9648_v2, %s8166_s27  ;;  %v4849_v2 = vmax.f32 %v4272_v50, %v7525_v43  ;;  %v3237_v33 = vsel %vm3221_vm9, %v3172_v52, %v9674_v48  ;;  %v2978_v13 = vsel %vm2961_vm6, %v2913_v5, %v12750_v57  ;;  %v9910_v5 = vld [vmem:[#allocation2 + $0x151] sm:$0xff]  ;;  %6380 = vst.msk [vmem:[#allocation6 + $0xb0] sm:$0x1] %vm4101_vm13, %v12745_v14 }
 0x368   :  { %v5103_v28 = vperm.slane %v4847_v19, 0  ;;  %v4145_v15 = vld [vmem:[#allocation3 + $0x18] sm:$0xff]  ;;  %1727 = vrot.lane.b32.xlu0 %v9664_v42, %s8165_s25  ;;  %v5104_v24 = vperm.slane %v4848_v0, 0  ;;  %v3967_v35 = vmax.f32 %v3903_v18, 0.0  ;;  %v3043_v32 = vsel %vm3026_vm5, %v2978_v13, %v12751_v51  ;;  %v9830_v18 = vld [vmem:[#allocation2 + $0x142] sm:$0xff] }
 0x369   :  { %v4207_v9 = vmax.f32 %v4143_v39, %v4145_v15  ;;  %v9779_v63 = vpop.permute.xlu2 %2739  ;;  %2239 = vrot.lane.b32.xlu1 %v680_v30, %s8167_s14  ;;  %v5105_v40 = vperm.slane %v4849_v2, 0  ;;  %v3108_v16 = vsel %vm3091_vm7, %v3043_v32, %v9686_v22  ;;  %4131 = vst.msk [vmem:[#allocation4 + $0x99] sm:$0x1] %vm4101_vm13, %v12745_v14 }
 0x36a   :  { %v2480_v47 = vpop.permute.xlu0 %2479  ;;  %v5231_v42 = vsel %vm5230_vm14, %v5103_v28, %v5102_v20  ;;  %4031 = vst.msk [vmem:[#allocation3 + $0x20] sm:$0xff] %vm3351_vm4, %v3967_v35  ;;  %v9835_v20 = vld [vmem:[#allocation2 + $0x141] sm:$0xff] }
 0x36b   :  { %v4273_v1 = vrot.slane %v4207_v9, 2  ;;  %v7526_v7 = vrot.slane %v4207_v9, 9  ;;  %v3302_v11 = vsel %vm3286_vm10, %v3237_v33, %v2480_v47  ;;  %v2226_v34 = vpop.permute.xlu1 %2225  ;;  %v4274_v45 = vrot.slane %v4207_v9, 4  ;;  %4132 = vst.msk [vmem:[#allocation4 + $0xa9] sm:$0x1] %vm4101_vm13, %v12745_v14 }
 0x36c   :  { %v3367_v26 = vsel %vm3351_vm4, %v3302_v11, %v2736_v58  ;;  %v4275_v23 = vrot.slane %v4207_v9, 6  ;;  %v5233_v27 = vsel %vm12570_vm15, %v5104_v24, %v5231_v42  ;;  %vm5240_vm15 = vcmask 1046534   ;;  %4141 = vst.msk [vmem:[#allocation4 + $0x139] sm:$0x1] %vm4101_vm13, %v12745_v14 }
 0x36d   :  { %v4850_v48 = vmax.f32 %v4207_v9, %v7526_v7  ;;  %7473 = vmatmul.msk.f32.gmra.mxu0 %vm3421_vm11, %v3367_v26  ;;  %v7527_v29 = vrot.slane %v4273_v1, 9  ;;  %v7528_v25 = vrot.slane %v4274_v45, 9  ;;  %v5235_v54 = vsel %vm12571_vm1, %v5105_v40, %v5233_v27  ;;  %v12754_v26 = vld [vmem:[#allocation125_spill] sm:$0xff] }
 0x36e   :  { %v7529_v31 = vrot.slane %v4275_v23, 9  ;;  %vm5242_vm1 = vcmask 1047559   ;;  %vm12770_vm13 = vcmask 1042434  }
 0x36f   :  { %v5106_v55 = vperm.slane %v4850_v48, 0  ;;  %2267 = vrot.lane.b32.xlu2 %v694_v62, %s8167_s14  ;;  %v4851_v17 = vmax.f32 %v4273_v1, %v7527_v29  ;;  %v4852_v36 = vmax.f32 %v4274_v45, %v7528_v25  ;;  %v12752_v1 = vld [vmem:[#allocation13_spill] sm:$0xff]  ;;  %v9871_v45 = vld [vmem:[#allocation2 + $0x21a] sm:$0xff] }
 0x370   :  { %2011 = vrot.lane.b32.xlu0 %v629_v46, %s8166_s27  ;;  %v4853_v50 = vmax.f32 %v4275_v23, %v7529_v31 }
 0x371   :  { %v3650_v3 = vpop.f32.mrf.mxu0  ;;  %v9813_v38 = vpop.permute.xlu2 %2229  ;;  %2523 = vrot.lane.b32.xlu1 %v9798_v59, %s8169_s30  ;;  %v5107_v44 = vperm.slane %v4851_v17, 0  ;;  %v5108_v49 = vperm.slane %v4852_v36, 0  ;;  %v5237_v58 = vsel %vm5236_vm2, %v5106_v55, %v5235_v54  ;;  %v8081_v55 = vld [vmem:[#allocation2 + $0xd8] sm:$0xff]  ;;  %v4146_v36 = vld [vmem:[#allocation3 + $0x20] sm:$0xff] }
 0x372   :  { %v3836_v61 = vmul.f32 %v9628_v37, %v3650_v3  ;;  %v1970_v6 = vpop.permute.xlu0 %1969  ;;  %v5109_v19 = vperm.slane %v4853_v50, 0  ;;  %v12755_v17 = vld [vmem:[#allocation22_spill] sm:$0xff]  ;;  %v12756_v50 = vld [vmem:[#allocation73_spill] sm:$0xff] }
 0x373   :  { %v1716_v43 = vpop.permute.xlu1 %1715  ;;  %v5239_v0 = vsel %vm5238_vm3, %v5107_v44, %v5237_v58  ;;  %v3173_v52 = vsel %vm3156_vm8, %v3108_v16, %v1970_v6 }
 0x374   :  { %v3904_v30 = vadd.f32 %v9638_v53, %v3836_v61  ;;  %v5241_v39 = vsel %vm5240_vm15, %v5108_v49, %v5239_v0  ;;  %v3238_v15 = vsel %vm3221_vm9, %v3173_v52, %v2226_v34  ;;  %v12757_v49 = vld [vmem:[#allocation119_spill] sm:$0xff] }
 0x375   :  { %v5243_v22 = vsel %vm5242_vm1, %v5109_v19, %v5241_v39  ;;  %v3303_v2 = vsel %vm3286_vm10, %v3238_v15, %v9710_v41  ;;  %v12753_v41 = vld [vmem:[#allocation75_spill] sm:$0xff]  ;;  %v9937_v19 = vld [vmem:[#allocation2 + $0x229] sm:$0xff] }
 0x376   :  { %v3968_v28 = vmax.f32 %v3904_v30, 0.0  ;;  %5366 = vst.msk [vmem:[#allocation4 + $0x11] sm:$0xff] %vm3351_vm4, %v5243_v22  ;;  %v695_v39 = vld [vmem:[#allocation2 + $0x228] sm:$0xff] }
 0x377   :  { %2751 = vrot.lane.b32.xlu2 %v9830_v18, %s8168_s28  ;;  %v9943_v22 = vld [vmem:[#allocation2 + $0x22a] sm:$0xff] }
 0x378   :  { %4032 = vst.msk [vmem:[#allocation3 + $0x28] sm:$0xff] %vm3351_vm4, %v3968_v28  ;;  %2495 = vrot.lane.b32.xlu0 %v9835_v20, %s8169_s30 }
 0x379   :  { %v9849_v24 = vpop.permute.xlu2 %1719  ;;  %1729 = vrot.lane.b32.xlu1 %v9697_v12, %s8165_s25  ;;  %v8080_v12 = vld [vmem:[#allocation2 + $0xc8] sm:$0xff] }
 0x37a   :  { %v2738_v9 = vpop.permute.xlu0 %2737  ;;  %v3653_v35 = vpop.f32.mrf.mxu0  ;;  %v2914_v7 = vsel %vm55_vm0, %v8080_v12, %v12752_v1 }
 0x37b   :  { %v3837_v33 = vmul.f32 %v9628_v37, %v3653_v35  ;;  %v3368_v47 = vsel %vm3351_vm4, %v3303_v2, %v2738_v9  ;;  %v2484_v42 = vpop.permute.xlu1 %2483  ;;  %v2979_v11 = vsel %vm2961_vm6, %v2914_v7, %v12753_v41 }
 0x37c   :  { %7474 = vmatmul.msk.f32.gmra.mxu0 %vm3421_vm11, %v3368_v47  ;;  %v3044_v62 = vsel %vm3026_vm5, %v2979_v11, %v12754_v26 }
 0x37d   :  { %v3905_v34 = vadd.f32 %v9638_v53, %v3837_v33  ;;  %v3109_v23 = vsel %vm3091_vm7, %v3044_v62, %v1716_v43 }
 0x37e   :  { %v3174_v29 = vsel %vm3156_vm8, %v3109_v23, %v9752_v4 }
 0x37f   :  { %v3969_v48 = vmax.f32 %v3905_v34, 0.0  ;;  %1757 = vrot.lane.b32.xlu2 %v9732_v10, %s8165_s25  ;;  %v4147_v2 = vld [vmem:[#allocation3 + $0x28] sm:$0xff] }
 0x380   :  { %2779 = vrot.lane.b32.xlu0 %v9871_v45, %s8168_s28 }
 0x381   :  { %4033 = vst.msk [vmem:[#allocation3 + $0x30] sm:$0xff] %vm3351_vm4, %v3969_v48  ;;  %v9889_v46 = vpop.permute.xlu2 %2487  ;;  %2013 = vrot.lane.b32.xlu1 %v9725_v8, %s8166_s27 }
 0x382   :  { %v2228_v10 = vpop.permute.xlu0 %2227 }
 0x383   :  { %v3239_v25 = vsel %vm3221_vm9, %v3174_v29, %v2228_v10  ;;  %v3656_v27 = vpop.f32.mrf.mxu0  ;;  %v1974_v40 = vpop.permute.xlu1 %1973 }
 0x384   :  { %v3838_v31 = vmul.f32 %v9628_v37, %v3656_v27  ;;  %v3304_v21 = vsel %vm3286_vm10, %v3239_v25, %v2484_v42 }
 0x385   :  { %v3369_v8 = vsel %vm3351_vm4, %v3304_v21, %v9779_v63  ;;  %v2915_v63 = vsel %vm55_vm0, %v8081_v55, %v12755_v17  ;;  %v8082_v17 = vld [vmem:[#allocation2 + $0xe0] sm:$0xff] }
 0x386   :  { %v3906_v4 = vadd.f32 %v9638_v53, %v3838_v31  ;;  %7475 = vmatmul.msk.f32.gmra.mxu0 %vm3421_vm11, %v3369_v8  ;;  %v2980_v54 = vsel %vm2961_vm6, %v2915_v63, %v12756_v50  ;;  %v12759_v63 = vld [vmem:[#allocation20_spill] sm:$0xff] }
 0x387   :  { %2241 = vrot.lane.b32.xlu2 %v681_v60, %s8167_s14  ;;  %v3045_v58 = vsel %vm3026_vm5, %v2980_v54, %v12757_v49  ;;  %v12760_v54 = vld [vmem:[#allocation66_spill] sm:$0xff] }
 0x388   :  { %v4148_v57 = vld [vmem:[#allocation3 + $0x30] sm:$0xff]  ;;  %v3970_v13 = vmax.f32 %v3906_v4, 0.0  ;;  %1985 = vrot.lane.b32.xlu0 %v9703_v56, %s8166_s27 }
 0x389   :  { %v4208_v3 = vmax.f32 %v4146_v36, %v4148_v57  ;;  %v9925_v44 = vpop.permute.xlu2 %1977  ;;  %2497 = vrot.lane.b32.xlu1 %v9910_v5, %s8169_s30  ;;  %v2916_v36 = vsel %vm55_vm0, %v8082_v17, %v12759_v63 }
 0x38a   :  { %4034 = vst.msk [vmem:[#allocation3 + $0x38] sm:$0xff] %vm3351_vm4, %v3970_v13  ;;  %v1718_v56 = vpop.permute.xlu0 %1717 }
 0x38b   :  { %v4276_v51 = vrot.slane %v4208_v3, 2  ;;  %v4277_v32 = vrot.slane %v4208_v3, 4  ;;  %v4278_v61 = vrot.slane %v4208_v3, 6  ;;  %v7530_v6 = vrot.slane %v4208_v3, 9  ;;  %v2742_v16 = vpop.permute.xlu1 %2741 }
 0x38c   :  { %v3110_v43 = vsel %vm3091_vm7, %v3045_v58, %v1718_v56 }
 0x38d   :  { %v7531_v0 = vrot.slane %v4276_v51, 9  ;;  %v7532_v30 = vrot.slane %v4277_v32, 9  ;;  %v4854_v52 = vmax.f32 %v4208_v3, %v7530_v6  ;;  %v7533_v28 = vrot.slane %v4278_v61, 9 }
 0x38e   :  { %v3175_v35 = vsel %vm3156_vm8, %v3110_v43, %v1974_v40  ;;  %v2981_v3 = vsel %vm2961_vm6, %v2916_v36, %v12760_v54 }
 0x38f   :  { %v4855_v15 = vmax.f32 %v4276_v51, %v7531_v0  ;;  %v4856_v9 = vmax.f32 %v4277_v32, %v7532_v30  ;;  %2525 = vrot.lane.b32.xlu2 %v9937_v19, %s8169_s30  ;;  %v5110_v33 = vperm.slane %v4854_v52, 0  ;;  %v3240_v34 = vsel %vm3221_vm9, %v3175_v35, %v9813_v38  ;;  %v9975_v38 = vld [vmem:[#allocation2 + $0x152] sm:$0xff] }
 0x390   :  { %2269 = vrot.lane.b32.xlu0 %v695_v39, %s8167_s14  ;;  %v4857_v62 = vmax.f32 %v4278_v61, %v7533_v28  ;;  %v12762_v61 = vld [vmem:[#allocation130_spill] sm:$0xff] }
 0x391   :  { %v5111_v47 = vperm.slane %v4855_v15, 0  ;;  %v4149_v42 = vld [vmem:[#allocation3 + $0x38] sm:$0xff]  ;;  %v3659_v12 = vpop.f32.mrf.mxu0  ;;  %v9955_v1 = vpop.permute.xlu2 %2745  ;;  %2781 = vrot.lane.b32.xlu1 %v9943_v22, %s8168_s28  ;;  %v5112_v7 = vperm.slane %v4856_v9, 0  ;;  %v3046_v6 = vsel %vm3026_vm5, %v2981_v3, %v12762_v61  ;;  %v12766_v3 = vld [vmem:[#allocation25_spill] sm:$0xff] }
 0x392   :  { %v4209_v41 = vmax.f32 %v4147_v2, %v4149_v42  ;;  %v3839_v11 = vmul.f32 %v9628_v37, %v3659_v12  ;;  %v2486_v26 = vpop.permute.xlu0 %2485  ;;  %v5113_v57 = vperm.slane %v4857_v62, 0  ;;  %v8083_v62 = vld [vmem:[#allocation2 + $0xf0] sm:$0xff] }
 0x393   :  { %v3305_v23 = vsel %vm3286_vm10, %v3240_v34, %v2486_v26  ;;  %v2232_v48 = vpop.permute.xlu1 %2231  ;;  %v5244_v29 = vsel %vm5230_vm14, %v5111_v47, %v5110_v33 }
 0x394   :  { %v4279_v10 = vrot.slane %v4209_v41, 2  ;;  %v7534_v25 = vrot.slane %v4209_v41, 9  ;;  %v3907_v27 = vadd.f32 %v9638_v53, %v3839_v11  ;;  %v3370_v40 = vsel %vm3351_vm4, %v3305_v23, %v2742_v16 }
 0x395   :  { %7476 = vmatmul.msk.f32.gmra.mxu0 %vm3421_vm11, %v3370_v40  ;;  %v4280_v31 = vrot.slane %v4209_v41, 4  ;;  %v4281_v21 = vrot.slane %v4209_v41, 6  ;;  %v5245_v55 = vsel %vm12758_vm12, %v5112_v7, %v5244_v29  ;;  %vm12761_vm12 = vcmask 1043459   ;;  %v10039_v40 = vld [vmem:[#allocation2 + $0x15a] sm:$0xff] }
 0x396   :  { %v4858_v60 = vmax.f32 %v4209_v41, %v7534_v25  ;;  %v3971_v8 = vmax.f32 %v3907_v27, 0.0  ;;  %v7535_v4 = vrot.slane %v4279_v10, 9  ;;  %v5246_v32 = vsel %vm12761_vm12, %v5113_v57, %v5245_v55  ;;  %v12765_v25 = vld [vmem:[#allocation128_spill] sm:$0xff]  ;;  %v10055_v57 = vld [vmem:[#allocation2 + $0x232] sm:$0xff] }
 0x397   :  { %1731 = vrot.lane.b32.xlu2 %v9835_v20, %s8165_s25  ;;  %v7536_v13 = vrot.slane %v4280_v31, 9  ;;  %v7537_v50 = vrot.slane %v4281_v21, 9 }
 0x398   :  { %v5114_v49 = vperm.slane %v4858_v60, 0  ;;  %4035 = vst.msk [vmem:[#allocation3 + $0x40] sm:$0xff] %vm3351_vm4, %v3971_v8  ;;  %2753 = vrot.lane.b32.xlu0 %v9975_v38, %s8168_s28  ;;  %v4859_v58 = vmax.f32 %v4279_v10, %v7535_v4  ;;  %v682_v10 = vld [vmem:[#allocation2 + $0x158] sm:$0xff] }
 0x399   :  { %v9993_v56 = vpop.permute.xlu2 %2235  ;;  %1987 = vrot.lane.b32.xlu1 %v9830_v18, %s8166_s27  ;;  %v4860_v20 = vmax.f32 %v4280_v31, %v7536_v13  ;;  %v4861_v51 = vmax.f32 %v4281_v21, %v7537_v50  ;;  %v3111_v18 = vsel %vm3091_vm7, %v3046_v6, %v9849_v24  ;;  %v696_v24 = vld [vmem:[#allocation2 + $0x230] sm:$0xff] }
 0x39a   :  { %v1976_v16 = vpop.permute.xlu0 %1975  ;;  %v3662_v43 = vpop.f32.mrf.mxu0  ;;  %v5115_v0 = vperm.slane %v4859_v58, 0  ;;  %v5247_v30 = vsel %vm5236_vm2, %v5114_v49, %v5246_v32  ;;  %v10059_v50 = vld [vmem:[#allocation2 + $0x231] sm:$0xff] }
 0x39b   :  { %v3840_v52 = vmul.f32 %v9628_v37, %v3662_v43  ;;  %v1722_v39 = vpop.permute.xlu1 %1721  ;;  %v5116_v28 = vperm.slane %v4860_v20, 0  ;;  %v3176_v15 = vsel %vm3156_vm8, %v3111_v18, %v1976_v16  ;;  %v5117_v9 = vperm.slane %v4861_v51, 0  ;;  %v12768_v32 = vld [vmem:[#allocation121_spill] sm:$0xff] }
 0x39c   :  { %v5248_v35 = vsel %vm5238_vm3, %v5115_v0, %v5247_v30  ;;  %v3241_v42 = vsel %vm3221_vm9, %v3176_v15, %v2232_v48  ;;  %v12764_v48 = vld [vmem:[#allocation78_spill] sm:$0xff]  ;;  %v683_v18 = vld [vmem:[#allocation2 + $0x168] sm:$0xff] }
 0x39d   :  { %v3908_v2 = vadd.f32 %v9638_v53, %v3840_v52  ;;  %v5249_v33 = vsel %vm5240_vm15, %v5116_v28, %v5248_v35  ;;  %v3306_v11 = vsel %vm3286_vm10, %v3241_v42, %v9889_v46 }
 0x39e   :  { %v5250_v47 = vsel %vm5242_vm1, %v5117_v9, %v5249_v33 }
 0x39f   :  { %v3972_v12 = vmax.f32 %v3908_v2, 0.0  ;;  %2015 = vrot.lane.b32.xlu2 %v9871_v45, %s8166_s27  ;;  %5367 = vst.msk [vmem:[#allocation4 + $0x21] sm:$0xff] %vm3351_vm4, %v5250_v47  ;;  %v12763_v45 = vld [vmem:[#allocation15_spill] sm:$0xff] }
 0x3a0   :  { %1759 = vrot.lane.b32.xlu0 %v9798_v59, %s8165_s25  ;;  %v2917_v23 = vsel %vm55_vm0, %v8083_v62, %v12763_v45  ;;  %v10033_v59 = vld [vmem:[#allocation2 + $0x159] sm:$0xff] }
 0x3a1   :  { %4036 = vst.msk [vmem:[#allocation3 + $0x48] sm:$0xff] %vm3351_vm4, %v3972_v12  ;;  %v10024_v7 = vpop.permute.xlu2 %1725  ;;  %2271 = vrot.lane.b32.xlu1 %v696_v24, %s8167_s14  ;;  %v2982_v29 = vsel %vm2961_vm6, %v2917_v23, %v12764_v48  ;;  %v4150_v52 = vld [vmem:[#allocation3 + $0x40] sm:$0xff] }
 0x3a2   :  { %v2744_v41 = vpop.permute.xlu0 %2743  ;;  %v3047_v27 = vsel %vm3026_vm5, %v2982_v29, %v12765_v25  ;;  %v10094_v23 = vld [vmem:[#allocation2 + $0x241] sm:$0xff] }
 0x3a3   :  { %v3371_v34 = vsel %vm3351_vm4, %v3306_v11, %v2744_v41  ;;  %v2490_v26 = vpop.permute.xlu1 %2489  ;;  %v3112_v46 = vsel %vm3091_vm7, %v3047_v27, %v1722_v39 }
 0x3a4   :  { %7477 = vmatmul.msk.f32.gmra.mxu0 %vm3421_vm11, %v3371_v34  ;;  %v3177_v8 = vsel %vm3156_vm8, %v3112_v46, %v9925_v44  ;;  %v8084_v44 = vld [vmem:[#allocation2 + $0xf8] sm:$0xff] }
 0x3a5   :  { %v2918_v49 = vsel %vm55_vm0, %v8084_v44, %v12766_v3  ;;  %v8085_v44 = vld [vmem:[#allocation2 + $0x108] sm:$0xff]  ;;  %v12769_v3 = vld [vmem:[#allocation23_spill] sm:$0xff] }
 0x3a7   :  { %2499 = vrot.lane.b32.xlu2 %v10033_v59, %s8169_s30 }
 0x3a8   :  { %2243 = vrot.lane.b32.xlu0 %v682_v10, %s8167_s14  ;;  %v4151_v29 = vld [vmem:[#allocation3 + $0x48] sm:$0xff] }
 0x3a9   :  { %v3665_v31 = vpop.f32.mrf.mxu0  ;;  %v10045_v21 = vpop.permute.xlu2 %2009  ;;  %2755 = vrot.lane.b32.xlu1 %v10039_v40, %s8168_s28 }
 0x3aa   :  { %v3841_v60 = vmul.f32 %v9628_v37, %v3665_v31  ;;  %v2234_v4 = vpop.permute.xlu0 %2233 }
 0x3ab   :  { %v3242_v55 = vsel %vm3221_vm9, %v3177_v8, %v2234_v4  ;;  %v1980_v17 = vpop.permute.xlu1 %1979 }
 0x3ac   :  { %v3909_v63 = vadd.f32 %v9638_v53, %v3841_v60  ;;  %v3307_v36 = vsel %vm3286_vm10, %v3242_v55, %v2490_v26 }
 0x3ad   :  { %v3372_v13 = vsel %vm3351_vm4, %v3307_v36, %v9955_v1  ;;  %v12767_v1 = vld [vmem:[#allocation76_spill] sm:$0xff] }
 0x3ae   :  { %v3973_v54 = vmax.f32 %v3909_v63, 0.0  ;;  %7478 = vmatmul.msk.f32.gmra.mxu0 %vm3421_vm11, %v3372_v13  ;;  %v2983_v20 = vsel %vm2961_vm6, %v2918_v49, %v12767_v1  ;;  %v10105_v13 = vld [vmem:[#allocation2 + $0x16a] sm:$0xff]  ;;  %v2919_v49 = vsel %vm55_vm0, %v8085_v44, %v12769_v3 }
 0x3af   :  { %2783 = vrot.lane.b32.xlu2 %v10055_v57, %s8168_s28  ;;  %v3048_v61 = vsel %vm3026_vm5, %v2983_v20, %v12768_v32  ;;  %v10110_v20 = vld [vmem:[#allocation2 + $0x169] sm:$0xff] }
 0x3b0   :  { %4037 = vst.msk [vmem:[#allocation3 + $0x50] sm:$0xff] %vm3351_vm4, %v3973_v54  ;;  %2527 = vrot.lane.b32.xlu0 %v10059_v50, %s8169_s30  ;;  %v684_v44 = vld [vmem:[#allocation2 + $0x170] sm:$0xff] }
 0x3b1   :  { %v10069_v58 = vpop.permute.xlu2 %2493  ;;  %1761 = vrot.lane.b32.xlu1 %v9937_v19, %s8165_s25 }
 0x3b2   :  { %v1724_v51 = vpop.permute.xlu0 %1723 }
 0x3b3   :  { %v3668_v6 = vpop.f32.mrf.mxu0  ;;  %v2748_v16 = vpop.permute.xlu1 %2747  ;;  %v3113_v43 = vsel %vm3091_vm7, %v3048_v61, %v1724_v51 }
 0x3b4   :  { %v3842_v0 = vmul.f32 %v9628_v37, %v3668_v6  ;;  %v3178_v19 = vsel %vm3156_vm8, %v3113_v43, %v1980_v17 }
 0x3b5   :  { %v3243_v24 = vsel %vm3221_vm9, %v3178_v19, %v9993_v56 }
 0x3b6   :  { %v3910_v30 = vadd.f32 %v9638_v53, %v3842_v0 }
 0x3b7   :  { %v4152_v39 = vld [vmem:[#allocation3 + $0x50] sm:$0xff]  ;;  %1989 = vrot.lane.b32.xlu2 %v9975_v38, %s8166_s27 }
 0x3b8   :  { %v4210_v28 = vmax.f32 %v4150_v52, %v4152_v39  ;;  %v3974_v15 = vmax.f32 %v3910_v30, 0.0  ;;  %1733 = vrot.lane.b32.xlu0 %v9910_v5, %s8165_s25  ;;  %v697_v5 = vld [vmem:[#allocation2 + $0x240] sm:$0xff]  ;;  %v12772_v52 = vld [vmem:[#allocation133_spill] sm:$0xff] }
 0x3b9   :  { %v10085_v9 = vpop.permute.xlu2 %2777  ;;  %2245 = vrot.lane.b32.xlu1 %v683_v18, %s8167_s14 }
 0x3ba   :  { %v4282_v35 = vrot.slane %v4210_v28, 2  ;;  %v4283_v2 = vrot.slane %v4210_v28, 4  ;;  %v7538_v33 = vrot.slane %v4210_v28, 9  ;;  %4038 = vst.msk [vmem:[#allocation3 + $0x58] sm:$0xff] %vm3351_vm4, %v3974_v15  ;;  %v2492_v47 = vpop.permute.xlu0 %2491  ;;  %v4284_v42 = vrot.slane %v4210_v28, 6 }
 0x3bb   :  { %v3308_v38 = vsel %vm3286_vm10, %v3243_v24, %v2492_v47  ;;  %v1982_v12 = vpop.permute.xlu1 %1981 }
 0x3bc   :  { %v7539_v41 = vrot.slane %v4282_v35, 9  ;;  %v7540_v11 = vrot.slane %v4283_v2, 9  ;;  %v4862_v34 = vmax.f32 %v4210_v28, %v7538_v33  ;;  %v3373_v26 = vsel %vm3351_vm4, %v3308_v38, %v2748_v16  ;;  %v12771_v16 = vld [vmem:[#allocation68_spill] sm:$0xff] }
 0x3bd   :  { %7479 = vmatmul.msk.f32.gmra.mxu0 %vm3421_vm11, %v3373_v26  ;;  %v7541_v48 = vrot.slane %v4284_v42, 9  ;;  %v2984_v43 = vsel %vm2961_vm6, %v2919_v49, %v12771_v16  ;;  %v10176_v49 = vld [vmem:[#allocation2 + $0x171] sm:$0xff] }
 0x3be   :  { %v4863_v62 = vmax.f32 %v4282_v35, %v7539_v41  ;;  %v4864_v45 = vmax.f32 %v4283_v2, %v7540_v11  ;;  %v5118_v10 = vperm.slane %v4862_v34, 0  ;;  %v8086_v11 = vld [vmem:[#allocation2 + $0x1e0] sm:$0xff] }
 0x3bf   :  { %2273 = vrot.lane.b32.xlu2 %v697_v5, %s8167_s14  ;;  %v4865_v4 = vmax.f32 %v4284_v42, %v7541_v48  ;;  %v12773_v5 = vld [vmem:[#allocation41_spill] sm:$0xff] }
 0x3c0   :  { %v5119_v56 = vperm.slane %v4863_v62, 0  ;;  %2017 = vrot.lane.b32.xlu0 %v9943_v22, %s8166_s27  ;;  %v5120_v46 = vperm.slane %v4864_v45, 0  ;;  %v12774_v62 = vld [vmem:[#allocation91_spill] sm:$0xff] }
 0x3c1   :  { %v4153_v25 = vld [vmem:[#allocation3 + $0x58] sm:$0xff]  ;;  %v10099_v27 = vpop.permute.xlu2 %1983  ;;  %2529 = vrot.lane.b32.xlu1 %v10094_v23, %s8169_s30  ;;  %v5121_v0 = vperm.slane %v4865_v4, 0 }
 0x3c2   :  { %v4211_v31 = vmax.f32 %v4151_v29, %v4153_v25  ;;  %v1754_v60 = vpop.permute.xlu0 %1753  ;;  %v3671_v8 = vpop.f32.mrf.mxu0  ;;  %v5251_v63 = vsel %vm5230_vm14, %v5119_v56, %v5118_v10  ;;  %v12775_v56 = vld [vmem:[#allocation135_spill] sm:$0xff] }
 0x3c3   :  { %v3843_v55 = vmul.f32 %v9628_v37, %v3671_v8  ;;  %v2266_v17 = vpop.permute.xlu1 %2265  ;;  %v5252_v6 = vsel %vm12770_vm13, %v5120_v46, %v5251_v63  ;;  %v10141_v10 = vld [vmem:[#allocation2 + $0x242] sm:$0xff] }
 0x3c4   :  { %v4285_v36 = vrot.slane %v4211_v31, 2  ;;  %v7542_v22 = vrot.slane %v4211_v31, 9  ;;  %v4286_v54 = vrot.slane %v4211_v31, 4  ;;  %v4287_v51 = vrot.slane %v4211_v31, 6 }
 0x3c5   :  { %v3911_v1 = vadd.f32 %v9638_v53, %v3843_v55  ;;  %v3049_v53 = vsel %vm3026_vm5, %v2984_v43, %v12772_v52  ;;  %v5253_v33 = vsel %vm12761_vm12, %v5121_v0, %v5252_v6  ;;  %v698_v6 = vld [vmem:[#allocation2 + $0x248] sm:$0xff]  ;;  %v12776_v52 = vld [vmem:[#allocation18_spill] sm:$0xff] }
 0x3c6   :  { %v4866_v32 = vmax.f32 %v4211_v31, %v7542_v22  ;;  %v7543_v61 = vrot.slane %v4285_v36, 9  ;;  %v7544_v37 = vrot.slane %v4286_v54, 9  ;;  %v7545_v18 = vrot.slane %v4287_v51, 9  ;;  %v10190_v43 = vld [vmem:[#allocation2 + $0x24a] sm:$0xff] }
 0x3c7   :  { %v3975_v30 = vmax.f32 %v3911_v1, 0.0  ;;  %2757 = vrot.lane.b32.xlu2 %v10105_v13, %s8168_s28  ;;  %v3114_v15 = vsel %vm3091_vm7, %v3049_v53, %v10024_v7  ;;  %v2933_v7 = vsel %vm55_vm0, %v8086_v11, %v12773_v5  ;;  %v8090_v11 = vld [vmem:[#allocation2 + $0x1e8] sm:$0xff]  ;;  %v12779_v5 = vld [vmem:[#allocation39_spill] sm:$0xff] }
 0x3c8   :  { %v5122_v39 = vperm.slane %v4866_v32, 0  ;;  %2501 = vrot.lane.b32.xlu0 %v10110_v20, %s8169_s30  ;;  %v4867_v19 = vmax.f32 %v4285_v36, %v7543_v61  ;;  %v4868_v28 = vmax.f32 %v4286_v54, %v7544_v37  ;;  %v4869_v2 = vmax.f32 %v4287_v51, %v7545_v18  ;;  %v10187_v37 = vld [vmem:[#allocation2 + $0x249] sm:$0xff] }
 0x3c9   :  { %4039 = vst.msk [vmem:[#allocation3 + $0x60] sm:$0xff] %vm3351_vm4, %v3975_v30  ;;  %v10124_v35 = vpop.permute.xlu2 %2267  ;;  %1735 = vrot.lane.b32.xlu1 %v10033_v59, %s8165_s25  ;;  %v3179_v24 = vsel %vm3156_vm8, %v3114_v15, %v1982_v12  ;;  %v2998_v59 = vsel %vm2961_vm6, %v2933_v7, %v12774_v62  ;;  %v8089_v18 = vld [vmem:[#allocation2 + $0x110] sm:$0xff]  ;;  %v12778_v15 = vld [vmem:[#allocation131_spill] sm:$0xff]  ;;  %v2934_v7 = vsel %vm55_vm0, %v8090_v11, %v12779_v5 }
 0x3ca   :  { %v2238_v47 = vpop.permute.xlu0 %2237  ;;  %v5123_v42 = vperm.slane %v4867_v19, 0  ;;  %v5124_v38 = vperm.slane %v4868_v28, 0  ;;  %v5254_v41 = vsel %vm5236_vm2, %v5122_v39, %v5253_v33  ;;  %v5125_v48 = vperm.slane %v4869_v2, 0  ;;  %v12777_v19 = vld [vmem:[#allocation81_spill] sm:$0xff] }
 0x3cb   :  { %v3244_v34 = vsel %vm3221_vm9, %v3179_v24, %v2238_v47  ;;  %v2750_v26 = vpop.permute.xlu1 %2749  ;;  %v3063_v29 = vsel %vm3026_vm5, %v2998_v59, %v12775_v56  ;;  %v2920_v53 = vsel %vm55_vm0, %v8089_v18, %v12776_v52  ;;  %v10206_v33 = vld [vmem:[#allocation2 + $0x172] sm:$0xff]  ;;  %v12780_v59 = vld [vmem:[#allocation83_spill] sm:$0xff]  ;;  %v12781_v56 = vld [vmem:[#allocation148_spill] sm:$0xff] }
 0x3cc   :  { %v3309_v45 = vsel %vm3286_vm10, %v3244_v34, %v10069_v58  ;;  %v5255_v12 = vsel %vm5238_vm3, %v5123_v42, %v5254_v41  ;;  %v3128_v31 = vsel %vm3091_vm7, %v3063_v29, %v1754_v60  ;;  %v2985_v28 = vsel %vm2961_vm6, %v2920_v53, %v12777_v19 }
 0x3cd   :  { %v3374_v25 = vsel %vm3351_vm4, %v3309_v45, %v2750_v26  ;;  %v5256_v46 = vsel %vm5240_vm15, %v5124_v38, %v5255_v12  ;;  %v3193_v58 = vsel %vm3156_vm8, %v3128_v31, %v10045_v21  ;;  %v10170_v21 = vld [vmem:[%s12552_s3] ss:$0 sm:$0xff]  ;;  %v3050_v2 = vsel %vm3026_vm5, %v2985_v28, %v12778_v15 }
 0x3ce   :  { %7480 = vmatmul.msk.f32.gmra.mxu0 %vm3421_vm11, %v3374_v25  ;;  %v5257_v8 = vsel %vm5242_vm1, %v5125_v48, %v5256_v46  ;;  %v3258_v60 = vsel %vm3221_vm9, %v3193_v58, %v2266_v17  ;;  %v2999_v45 = vsel %vm2961_vm6, %v2934_v7, %v12780_v59  ;;  %v10263_v7 = vld [vmem:[#allocation2 + $0x25a] sm:$0xff] }
 0x3cf   :  { %1763 = vrot.lane.b32.xlu2 %v10059_v50, %s8165_s25  ;;  %5368 = vst.msk [vmem:[#allocation4 + $0x31] sm:$0xff] %vm3351_vm4, %v5257_v8  ;;  %v10163_v50 = vld [vmem:[%s12551_s2] ss:$0 sm:$0xff] }
 0x3d0   :  { %2785 = vrot.lane.b32.xlu0 %v10141_v10, %s8168_s28  ;;  %v4154_v47 = vld [vmem:[#allocation3 + $0x60] sm:$0xff] }
 0x3d1   :  { %v3674_v4 = vpop.f32.mrf.mxu0  ;;  %v10155_v55 = vpop.permute.xlu2 %2751  ;;  %2019 = vrot.lane.b32.xlu1 %v10055_v57, %s8166_s27 }
 0x3d2   :  { %v3844_v63 = vmul.f32 %v10163_v50, %v3674_v4  ;;  %v2522_v36 = vpop.permute.xlu0 %2521 }
 0x3d3   :  { %v3323_v22 = vsel %vm3286_vm10, %v3258_v60, %v2522_v36  ;;  %v1756_v54 = vpop.permute.xlu1 %1755  ;;  %v699_v60 = vld [vmem:[#allocation2 + $0x258] sm:$0xff] }
 0x3d4   :  { %v3912_v57 = vadd.f32 %v10170_v21, %v3844_v63  ;;  %v3388_v17 = vsel %vm3351_vm4, %v3323_v22, %v10085_v9 }
 0x3d5   :  { %7494 = vmatmul.msk.f32.vlgmr.msra.gmra.mxu1 %vm3421_vm11, %v3388_v17 }
 0x3d6   :  { %v3976_v3 = vmax.f32 %v3912_v57, 0.0 }
 0x3d7   :  { %2247 = vrot.lane.b32.xlu2 %v684_v44, %s8167_s14 }
 0x3d8   :  { %4040 = vst.msk [vmem:[#allocation3 + $0x68] sm:$0xff] %vm3351_vm4, %v3976_v3  ;;  %1991 = vrot.lane.b32.xlu0 %v10039_v40, %s8166_s27 }
 0x3d9   :  { %v10182_v1 = vpop.permute.xlu2 %1757  ;;  %2503 = vrot.lane.b32.xlu1 %v10176_v49, %s8169_s30 }
 0x3da   :  { %v1728_v51 = vpop.permute.xlu0 %1727 }
 0x3db   :  { %v3677_v9 = vpop.f32.mrf.mxu0  ;;  %v2240_v32 = vpop.permute.xlu1 %2239  ;;  %v3115_v24 = vsel %vm3091_vm7, %v3050_v2, %v1728_v51 }
 0x3dc   :  { %v3845_v61 = vmul.f32 %v10163_v50, %v3677_v9  ;;  %v3180_v38 = vsel %vm3156_vm8, %v3115_v24, %v10099_v27 }
 0x3de   :  { %v3913_v16 = vadd.f32 %v10170_v21, %v3845_v61 }
 0x3df   :  { %2531 = vrot.lane.b32.xlu2 %v10187_v37, %s8169_s30 }
 0x3e0   :  { %v3977_v40 = vmax.f32 %v3913_v16, 0.0  ;;  %2275 = vrot.lane.b32.xlu0 %v698_v6, %s8167_s14  ;;  %v10251_v16 = vld [vmem:[#allocation2 + $0x182] sm:$0xff] }
 0x3e1   :  { %v10195_v0 = vpop.permute.xlu2 %2241  ;;  %2787 = vrot.lane.b32.xlu1 %v10190_v43, %s8168_s28 }
 0x3e2   :  { %4041 = vst.msk [vmem:[#allocation3 + $0x70] sm:$0xff] %vm3351_vm4, %v3977_v40  ;;  %v2012_v30 = vpop.permute.xlu0 %2011  ;;  %v4155_v40 = vld [vmem:[#allocation3 + $0x68] sm:$0xff] }
 0x3e3   :  { %v2524_v39 = vpop.permute.xlu1 %2523 }
 0x3e7   :  { %1737 = vrot.lane.b32.xlu2 %v10110_v20, %s8165_s25  ;;  %v3245_v20 = vsel %vm3221_vm9, %v3180_v38, %v2240_v32  ;;  %v685_v32 = vld [vmem:[#allocation2 + $0x180] sm:$0xff] }
 0x3e8   :  { %2759 = vrot.lane.b32.xlu0 %v10206_v33, %s8168_s28 }
 0x3e9   :  { %v4156_v42 = vld [vmem:[#allocation3 + $0x70] sm:$0xff]  ;;  %v10215_v41 = vpop.permute.xlu2 %2525  ;;  %1993 = vrot.lane.b32.xlu1 %v10105_v13, %s8166_s27  ;;  %v3064_v13 = vsel %vm3026_vm5, %v2999_v45, %v12781_v56 }
 0x3ea   :  { %v4212_v34 = vmax.f32 %v4154_v47, %v4156_v42  ;;  %v2496_v26 = vpop.permute.xlu0 %2495  ;;  %v3680_v62 = vpop.f32.mrf.mxu0  ;;  %v3129_v25 = vsel %vm3091_vm7, %v3064_v13, %v1756_v54 }
 0x3eb   :  { %v3310_v48 = vsel %vm3286_vm10, %v3245_v20, %v2496_v26  ;;  %v3846_v27 = vmul.f32 %v10163_v50, %v3680_v62  ;;  %v10226_v12 = vpop.permute.xlu1 %1729  ;;  %v3194_v4 = vsel %vm3156_vm8, %v3129_v25, %v2012_v30  ;;  %v10265_v62 = vld [vmem:[#allocation2 + $0x259] sm:$0xff] }
 0x3ec   :  { %v4288_v29 = vrot.slane %v4212_v34, 2  ;;  %v4289_v46 = vrot.slane %v4212_v34, 4  ;;  %v3375_v8 = vsel %vm3351_vm4, %v3310_v48, %v10155_v55  ;;  %v7546_v36 = vrot.slane %v4212_v34, 9  ;;  %v8091_v48 = vld [vmem:[#allocation2 + $0x1f8] sm:$0xff] }
 0x3ed   :  { %v3914_v31 = vadd.f32 %v10170_v21, %v3846_v27  ;;  %7481 = vmatmul.msk.f32.gmra.mxu0 %vm3421_vm11, %v3375_v8  ;;  %v3259_v54 = vsel %vm3221_vm9, %v3194_v4, %v10124_v35  ;;  %v4290_v57 = vrot.slane %v4212_v34, 6  ;;  %v12782_v27 = vld [vmem:[#allocation33_spill] sm:$0xff] }
 0x3ee   :  { %v7547_v58 = vrot.slane %v4288_v29, 9  ;;  %v7548_v22 = vrot.slane %v4289_v46, 9  ;;  %v3324_v44 = vsel %vm3286_vm10, %v3259_v54, %v2524_v39  ;;  %v4870_v9 = vmax.f32 %v4212_v34, %v7546_v36 }
 0x3ef   :  { %v3978_v63 = vmax.f32 %v3914_v31, 0.0  ;;  %2021 = vrot.lane.b32.xlu2 %v10141_v10, %s8166_s27  ;;  %v7549_v61 = vrot.slane %v4290_v57, 9  ;;  %v2935_v56 = vsel %vm55_vm0, %v8091_v48, %v12782_v27  ;;  %v10321_v48 = vld [vmem:[#allocation2 + $0x261] sm:$0xff] }
 0x3f0   :  { %1765 = vrot.lane.b32.xlu0 %v10094_v23, %s8165_s25  ;;  %v4871_v17 = vmax.f32 %v4288_v29, %v7547_v58  ;;  %v10249_v23 = vld [vmem:[#allocation2 + $0x181] sm:$0xff]  ;;  %v4872_v35 = vmax.f32 %v4289_v46, %v7548_v22  ;;  %v5126_v30 = vperm.slane %v4870_v9, 0 }
 0x3f1   :  { %4042 = vst.msk [vmem:[#allocation3 + $0x78] sm:$0xff] %vm3351_vm4, %v3978_v63  ;;  %v10243_v55 = vpop.permute.xlu2 %1731  ;;  %2277 = vrot.lane.b32.xlu1 %v699_v60, %s8167_s14  ;;  %v4873_v28 = vmax.f32 %v4290_v57, %v7549_v61  ;;  %v12783_v46 = vld [vmem:[#allocation96_spill] sm:$0xff]  ;;  %v12784_v60 = vld [vmem:[#allocation146_spill] sm:$0xff] }
 0x3f2   :  { %v2780_v3 = vpop.permute.xlu0 %2779  ;;  %v5127_v6 = vperm.slane %v4871_v17, 0  ;;  %v5128_v52 = vperm.slane %v4872_v35, 0  ;;  %v3000_v31 = vsel %vm2961_vm6, %v2935_v56, %v12783_v46  ;;  %v12785_v9 = vld [vmem:[#allocation28_spill] sm:$0xff] }
 0x3f3   :  { %v3389_v10 = vsel %vm3351_vm4, %v3324_v44, %v2780_v3  ;;  %v2014_v51 = vpop.permute.xlu1 %2013  ;;  %v5129_v13 = vperm.slane %v4873_v28, 0  ;;  %v3065_v63 = vsel %vm3026_vm5, %v3000_v31, %v12784_v60  ;;  %v8093_v46 = vld [vmem:[#allocation2 + $0x128] sm:$0xff]  ;;  %v12788_v31 = vld [vmem:[#allocation26_spill] sm:$0xff] }
 0x3f4   :  { %7495 = vmatmul.msk.f32.gmra.mxu1 %vm3421_vm11, %v3389_v10  ;;  %v5258_v24 = vsel %vm5230_vm14, %v5127_v6, %v5126_v30  ;;  %v3130_v54 = vsel %vm3091_vm7, %v3065_v63, %v10182_v1  ;;  %v8092_v10 = vld [vmem:[#allocation2 + $0x120] sm:$0xff] }
 0x3f5   :  { %v5259_v45 = vsel %vm12770_vm13, %v5128_v52, %v5258_v24  ;;  %v2921_v35 = vsel %vm55_vm0, %v8092_v10, %v12785_v9  ;;  %v12786_v6 = vld [vmem:[#allocation79_spill] sm:$0xff]  ;;  %v12790_v60 = vld [vmem:[#allocation136_spill] sm:$0xff] }
 0x3f6   :  { %v5260_v22 = vsel %vm12761_vm12, %v5129_v13, %v5259_v45  ;;  %v10331_v13 = vld [vmem:[#allocation2 + $0x18a] sm:$0xff]  ;;  %v8094_v10 = vld [vmem:[#allocation2 + $0x200] sm:$0xff] }
 0x3f7   :  { %2505 = vrot.lane.b32.xlu2 %v10249_v23, %s8169_s30  ;;  %v12791_v9 = vld [vmem:[#allocation44_spill] sm:$0xff] }
 0x3f8   :  { %v4157_v18 = vld [vmem:[#allocation3 + $0x78] sm:$0xff]  ;;  %2249 = vrot.lane.b32.xlu0 %v685_v32, %s8167_s14  ;;  %v3195_v32 = vsel %vm3156_vm8, %v3130_v54, %v2014_v51 }
 0x3f9   :  { %v4213_v53 = vmax.f32 %v4155_v40, %v4157_v18  ;;  %v3683_v39 = vpop.f32.mrf.mxu0  ;;  %v10256_v19 = vpop.permute.xlu2 %2015  ;;  %2761 = vrot.lane.b32.xlu1 %v10251_v16, %s8168_s28  ;;  %v2986_v40 = vsel %vm2961_vm6, %v2921_v35, %v12786_v6  ;;  %v2936_v35 = vsel %vm55_vm0, %v8094_v10, %v12791_v9  ;;  %v10361_v6 = vld [vmem:[#allocation2 + $0x262] sm:$0xff] }
 0x3fa   :  { %v3847_v15 = vmul.f32 %v10163_v50, %v3683_v39  ;;  %v1986_v2 = vpop.permute.xlu0 %1985 }
 0x3fb   :  { %v4291_v47 = vrot.slane %v4213_v53, 2  ;;  %v4292_v42 = vrot.slane %v4213_v53, 4  ;;  %v7550_v38 = vrot.slane %v4213_v53, 9  ;;  %v2498_v11 = vpop.permute.xlu1 %2497  ;;  %v4293_v34 = vrot.slane %v4213_v53, 6 }
 0x3fc   :  { %v3915_v5 = vadd.f32 %v10170_v21, %v3847_v15 }
 0x3fd   :  { %v7551_v20 = vrot.slane %v4291_v47, 9  ;;  %v4874_v26 = vmax.f32 %v4213_v53, %v7550_v38  ;;  %v7552_v59 = vrot.slane %v4292_v42, 9  ;;  %v7553_v25 = vrot.slane %v4293_v34, 9  ;;  %v12787_v53 = vld [vmem:[#allocation123_spill] sm:$0xff] }
 0x3fe   :  { %v3979_v29 = vmax.f32 %v3915_v5, 0.0  ;;  %v3051_v39 = vsel %vm3026_vm5, %v2986_v40, %v12787_v53  ;;  %v12793_v40 = vld [vmem:[#allocation138_spill] sm:$0xff] }
 0x3ff   :  { %v5130_v8 = vperm.slane %v4874_v26, 0  ;;  %2789 = vrot.lane.b32.xlu2 %v10263_v7, %s8168_s28  ;;  %v4875_v58 = vmax.f32 %v4291_v47, %v7551_v20  ;;  %v4876_v4 = vmax.f32 %v4292_v42, %v7552_v59  ;;  %v4877_v36 = vmax.f32 %v4293_v34, %v7553_v25  ;;  %v686_v34 = vld [vmem:[#allocation2 + $0x188] sm:$0xff] }
 0x400   :  { %4043 = vst.msk [vmem:[#allocation3 + $0x80] sm:$0xff] %vm3351_vm4, %v3979_v29  ;;  %2533 = vrot.lane.b32.xlu0 %v10265_v62, %s8169_s30  ;;  %v3116_v24 = vsel %vm3091_vm7, %v3051_v39, %v10226_v12  ;;  %v10334_v25 = vld [vmem:[#allocation2 + $0x189] sm:$0xff] }
 0x401   :  { %v10282_v57 = vpop.permute.xlu2 %2499  ;;  %1767 = vrot.lane.b32.xlu1 %v10187_v37, %s8165_s25  ;;  %v5131_v17 = vperm.slane %v4875_v58, 0  ;;  %v5132_v44 = vperm.slane %v4876_v4, 0  ;;  %v5261_v3 = vsel %vm5236_vm2, %v5130_v8, %v5260_v22  ;;  %v5133_v52 = vperm.slane %v4877_v36, 0  ;;  %v12789_v8 = vld [vmem:[#allocation71_spill] sm:$0xff] }
 0x402   :  { %v2270_v61 = vpop.permute.xlu0 %2269  ;;  %v3181_v38 = vsel %vm3156_vm8, %v3116_v24, %v1986_v2 }
 0x403   :  { %v3260_v1 = vsel %vm3221_vm9, %v3195_v32, %v2270_v61  ;;  %v3686_v30 = vpop.f32.mrf.mxu0  ;;  %v2782_v18 = vpop.permute.xlu1 %2781  ;;  %v5262_v37 = vsel %vm5238_vm3, %v5131_v17, %v5261_v3  ;;  %v3246_v12 = vsel %vm3221_vm9, %v3181_v38, %v10195_v0  ;;  %v12792_v32 = vld [vmem:[#allocation94_spill] sm:$0xff] }
 0x404   :  { %v3848_v28 = vmul.f32 %v10163_v50, %v3686_v30  ;;  %v3325_v15 = vsel %vm3286_vm10, %v3260_v1, %v10215_v41  ;;  %v5263_v51 = vsel %vm5240_vm15, %v5132_v44, %v5262_v37  ;;  %v3311_v2 = vsel %vm3286_vm10, %v3246_v12, %v2498_v11 }
 0x405   :  { %v3390_v47 = vsel %vm3351_vm4, %v3325_v15, %v2782_v18  ;;  %v5264_v42 = vsel %vm5242_vm1, %v5133_v52, %v5263_v51  ;;  %v3001_v61 = vsel %vm2961_vm6, %v2936_v35, %v12792_v32 }
 0x406   :  { %v3916_v5 = vadd.f32 %v10170_v21, %v3848_v28  ;;  %7496 = vmatmul.msk.f32.gmra.mxu1 %vm3421_vm11, %v3390_v47  ;;  %5369 = vst.msk [vmem:[#allocation4 + $0x41] sm:$0xff] %vm3351_vm4, %v5264_v42  ;;  %v3066_v1 = vsel %vm3026_vm5, %v3001_v61, %v12793_v40 }
 0x407   :  { %1995 = vrot.lane.b32.xlu2 %v10206_v33, %s8166_s27  ;;  %v700_v33 = vld [vmem:[#allocation2 + $0x260] sm:$0xff] }
 0x408   :  { %v3980_v41 = vmax.f32 %v3916_v5, 0.0  ;;  %1739 = vrot.lane.b32.xlu0 %v10176_v49, %s8165_s25  ;;  %v4158_v18 = vld [vmem:[#allocation3 + $0x80] sm:$0xff]  ;;  %v687_v5 = vld [vmem:[#allocation2 + $0x198] sm:$0xff] }
 0x409   :  { %v10314_v20 = vpop.permute.xlu2 %2783  ;;  %2251 = vrot.lane.b32.xlu1 %v686_v34, %s8167_s14 }
 0x40a   :  { %4044 = vst.msk [vmem:[#allocation3 + $0x88] sm:$0xff] %vm3351_vm4, %v3980_v41  ;;  %v2754_v26 = vpop.permute.xlu0 %2753 }
 0x40b   :  { %v3376_v59 = vsel %vm3351_vm4, %v3311_v2, %v2754_v26  ;;  %v1988_v45 = vpop.permute.xlu1 %1987 }
 0x40c   :  { %7482 = vmatmul.msk.f32.gmra.mxu0 %vm3421_vm11, %v3376_v59 }
 0x40f   :  { %2279 = vrot.lane.b32.xlu2 %v700_v33, %s8167_s14 }
 0x410   :  { %2023 = vrot.lane.b32.xlu0 %v10190_v43, %s8166_s27  ;;  %v2922_v43 = vsel %vm55_vm0, %v8093_v46, %v12788_v31 }
 0x411   :  { %v10326_v49 = vpop.permute.xlu2 %1989  ;;  %2535 = vrot.lane.b32.xlu1 %v10321_v48, %s8169_s30  ;;  %v2987_v58 = vsel %vm2961_vm6, %v2922_v43, %v12789_v8  ;;  %v701_v43 = vld [vmem:[#allocation2 + $0x270] sm:$0xff] }
 0x412   :  { %v1760_v0 = vpop.permute.xlu0 %1759  ;;  %v3689_v11 = vpop.f32.mrf.mxu0  ;;  %v3052_v63 = vsel %vm3026_vm5, %v2987_v58, %v12790_v60  ;;  %v10398_v8 = vld [vmem:[#allocation2 + $0x272] sm:$0xff]  ;;  %v4159_v58 = vld [vmem:[#allocation3 + $0x88] sm:$0xff] }
 0x413   :  { %v3849_v27 = vmul.f32 %v10163_v50, %v3689_v11  ;;  %v2272_v56 = vpop.permute.xlu1 %2271  ;;  %v3117_v36 = vsel %vm3091_vm7, %v3052_v63, %v10243_v55  ;;  %v3131_v30 = vsel %vm3091_vm7, %v3066_v1, %v1760_v0  ;;  %v12795_v1 = vld [vmem:[#allocation84_spill] sm:$0xff] }
 0x414   :  { %v3182_v54 = vsel %vm3156_vm8, %v3117_v36, %v1988_v45  ;;  %v3196_v39 = vsel %vm3156_vm8, %v3131_v30, %v10256_v19  ;;  %v751_v19 = vld [vmem:[#allocation2 + $0x199] sm:$0xff] }
 0x415   :  { %v3917_v29 = vadd.f32 %v10170_v21, %v3849_v27 }
 0x417   :  { %v3981_v4 = vmax.f32 %v3917_v29, 0.0  ;;  %2763 = vrot.lane.b32.xlu2 %v10331_v13, %s8168_s28  ;;  %v10395_v29 = vld [vmem:[#allocation2 + $0x271] sm:$0xff] }
 0x418   :  { %2507 = vrot.lane.b32.xlu0 %v10334_v25, %s8169_s30 }
 0x419   :  { %4045 = vst.msk [vmem:[#allocation3 + $0x90] sm:$0xff] %vm3351_vm4, %v3981_v4  ;;  %v10349_v22 = vpop.permute.xlu2 %2273  ;;  %1741 = vrot.lane.b32.xlu1 %v10249_v23, %s8165_s25 }
 0x41a   :  { %v2244_v17 = vpop.permute.xlu0 %2243 }
 0x41b   :  { %v3247_v44 = vsel %vm3221_vm9, %v3182_v54, %v2244_v17  ;;  %v2756_v3 = vpop.permute.xlu1 %2755  ;;  %v8095_v17 = vld [vmem:[#allocation2 + $0x138] sm:$0xff] }
 0x41c   :  { %v3312_v55 = vsel %vm3286_vm10, %v3247_v44, %v10282_v57  ;;  %v12794_v44 = vld [vmem:[#allocation21_spill] sm:$0xff] }
 0x41d   :  { %v3377_v23 = vsel %vm3351_vm4, %v3312_v55, %v2756_v3  ;;  %v2923_v3 = vsel %vm55_vm0, %v8095_v17, %v12794_v44 }
 0x41e   :  { %7483 = vmatmul.msk.f32.gmra.mxu0 %vm3421_vm11, %v3377_v23  ;;  %v2988_v30 = vsel %vm2961_vm6, %v2923_v3, %v12795_v1  ;;  %v582_v3 = vld [vmem:[#allocation2 + $0x2d1] sm:$0xff] }
 0x41f   :  { %1769 = vrot.lane.b32.xlu2 %v10265_v62, %s8165_s25  ;;  %v3261_v62 = vsel %vm3221_vm9, %v3196_v39, %v2272_v56 }
 0x420   :  { %v4160_v52 = vld [vmem:[#allocation3 + $0x90] sm:$0xff]  ;;  %2791 = vrot.lane.b32.xlu0 %v10361_v6, %s8168_s28 }
 0x421   :  { %v4214_v57 = vmax.f32 %v4158_v18, %v4160_v52  ;;  %v3692_v37 = vpop.f32.mrf.mxu0  ;;  %v10372_v53 = vpop.permute.xlu2 %2757  ;;  %2025 = vrot.lane.b32.xlu1 %v10263_v7, %s8166_s27 }
 0x422   :  { %v3850_v28 = vmul.f32 %v10163_v50, %v3692_v37  ;;  %v2528_v15 = vpop.permute.xlu0 %2527 }
 0x423   :  { %v4294_v51 = vrot.slane %v4214_v57, 2  ;;  %v10380_v24 = vpop.permute.xlu1 %1761  ;;  %v4295_v47 = vrot.slane %v4214_v57, 4  ;;  %v3326_v38 = vsel %vm3286_vm10, %v3261_v62, %v2528_v15  ;;  %v7554_v12 = vrot.slane %v4214_v57, 9  ;;  %v815_v62 = vld [vmem:[#allocation2 + $0x19a] sm:$0xff] }
 0x424   :  { %v3918_v42 = vadd.f32 %v10170_v21, %v3850_v28  ;;  %v3391_v7 = vsel %vm3351_vm4, %v3326_v38, %v10314_v20  ;;  %v4296_v26 = vrot.slane %v4214_v57, 6  ;;  %v12796_v28 = vld [vmem:[#allocation134_spill] sm:$0xff] }
 0x425   :  { %v7555_v34 = vrot.slane %v4294_v51, 9  ;;  %7497 = vmatmul.msk.f32.gmra.mxu1 %vm3421_vm11, %v3391_v7  ;;  %v7556_v2 = vrot.slane %v4295_v47, 9  ;;  %v4878_v20 = vmax.f32 %v4214_v57, %v7554_v12  ;;  %v3053_v15 = vsel %vm3026_vm5, %v2988_v30, %v12796_v28 }
 0x426   :  { %v3982_v41 = vmax.f32 %v3918_v42, 0.0  ;;  %v7557_v46 = vrot.slane %v4296_v26, 9 }
 0x427   :  { %2253 = vrot.lane.b32.xlu2 %v687_v5, %s8167_s14  ;;  %v4879_v59 = vmax.f32 %v4294_v51, %v7555_v34  ;;  %v4880_v27 = vmax.f32 %v4295_v47, %v7556_v2  ;;  %v5134_v4 = vperm.slane %v4878_v20, 0  ;;  %v12797_v20 = vld [vmem:[#allocation42_spill] sm:$0xff] }
 0x428   :  { %4046 = vst.msk [vmem:[#allocation3 + $0x98] sm:$0xff] %vm3351_vm4, %v3982_v41  ;;  %1997 = vrot.lane.b32.xlu0 %v10251_v16, %s8166_s27  ;;  %v4881_v10 = vmax.f32 %v4296_v26, %v7557_v46 }
 0x429   :  { %v10391_v45 = vpop.permute.xlu2 %1763  ;;  %2509 = vrot.lane.b32.xlu1 %v751_v19, %s8169_s30  ;;  %v5135_v31 = vperm.slane %v4879_v59, 0  ;;  %v5136_v63 = vperm.slane %v4880_v27, 0 }
 0x42a   :  { %v1734_v33 = vpop.permute.xlu0 %1733  ;;  %v5137_v51 = vperm.slane %v4881_v10, 0 }
 0x42b   :  { %v3695_v0 = vpop.f32.mrf.mxu0  ;;  %v2246_v11 = vpop.permute.xlu1 %2245  ;;  %v5265_v35 = vsel %vm5230_vm14, %v5135_v31, %v5134_v4  ;;  %v3118_v38 = vsel %vm3091_vm7, %v3053_v15, %v1734_v33  ;;  %v8096_v33 = vld [vmem:[#allocation2 + $0x210] sm:$0xff]  ;;  %v12799_v4 = vld [vmem:[#allocation151_spill] sm:$0xff] }
 0x42c   :  { %v3851_v56 = vmul.f32 %v10163_v50, %v3695_v0  ;;  %v5266_v39 = vsel %vm12770_vm13, %v5136_v63, %v5265_v35  ;;  %v3183_v26 = vsel %vm3156_vm8, %v3118_v38, %v10326_v49  ;;  %v12798_v31 = vld [vmem:[#allocation86_spill] sm:$0xff] }
 0x42d   :  { %v5267_v7 = vsel %vm12761_vm12, %v5137_v51, %v5266_v39  ;;  %v3248_v0 = vsel %vm3221_vm9, %v3183_v26, %v2246_v11  ;;  %v12800_v39 = vld [vmem:[#allocation36_spill] sm:$0xff] }
 0x42e   :  { %v3919_v16 = vadd.f32 %v10170_v21, %v3851_v56  ;;  %v711_v51 = vld [vmem:[#allocation2 + $0x2e8] sm:$0xff] }
 0x42f   :  { %v4161_v60 = vld [vmem:[#allocation3 + $0x98] sm:$0xff]  ;;  %2537 = vrot.lane.b32.xlu2 %v10395_v29, %s8169_s30 }
 0x430   :  { %v4215_v36 = vmax.f32 %v4159_v58, %v4161_v60  ;;  %v3983_v54 = vmax.f32 %v3919_v16, 0.0  ;;  %2281 = vrot.lane.b32.xlu0 %v701_v43, %s8167_s14 }
 0x431   :  { %v10405_v9 = vpop.permute.xlu2 %2247  ;;  %2793 = vrot.lane.b32.xlu1 %v10398_v8, %s8168_s28 }
 0x432   :  { %v4297_v55 = vrot.slane %v4215_v36, 2  ;;  %v4298_v32 = vrot.slane %v4215_v36, 4  ;;  %v7558_v61 = vrot.slane %v4215_v36, 9  ;;  %4047 = vst.msk [vmem:[#allocation3 + $0xa0] sm:$0xff] %vm3351_vm4, %v3983_v54  ;;  %v2018_v23 = vpop.permute.xlu0 %2017  ;;  %v4299_v40 = vrot.slane %v4215_v36, 6 }
 0x433   :  { %v2530_v18 = vpop.permute.xlu1 %2529 }
 0x434   :  { %v7559_v52 = vrot.slane %v4297_v55, 9  ;;  %v4882_v57 = vmax.f32 %v4215_v36, %v7558_v61  ;;  %v7560_v37 = vrot.slane %v4298_v32, 9  ;;  %v7561_v47 = vrot.slane %v4299_v40, 9 }
 0x436   :  { %v5138_v42 = vperm.slane %v4882_v57, 0  ;;  %v4883_v5 = vmax.f32 %v4297_v55, %v7559_v52  ;;  %v4884_v34 = vmax.f32 %v4298_v32, %v7560_v37  ;;  %v4885_v41 = vmax.f32 %v4299_v40, %v7561_v47  ;;  %v752_v57 = vld [vmem:[#allocation2 + $0x1a1] sm:$0xff]  ;;  %v8097_v37 = vld [vmem:[#allocation2 + $0x218] sm:$0xff] }
 0x437   :  { %1743 = vrot.lane.b32.xlu2 %v10334_v25, %s8165_s25  ;;  %v2937_v25 = vsel %vm55_vm0, %v8096_v33, %v12797_v20  ;;  %v2938_v28 = vsel %vm55_vm0, %v8097_v37, %v12800_v39  ;;  %v12804_v20 = vld [vmem:[#allocation82_spill] sm:$0xff] }
 0x438   :  { %2765 = vrot.lane.b32.xlu0 %v815_v62, %s8168_s28  ;;  %v5139_v19 = vperm.slane %v4883_v5, 0  ;;  %v5140_v12 = vperm.slane %v4884_v34, 0  ;;  %v5268_v2 = vsel %vm5236_vm2, %v5138_v42, %v5267_v7  ;;  %v5141_v56 = vperm.slane %v4885_v41, 0  ;;  %v12801_v62 = vld [vmem:[#allocation99_spill] sm:$0xff]  ;;  %v12802_v42 = vld [vmem:[#allocation149_spill] sm:$0xff] }
 0x439   :  { %v10424_v59 = vpop.permute.xlu2 %2531  ;;  %1999 = vrot.lane.b32.xlu1 %v10331_v13, %s8166_s27  ;;  %v3002_v43 = vsel %vm2961_vm6, %v2937_v25, %v12798_v31  ;;  %v3003_v47 = vsel %vm2961_vm6, %v2938_v28, %v12801_v62  ;;  %v8098_v7 = vld [vmem:[#allocation2 + $0x140] sm:$0xff]  ;;  %v8100_v62 = vld [vmem:[#allocation2 + $0x228] sm:$0xff] }
 0x43a   :  { %v2502_v27 = vpop.permute.xlu0 %2501  ;;  %v5269_v46 = vsel %vm5238_vm3, %v5139_v19, %v5268_v2  ;;  %v3698_v16 = vpop.f32.mrf.mxu0  ;;  %v3067_v60 = vsel %vm3026_vm5, %v3002_v43, %v12799_v4  ;;  %v3068_v38 = vsel %vm3026_vm5, %v3003_v47, %v12802_v42  ;;  %v12803_v19 = vld [vmem:[#allocation31_spill] sm:$0xff] }
 0x43b   :  { %v3313_v49 = vsel %vm3286_vm10, %v3248_v0, %v2502_v27  ;;  %v10435_v58 = vpop.permute.xlu1 %1735  ;;  %v5270_v13 = vsel %vm5240_vm15, %v5140_v12, %v5269_v46  ;;  %v3852_v63 = vmul.f32 %v10163_v50, %v3698_v16  ;;  %v3132_v54 = vsel %vm3091_vm7, %v3067_v60, %v10380_v24  ;;  %v10496_v31 = vld [vmem:[#allocation2 + $0x27a] sm:$0xff] }
 0x43c   :  { %v3378_v11 = vsel %vm3351_vm4, %v3313_v49, %v10372_v53  ;;  %v5271_v36 = vsel %vm5242_vm1, %v5141_v56, %v5270_v13  ;;  %v3197_v17 = vsel %vm3156_vm8, %v3132_v54, %v2018_v23  ;;  %v688_v23 = vld [vmem:[#allocation2 + $0x1a0] sm:$0xff]  ;;  %v3133_v34 = vsel %vm3091_vm7, %v3068_v38, %v10391_v45  ;;  %v12805_v56 = vld [vmem:[#allocation126_spill] sm:$0xff] }
 0x43d   :  { %7484 = vmatmul.msk.f32.gmra.mxu0 %vm3421_vm11, %v3378_v11  ;;  %5370 = vst.msk [vmem:[#allocation4 + $0x51] sm:$0xff] %vm3351_vm4, %v5271_v36  ;;  %v3920_v44 = vadd.f32 %v10170_v21, %v3852_v63  ;;  %v3262_v53 = vsel %vm3221_vm9, %v3197_v17, %v10349_v22  ;;  %v2924_v12 = vsel %vm55_vm0, %v8098_v7, %v12803_v19  ;;  %v816_v13 = vld [vmem:[#allocation2 + $0x1a2] sm:$0xff]  ;;  %v10506_v63 = vld [vmem:[#allocation2 + $0x2ea] sm:$0xff] }
 0x43e   :  { %v3327_v35 = vsel %vm3286_vm10, %v3262_v53, %v2530_v18  ;;  %v10468_v18 = vld [vmem:[#allocation2 + $0x279] sm:$0xff]  ;;  %v2989_v25 = vsel %vm2961_vm6, %v2924_v12, %v12804_v20  ;;  %v624_v53 = vld [vmem:[#allocation2 + $0x1ca] sm:$0xff] }
 0x43f   :  { %2027 = vrot.lane.b32.xlu2 %v10361_v6, %s8166_s27  ;;  %v3984_v10 = vmax.f32 %v3920_v44, 0.0  ;;  %v702_v6 = vld [vmem:[#allocation2 + $0x278] sm:$0xff]  ;;  %v3054_v46 = vsel %vm3026_vm5, %v2989_v25, %v12805_v56  ;;  %v703_v19 = vld [vmem:[#allocation2 + $0x288] sm:$0xff] }
 0x440   :  { %1771 = vrot.lane.b32.xlu0 %v10321_v48, %s8165_s25  ;;  %v646_v48 = vld [vmem:[#allocation2 + $0x2d2] sm:$0xff]  ;;  %v3119_v49 = vsel %vm3091_vm7, %v3054_v46, %v10435_v58  ;;  %v12809_v47 = vld [vmem:[#allocation47_spill] sm:$0xff] }
 0x441   :  { %v10456_v24 = vpop.permute.xlu2 %1737  ;;  %1789 = vrot.lane.b32.xlu1 %v582_v3, %s8165_s25  ;;  %4048 = vst.msk [vmem:[#allocation3 + $0xa8] sm:$0xff] %vm3351_vm4, %v3984_v10  ;;  %v560_v3 = vld [vmem:[#allocation2 + $0x1c9] sm:$0xff] }
 0x442   :  { %v2786_v55 = vpop.permute.xlu0 %2785  ;;  %v10521_v10 = vld [vmem:[#allocation2 + $0x2e9] sm:$0xff] }
 0x443   :  { %v3392_v32 = vsel %vm3351_vm4, %v3327_v35, %v2786_v55  ;;  %v2020_v61 = vpop.permute.xlu1 %2019 }
 0x444   :  { %7498 = vmatmul.msk.f32.gmra.mxu1 %vm3421_vm11, %v3392_v32  ;;  %v3198_v2 = vsel %vm3156_vm8, %v3133_v34, %v2020_v61  ;;  %v8099_v61 = vld [vmem:[#allocation2 + $0x150] sm:$0xff] }
 0x445   :  { %v12810_v34 = vld [vmem:[#allocation97_spill] sm:$0xff] }
 0x447   :  { %2283 = vrot.lane.b32.xlu2 %v702_v6, %s8167_s14  ;;  %v12806_v6 = vld [vmem:[#allocation29_spill] sm:$0xff] }
 0x448   :  { %2255 = vrot.lane.b32.xlu0 %v688_v23, %s8167_s14  ;;  %v2925_v23 = vsel %vm55_vm0, %v8099_v61, %v12806_v6  ;;  %v712_v61 = vld [vmem:[#allocation2 + $0x2f0] sm:$0xff] }
 0x449   :  { %v10465_v22 = vpop.permute.xlu2 %2021  ;;  %2045 = vrot.lane.b32.xlu1 %v646_v48, %s8166_s27  ;;  %v4162_v48 = vld [vmem:[#allocation3 + $0xa0] sm:$0xff] }
 0x44a   :  { %v1992_v40 = vpop.permute.xlu0 %1991 }
 0x44b   :  { %v3701_v1 = vpop.f32.mrf.mxu0  ;;  %v2504_v30 = vpop.permute.xlu1 %2503  ;;  %v3184_v60 = vsel %vm3156_vm8, %v3119_v49, %v1992_v40  ;;  %v583_v40 = vld [vmem:[#allocation2 + $0x2d9] sm:$0xff] }
 0x44c   :  { %v3853_v52 = vmul.f32 %v10163_v50, %v3701_v1  ;;  %v12807_v1 = vld [vmem:[#allocation74_spill] sm:$0xff] }
 0x44e   :  { %v3921_v15 = vadd.f32 %v10170_v21, %v3853_v52 }
 0x44f   :  { %2539 = vrot.lane.b32.xlu2 %v10468_v18, %s8169_s30 }
 0x450   :  { %2511 = vrot.lane.b32.xlu0 %v752_v57, %s8169_s30  ;;  %v3985_v5 = vmax.f32 %v3921_v15, 0.0  ;;  %v12808_v57 = vld [vmem:[#allocation139_spill] sm:$0xff] }
 0x451   :  { %v10483_v41 = vpop.permute.xlu2 %2505  ;;  %2301 = vrot.lane.b32.xlu1 %v711_v51, %s8167_s14 }
 0x452   :  { %4049 = vst.msk [vmem:[#allocation3 + $0xb0] sm:$0xff] %vm3351_vm4, %v3985_v5  ;;  %v3743_v26 = vpop.f32.mrf.mxu1  ;;  %v2276_v33 = vpop.permute.xlu0 %2275 }
 0x453   :  { %v3867_v0 = vmul.f32 %v10163_v50, %v3743_v26  ;;  %v3263_v45 = vsel %vm3221_vm9, %v3198_v2, %v2276_v33  ;;  %v2788_v27 = vpop.permute.xlu1 %2787  ;;  %v12811_v2 = vld [vmem:[#allocation141_spill] sm:$0xff]  ;;  %v689_v33 = vld [vmem:[#allocation2 + $0x1e0] sm:$0xff] }
 0x454   :  { %v3328_v43 = vsel %vm3286_vm10, %v3263_v45, %v10424_v59  ;;  %v3249_v59 = vsel %vm3221_vm9, %v3184_v60, %v10405_v9 }
 0x455   :  { %v3935_v16 = vadd.f32 %v10170_v21, %v3867_v0  ;;  %v3393_v4 = vsel %vm3351_vm4, %v3328_v43, %v2788_v27  ;;  %v3314_v36 = vsel %vm3286_vm10, %v3249_v59, %v2504_v30  ;;  %v2990_v30 = vsel %vm2961_vm6, %v2925_v23, %v12807_v1  ;;  %v647_v27 = vld [vmem:[#allocation2 + $0x2da] sm:$0xff] }
 0x456   :  { %7499 = vmatmul.msk.f32.gmra.mxu1 %vm3421_vm11, %v3393_v4  ;;  %v3055_v37 = vsel %vm3026_vm5, %v2990_v30, %v12808_v57 }
 0x457   :  { %v3999_v11 = vmax.f32 %v3935_v16, 0.0  ;;  %2795 = vrot.lane.b32.xlu2 %v10496_v31, %s8168_s28  ;;  %v3120_v39 = vsel %vm3091_vm7, %v3055_v37, %v10456_v24 }
 0x458   :  { %2767 = vrot.lane.b32.xlu0 %v816_v13, %s8168_s28 }
 0x459   :  { %4063 = vst.msk [vmem:[#allocation3 + $0x120] sm:$0xff] %vm3351_vm4, %v3999_v11  ;;  %v10514_v58 = vpop.permute.xlu2 %2789  ;;  %2813 = vrot.lane.b32.xlu1 %v10506_v63, %s8168_s28  ;;  %v4164_v32 = vld [vmem:[#allocation3 + $0xb0] sm:$0xff] }
 0x45a   :  { %v2760_v54 = vpop.permute.xlu0 %2759  ;;  %v10533_v52 = vmax.f32 %v4162_v48, %v4164_v32 }
 0x45b   :  { %v3379_v17 = vsel %vm3351_vm4, %v3314_v36, %v2760_v54  ;;  %v1994_v44 = vpop.permute.xlu1 %1993 }
 0x45c   :  { %7485 = vmatmul.msk.f32.gmra.mxu0 %vm3421_vm11, %v3379_v17  ;;  %v3185_v15 = vsel %vm3156_vm8, %v3120_v39, %v1994_v44  ;;  %v4300_v42 = vrot.slane %v10533_v52, 2  ;;  %v4301_v25 = vrot.slane %v10533_v52, 4  ;;  %v4302_v59 = vrot.slane %v10533_v52, 6 }
 0x45e   :  { %v7563_v56 = vrot.slane %v4300_v42, 9  ;;  %v7564_v13 = vrot.slane %v4301_v25, 9  ;;  %v7565_v6 = vrot.slane %v4302_v59, 9 }
 0x45f   :  { %1745 = vrot.lane.b32.xlu2 %v560_v3, %s8165_s25  ;;  %v10581_v3 = vld [vmem:[#allocation2 + $0x289] sm:$0xff] }
 0x460   :  { %2557 = vrot.lane.b32.xlu0 %v10521_v10, %s8169_s30  ;;  %v4887_v36 = vmax.f32 %v4300_v42, %v7563_v56  ;;  %v4889_v37 = vmax.f32 %v4302_v59, %v7565_v6  ;;  %v10598_v42 = vld [vmem:[#allocation2 + $0x1e2] sm:$0xff]  ;;  %v561_v59 = vld [vmem:[#allocation2 + $0x1d1] sm:$0xff] }
 0x461   :  { %v10526_v9 = vpop.permute.xlu2 %1995  ;;  %2001 = vrot.lane.b32.xlu1 %v624_v53, %s8166_s27 }
 0x462   :  { %v1766_v35 = vpop.permute.xlu0 %1765  ;;  %v5143_v23 = vperm.slane %v4887_v36, 0 }
 0x463   :  { %v2278_v55 = vpop.permute.xlu1 %2277 }
 0x467   :  { %2029 = vrot.lane.b32.xlu2 %v10398_v8, %s8166_s27  ;;  %v2939_v8 = vsel %vm55_vm0, %v8100_v62, %v12809_v47 }
 0x468   :  { %1773 = vrot.lane.b32.xlu0 %v10395_v29, %s8165_s25  ;;  %v3004_v24 = vsel %vm2961_vm6, %v2939_v8, %v12810_v34  ;;  %v10596_v8 = vld [vmem:[#allocation2 + $0x28a] sm:$0xff]  ;;  %v10600_v34 = vld [vmem:[#allocation2 + $0x2f2] sm:$0xff] }
 0x469   :  { %v10543_v28 = vpop.permute.xlu2 %2279  ;;  %1791 = vrot.lane.b32.xlu1 %v583_v40, %s8165_s25  ;;  %v3069_v26 = vsel %vm3026_vm5, %v3004_v24, %v12811_v2 }
 0x46a   :  { %v2250_v51 = vpop.permute.xlu0 %2249  ;;  %v3704_v5 = vpop.f32.mrf.mxu0  ;;  %v3134_v0 = vsel %vm3091_vm7, %v3069_v26, %v1766_v35  ;;  %v10585_v35 = vld [vmem:[#allocation2 + $0x1e1] sm:$0xff] }
 0x46b   :  { %v3250_v38 = vsel %vm3221_vm9, %v3185_v15, %v2250_v51  ;;  %v2762_v29 = vpop.permute.xlu1 %2761  ;;  %v3854_v7 = vmul.f32 %v10163_v50, %v3704_v5  ;;  %v3199_v43 = vsel %vm3156_vm8, %v3134_v0, %v10465_v22 }
 0x46c   :  { %v3315_v12 = vsel %vm3286_vm10, %v3250_v38, %v10483_v41  ;;  %v7562_v41 = vrot.slane %v10533_v52, 9  ;;  %v3264_v4 = vsel %vm3221_vm9, %v3199_v43, %v2278_v55  ;;  %v4888_v55 = vmax.f32 %v4301_v25, %v7564_v13  ;;  %v12812_v43 = vld [vmem:[#allocation24_spill] sm:$0xff] }
 0x46d   :  { %v3380_v20 = vsel %vm3351_vm4, %v3315_v12, %v2762_v29  ;;  %v3922_v45 = vadd.f32 %v10170_v21, %v3854_v7 }
 0x46e   :  { %7486 = vmatmul.msk.f32.gmra.mxu0 %vm3421_vm11, %v3380_v20  ;;  %v4886_v53 = vmax.f32 %v10533_v52, %v7562_v41  ;;  %v5144_v30 = vperm.slane %v4888_v55, 0  ;;  %v8101_v41 = vld [vmem:[#allocation2 + $0x158] sm:$0xff] }
 0x46f   :  { %2285 = vrot.lane.b32.xlu2 %v703_v19, %s8167_s14  ;;  %v3986_v46 = vmax.f32 %v3922_v45, 0.0  ;;  %v5145_v19 = vperm.slane %v4889_v37, 0  ;;  %v10621_v55 = vld [vmem:[#allocation2 + $0x2f1] sm:$0xff] }
 0x470   :  { %2257 = vrot.lane.b32.xlu0 %v689_v33, %s8167_s14  ;;  %v5142_v48 = vperm.slane %v4886_v53, 0  ;;  %v12815_v37 = vld [vmem:[#allocation45_spill] sm:$0xff] }
 0x471   :  { %v3746_v49 = vpop.f32.mrf.mxu1  ;;  %v10568_v16 = vpop.permute.xlu2 %2763  ;;  %2047 = vrot.lane.b32.xlu1 %v647_v27, %s8166_s27  ;;  %4050 = vst.msk [vmem:[#allocation3 + $0xb8] sm:$0xff] %vm3351_vm4, %v3986_v46 }
 0x472   :  { %v3868_v60 = vmul.f32 %v10163_v50, %v3746_v49  ;;  %v2534_v11 = vpop.permute.xlu0 %2533  ;;  %v5272_v15 = vsel %vm5230_vm14, %v5143_v23, %v5142_v48  ;;  %v2926_v49 = vsel %vm55_vm0, %v8101_v41, %v12812_v43  ;;  %v625_v23 = vld [vmem:[#allocation2 + $0x1d2] sm:$0xff]  ;;  %v10681_v43 = vld [vmem:[#allocation2 + $0x1e9] sm:$0xff] }
 0x473   :  { %v3329_v54 = vsel %vm3286_vm10, %v3264_v4, %v2534_v11  ;;  %v10576_v17 = vpop.permute.xlu1 %1767  ;;  %v5273_v7 = vsel %vm12770_vm13, %v5144_v30, %v5272_v15 }
 0x474   :  { %v3936_v22 = vadd.f32 %v10170_v21, %v3868_v60  ;;  %v3394_v44 = vsel %vm3351_vm4, %v3329_v54, %v10514_v58  ;;  %v4163_v58 = vld [vmem:[#allocation3 + $0xa8] sm:$0xff]  ;;  %v5274_v0 = vsel %vm12761_vm12, %v5145_v19, %v5273_v7  ;;  %v12813_v60 = vld [vmem:[#allocation87_spill] sm:$0xff] }
 0x475   :  { %7500 = vmatmul.msk.f32.gmra.mxu1 %vm3421_vm11, %v3394_v44  ;;  %v2991_v11 = vsel %vm2961_vm6, %v2926_v49, %v12813_v60  ;;  %v12814_v44 = vld [vmem:[#allocation137_spill] sm:$0xff]  ;;  %v8104_v49 = vld [vmem:[#allocation2 + $0x240] sm:$0xff] }
 0x476   :  { %v4000_v32 = vmax.f32 %v3936_v22, 0.0  ;;  %v3056_v53 = vsel %vm3026_vm5, %v2991_v11, %v12814_v44  ;;  %v713_v11 = vld [vmem:[#allocation2 + $0x300] sm:$0xff] }
 0x477   :  { %2541 = vrot.lane.b32.xlu2 %v10581_v3, %s8169_s30 }
 0x478   :  { %4064 = vst.msk [vmem:[#allocation3 + $0x128] sm:$0xff] %vm3351_vm4, %v4000_v32  ;;  %2513 = vrot.lane.b32.xlu0 %v10585_v35, %s8169_s30  ;;  %v4165_v40 = vld [vmem:[#allocation3 + $0xb8] sm:$0xff] }
 0x479   :  { %v10592_v1 = vpop.permute.xlu2 %1769  ;;  %2303 = vrot.lane.b32.xlu1 %v712_v61, %s8167_s14  ;;  %v4217_v52 = vmax.f32 %v4163_v58, %v4165_v40 }
 0x47a   :  { %v1740_v57 = vpop.permute.xlu0 %1739 }
 0x47b   :  { %v2252_v39 = vpop.permute.xlu1 %2251  ;;  %v4303_v51 = vrot.slane %v4217_v52, 2  ;;  %v4304_v62 = vrot.slane %v4217_v52, 4  ;;  %v7566_v47 = vrot.slane %v4217_v52, 9  ;;  %v4305_v38 = vrot.slane %v4217_v52, 6 }
 0x47c   :  { %v3121_v61 = vsel %vm3091_vm7, %v3056_v53, %v1740_v57  ;;  %v8102_v57 = vld [vmem:[#allocation2 + $0x230] sm:$0xff] }
 0x47d   :  { %v7567_v5 = vrot.slane %v4303_v51, 9  ;;  %v4890_v29 = vmax.f32 %v4217_v52, %v7566_v47  ;;  %v7568_v24 = vrot.slane %v4304_v62, 9  ;;  %v7569_v12 = vrot.slane %v4305_v38, 9 }
 0x47e   :  { %v3186_v40 = vsel %vm3156_vm8, %v3121_v61, %v10526_v9  ;;  %v2940_v15 = vsel %vm55_vm0, %v8102_v57, %v12815_v37  ;;  %v12822_v57 = vld [vmem:[#allocation85_spill] sm:$0xff] }
 0x47f   :  { %2797 = vrot.lane.b32.xlu2 %v10596_v8, %s8168_s28  ;;  %v5146_v2 = vperm.slane %v4890_v29, 0  ;;  %v4891_v26 = vmax.f32 %v4303_v51, %v7567_v5  ;;  %v4892_v33 = vmax.f32 %v4304_v62, %v7568_v24  ;;  %v4893_v25 = vmax.f32 %v4305_v38, %v7569_v12  ;;  %v12816_v38 = vld [vmem:[#allocation89_spill] sm:$0xff]  ;;  %v12817_v24 = vld [vmem:[#allocation154_spill] sm:$0xff] }
 0x480   :  { %2769 = vrot.lane.b32.xlu0 %v10598_v42, %s8168_s28  ;;  %v3251_v51 = vsel %vm3221_vm9, %v3186_v40, %v2252_v39  ;;  %v3005_v5 = vsel %vm2961_vm6, %v2940_v15, %v12816_v38 }
 0x481   :  { %v10607_v20 = vpop.permute.xlu2 %2253  ;;  %2815 = vrot.lane.b32.xlu1 %v10600_v34, %s8168_s28  ;;  %v5147_v27 = vperm.slane %v4891_v26, 0  ;;  %v5148_v56 = vperm.slane %v4892_v33, 0  ;;  %v5275_v46 = vsel %vm5236_vm2, %v5146_v2, %v5274_v0  ;;  %v5149_v54 = vperm.slane %v4893_v25, 0  ;;  %v690_v0 = vld [vmem:[#allocation2 + $0x1e8] sm:$0xff] }
 0x482   :  { %v2024_v45 = vpop.permute.xlu0 %2023  ;;  %v3070_v7 = vsel %vm3026_vm5, %v3005_v5, %v12817_v24  ;;  %v10716_v5 = vld [vmem:[#allocation2 + $0x292] sm:$0xff] }
 0x483   :  { %v3749_v13 = vpop.f32.mrf.mxu1  ;;  %v2536_v4 = vpop.permute.xlu1 %2535  ;;  %v5276_v22 = vsel %vm5238_vm3, %v5147_v27, %v5275_v46  ;;  %v10673_v27 = vld [vmem:[#allocation2 + $0x291] sm:$0xff] }
 0x484   :  { %v3869_v36 = vmul.f32 %v10163_v50, %v3749_v13  ;;  %v5277_v32 = vsel %vm5240_vm15, %v5148_v56, %v5276_v22  ;;  %v10678_v56 = vld [vmem:[%s12551_s2] ss:$0 sm:$0xff]  ;;  %v12818_v13 = vld [vmem:[#allocation38_spill] sm:$0xff]  ;;  %v12820_v22 = vld [vmem:[#allocation152_spill] sm:$0xff] }
 0x485   :  { %v5278_v58 = vsel %vm5242_vm1, %v5149_v54, %v5277_v32  ;;  %v4178_v54 = vld [vmem:[#allocation3 + $0x120] sm:$0xff] }
 0x486   :  { %v3937_v6 = vadd.f32 %v10170_v21, %v3869_v36  ;;  %5371 = vst.msk [vmem:[#allocation4 + $0x61] sm:$0xff] %vm3351_vm4, %v5278_v58  ;;  %v12821_v58 = vld [vmem:[#allocation34_spill] sm:$0xff] }
 0x487   :  { %1747 = vrot.lane.b32.xlu2 %v561_v59, %s8165_s25  ;;  %v12819_v59 = vld [vmem:[#allocation102_spill] sm:$0xff] }
 0x488   :  { %2559 = vrot.lane.b32.xlu0 %v10621_v55, %s8169_s30  ;;  %v4001_v48 = vmax.f32 %v3937_v6, 0.0 }
 0x489   :  { %v3707_v30 = vpop.f32.mrf.mxu0  ;;  %v10633_v52 = vpop.permute.xlu2 %2537  ;;  %2003 = vrot.lane.b32.xlu1 %v625_v23, %s8166_s27  ;;  %v8106_v23 = vld [vmem:[#allocation2 + $0x168] sm:$0xff] }
 0x48a   :  { %v3855_v62 = vmul.f32 %v10163_v50, %v3707_v30  ;;  %4065 = vst.msk [vmem:[#allocation3 + $0x130] sm:$0xff] %vm3351_vm4, %v4001_v48  ;;  %v2508_v47 = vpop.permute.xlu0 %2507  ;;  %v3135_v50 = vsel %vm3091_vm7, %v3070_v7, %v10576_v17  ;;  %v2927_v48 = vsel %vm55_vm0, %v8106_v23, %v12821_v58 }
 0x48b   :  { %v3316_v9 = vsel %vm3286_vm10, %v3251_v51, %v2508_v47  ;;  %v1742_v29 = vpop.permute.xlu1 %1741  ;;  %v3200_v39 = vsel %vm3156_vm8, %v3135_v50, %v2024_v45  ;;  %v2992_v37 = vsel %vm2961_vm6, %v2927_v48, %v12822_v57 }
 0x48c   :  { %v3923_v19 = vadd.f32 %v10170_v21, %v3855_v62  ;;  %v3381_v12 = vsel %vm3351_vm4, %v3316_v9, %v10568_v16  ;;  %v3265_v21 = vsel %vm3221_vm9, %v3200_v39, %v10543_v28  ;;  %v10727_v39 = vld [vmem:[#allocation2 + $0x302] sm:$0xff] }
 0x48d   :  { %7487 = vmatmul.msk.f32.gmra.mxu0 %vm3421_vm11, %v3381_v12  ;;  %v3330_v17 = vsel %vm3286_vm10, %v3265_v21, %v2536_v4  ;;  %v2941_v4 = vsel %vm55_vm0, %v8104_v49, %v12818_v13  ;;  %v12824_v13 = vld [vmem:[#allocation50_spill] sm:$0xff] }
 0x48e   :  { %v3987_v2 = vmax.f32 %v3923_v19, 0.0  ;;  %v3006_v36 = vsel %vm2961_vm6, %v2941_v4, %v12819_v59  ;;  %v10722_v19 = vld [vmem:[#allocation2 + $0x1ea] sm:$0xff] }
 0x48f   :  { %2031 = vrot.lane.b32.xlu2 %v10496_v31, %s8166_s27  ;;  %v704_v31 = vld [vmem:[#allocation2 + $0x290] sm:$0xff]  ;;  %v3071_v44 = vsel %vm3026_vm5, %v3006_v36, %v12820_v22  ;;  %v12825_v36 = vld [vmem:[#allocation100_spill] sm:$0xff] }
 0x490   :  { %4051 = vst.msk [vmem:[#allocation3 + $0xc0] sm:$0xff] %vm3351_vm4, %v3987_v2  ;;  %1775 = vrot.lane.b32.xlu0 %v10468_v18, %s8165_s25  ;;  %v3136_v61 = vsel %vm3091_vm7, %v3071_v44, %v10592_v1  ;;  %v12823_v1 = vld [vmem:[#allocation129_spill] sm:$0xff]  ;;  %v12826_v44 = vld [vmem:[#allocation144_spill] sm:$0xff] }
 0x491   :  { %v10660_v16 = vpop.permute.xlu2 %1743  ;;  %1793 = vrot.lane.b32.xlu1 %v10521_v10, %s8165_s25  ;;  %v4180_v41 = vld [vmem:[#allocation3 + $0x130] sm:$0xff]  ;;  %v3057_v62 = vsel %vm3026_vm5, %v2992_v37, %v12823_v1 }
 0x492   :  { %v2792_v26 = vpop.permute.xlu0 %2791  ;;  %v10697_v53 = vmax.f32 %v4178_v54, %v4180_v41  ;;  %v3122_v24 = vsel %vm3091_vm7, %v3057_v62, %v1742_v29  ;;  %v10747_v41 = vld [vmem:[#allocation2 + $0x301] sm:$0xff] }
 0x493   :  { %v3395_v33 = vsel %vm3351_vm4, %v3330_v17, %v2792_v26  ;;  %v2026_v25 = vpop.permute.xlu1 %2025 }
 0x494   :  { %7501 = vmatmul.msk.f32.gmra.mxu1 %vm3421_vm11, %v3395_v33  ;;  %v3201_v40 = vsel %vm3156_vm8, %v3136_v61, %v2026_v25  ;;  %v4324_v47 = vrot.slane %v10697_v53, 2  ;;  %v7594_v33 = vrot.slane %v10697_v53, 9 }
 0x496   :  { %v7595_v29 = vrot.slane %v4324_v47, 9  ;;  %v4918_v49 = vmax.f32 %v10697_v53, %v7594_v33 }
 0x497   :  { %2287 = vrot.lane.b32.xlu2 %v704_v31, %s8167_s14 }
 0x498   :  { %2259 = vrot.lane.b32.xlu0 %v690_v0, %s8167_s14 }
 0x499   :  { %v10669_v18 = vpop.permute.xlu2 %2027  ;;  %2049 = vrot.lane.b32.xlu1 %v10506_v63, %s8166_s27  ;;  %v10688_v63 = vld [vmem:[%s12552_s3] ss:$0 sm:$0xff] }
 0x49a   :  { %v1998_v10 = vpop.permute.xlu0 %1997 }
 0x49b   :  { %v3710_v28 = vpop.f32.mrf.mxu0  ;;  %v2510_v45 = vpop.permute.xlu1 %2509  ;;  %v3187_v50 = vsel %vm3156_vm8, %v3122_v24, %v1998_v10 }
 0x49c   :  { %v3856_v46 = vmul.f32 %v10678_v56, %v3710_v28  ;;  %v3252_v21 = vsel %vm3221_vm9, %v3187_v50, %v10607_v20  ;;  %v4326_v28 = vrot.slane %v10697_v53, 6  ;;  %v4919_v20 = vmax.f32 %v4324_v47, %v7595_v29 }
 0x49d   :  { %v3317_v25 = vsel %vm3286_vm10, %v3252_v21, %v2510_v45  ;;  %v8107_v45 = vld [vmem:[#allocation2 + $0x248] sm:$0xff] }
 0x49e   :  { %v3924_v60 = vadd.f32 %v10688_v63, %v3856_v46  ;;  %v2942_v4 = vsel %vm55_vm0, %v8107_v45, %v12824_v13  ;;  %v5175_v59 = vperm.slane %v4919_v20, 0 }
 0x49f   :  { %2543 = vrot.lane.b32.xlu2 %v10673_v27, %s8169_s30  ;;  %v3007_v54 = vsel %vm2961_vm6, %v2942_v4, %v12825_v36 }
 0x4a0   :  { %2515 = vrot.lane.b32.xlu0 %v10681_v43, %s8169_s30  ;;  %v3988_v32 = vmax.f32 %v3924_v60, 0.0  ;;  %v7597_v60 = vrot.slane %v4326_v28, 9 }
 0x4a1   :  { %v10703_v6 = vpop.permute.xlu2 %2283  ;;  %2305 = vrot.lane.b32.xlu1 %v713_v11, %s8167_s14 }
 0x4a2   :  { %4052 = vst.msk [vmem:[#allocation3 + $0xc8] sm:$0xff] %vm3351_vm4, %v3988_v32  ;;  %v2282_v30 = vpop.permute.xlu0 %2281  ;;  %v3752_v38 = vpop.f32.mrf.mxu1  ;;  %v5174_v32 = vperm.slane %v4918_v49, 0  ;;  %v691_v49 = vld [vmem:[#allocation2 + $0x1f8] sm:$0xff] }
 0x4a3   :  { %v3266_v15 = vsel %vm3221_vm9, %v3201_v40, %v2282_v30  ;;  %v2794_v51 = vpop.permute.xlu1 %2793  ;;  %v3870_v7 = vmul.f32 %v10678_v56, %v3752_v38  ;;  %v4921_v30 = vmax.f32 %v4326_v28, %v7597_v60  ;;  %v705_v28 = vld [vmem:[#allocation2 + $0x2a0] sm:$0xff] }
 0x4a4   :  { %v3331_v9 = vsel %vm3286_vm10, %v3266_v15, %v10633_v52  ;;  %v4325_v52 = vrot.slane %v10697_v53, 4  ;;  %v4179_v53 = vld [vmem:[#allocation3 + $0x128] sm:$0xff]  ;;  %v5300_v15 = vsel %vm5230_vm14, %v5175_v59, %v5174_v32 }
 0x4a5   :  { %v3396_v12 = vsel %vm3351_vm4, %v3331_v9, %v2794_v51  ;;  %v3938_v2 = vadd.f32 %v10688_v63, %v3870_v7  ;;  %v5177_v50 = vperm.slane %v4921_v30, 0  ;;  %v12827_v32 = vld [vmem:[#allocation32_spill] sm:$0xff] }
 0x4a6   :  { %7502 = vmatmul.msk.f32.gmra.mxu1 %vm3421_vm11, %v3396_v12  ;;  %v7596_v46 = vrot.slane %v4325_v52, 9 }
 0x4a7   :  { %2799 = vrot.lane.b32.xlu2 %v10716_v5, %s8168_s28  ;;  %v4002_v17 = vmax.f32 %v3938_v2, 0.0 }
 0x4a8   :  { %2771 = vrot.lane.b32.xlu0 %v10722_v19, %s8168_s28  ;;  %v4920_v11 = vmax.f32 %v4325_v52, %v7596_v46 }
 0x4a9   :  { %v2540_v26 = vpop.permute.xlu2 %2539  ;;  %2817 = vrot.lane.b32.xlu1 %v10727_v39, %s8168_s28  ;;  %4066 = vst.msk [vmem:[#allocation3 + $0x138] sm:$0xff] %vm3351_vm4, %v4002_v17 }
 0x4aa   :  { %v2766_v31 = vpop.permute.xlu0 %2765  ;;  %v5176_v57 = vperm.slane %v4920_v11, 0 }
 0x4ab   :  { %v3382_v0 = vsel %vm3351_vm4, %v3317_v25, %v2766_v31  ;;  %v10743_v10 = vpop.permute.xlu1 %1999 }
 0x4ac   :  { %7488 = vmatmul.msk.f32.gmra.mxu0 %vm3421_vm11, %v3382_v0 }
 0x4af   :  { %1749 = vrot.lane.b32.xlu2 %v10585_v35, %s8165_s25  ;;  %v3072_v35 = vsel %vm3026_vm5, %v3007_v54, %v12826_v44 }
 0x4b0   :  { %2561 = vrot.lane.b32.xlu0 %v10747_v41, %s8169_s30  ;;  %v4181_v61 = vld [vmem:[#allocation3 + $0x138] sm:$0xff] }
 0x4b1   :  { %v2796_v22 = vpop.permute.xlu2 %2795  ;;  %2005 = vrot.lane.b32.xlu1 %v10598_v42, %s8166_s27  ;;  %v4225_v58 = vmax.f32 %v4179_v53, %v4181_v61  ;;  %v8108_v53 = vld [vmem:[#allocation2 + $0x170] sm:$0xff] }
 0x4b2   :  { %v1772_v23 = vpop.permute.xlu0 %1771  ;;  %v2928_v61 = vsel %vm55_vm0, %v8108_v53, %v12827_v32  ;;  %v12835_v53 = vld [vmem:[#allocation157_spill] sm:$0xff] }
 0x4b3   :  { %v3137_v48 = vsel %vm3091_vm7, %v3072_v35, %v1772_v23  ;;  %v10763_v40 = vpop.permute.xlu1 %1789  ;;  %v4327_v42 = vrot.slane %v4225_v58, 2  ;;  %v7598_v51 = vrot.slane %v4225_v58, 9  ;;  %v4328_v62 = vrot.slane %v4225_v58, 4  ;;  %v10799_v35 = vld [vmem:[#allocation2 + $0x2a1] sm:$0xff]  ;;  %v755_v23 = vld [vmem:[#allocation2 + $0x1f9] sm:$0xff] }
 0x4b4   :  { %v3202_v37 = vsel %vm3156_vm8, %v3137_v48, %v10669_v18  ;;  %v4329_v38 = vrot.slane %v4225_v58, 6 }
 0x4b5   :  { %v3267_v1 = vsel %vm3221_vm9, %v3202_v37, %v10703_v6  ;;  %v4922_v9 = vmax.f32 %v4225_v58, %v7598_v51  ;;  %v7599_v7 = vrot.slane %v4327_v42, 9  ;;  %v7600_v12 = vrot.slane %v4328_v62, 9  ;;  %v12828_v58 = vld [vmem:[#allocation77_spill] sm:$0xff]  ;;  %v12829_v37 = vld [vmem:[#allocation142_spill] sm:$0xff] }
 0x4b6   :  { %v3332_v47 = vsel %vm3286_vm10, %v3267_v1, %v2540_v26  ;;  %v7601_v18 = vrot.slane %v4329_v38, 9  ;;  %v5301_v6 = vsel %vm12770_vm13, %v5176_v57, %v5300_v15  ;;  %v2993_v48 = vsel %vm2961_vm6, %v2928_v61, %v12828_v58  ;;  %v714_v57 = vld [vmem:[#allocation2 + $0x308] sm:$0xff] }
 0x4b7   :  { %2033 = vrot.lane.b32.xlu2 %v10596_v8, %s8166_s27  ;;  %v3397_v24 = vsel %vm3351_vm4, %v3332_v47, %v2796_v22  ;;  %v5178_v2 = vperm.slane %v4922_v9, 0  ;;  %v4923_v8 = vmax.f32 %v4327_v42, %v7599_v7  ;;  %v4924_v29 = vmax.f32 %v4328_v62, %v7600_v12  ;;  %v12830_v7 = vld [vmem:[#allocation58_spill] sm:$0xff] }
 0x4b8   :  { %1777 = vrot.lane.b32.xlu0 %v10581_v3, %s8165_s25  ;;  %7503 = vmatmul.msk.f32.gmra.mxu1 %vm3421_vm11, %v3397_v24  ;;  %v4925_v26 = vmax.f32 %v4329_v38, %v7601_v18  ;;  %v5302_v0 = vsel %vm12761_vm12, %v5177_v50, %v5301_v6  ;;  %v10819_v24 = vld [vmem:[#allocation2 + $0x2a2] sm:$0xff]  ;;  %v12831_v18 = vld [vmem:[#allocation109_spill] sm:$0xff] }
 0x4b9   :  { %v10778_v52 = vpop.permute.xlu2 %1745  ;;  %1795 = vrot.lane.b32.xlu1 %v10621_v55, %s8165_s25  ;;  %v5179_v25 = vperm.slane %v4923_v8, 0  ;;  %v5180_v31 = vperm.slane %v4924_v29, 0  ;;  %v5303_v46 = vsel %vm5236_vm2, %v5178_v2, %v5302_v0  ;;  %v10826_v50 = vld [vmem:[#allocation2 + $0x30a] sm:$0xff] }
 0x4ba   :  { %v2256_v21 = vpop.permute.xlu0 %2255  ;;  %v3713_v17 = vpop.f32.mrf.mxu0  ;;  %v5181_v45 = vperm.slane %v4925_v26, 0  ;;  %v12832_v2 = vld [vmem:[#allocation153_spill] sm:$0xff] }
 0x4bb   :  { %v3857_v33 = vmul.f32 %v10678_v56, %v3713_v17  ;;  %v2046_v3 = vpop.permute.xlu1 %2045  ;;  %v5304_v55 = vsel %vm5238_vm3, %v5179_v25, %v5303_v46  ;;  %v4166_v46 = vld [vmem:[#allocation3 + $0xc0] sm:$0xff] }
 0x4bc   :  { %v5305_v13 = vsel %vm5240_vm15, %v5180_v31, %v5304_v55  ;;  %v8110_v55 = vld [vmem:[#allocation2 + $0x258] sm:$0xff] }
 0x4bd   :  { %v3925_v20 = vadd.f32 %v10688_v63, %v3857_v33  ;;  %v5306_v60 = vsel %vm5242_vm1, %v5181_v45, %v5305_v13  ;;  %v12833_v13 = vld [vmem:[#allocation48_spill] sm:$0xff] }
 0x4be   :  { %5375 = vst.msk [vmem:[#allocation4 + $0xc1] sm:$0xff] %vm3351_vm4, %v5306_v60 }
 0x4bf   :  { %v3989_v4 = vmax.f32 %v3925_v20, 0.0  ;;  %2289 = vrot.lane.b32.xlu2 %v705_v28, %s8167_s14 }
 0x4c0   :  { %2261 = vrot.lane.b32.xlu0 %v691_v49, %s8167_s14 }
 0x4c1   :  { %4053 = vst.msk [vmem:[#allocation3 + $0xd0] sm:$0xff] %vm3351_vm4, %v3989_v4  ;;  %v3755_v11 = vpop.f32.mrf.mxu1  ;;  %v10793_v59 = vpop.permute.xlu2 %2029  ;;  %2051 = vrot.lane.b32.xlu1 %v10600_v34, %s8166_s27  ;;  %v3058_v34 = vsel %vm3026_vm5, %v2993_v48, %v12829_v37  ;;  %v2943_v4 = vsel %vm55_vm0, %v8110_v55, %v12833_v13 }
 0x4c2   :  { %v3871_v36 = vmul.f32 %v10678_v56, %v3755_v11  ;;  %v2512_v54 = vpop.permute.xlu0 %2511  ;;  %v3123_v15 = vsel %vm3091_vm7, %v3058_v34, %v10660_v16  ;;  %v8109_v16 = vld [vmem:[#allocation2 + $0x2b8] sm:$0xff]  ;;  %v12834_v11 = vld [vmem:[#allocation92_spill] sm:$0xff] }
 0x4c3   :  { %v2302_v22 = vpop.permute.xlu1 %2301  ;;  %v3188_v42 = vsel %vm3156_vm8, %v3123_v15, %v10743_v10  ;;  %v2951_v12 = vsel %vm55_vm0, %v8109_v16, %v12830_v7  ;;  %v819_v10 = vld [vmem:[#allocation2 + $0x1fa] sm:$0xff]  ;;  %v706_v7 = vld [vmem:[#allocation2 + $0x2a8] sm:$0xff] }
 0x4c4   :  { %v3939_v44 = vadd.f32 %v10688_v63, %v3871_v36  ;;  %v3253_v1 = vsel %vm3221_vm9, %v3188_v42, %v2256_v21  ;;  %v3016_v6 = vsel %vm2961_vm6, %v2951_v12, %v12831_v18  ;;  %v3008_v36 = vsel %vm2961_vm6, %v2943_v4, %v12834_v11  ;;  %v692_v18 = vld [vmem:[#allocation2 + $0x200] sm:$0xff]  ;;  %v10892_v4 = vld [vmem:[#allocation2 + $0x2a9] sm:$0xff]  ;;  %v12837_v11 = vld [vmem:[#allocation90_spill] sm:$0xff] }
 0x4c5   :  { %v3318_v47 = vsel %vm3286_vm10, %v3253_v1, %v2512_v54  ;;  %v3081_v8 = vsel %vm3026_vm5, %v3016_v6, %v12832_v2  ;;  %v4167_v6 = vld [vmem:[#allocation3 + $0xc8] sm:$0xff] }
 0x4c6   :  { %v4003_v30 = vmax.f32 %v3939_v44, 0.0  ;;  %v3146_v29 = vsel %vm3091_vm7, %v3081_v8, %v10763_v40  ;;  %v304_v8 = vld [vmem:[#allocation2 + $0x1b0] sm:$0xff] }
 0x4c7   :  { %2545 = vrot.lane.b32.xlu2 %v10799_v35, %s8169_s30  ;;  %v3211_v21 = vsel %vm3156_vm8, %v3146_v29, %v2046_v3  ;;  %v10845_v3 = vld [vmem:[#allocation2 + $0x309] sm:$0xff] }
 0x4c8   :  { %4067 = vst.msk [vmem:[#allocation3 + $0x140] sm:$0xff] %vm3351_vm4, %v4003_v30  ;;  %2517 = vrot.lane.b32.xlu0 %v755_v23, %s8169_s30  ;;  %v4168_v26 = vld [vmem:[#allocation3 + $0xd0] sm:$0xff]  ;;  %v3276_v33 = vsel %vm3221_vm9, %v3211_v21, %v2302_v22 }
 0x4c9   :  { %v2286_v51 = vpop.permute.xlu2 %2285  ;;  %2307 = vrot.lane.b32.xlu1 %v714_v57, %s8167_s14  ;;  %v4218_v49 = vmax.f32 %v4166_v46, %v4168_v26 }
 0x4ca   :  { %v2768_v62 = vpop.permute.xlu0 %2767 }
 0x4cb   :  { %v2814_v38 = vpop.permute.xlu1 %2813  ;;  %v3383_v9 = vsel %vm3351_vm4, %v3318_v47, %v2768_v62  ;;  %v4306_v54 = vrot.slane %v4218_v49, 2  ;;  %v4307_v48 = vrot.slane %v4218_v49, 4  ;;  %v7570_v42 = vrot.slane %v4218_v49, 9 }
 0x4cc   :  { %7489 = vmatmul.msk.f32.gmra.mxu0 %vm3421_vm11, %v3383_v9 }
 0x4cd   :  { %v7571_v37 = vrot.slane %v4306_v54, 9  ;;  %v7572_v62 = vrot.slane %v4307_v48, 9  ;;  %v4894_v9 = vmax.f32 %v4218_v49, %v7570_v42 }
 0x4cf   :  { %2801 = vrot.lane.b32.xlu2 %v10819_v24, %s8168_s28  ;;  %v4895_v47 = vmax.f32 %v4306_v54, %v7571_v37  ;;  %v4896_v16 = vmax.f32 %v4307_v48, %v7572_v62  ;;  %v715_v48 = vld [vmem:[#allocation2 + $0x318] sm:$0xff] }
 0x4d0   :  { %2773 = vrot.lane.b32.xlu0 %v819_v10, %s8168_s28 }
 0x4d1   :  { %v2542_v17 = vpop.permute.xlu2 %2541  ;;  %2819 = vrot.lane.b32.xlu1 %v10826_v50, %s8168_s28  ;;  %v5151_v10 = vperm.slane %v4895_v47, 0  ;;  %v5152_v29 = vperm.slane %v4896_v16, 0 }
 0x4d2   :  { %v2558_v25 = vpop.permute.xlu0 %2557 }
 0x4d3   :  { %v3341_v31 = vsel %vm3286_vm10, %v3276_v33, %v2558_v25  ;;  %v3758_v0 = vpop.f32.mrf.mxu1  ;;  %v10840_v28 = vpop.permute.xlu1 %2001 }
 0x4d4   :  { %v3406_v40 = vsel %vm3351_vm4, %v3341_v31, %v2814_v38  ;;  %v3872_v20 = vmul.f32 %v10678_v56, %v3758_v0 }
 0x4d5   :  { %7512 = vmatmul.msk.f32.vlgmr.msra.gmra.mxu3 %vm3421_vm11, %v3406_v40  ;;  %v12836_v40 = vld [vmem:[#allocation27_spill] sm:$0xff] }
 0x4d6   :  { %v3940_v45 = vadd.f32 %v10688_v63, %v3872_v20  ;;  %v2929_v20 = vsel %vm55_vm0, %v304_v8, %v12836_v40  ;;  %v8111_v8 = vld [vmem:[#allocation2 + $0x2c0] sm:$0xff] }
 0x4d7   :  { %1751 = vrot.lane.b32.xlu2 %v10681_v43, %s8165_s25  ;;  %v3073_v43 = vsel %vm3026_vm5, %v3008_v36, %v12835_v53  ;;  %v2994_v36 = vsel %vm2961_vm6, %v2929_v20, %v12837_v11 }
 0x4d8   :  { %2563 = vrot.lane.b32.xlu0 %v10845_v3, %s8169_s30  ;;  %v4004_v60 = vmax.f32 %v3940_v45, 0.0 }
 0x4d9   :  { %v3716_v22 = vpop.f32.mrf.mxu0  ;;  %v2798_v44 = vpop.permute.xlu2 %2797  ;;  %2007 = vrot.lane.b32.xlu1 %v10722_v19, %s8166_s27 }
 0x4da   :  { %v3858_v32 = vmul.f32 %v10678_v56, %v3716_v22  ;;  %4068 = vst.msk [vmem:[#allocation3 + $0x148] sm:$0xff] %vm3351_vm4, %v4004_v60  ;;  %v1774_v61 = vpop.permute.xlu0 %1773  ;;  %v756_v22 = vld [vmem:[#allocation2 + $0x201] sm:$0xff] }
 0x4db   :  { %v3138_v23 = vsel %vm3091_vm7, %v3073_v43, %v1774_v61  ;;  %v10863_v58 = vpop.permute.xlu1 %1791  ;;  %v12838_v43 = vld [vmem:[#allocation140_spill] sm:$0xff] }
 0x4dc   :  { %v3926_v30 = vadd.f32 %v10688_v63, %v3858_v32  ;;  %v3203_v57 = vsel %vm3156_vm8, %v3138_v23, %v10793_v59  ;;  %v4308_v59 = vrot.slane %v4218_v49, 6  ;;  %v3059_v32 = vsel %vm3026_vm5, %v2994_v36, %v12838_v43 }
 0x4dd   :  { %v3268_v19 = vsel %vm3221_vm9, %v3203_v57, %v2286_v51  ;;  %v3124_v57 = vsel %vm3091_vm7, %v3059_v32, %v10778_v52  ;;  %v12844_v32 = vld [vmem:[#allocation155_spill] sm:$0xff] }
 0x4de   :  { %v3990_v34 = vmax.f32 %v3926_v30, 0.0  ;;  %v3333_v15 = vsel %vm3286_vm10, %v3268_v19, %v2542_v17  ;;  %v7573_v12 = vrot.slane %v4308_v59, 9 }
 0x4df   :  { %2035 = vrot.lane.b32.xlu2 %v10716_v5, %s8166_s27  ;;  %v3398_v1 = vsel %vm3351_vm4, %v3333_v15, %v2798_v44  ;;  %v3189_v15 = vsel %vm3156_vm8, %v3124_v57, %v10840_v28  ;;  %v10965_v57 = vld [vmem:[#allocation2 + $0x2b9] sm:$0xff] }
 0x4e0   :  { %4054 = vst.msk [vmem:[#allocation3 + $0xd8] sm:$0xff] %vm3351_vm4, %v3990_v34  ;;  %1779 = vrot.lane.b32.xlu0 %v10673_v27, %s8165_s25  ;;  %7504 = vmatmul.msk.f32.gmra.mxu1 %vm3421_vm11, %v3398_v1  ;;  %v5150_v27 = vperm.slane %v4894_v9, 0 }
 0x4e1   :  { %v10877_v51 = vpop.permute.xlu2 %1747  ;;  %1797 = vrot.lane.b32.xlu1 %v10747_v41, %s8165_s25  ;;  %v4897_v41 = vmax.f32 %v4308_v59, %v7573_v12 }
 0x4e2   :  { %v2258_v38 = vpop.permute.xlu0 %2257  ;;  %v5279_v26 = vsel %vm5230_vm14, %v5151_v10, %v5150_v27  ;;  %v10919_v27 = vld [vmem:[#allocation2 + $0x2aa] sm:$0xff] }
 0x4e3   :  { %v10881_v5 = vpop.permute.xlu1 %2047  ;;  %v5153_v54 = vperm.slane %v4897_v41, 0  ;;  %v3254_v59 = vsel %vm3221_vm9, %v3189_v15, %v2258_v38 }
 0x4e7   :  { %v4169_v2 = vld [vmem:[#allocation3 + $0xd8] sm:$0xff]  ;;  %2291 = vrot.lane.b32.xlu2 %v706_v7, %s8167_s14 }
 0x4e8   :  { %v4219_v21 = vmax.f32 %v4167_v6, %v4169_v2  ;;  %2263 = vrot.lane.b32.xlu0 %v692_v18, %s8167_s14 }
 0x4e9   :  { %v10885_v17 = vpop.permute.xlu2 %2031  ;;  %2053 = vrot.lane.b32.xlu1 %v10727_v39, %s8166_s27  ;;  %v5280_v39 = vsel %vm12770_vm13, %v5152_v29, %v5279_v26  ;;  %v12839_v29 = vld [vmem:[#allocation57_spill] sm:$0xff]  ;;  %v820_v26 = vld [vmem:[#allocation2 + $0x202] sm:$0xff] }
 0x4ea   :  { %v4309_v33 = vrot.slane %v4219_v21, 2  ;;  %v4310_v25 = vrot.slane %v4219_v21, 4  ;;  %v7574_v31 = vrot.slane %v4219_v21, 9  ;;  %v2514_v0 = vpop.permute.xlu0 %2513  ;;  %v4311_v46 = vrot.slane %v4219_v21, 6 }
 0x4eb   :  { %v3719_v49 = vpop.f32.mrf.mxu0  ;;  %v2304_v45 = vpop.permute.xlu1 %2303  ;;  %v5281_v34 = vsel %vm12761_vm12, %v5153_v54, %v5280_v39  ;;  %v3319_v9 = vsel %vm3286_vm10, %v3254_v59, %v2514_v0  ;;  %v12841_v0 = vld [vmem:[#allocation165_spill] sm:$0xff]  ;;  %v12842_v54 = vld [vmem:[#allocation40_spill] sm:$0xff] }
 0x4ec   :  { %v7575_v55 = vrot.slane %v4309_v33, 9  ;;  %v4898_v13 = vmax.f32 %v4219_v21, %v7574_v31  ;;  %v3859_v60 = vmul.f32 %v10678_v56, %v3719_v49  ;;  %v7576_v44 = vrot.slane %v4310_v25, 9  ;;  %v10928_v31 = vld [vmem:[#allocation2 + $0x31a] sm:$0xff] }
 0x4ed   :  { %v7577_v53 = vrot.slane %v4311_v46, 9  ;;  %v2952_v21 = vsel %vm55_vm0, %v8111_v8, %v12839_v29  ;;  %v716_v59 = vld [vmem:[#allocation2 + $0x320] sm:$0xff] }
 0x4ee   :  { %v5154_v61 = vperm.slane %v4898_v13, 0  ;;  %v3927_v23 = vadd.f32 %v10688_v63, %v3859_v60  ;;  %v4899_v30 = vmax.f32 %v4309_v33, %v7575_v55  ;;  %v4900_v37 = vmax.f32 %v4310_v25, %v7576_v44  ;;  %v12840_v33 = vld [vmem:[#allocation101_spill] sm:$0xff] }
 0x4ef   :  { %2547 = vrot.lane.b32.xlu2 %v10892_v4, %s8169_s30  ;;  %v4901_v19 = vmax.f32 %v4311_v46, %v7577_v53  ;;  %v3017_v25 = vsel %vm2961_vm6, %v2952_v21, %v12840_v33  ;;  %v12843_v44 = vld [vmem:[#allocation105_spill] sm:$0xff]  ;;  %v10994_v21 = vld [vmem:[#allocation2 + $0x322] sm:$0xff] }
 0x4f0   :  { %2519 = vrot.lane.b32.xlu0 %v756_v22, %s8169_s30  ;;  %v3991_v42 = vmax.f32 %v3927_v23, 0.0  ;;  %v5155_v1 = vperm.slane %v4899_v30, 0  ;;  %v5282_v62 = vsel %vm5236_vm2, %v5154_v61, %v5281_v34  ;;  %v5156_v52 = vperm.slane %v4900_v37, 0 }
 0x4f1   :  { %v2288_v47 = vpop.permute.xlu2 %2287  ;;  %2309 = vrot.lane.b32.xlu1 %v715_v48, %s8167_s14  ;;  %v5157_v12 = vperm.slane %v4901_v19, 0  ;;  %v3082_v46 = vsel %vm3026_vm5, %v3017_v25, %v12841_v0  ;;  %v707_v48 = vld [vmem:[#allocation2 + $0x2b8] sm:$0xff]  ;;  %v12847_v0 = vld [vmem:[#allocation132_spill] sm:$0xff] }
 0x4f2   :  { %4055 = vst.msk [vmem:[#allocation3 + $0xe0] sm:$0xff] %vm3351_vm4, %v3991_v42  ;;  %v3761_v16 = vpop.f32.mrf.mxu1  ;;  %v2770_v7 = vpop.permute.xlu0 %2769  ;;  %v5283_v28 = vsel %vm5238_vm3, %v5155_v1, %v5282_v62  ;;  %v3147_v20 = vsel %vm3091_vm7, %v3082_v46, %v10863_v58  ;;  %v10946_v58 = vld [vmem:[#allocation2 + $0x319] sm:$0xff] }
 0x4f3   :  { %v3873_v10 = vmul.f32 %v10678_v56, %v3761_v16  ;;  %v3384_v18 = vsel %vm3351_vm4, %v3319_v9, %v2770_v7  ;;  %v2816_v6 = vpop.permute.xlu1 %2815  ;;  %v5284_v38 = vsel %vm5240_vm15, %v5156_v52, %v5283_v28  ;;  %v3212_v49 = vsel %vm3156_vm8, %v3147_v20, %v10881_v5  ;;  %v8112_v5 = vld [vmem:[#allocation2 + $0x260] sm:$0xff]  ;;  %v305_v7 = vld [vmem:[#allocation2 + $0x1b8] sm:$0xff] }
 0x4f4   :  { %7490 = vmatmul.msk.f32.gmra.mxu0 %vm3421_vm11, %v3384_v18  ;;  %v5285_v2 = vsel %vm5242_vm1, %v5157_v12, %v5284_v38  ;;  %v3277_v13 = vsel %vm3221_vm9, %v3212_v49, %v2304_v45  ;;  %v2944_v45 = vsel %vm55_vm0, %v8112_v5, %v12842_v54  ;;  %v10980_v9 = vld [vmem:[#allocation2 + $0x321] sm:$0xff] }
 0x4f5   :  { %v3941_v41 = vadd.f32 %v10688_v63, %v3873_v10  ;;  %5372 = vst.msk [vmem:[#allocation4 + $0x71] sm:$0xff] %vm3351_vm4, %v5285_v2  ;;  %v3009_v53 = vsel %vm2961_vm6, %v2944_v45, %v12843_v44  ;;  %v12845_v2 = vld [vmem:[#allocation37_spill] sm:$0xff]  ;;  %v10998_v25 = vld [vmem:[#allocation2 + $0x2ba] sm:$0xff] }
 0x4f6   :  { %v3074_v61 = vsel %vm3026_vm5, %v3009_v53, %v12844_v32  ;;  %v2930_v8 = vsel %vm55_vm0, %v305_v7, %v12845_v2  ;;  %v8113_v44 = vld [vmem:[#allocation2 + $0x2d0] sm:$0xff] }
 0x4f7   :  { %v4005_v40 = vmax.f32 %v3941_v41, 0.0  ;;  %2803 = vrot.lane.b32.xlu2 %v10919_v27, %s8168_s28  ;;  %v12846_v41 = vld [vmem:[#allocation88_spill] sm:$0xff]  ;;  %v12848_v53 = vld [vmem:[#allocation49_spill] sm:$0xff] }
 0x4f8   :  { %2775 = vrot.lane.b32.xlu0 %v820_v26, %s8168_s28  ;;  %v2995_v26 = vsel %vm2961_vm6, %v2930_v8, %v12846_v41 }
 0x4f9   :  { %4069 = vst.msk [vmem:[#allocation3 + $0x150] sm:$0xff] %vm3351_vm4, %v4005_v40  ;;  %v2544_v55 = vpop.permute.xlu2 %2543  ;;  %2821 = vrot.lane.b32.xlu1 %v10928_v31, %s8168_s28  ;;  %v3060_v46 = vsel %vm3026_vm5, %v2995_v26, %v12847_v0 }
 0x4fa   :  { %v2560_v60 = vpop.permute.xlu0 %2559  ;;  %v3125_v20 = vsel %vm3091_vm7, %v3060_v46, %v10877_v51 }
 0x4fb   :  { %v3342_v39 = vsel %vm3286_vm10, %v3277_v13, %v2560_v60  ;;  %v2004_v11 = vpop.permute.xlu1 %2003 }
 0x4fc   :  { %v3407_v36 = vsel %vm3351_vm4, %v3342_v39, %v2816_v6  ;;  %v3190_v13 = vsel %vm3156_vm8, %v3125_v20, %v2004_v11 }
 0x4fd   :  { %7513 = vmatmul.msk.f32.gmra.mxu3 %vm3421_vm11, %v3407_v36 }
 0x4ff   :  { %1781 = vrot.lane.b32.xlu2 %v10799_v35, %s8165_s25 }
 0x500   :  { %2565 = vrot.lane.b32.xlu0 %v10946_v58, %s8169_s30  ;;  %v4184_v34 = vld [vmem:[#allocation3 + $0x150] sm:$0xff] }
 0x501   :  { %v2800_v22 = vpop.permute.xlu2 %2799  ;;  %1799 = vrot.lane.b32.xlu1 %v10845_v3, %s8165_s25 }
 0x502   :  { %v1776_v43 = vpop.permute.xlu0 %1775 }
 0x503   :  { %v10960_v23 = vpop.permute.xlu1 %1793  ;;  %v3139_v35 = vsel %vm3091_vm7, %v3074_v61, %v1776_v43  ;;  %v2953_v43 = vsel %vm55_vm0, %v8113_v44, %v12848_v53  ;;  %v12849_v61 = vld [vmem:[#allocation112_spill] sm:$0xff] }
 0x504   :  { %v3204_v30 = vsel %vm3156_vm8, %v3139_v35, %v10885_v17  ;;  %v3018_v35 = vsel %vm2961_vm6, %v2953_v43, %v12849_v61 }
 0x505   :  { %v3269_v3 = vsel %vm3221_vm9, %v3204_v30, %v2288_v47 }
 0x506   :  { %v3334_v37 = vsel %vm3286_vm10, %v3269_v3, %v2544_v55 }
 0x507   :  { %2293 = vrot.lane.b32.xlu2 %v707_v48, %s8167_s14  ;;  %v3399_v15 = vsel %vm3351_vm4, %v3334_v37, %v2800_v22  ;;  %v4183_v37 = vld [vmem:[#allocation3 + $0x148] sm:$0xff] }
 0x508   :  { %2037 = vrot.lane.b32.xlu0 %v10819_v24, %s8166_s27  ;;  %7505 = vmatmul.msk.f32.gmra.mxu1 %vm3421_vm11, %v3399_v15  ;;  %v4182_v24 = vld [vmem:[#allocation3 + $0x140] sm:$0xff] }
 0x509   :  { %v10972_v19 = vpop.permute.xlu2 %1749  ;;  %2549 = vrot.lane.b32.xlu1 %v10965_v57, %s8169_s30  ;;  %v4226_v47 = vmax.f32 %v4182_v24, %v4184_v34 }
 0x50a   :  { %v2260_v17 = vpop.permute.xlu0 %2259  ;;  %v3722_v42 = vpop.f32.mrf.mxu0 }
 0x50b   :  { %v3860_v1 = vmul.f32 %v10678_v56, %v3722_v42  ;;  %v2050_v62 = vpop.permute.xlu1 %2049  ;;  %v4330_v12 = vrot.slane %v4226_v47, 2  ;;  %v4331_v29 = vrot.slane %v4226_v47, 4  ;;  %v7602_v49 = vrot.slane %v4226_v47, 9 }
 0x50c   :  { %v4332_v60 = vrot.slane %v4226_v47, 6  ;;  %v3255_v36 = vsel %vm3221_vm9, %v3190_v13, %v2260_v17 }
 0x50d   :  { %v3928_v52 = vadd.f32 %v10688_v63, %v3860_v1  ;;  %v7603_v33 = vrot.slane %v4330_v12, 9  ;;  %v7604_v55 = vrot.slane %v4331_v29, 9  ;;  %v4926_v45 = vmax.f32 %v4226_v47, %v7602_v49 }
 0x50e   :  { %v7605_v48 = vrot.slane %v4332_v60, 9 }
 0x50f   :  { %v3992_v16 = vmax.f32 %v3928_v52, 0.0  ;;  %2311 = vrot.lane.b32.xlu2 %v716_v59, %s8167_s14  ;;  %v4927_v39 = vmax.f32 %v4330_v12, %v7603_v33  ;;  %v4928_v32 = vmax.f32 %v4331_v29, %v7604_v55  ;;  %v5182_v34 = vperm.slane %v4926_v45, 0  ;;  %v12852_v45 = vld [vmem:[#allocation103_spill] sm:$0xff] }
 0x510   :  { %2055 = vrot.lane.b32.xlu0 %v10826_v50, %s8166_s27  ;;  %v4929_v59 = vmax.f32 %v4332_v60, %v7605_v48  ;;  %v8114_v60 = vld [vmem:[#allocation2 + $0x270] sm:$0xff] }
 0x511   :  { %4056 = vst.msk [vmem:[#allocation3 + $0xe8] sm:$0xff] %vm3351_vm4, %v3992_v16  ;;  %v3764_v28 = vpop.f32.mrf.mxu1  ;;  %v10986_v10 = vpop.permute.xlu2 %2033  ;;  %2567 = vrot.lane.b32.xlu1 %v10980_v9, %s8169_s30  ;;  %v5183_v30 = vperm.slane %v4927_v39, 0  ;;  %v5184_v42 = vperm.slane %v4928_v32, 0  ;;  %v12851_v39 = vld [vmem:[#allocation53_spill] sm:$0xff]  ;;  %v12853_v32 = vld [vmem:[#allocation147_spill] sm:$0xff] }
 0x512   :  { %v3874_v18 = vmul.f32 %v10678_v56, %v3764_v28  ;;  %v2516_v6 = vpop.permute.xlu0 %2515  ;;  %v5185_v29 = vperm.slane %v4929_v59, 0 }
 0x513   :  { %v2306_v38 = vpop.permute.xlu1 %2305  ;;  %v3320_v51 = vsel %vm3286_vm10, %v3255_v36, %v2516_v6  ;;  %v2945_v36 = vsel %vm55_vm0, %v8114_v60, %v12851_v39 }
 0x514   :  { %v3942_v50 = vadd.f32 %v10688_v63, %v3874_v18 }
 0x516   :  { %v4006_v40 = vmax.f32 %v3942_v50, 0.0  ;;  %v708_v50 = vld [vmem:[#allocation2 + $0x2c0] sm:$0xff] }
 0x517   :  { %2823 = vrot.lane.b32.xlu2 %v10994_v21, %s8168_s28 }
 0x518   :  { %4070 = vst.msk [vmem:[#allocation3 + $0x158] sm:$0xff] %vm3351_vm4, %v4006_v40  ;;  %2805 = vrot.lane.b32.xlu0 %v10998_v25, %s8168_s28  ;;  %v11045_v40 = vld [vmem:[#allocation2 + $0x2c2] sm:$0xff] }
 0x519   :  { %v11011_v5 = vpop.permute.xlu2 %2289  ;;  %2039 = vrot.lane.b32.xlu1 %v10919_v27, %s8166_s27  ;;  %v12850_v27 = vld [vmem:[#allocation164_spill] sm:$0xff] }
 0x51a   :  { %v2772_v54 = vpop.permute.xlu0 %2771  ;;  %v3083_v3 = vsel %vm3026_vm5, %v3018_v35, %v12850_v27 }
 0x51b   :  { %v3385_v11 = vsel %vm3351_vm4, %v3320_v51, %v2772_v54  ;;  %v2818_v22 = vpop.permute.xlu1 %2817  ;;  %v3148_v15 = vsel %vm3091_vm7, %v3083_v3, %v10960_v23  ;;  %v5307_v23 = vsel %vm5230_vm14, %v5183_v30, %v5182_v34 }
 0x51c   :  { %7491 = vmatmul.msk.f32.gmra.mxu0 %vm3421_vm11, %v3385_v11  ;;  %v3213_v24 = vsel %vm3156_vm8, %v3148_v15, %v2050_v62  ;;  %v3010_v11 = vsel %vm2961_vm6, %v2945_v36, %v12852_v45  ;;  %v4170_v36 = vld [vmem:[#allocation3 + $0xe0] sm:$0xff]  ;;  %v773_v45 = vld [vmem:[#allocation2 + $0x2d1] sm:$0xff] }
 0x51d   :  { %v3278_v47 = vsel %vm3221_vm9, %v3213_v24, %v2306_v38  ;;  %v11039_v38 = vld [vmem:[#allocation2 + $0x2c1] sm:$0xff]  ;;  %v3075_v61 = vsel %vm3026_vm5, %v3010_v11, %v12853_v32 }
 0x51e   :  { %v12858_v11 = vld [vmem:[#allocation111_spill] sm:$0xff] }
 0x51f   :  { %v4185_v17 = vld [vmem:[#allocation3 + $0x158] sm:$0xff]  ;;  %1801 = vrot.lane.b32.xlu2 %v10946_v58, %s8165_s25 }
 0x520   :  { %v4227_v1 = vmax.f32 %v4183_v37, %v4185_v17  ;;  %1783 = vrot.lane.b32.xlu0 %v10892_v4, %s8165_s25  ;;  %v11069_v17 = vld [vmem:[#allocation2 + $0x331] sm:$0xff] }
 0x521   :  { %v2546_v52 = vpop.permute.xlu2 %2545  ;;  %2057 = vrot.lane.b32.xlu1 %v10928_v31, %s8166_s27  ;;  %v5308_v31 = vsel %vm12770_vm13, %v5184_v42, %v5307_v23 }
 0x522   :  { %v4333_v16 = vrot.slane %v4227_v1, 2  ;;  %v7606_v7 = vrot.slane %v4227_v1, 9  ;;  %v2562_v12 = vpop.permute.xlu0 %2561  ;;  %v4334_v58 = vrot.slane %v4227_v1, 4  ;;  %v4335_v28 = vrot.slane %v4227_v1, 6 }
 0x523   :  { %v3343_v18 = vsel %vm3286_vm10, %v3278_v47, %v2562_v12  ;;  %v3767_v62 = vpop.f32.mrf.mxu1  ;;  %v11036_v6 = vpop.permute.xlu1 %2005  ;;  %v5309_v13 = vsel %vm12761_vm12, %v5185_v29, %v5308_v31  ;;  %v11087_v12 = vld [vmem:[#allocation2 + $0x332] sm:$0xff]  ;;  %v12854_v31 = vld [vmem:[#allocation35_spill] sm:$0xff] }
 0x524   :  { %v4930_v4 = vmax.f32 %v4227_v1, %v7606_v7  ;;  %v3408_v2 = vsel %vm3351_vm4, %v3343_v18, %v2818_v22  ;;  %v3875_v8 = vmul.f32 %v10678_v56, %v3767_v62  ;;  %v7607_v41 = vrot.slane %v4333_v16, 9  ;;  %v717_v1 = vld [vmem:[#allocation2 + $0x330] sm:$0xff] }
 0x525   :  { %7514 = vmatmul.msk.f32.gmra.mxu3 %vm3421_vm11, %v3408_v2  ;;  %v7608_v26 = vrot.slane %v4334_v58, 9  ;;  %v7609_v33 = vrot.slane %v4335_v28, 9 }
 0x526   :  { %v5186_v0 = vperm.slane %v4930_v4, 0  ;;  %v3943_v46 = vadd.f32 %v10688_v63, %v3875_v8  ;;  %v4931_v20 = vmax.f32 %v4333_v16, %v7607_v41  ;;  %v8115_v8 = vld [vmem:[#allocation2 + $0x1c8] sm:$0xff] }
 0x527   :  { %2551 = vrot.lane.b32.xlu2 %v11039_v38, %s8169_s30  ;;  %v4932_v49 = vmax.f32 %v4334_v58, %v7608_v26  ;;  %v4933_v55 = vmax.f32 %v4335_v28, %v7609_v33  ;;  %v709_v28 = vld [vmem:[#allocation2 + $0x2d0] sm:$0xff]  ;;  %v2931_v29 = vsel %vm55_vm0, %v8115_v8, %v12854_v31  ;;  %v718_v33 = vld [vmem:[#allocation2 + $0x338] sm:$0xff] }
 0x528   :  { %2295 = vrot.lane.b32.xlu0 %v708_v50, %s8167_s14  ;;  %v4007_v51 = vmax.f32 %v3943_v46, 0.0  ;;  %v5310_v54 = vsel %vm5236_vm2, %v5186_v0, %v5309_v13  ;;  %v5187_v53 = vperm.slane %v4931_v20, 0  ;;  %v12855_v50 = vld [vmem:[#allocation80_spill] sm:$0xff] }
 0x529   :  { %v3725_v22 = vpop.f32.mrf.mxu0  ;;  %v2802_v44 = vpop.permute.xlu2 %2801  ;;  %2807 = vrot.lane.b32.xlu1 %v11045_v40, %s8168_s28  ;;  %v5188_v43 = vperm.slane %v4932_v49, 0  ;;  %v5189_v3 = vperm.slane %v4933_v55, 0  ;;  %v2996_v41 = vsel %vm2961_vm6, %v2931_v29, %v12855_v50 }
 0x52a   :  { %v3861_v35 = vmul.f32 %v10678_v56, %v3725_v22  ;;  %4071 = vst.msk [vmem:[#allocation3 + $0x160] sm:$0xff] %vm3351_vm4, %v4007_v51  ;;  %v1778_v48 = vpop.permute.xlu0 %1777  ;;  %v5311_v37 = vsel %vm5238_vm3, %v5187_v53, %v5310_v54  ;;  %v12857_v51 = vld [vmem:[#allocation60_spill] sm:$0xff] }
 0x52b   :  { %v3140_v30 = vsel %vm3091_vm7, %v3075_v61, %v1778_v48  ;;  %v11063_v27 = vpop.permute.xlu1 %1795  ;;  %v5312_v42 = vsel %vm5240_vm15, %v5188_v43, %v5311_v37  ;;  %v12859_v53 = vld [vmem:[#allocation156_spill] sm:$0xff] }
 0x52c   :  { %v3929_v34 = vadd.f32 %v10688_v63, %v3861_v35  ;;  %v3205_v15 = vsel %vm3156_vm8, %v3140_v30, %v10986_v10  ;;  %v5313_v59 = vsel %vm5242_vm1, %v5189_v3, %v5312_v42 }
 0x52d   :  { %v3270_v24 = vsel %vm3221_vm9, %v3205_v15, %v11011_v5  ;;  %5376 = vst.msk [vmem:[#allocation4 + $0xd1] sm:$0xff] %vm3351_vm4, %v5313_v59 }
 0x52e   :  { %v3993_v47 = vmax.f32 %v3929_v34, 0.0  ;;  %v3335_v23 = vsel %vm3286_vm10, %v3270_v24, %v2546_v52 }
 0x52f   :  { %2569 = vrot.lane.b32.xlu2 %v11069_v17, %s8169_s30  ;;  %v3400_v10 = vsel %vm3351_vm4, %v3335_v23, %v2802_v44  ;;  %v11124_v44 = vld [vmem:[#allocation2 + $0x33a] sm:$0xff] }
 0x530   :  { %4057 = vst.msk [vmem:[#allocation3 + $0xf0] sm:$0xff] %vm3351_vm4, %v3993_v47  ;;  %2313 = vrot.lane.b32.xlu0 %v717_v1, %s8167_s14  ;;  %7506 = vmatmul.msk.f32.gmra.mxu1 %vm3421_vm11, %v3400_v10  ;;  %v11145_v47 = vld [vmem:[#allocation2 + $0x339] sm:$0xff] }
 0x531   :  { %v11083_v16 = vpop.permute.xlu2 %1751  ;;  %1785 = vrot.lane.b32.xlu1 %v10965_v57, %s8165_s25 }
 0x532   :  { %v2262_v5 = vpop.permute.xlu0 %2261 }
 0x533   :  { %v2052_v52 = vpop.permute.xlu1 %2051 }
 0x535   :  { %v3770_v7 = vpop.f32.mrf.mxu1 }
 0x536   :  { %v3876_v58 = vmul.f32 %v10678_v56, %v3770_v7 }
 0x537   :  { %2041 = vrot.lane.b32.xlu2 %v10998_v25, %s8166_s27  ;;  %v12856_v25 = vld [vmem:[#allocation145_spill] sm:$0xff] }
 0x538   :  { %v3944_v18 = vadd.f32 %v10688_v63, %v3876_v58  ;;  %2825 = vrot.lane.b32.xlu0 %v11087_v12, %s8168_s28  ;;  %v3061_v26 = vsel %vm3026_vm5, %v2996_v41, %v12856_v25  ;;  %v4172_v55 = vld [vmem:[#allocation3 + $0xf0] sm:$0xff]  ;;  %v12861_v58 = vld [vmem:[#allocation95_spill] sm:$0xff] }
 0x539   :  { %v11095_v62 = vpop.permute.xlu2 %2035  ;;  %2297 = vrot.lane.b32.xlu1 %v709_v28, %s8167_s14  ;;  %v3126_v0 = vsel %vm3091_vm7, %v3061_v26, %v10972_v19  ;;  %v11120_v54 = vmax.f32 %v4170_v36, %v4172_v55  ;;  %v710_v25 = vld [vmem:[#allocation2 + $0x2d8] sm:$0xff] }
 0x53a   :  { %v2518_v57 = vpop.permute.xlu0 %2517  ;;  %v4008_v4 = vmax.f32 %v3944_v18, 0.0  ;;  %v3191_v46 = vsel %vm3156_vm8, %v3126_v0, %v11036_v6  ;;  %v8116_v6 = vld [vmem:[#allocation2 + $0x2d8] sm:$0xff] }
 0x53b   :  { %v2308_v2 = vpop.permute.xlu1 %2307  ;;  %v3256_v20 = vsel %vm3221_vm9, %v3191_v46, %v2262_v5  ;;  %v4312_v61 = vrot.slane %v11120_v54, 2  ;;  %v7578_v23 = vrot.slane %v11120_v54, 9  ;;  %v12860_v5 = vld [vmem:[#allocation51_spill] sm:$0xff] }
 0x53c   :  { %4072 = vst.msk [vmem:[#allocation3 + $0x168] sm:$0xff] %vm3351_vm4, %v4008_v4  ;;  %v3321_v13 = vsel %vm3286_vm10, %v3256_v20, %v2518_v57  ;;  %v12862_v57 = vld [vmem:[#allocation160_spill] sm:$0xff]  ;;  %v4314_v4 = vrot.slane %v11120_v54, 6  ;;  %v774_v46 = vld [vmem:[#allocation2 + $0x2d9] sm:$0xff] }
 0x53d   :  { %v7579_v24 = vrot.slane %v4312_v61, 9  ;;  %v4902_v8 = vmax.f32 %v11120_v54, %v7578_v23 }
 0x53f   :  { %2059 = vrot.lane.b32.xlu2 %v10994_v21, %s8166_s27  ;;  %v837_v21 = vld [vmem:[#allocation2 + $0x2d2] sm:$0xff]  ;;  %v4903_v28 = vmax.f32 %v4312_v61, %v7579_v24  ;;  %v5158_v20 = vperm.slane %v4902_v8, 0 }
 0x540   :  { %1803 = vrot.lane.b32.xlu0 %v10980_v9, %s8165_s25  ;;  %v2954_v9 = vsel %vm55_vm0, %v8116_v6, %v12857_v51  ;;  %v12863_v8 = vld [vmem:[#allocation30_spill] sm:$0xff] }
 0x541   :  { %v2292_v49 = vpop.permute.xlu2 %2291  ;;  %2315 = vrot.lane.b32.xlu1 %v718_v33, %s8167_s14  ;;  %v3019_v22 = vsel %vm2961_vm6, %v2954_v9, %v12858_v11  ;;  %v5159_v26 = vperm.slane %v4903_v28, 0  ;;  %v7581_v33 = vrot.slane %v4314_v4, 9  ;;  %v11188_v11 = vld [vmem:[%s12552_s3] ss:$0 sm:$0xff] }
 0x542   :  { %v2774_v60 = vpop.permute.xlu0 %2773  ;;  %v3084_v43 = vsel %vm3026_vm5, %v3019_v22, %v12859_v53 }
 0x543   :  { %v3386_v19 = vsel %vm3351_vm4, %v3321_v13, %v2774_v60  ;;  %v2820_v39 = vpop.permute.xlu1 %2819  ;;  %v3149_v32 = vsel %vm3091_vm7, %v3084_v43, %v11063_v27  ;;  %v4313_v27 = vrot.slane %v11120_v54, 4  ;;  %v4171_v13 = vld [vmem:[#allocation3 + $0xe8] sm:$0xff]  ;;  %v5286_v6 = vsel %vm5230_vm14, %v5159_v26, %v5158_v20  ;;  %v838_v26 = vld [vmem:[#allocation2 + $0x2da] sm:$0xff] }
 0x544   :  { %7492 = vmatmul.msk.f32.gmra.mxu0 %vm3421_vm11, %v3386_v19  ;;  %v3214_v35 = vsel %vm3156_vm8, %v3149_v32, %v2052_v52  ;;  %v4905_v51 = vmax.f32 %v4314_v4, %v7581_v33  ;;  %v719_v43 = vld [vmem:[#allocation2 + $0x348] sm:$0xff]  ;;  %v12865_v33 = vld [vmem:[#allocation143_spill] sm:$0xff] }
 0x545   :  { %v3279_v30 = vsel %vm3221_vm9, %v3214_v35, %v2308_v2  ;;  %v7580_v7 = vrot.slane %v4313_v27, 9 }
 0x547   :  { %2809 = vrot.lane.b32.xlu2 %v837_v21, %s8168_s28  ;;  %v4904_v50 = vmax.f32 %v4313_v27, %v7580_v7  ;;  %v783_v27 = vld [vmem:[#allocation2 + $0x349] sm:$0xff] }
 0x548   :  { %2553 = vrot.lane.b32.xlu0 %v773_v45, %s8169_s30 }
 0x549   :  { %v2548_v48 = vpop.permute.xlu2 %2547  ;;  %2827 = vrot.lane.b32.xlu1 %v11124_v44, %s8168_s28  ;;  %v3728_v3 = vpop.f32.mrf.mxu0  ;;  %v5160_v60 = vperm.slane %v4904_v50, 0 }
 0x54a   :  { %v2564_v37 = vpop.permute.xlu0 %2563  ;;  %v3862_v34 = vmul.f32 %v10678_v56, %v3728_v3  ;;  %v8117_v56 = vld [vmem:[#allocation2 + $0x278] sm:$0xff] }
 0x54b   :  { %v3344_v15 = vsel %vm3286_vm10, %v3279_v30, %v2564_v37  ;;  %v11139_v42 = vpop.permute.xlu1 %2007  ;;  %v2946_v52 = vsel %vm55_vm0, %v8117_v56, %v12860_v5  ;;  %v5287_v61 = vsel %vm12770_vm13, %v5160_v60, %v5286_v6 }
 0x54c   :  { %v3409_v1 = vsel %vm3351_vm4, %v3344_v15, %v2820_v39  ;;  %v3930_v59 = vadd.f32 %v10688_v63, %v3862_v34  ;;  %v3011_v63 = vsel %vm2961_vm6, %v2946_v52, %v12861_v58  ;;  %v5161_v34 = vperm.slane %v4905_v51, 0  ;;  %v12867_v51 = vld [vmem:[#allocation104_spill] sm:$0xff] }
 0x54d   :  { %7515 = vmatmul.msk.f32.gmra.mxu3 %vm3421_vm11, %v3409_v1 }
 0x54e   :  { %v3994_v10 = vmax.f32 %v3930_v59, 0.0  ;;  %v5288_v5 = vsel %vm12761_vm12, %v5161_v34, %v5287_v61  ;;  %v5495_v34 = vld [vmem:[#allocation4 + $0x21] sm:$0xff] }
 0x54f   :  { %1787 = vrot.lane.b32.xlu2 %v11039_v38, %s8165_s25  ;;  %v3076_v38 = vsel %vm3026_vm5, %v3011_v63, %v12862_v57 }
 0x550   :  { %2571 = vrot.lane.b32.xlu0 %v11145_v47, %s8169_s30  ;;  %4058 = vst.msk [vmem:[#allocation3 + $0xf8] sm:$0xff] %vm3351_vm4, %v3994_v10 }
 0x551   :  { %v2804_v18 = vpop.permute.xlu2 %2803  ;;  %1805 = vrot.lane.b32.xlu1 %v11069_v17, %s8165_s25 }
 0x552   :  { %v1780_v2 = vpop.permute.xlu0 %1779 }
 0x553   :  { %v3141_v31 = vsel %vm3091_vm7, %v3076_v38, %v1780_v2  ;;  %v11164_v29 = vpop.permute.xlu1 %1797  ;;  %v8120_v2 = vld [vmem:[#allocation2 + $0x1d0] sm:$0xff] }
 0x554   :  { %v3206_v41 = vsel %vm3156_vm8, %v3141_v31, %v11095_v62  ;;  %v847_v31 = vld [vmem:[#allocation2 + $0x34a] sm:$0xff] }
 0x555   :  { %v3271_v17 = vsel %vm3221_vm9, %v3206_v41, %v2292_v49  ;;  %v11178_v49 = vld [vmem:[%s12551_s2] ss:$0 sm:$0xff]  ;;  %v12864_v41 = vld [vmem:[#allocation93_spill] sm:$0xff] }
 0x556   :  { %v3336_v0 = vsel %vm3286_vm10, %v3271_v17, %v2548_v48 }
 0x557   :  { %2299 = vrot.lane.b32.xlu2 %v710_v25, %s8167_s14  ;;  %v3401_v55 = vsel %vm3351_vm4, %v3336_v0, %v2804_v18  ;;  %v4173_v19 = vld [vmem:[#allocation3 + $0xf8] sm:$0xff] }
 0x558   :  { %2043 = vrot.lane.b32.xlu0 %v11045_v40, %s8166_s27  ;;  %7507 = vmatmul.msk.f32.gmra.mxu1 %vm3421_vm11, %v3401_v55  ;;  %v3797_v62 = vpop.f32.mrf.mxu3  ;;  %v4221_v39 = vmax.f32 %v4171_v13, %v4173_v19 }
 0x559   :  { %v3885_v36 = vmul.f32 %v11178_v49, %v3797_v62  ;;  %v11181_v21 = vpop.permute.xlu2 %1781  ;;  %2555 = vrot.lane.b32.xlu1 %v774_v46, %s8169_s30 }
 0x55a   :  { %v2264_v9 = vpop.permute.xlu0 %2263  ;;  %v4315_v40 = vrot.slane %v4221_v39, 2  ;;  %v4316_v54 = vrot.slane %v4221_v39, 4  ;;  %v7582_v45 = vrot.slane %v4221_v39, 9  ;;  %v4317_v32 = vrot.slane %v4221_v39, 6 }
 0x55b   :  { %v3953_v22 = vadd.f32 %v11188_v11, %v3885_v36  ;;  %v11191_v53 = vpop.permute.xlu1 %2053  ;;  %v8121_v36 = vld [vmem:[#allocation2 + $0x2e8] sm:$0xff] }
 0x55c   :  { %v7583_v35 = vrot.slane %v4315_v40, 9  ;;  %v4906_v48 = vmax.f32 %v4221_v39, %v7582_v45  ;;  %v7584_v37 = vrot.slane %v4316_v54, 9  ;;  %v7585_v1 = vrot.slane %v4317_v32, 9  ;;  %v720_v39 = vld [vmem:[#allocation2 + $0x350] sm:$0xff] }
 0x55d   :  { %v4017_v30 = vmax.f32 %v3953_v22, 0.0  ;;  %v3773_v3 = vpop.f32.mrf.mxu1 }
 0x55e   :  { %v3877_v15 = vmul.f32 %v11178_v49, %v3773_v3  ;;  %v5162_v24 = vperm.slane %v4906_v48, 0  ;;  %v4907_v59 = vmax.f32 %v4315_v40, %v7583_v35  ;;  %v4908_v23 = vmax.f32 %v4316_v54, %v7584_v37  ;;  %v848_v40 = vld [vmem:[#allocation2 + $0x352] sm:$0xff]  ;;  %v12868_v54 = vld [vmem:[#allocation167_spill] sm:$0xff] }
 0x55f   :  { %4081 = vst.msk [vmem:[#allocation3 + $0x1b0] sm:$0xff] %vm3351_vm4, %v4017_v30  ;;  %2317 = vrot.lane.b32.xlu2 %v719_v43, %s8167_s14  ;;  %v4909_v56 = vmax.f32 %v4317_v32, %v7585_v1  ;;  %v5398_v48 = vld [vmem:[#allocation4 + $0x1] sm:$0xff]  ;;  %v11247_v30 = vld [vmem:[#allocation4 + $0x12] sm:$0xff] }
 0x560   :  { %v3945_v10 = vadd.f32 %v11188_v11, %v3877_v15  ;;  %2061 = vrot.lane.b32.xlu0 %v11087_v12, %s8166_s27  ;;  %v5163_v7 = vperm.slane %v4907_v59, 0  ;;  %v5164_v58 = vperm.slane %v4908_v23, 0  ;;  %v5289_v63 = vsel %vm5236_vm2, %v5162_v24, %v5288_v5  ;;  %v784_v15 = vld [vmem:[#allocation2 + $0x351] sm:$0xff]  ;;  %v5414_v5 = vld [vmem:[#allocation4 + $0x2] sm:$0xff] }
 0x561   :  { %v11201_v52 = vpop.permute.xlu2 %2293  ;;  %2573 = vrot.lane.b32.xlu1 %v783_v27, %s8169_s30  ;;  %v5165_v38 = vperm.slane %v4909_v56, 0  ;;  %v2932_v12 = vsel %vm55_vm0, %v8120_v2, %v12863_v8  ;;  %v7737_v27 = vpack.i.bf16 %v5398_v48, %v11247_v30  ;;  %v5430_v1 = vld [vmem:[#allocation4 + $0x10] sm:$0xff]  ;;  %v11261_v56 = vld [vmem:[#allocation4 + $0x22] sm:$0xff] }
 0x562   :  { %v4009_v28 = vmax.f32 %v3945_v10, 0.0  ;;  %v2520_v18 = vpop.permute.xlu0 %2519  ;;  %v5290_v4 = vsel %vm5238_vm3, %v5163_v7, %v5289_v63  ;;  %v2997_v25 = vsel %vm2961_vm6, %v2932_v12, %v12864_v41  ;;  %v7747_v59 = vpack.i.bf16 %v5430_v1, %v5495_v34  ;;  %v5479_v7 = vld [vmem:[#allocation4 + $0x20] sm:$0xff]  ;;  %v11263_v63 = vld [vmem:[#allocation4 + $0x11] sm:$0xff] }
 0x563   :  { %v2310_v57 = vpop.permute.xlu1 %2309  ;;  %v5291_v50 = vsel %vm5240_vm15, %v5164_v58, %v5290_v4  ;;  %v3062_v0 = vsel %vm3026_vm5, %v2997_v25, %v12865_v33  ;;  %v12869_v4 = vld [vmem:[#allocation52_spill] sm:$0xff]  ;;  %v12870_v12 = vld [vmem:[#allocation114_spill] sm:$0xff] }
 0x564   :  { %4073 = vst.msk [vmem:[#allocation3 + $0x170] sm:$0xff] %vm3351_vm4, %v4009_v28  ;;  %v5292_v17 = vsel %vm5242_vm1, %v5165_v38, %v5291_v50  ;;  %v3127_v46 = vsel %vm3091_vm7, %v3062_v0, %v11083_v16  ;;  %v11265_v28 = vld [vmem:[#allocation4 + $0x31] sm:$0xff]  ;;  %v8123_v0 = vld [vmem:[#allocation2 + $0x288] sm:$0xff] }
 0x565   :  { %5373 = vst.msk [vmem:[#allocation4 + $0x81] sm:$0xff] %vm3351_vm4, %v5292_v17  ;;  %v3192_v20 = vsel %vm3156_vm8, %v3127_v46, %v11139_v42  ;;  %v12866_v42 = vld [vmem:[#allocation59_spill] sm:$0xff]  ;;  %v8122_v38 = vld [vmem:[#allocation2 + $0x2f0] sm:$0xff]  ;;  %v7762_v8 = vpack.i.bf16 %v5479_v7, %v11265_v28 }
 0x566   :  { %v3257_v55 = vsel %vm3221_vm9, %v3192_v20, %v2264_v9  ;;  %v2955_v6 = vsel %vm55_vm0, %v8121_v36, %v12866_v42  ;;  %v2956_v2 = vsel %vm55_vm0, %v8122_v38, %v12869_v4  ;;  %v12871_v25 = vld [vmem:[#allocation166_spill] sm:$0xff]  ;;  %v12872_v46 = vld [vmem:[#allocation43_spill] sm:$0xff] }
 0x567   :  { %2829 = vrot.lane.b32.xlu2 %v847_v31, %s8168_s28  ;;  %v3322_v60 = vsel %vm3286_vm10, %v3257_v55, %v2520_v18  ;;  %v3020_v9 = vsel %vm2961_vm6, %v2955_v6, %v12867_v51  ;;  %v7752_v18 = vpack.i.bf16 %v11263_v63, %v11261_v56  ;;  %v3021_v31 = vsel %vm2961_vm6, %v2956_v2, %v12870_v12  ;;  %v4186_v55 = vld [vmem:[#allocation3 + $0x160] sm:$0xff]  ;;  %v5480_v51 = vld [vmem:[#allocation4 + $0x30] sm:$0xff] }
 0x568   :  { %2811 = vrot.lane.b32.xlu0 %v838_v26, %s8168_s28  ;;  %v3086_v26 = vsel %vm3026_vm5, %v3021_v31, %v12871_v25  ;;  %v2947_v20 = vsel %vm55_vm0, %v8123_v0, %v12872_v46  ;;  %v11341_v25 = vld [vmem:[#allocation4 + $0x52] sm:$0xff] }
 0x569   :  { %v11223_v13 = vpop.permute.xlu2 %2311  ;;  %2063 = vrot.lane.b32.xlu1 %v11124_v44, %s8166_s27  ;;  %v3085_v44 = vsel %vm3026_vm5, %v3020_v9, %v12868_v54  ;;  %s8171_s27 = smov 64   ;;  %v8124_v46 = vld [vmem:[#allocation2 + $0x290] sm:$0xff] }
 0x56a   :  { %v2776_v19 = vpop.permute.xlu0 %2775  ;;  %v3150_v45 = vsel %vm3091_vm7, %v3085_v44, %v11164_v29 }
 0x56b   :  { %v3387_v62 = vsel %vm3351_vm4, %v3322_v60, %v2776_v19  ;;  %v2822_v16 = vpop.permute.xlu1 %2821  ;;  %v3215_v22 = vsel %vm3156_vm8, %v3150_v45, %v11191_v53  ;;  %v4188_v50 = vld [vmem:[#allocation3 + $0x170] sm:$0xff]  ;;  %v11297_v45 = vld [vmem:[#allocation4 + $0x41] sm:$0xff] }
 0x56c   :  { %7493 = vmatmul.msk.f32.gmra.mxu0 %vm3421_vm11, %v3387_v62  ;;  %v3280_v61 = vsel %vm3221_vm9, %v3215_v22, %v2310_v57  ;;  %v7742_v57 = vpack.i.bf16 %v5414_v5, %v5479_v7  ;;  %v11285_v62 = vld [vmem:[#allocation4 + $0x32] sm:$0xff]  ;;  %v11289_v36 = vmax.f32 %v4186_v55, %v4188_v50 }
 0x56d   :  { %v11326_v5 = vld [vmem:[#allocation4 + $0x51] sm:$0xff] }
 0x56e   :  { %v7610_v7 = vrot.slane %v11289_v36, 9 }
 0x56f   :  { %2319 = vrot.lane.b32.xlu2 %v720_v39, %s8167_s14 }
 0x570   :  { %1807 = vrot.lane.b32.xlu0 %v11145_v47, %s8165_s25  ;;  %s8170_s25 = smov 96   ;;  %v4934_v12 = vmax.f32 %v11289_v36, %v7610_v7 }
 0x571   :  { %v3731_v43 = vpop.f32.mrf.mxu0  ;;  %v11243_v32 = vpop.permute.xlu2 %2823  ;;  %2831 = vrot.lane.b32.xlu1 %v848_v40, %s8168_s28  ;;  %v12874_v40 = vld [vmem:[#allocation158_spill] sm:$0xff] }
 0x572   :  { %v2566_v35 = vpop.permute.xlu0 %2565  ;;  %v3863_v3 = vmul.f32 %v11178_v49, %v3731_v43 }
 0x573   :  { %v3345_v29 = vsel %vm3286_vm10, %v3280_v61, %v2566_v35  ;;  %v1800_v37 = vpop.permute.xlu1 %1799  ;;  %v7767_v61 = vpack.i.bf16 %v5495_v34, %v11285_v62 }
 0x574   :  { %v3410_v47 = vsel %vm3351_vm4, %v3345_v29, %v2822_v16  ;;  %v3931_v53 = vadd.f32 %v11188_v11, %v3863_v3  ;;  %v3151_v60 = vsel %vm3091_vm7, %v3086_v26, %v1800_v37  ;;  %v12873_v16 = vld [vmem:[#allocation108_spill] sm:$0xff]  ;;  %v7757_v3 = vpack.i.bf16 %v11247_v30, %v5480_v51 }
 0x575   :  { %7516 = vmatmul.msk.f32.gmra.mxu3 %vm3421_vm11, %v3410_v47  ;;  %v3012_v39 = vsel %vm2961_vm6, %v2947_v20, %v12873_v16  ;;  %v4336_v37 = vrot.slane %v11289_v36, 2  ;;  %v12875_v20 = vld [vmem:[#allocation56_spill] sm:$0xff]  ;;  %v12876_v16 = vld [vmem:[#allocation106_spill] sm:$0xff] }
 0x576   :  { %v3995_v24 = vmax.f32 %v3931_v53, 0.0  ;;  %v3077_v54 = vsel %vm3026_vm5, %v3012_v39, %v12874_v40  ;;  %v2948_v55 = vsel %vm55_vm0, %v8124_v46, %v12875_v20 }
 0x577   :  { %7738 = vrot.lane.b32.xlu2 %v7737_v27, %s8168_s28  ;;  %v3142_v22 = vsel %vm3091_vm7, %v3077_v54, %v11181_v21  ;;  %v7777_v21 = vpack.i.bf16 %v5480_v51, %v11297_v45  ;;  %v11321_v27 = vld [vmem:[#allocation4 + $0x42] sm:$0xff]  ;;  %v7611_v1 = vrot.slane %v4336_v37, 9  ;;  %v3013_v39 = vsel %vm2961_vm6, %v2948_v55, %v12876_v16 }
 0x578   :  { %2575 = vrot.lane.b32.xlu0 %v784_v15, %s8169_s30  ;;  %4059 = vst.msk [vmem:[#allocation3 + $0x100] sm:$0xff] %vm3351_vm4, %v3995_v24 }
 0x579   :  { %v11258_v23 = vpop.permute.xlu2 %1801  ;;  %7748 = vrot.lane.b32.xlu1 %v7747_v59, %s8170_s25  ;;  %v4935_v4 = vmax.f32 %v4336_v37, %v7611_v1 }
 0x57a   :  { %v2038_v10 = vpop.permute.xlu0 %2037 }
 0x57b   :  { %v2550_v58 = vpop.permute.xlu1 %2549  ;;  %v3207_v48 = vsel %vm3156_vm8, %v3142_v22, %v2038_v10  ;;  %v5481_v10 = vld [vmem:[#allocation4 + $0x40] sm:$0xff]  ;;  %v5191_v26 = vperm.slane %v4935_v4, 0 }
 0x57c   :  { %v3272_v47 = vsel %vm3221_vm9, %v3207_v48, %v11201_v52  ;;  %v7772_v38 = vpack.i.bf16 %v11261_v56, %v5481_v10  ;;  %v7792_v2 = vpack.i.bf16 %v5481_v10, %v11326_v5 }
 0x57d   :  { %v3337_v53 = vsel %vm3286_vm10, %v3272_v47, %v2550_v58  ;;  %v7782_v58 = vpack.i.bf16 %v11265_v28, %v11321_v27 }
 0x57f   :  { %7753 = vrot.lane.b32.xlu2 %v7752_v18, %s8168_s28 }
 0x580   :  { %v3800_v41 = vpop.f32.mrf.mxu3  ;;  %7743 = vrot.lane.b32.xlu0 %v7742_v57, %s8171_s27 }
 0x581   :  { %v3886_v17 = vmul.f32 %v11178_v49, %v3800_v41  ;;  %v11279_v33 = vpop.permute.xlu2 %2551  ;;  %7763 = vrot.lane.b32.xlu1 %v7762_v8, %s8170_s25  ;;  %v4338_v8 = vrot.slane %v11289_v36, 6 }
 0x582   :  { %v2056_v19 = vpop.permute.xlu0 %2055 }
 0x583   :  { %v3954_v42 = vadd.f32 %v11188_v11, %v3886_v17  ;;  %v3216_v6 = vsel %vm3156_vm8, %v3151_v60, %v2056_v19  ;;  %v2568_v9 = vpop.permute.xlu1 %2567  ;;  %v5482_v17 = vld [vmem:[#allocation4 + $0x50] sm:$0xff]  ;;  %v7613_v60 = vrot.slane %v4338_v8, 9  ;;  %v11347_v19 = vld [vmem:[#allocation4 + $0x61] sm:$0xff] }
 0x584   :  { %v3281_v44 = vsel %vm3221_vm9, %v3216_v6, %v11223_v13  ;;  %v12877_v6 = vld [vmem:[#allocation150_spill] sm:$0xff] }
 0x585   :  { %v4018_v43 = vmax.f32 %v3954_v42, 0.0  ;;  %v3346_v35 = vsel %vm3286_vm10, %v3281_v44, %v2568_v9  ;;  %v3776_v13 = vpop.f32.mrf.mxu1  ;;  %v7797_v42 = vpack.i.bf16 %v11297_v45, %v11341_v25  ;;  %v3078_v51 = vsel %vm3026_vm5, %v3013_v39, %v12877_v6  ;;  %v4187_v9 = vld [vmem:[#allocation3 + $0x168] sm:$0xff]  ;;  %v8125_v6 = vld [vmem:[#allocation2 + $0x300] sm:$0xff] }
 0x586   :  { %v3411_v29 = vsel %vm3351_vm4, %v3346_v35, %v11243_v32  ;;  %v3878_v30 = vmul.f32 %v11178_v49, %v3776_v13  ;;  %v4337_v32 = vrot.slane %v11289_v36, 4  ;;  %v5190_v36 = vperm.slane %v4934_v12, 0  ;;  %v11359_v35 = vld [vmem:[#allocation4 + $0x62] sm:$0xff] }
 0x587   :  { %4082 = vst.msk [vmem:[#allocation3 + $0x1b8] sm:$0xff] %vm3351_vm4, %v4018_v43  ;;  %7768 = vrot.lane.b32.xlu2 %v7767_v61, %s8168_s28  ;;  %7517 = vmatmul.msk.f32.gmra.mxu3 %vm3421_vm11, %v3411_v29  ;;  %v7787_v44 = vpack.i.bf16 %v11285_v62, %v5482_v17  ;;  %v7807_v61 = vpack.i.bf16 %v5482_v17, %v11347_v19 }
 0x588   :  { %7758 = vrot.lane.b32.xlu0 %v7757_v3, %s8171_s27  ;;  %v3946_v24 = vadd.f32 %v11188_v11, %v3878_v30  ;;  %v7612_v57 = vrot.slane %v4337_v32, 9  ;;  %v5314_v48 = vsel %vm5230_vm14, %v5191_v26, %v5190_v36  ;;  %v4937_v3 = vmax.f32 %v4338_v8, %v7613_v60 }
 0x589   :  { %v11316_v34 = vpop.permute.xlu2 %2569  ;;  %7778 = vrot.lane.b32.xlu1 %v7777_v21, %s8170_s25  ;;  %v7812_v1 = vpack.i.bf16 %v11326_v5, %v11359_v35 }
 0x58a   :  { %v2806_v15 = vpop.permute.xlu0 %2805  ;;  %v4010_v18 = vmax.f32 %v3946_v24, 0.0  ;;  %v4936_v50 = vmax.f32 %v4337_v32, %v7612_v57 }
 0x58b   :  { %v3402_v59 = vsel %vm3351_vm4, %v3337_v53, %v2806_v15  ;;  %v2040_v52 = vpop.permute.xlu1 %2039 }
 0x58c   :  { %7508 = vmatmul.msk.f32.gmra.mxu1 %vm3421_vm11, %v3402_v59  ;;  %4074 = vst.msk [vmem:[#allocation3 + $0x178] sm:$0xff] %vm3351_vm4, %v4010_v18  ;;  %v5192_v40 = vperm.slane %v4936_v50, 0  ;;  %v5483_v18 = vld [vmem:[#allocation4 + $0x60] sm:$0xff] }
 0x58d   :  { %v7802_v17 = vpack.i.bf16 %v11321_v27, %v5483_v18 }
 0x58e   :  { %v5315_v24 = vsel %vm12770_vm13, %v5192_v40, %v5314_v48 }
 0x58f   :  { %7783 = vrot.lane.b32.xlu2 %v7782_v58, %s8168_s28 }
 0x590   :  { %7773 = vrot.lane.b32.xlu0 %v7772_v38, %s8171_s27  ;;  %v5193_v38 = vperm.slane %v4937_v3, 0 }
 0x591   :  { %v11338_v31 = vpop.permute.xlu2 %2041  ;;  %7793 = vrot.lane.b32.xlu1 %v7792_v2, %s8170_s25 }
 0x592   :  { %v1784_v41 = vpop.permute.xlu0 %1783  ;;  %v5316_v20 = vsel %vm12761_vm12, %v5193_v38, %v5315_v24  ;;  %v5502_v38 = vld [vmem:[#allocation4 + $0x91] sm:$0xff] }
 0x593   :  { %v11343_v0 = vpop.permute.xlu1 %2057  ;;  %v4189_v54 = vld [vmem:[#allocation3 + $0x178] sm:$0xff]  ;;  %v3143_v43 = vsel %vm3091_vm7, %v3078_v51, %v1784_v41 }
 0x594   :  { %v4229_v22 = vmax.f32 %v4187_v9, %v4189_v54  ;;  %v3208_v53 = vsel %vm3156_vm8, %v3143_v43, %v2040_v52  ;;  %v5500_v52 = vld [vmem:[#allocation4 + $0x71] sm:$0xff] }
 0x595   :  { %v7822_v55 = vpack.i.bf16 %v5483_v18, %v5500_v52  ;;  %v12878_v51 = vld [vmem:[#allocation62_spill] sm:$0xff] }
 0x596   :  { %v4339_v29 = vrot.slane %v4229_v22, 2  ;;  %v4340_v37 = vrot.slane %v4229_v22, 4  ;;  %v7614_v21 = vrot.slane %v4229_v22, 9  ;;  %v4341_v30 = vrot.slane %v4229_v22, 6  ;;  %v11389_v54 = vld [vmem:[#allocation4 + $0x72] sm:$0xff] }
 0x597   :  { %7798 = vrot.lane.b32.xlu2 %v7797_v42, %s8168_s28  ;;  %v2957_v9 = vsel %vm55_vm0, %v8125_v6, %v12878_v51 }
 0x598   :  { %7788 = vrot.lane.b32.xlu0 %v7787_v44, %s8171_s27  ;;  %v7615_v59 = vrot.slane %v4339_v29, 9  ;;  %v4938_v10 = vmax.f32 %v4229_v22, %v7614_v21  ;;  %v7616_v57 = vrot.slane %v4340_v37, 9  ;;  %v7617_v8 = vrot.slane %v4341_v30, 9  ;;  %v12879_v22 = vld [vmem:[#allocation113_spill] sm:$0xff]  ;;  %v5501_v21 = vld [vmem:[#allocation4 + $0x81] sm:$0xff] }
 0x599   :  { %v3734_v13 = vpop.f32.mrf.mxu0  ;;  %v11363_v47 = vpop.permute.xlu2 %2059  ;;  %7808 = vrot.lane.b32.xlu1 %v7807_v61, %s8170_s25  ;;  %v3022_v43 = vsel %vm2961_vm6, %v2957_v9, %v12879_v22  ;;  %v5484_v61 = vld [vmem:[#allocation4 + $0x70] sm:$0xff] }
 0x59a   :  { %v3864_v32 = vmul.f32 %v11178_v49, %v3734_v13  ;;  %v2296_v15 = vpop.permute.xlu0 %2295  ;;  %v5194_v12 = vperm.slane %v4938_v10, 0  ;;  %v4939_v50 = vmax.f32 %v4339_v29, %v7615_v59  ;;  %v4940_v41 = vmax.f32 %v4340_v37, %v7616_v57  ;;  %v12880_v29 = vld [vmem:[#allocation159_spill] sm:$0xff] }
 0x59b   :  { %v3273_v7 = vsel %vm3221_vm9, %v3208_v53, %v2296_v15  ;;  %v2808_v58 = vpop.permute.xlu1 %2807  ;;  %v4941_v46 = vmax.f32 %v4341_v30, %v7617_v8  ;;  %v3087_v37 = vsel %vm3026_vm5, %v3022_v43, %v12880_v29  ;;  %v7827_v30 = vpack.i.bf16 %v11347_v19, %v11389_v54  ;;  %v11414_v19 = vld [vmem:[#allocation4 + $0x82] sm:$0xff]  ;;  %v6024_v43 = vld [vmem:[%s12553_s4 + $0x78] sm:$0xff] }
 0x59c   :  { %v3932_v4 = vadd.f32 %v11188_v11, %v3864_v32  ;;  %v3338_v2 = vsel %vm3286_vm10, %v3273_v7, %v11279_v33  ;;  %v5195_v60 = vperm.slane %v4939_v50, 0  ;;  %v5196_v33 = vperm.slane %v4940_v41, 0  ;;  %6093 = vmatpush.msrb.mxu1 %v6024_v43  ;;  %v6014_v43 = vld [vmem:[%s12553_s4 + $0x28] sm:$0xff] }
 0x59d   :  { %v3403_v5 = vsel %vm3351_vm4, %v3338_v2, %v2808_v58  ;;  %v5317_v16 = vsel %vm5236_vm2, %v5194_v12, %v5316_v20  ;;  %v5197_v36 = vperm.slane %v4941_v46, 0  ;;  %v3152_v13 = vsel %vm3091_vm7, %v3087_v37, %v11258_v23  ;;  %v5485_v58 = vld [vmem:[#allocation4 + $0x80] sm:$0xff]  ;;  %v12881_v46 = vld [vmem:[#allocation54_spill] sm:$0xff] }
 0x59e   :  { %v3996_v26 = vmax.f32 %v3932_v4, 0.0  ;;  %7509 = vmatmul.msk.f32.gmra.mxu1 %vm3421_vm11, %v3403_v5  ;;  %v5318_v42 = vsel %vm5238_vm3, %v5195_v60, %v5317_v16  ;;  %v3217_v32 = vsel %vm3156_vm8, %v3152_v13, %v11343_v0  ;;  %v7817_v53 = vpack.i.bf16 %v11341_v25, %v5484_v61 }
 0x59f   :  { %7813 = vrot.lane.b32.xlu2 %v7812_v1, %s8168_s28  ;;  %v5319_v44 = vsel %vm5240_vm15, %v5196_v33, %v5318_v42  ;;  %v7837_v1 = vpack.i.bf16 %v5484_v61, %v5501_v21  ;;  %v7842_v8 = vpack.i.bf16 %v5500_v52, %v11414_v19  ;;  %v7832_v5 = vpack.i.bf16 %v11359_v35, %v5485_v58  ;;  %v8126_v52 = vld [vmem:[#allocation2 + $0x2a0] sm:$0xff]  ;;  %v12882_v33 = vld [vmem:[#allocation98_spill] sm:$0xff] }
 0x5a0   :  { %4060 = vst.msk [vmem:[#allocation3 + $0x108] sm:$0xff] %vm3351_vm4, %v3996_v26  ;;  %7803 = vrot.lane.b32.xlu0 %v7802_v17, %s8171_s27  ;;  %v5320_v3 = vsel %vm5242_vm1, %v5197_v36, %v5319_v44  ;;  %v2949_v20 = vsel %vm55_vm0, %v8126_v52, %v12881_v46  ;;  %v12883_v36 = vld [vmem:[#allocation163_spill] sm:$0xff]  ;;  %v6019_v52 = vld [vmem:[%s12553_s4 + $0x50] sm:$0xff] }
 0x5a1   :  { %v11383_v39 = vpop.permute.xlu2 %2809  ;;  %7823 = vrot.lane.b32.xlu1 %v7822_v55, %s8170_s25  ;;  %5377 = vst.msk [vmem:[#allocation4 + $0xe1] sm:$0xff] %vm3351_vm4, %v5320_v3  ;;  %v5486_v55 = vld [vmem:[#allocation4 + $0x90] sm:$0xff]  ;;  %v3014_v16 = vsel %vm2961_vm6, %v2949_v20, %v12882_v33  ;;  %v6040_v61 = vld [vmem:[%s12553_s4 + $0xf8] sm:$0xff]  ;;  %v11453_v21 = vld [vmem:[#allocation4 + $0xc0] sm:$0xff] }
 0x5a2   :  { %v2314_v40 = vpop.permute.xlu0 %2313  ;;  %v3079_v42 = vsel %vm3026_vm5, %v3014_v16, %v12883_v36  ;;  %v7847_v51 = vpack.i.bf16 %v11389_v54, %v5486_v55  ;;  %v12884_v3 = vld [vmem:[#allocation61_spill] sm:$0xff]  ;;  %6158 = vmatpush.msra.mxu2 %v6040_v61  ;;  %v6033_v33 = vld [vmem:[%s12553_s4 + $0xc0] sm:$0xff]  ;;  %v6032_v36 = vld [vmem:[%s12553_s4 + $0xb8] sm:$0xff] }
 0x5a3   :  { %v1786_v48 = vpop.permute.xlu1 %1785  ;;  %v3282_v15 = vsel %vm3221_vm9, %v3217_v32, %v2314_v40  ;;  %v6035_v46 = vld [vmem:[%s12553_s4 + $0xd0] sm:$0xff]  ;;  %v6018_v20 = vld [vmem:[%s12553_s4 + $0x48] sm:$0xff]  ;;  %v6017_v16 = vld [vmem:[%s12553_s4 + $0x40] sm:$0xff] }
 0x5a4   :  { %v3347_v0 = vsel %vm3286_vm10, %v3282_v15, %v11316_v34  ;;  %v7852_v34 = vpack.i.bf16 %v5485_v58, %v5502_v38  ;;  %v3144_v6 = vsel %vm3091_vm7, %v3079_v42, %v1786_v48  ;;  %v8127_v48 = vld [vmem:[#allocation2 + $0x308] sm:$0xff]  ;;  %v6023_v15 = vld [vmem:[%s12553_s4 + $0x70] sm:$0xff]  ;;  %v6037_v58 = vld [vmem:[%s12553_s4 + $0xe0] sm:$0xff] }
 0x5a5   :  { %v3209_v9 = vsel %vm3156_vm8, %v3144_v6, %v11338_v31  ;;  %v2958_v29 = vsel %vm55_vm0, %v8127_v48, %v12884_v3  ;;  %v5422_v31 = vld [vmem:[#allocation4 + $0xa2] sm:$0xff]  ;;  %6094 = vmatpush.msrb.mxu1 %v6023_v15  ;;  %v6016_v42 = vld [vmem:[%s12553_s4 + $0x38] sm:$0xff] }
 0x5a6   :  { %v6034_v55 = vld [vmem:[%s12553_s4 + $0xc8] sm:$0xff]  ;;  %v8128_v48 = vld [vmem:[#allocation2 + $0x318] sm:$0xff] }
 0x5a7   :  { %7828 = vrot.lane.b32.xlu2 %v7827_v30, %s8168_s28  ;;  %v12885_v30 = vld [vmem:[#allocation107_spill] sm:$0xff]  ;;  %v6030_v61 = vld [vmem:[%s12553_s4 + $0xa8] sm:$0xff] }
 0x5a8   :  { %v3803_v24 = vpop.f32.mrf.mxu3  ;;  %7818 = vrot.lane.b32.xlu0 %v7817_v53, %s8171_s27  ;;  %v3023_v32 = vsel %vm2961_vm6, %v2958_v29, %v12885_v30  ;;  %v12887_v3 = vld [vmem:[#allocation55_spill] sm:$0xff]  ;;  %v12889_v15 = vld [vmem:[#allocation168_spill] sm:$0xff] }
 0x5a9   :  { %v3887_v59 = vmul.f32 %v11178_v49, %v3803_v24  ;;  %v11409_v10 = vpop.permute.xlu2 %1787  ;;  %7838 = vrot.lane.b32.xlu1 %v7837_v1, %s8170_s25  ;;  %v6039_v1 = vld [vmem:[%s12553_s4 + $0xf0] sm:$0xff]  ;;  %v2959_v29 = vsel %vm55_vm0, %v8128_v48, %v12887_v3  ;;  %v6013_v30 = vld [vmem:[%s12553_s4 + $0x20] sm:$0xff] }
 0x5aa   :  { %v2826_v23 = vpop.permute.xlu0 %2825  ;;  %v12886_v24 = vld [vmem:[#allocation169_spill] sm:$0xff]  ;;  %6159 = vmatpush.msra.mxu2 %v6039_v1 }
 0x5ab   :  { %v3955_v7 = vadd.f32 %v11188_v11, %v3887_v59  ;;  %v3412_v18 = vsel %vm3351_vm4, %v3347_v0, %v2826_v23  ;;  %v2298_v57 = vpop.permute.xlu1 %2297  ;;  %v3088_v59 = vsel %vm3026_vm5, %v3023_v32, %v12886_v24  ;;  %v7862_v0 = vpack.i.bf16 %v5422_v31, %v11453_v21  ;;  %v6029_v32 = vld [vmem:[%s12553_s4 + $0xa0] sm:$0xff] }
 0x5ac   :  { %7518 = vmatmul.msk.f32.gmra.mxu3 %vm3421_vm11, %v3412_v18  ;;  %v3274_v44 = vsel %vm3221_vm9, %v3209_v9, %v2298_v57  ;;  %v6021_v18 = vld [vmem:[%s12553_s4 + $0x60] sm:$0xff] }
 0x5ad   :  { %v4019_v4 = vmax.f32 %v3955_v7, 0.0  ;;  %v3779_v2 = vpop.f32.mrf.mxu1  ;;  %v6038_v7 = vld [vmem:[%s12553_s4 + $0xe8] sm:$0xff] }
 0x5ae   :  { %v3879_v12 = vmul.f32 %v11178_v49, %v3779_v2  ;;  %6160 = vmatpush.msra.mxu2 %v6038_v7 }
 0x5af   :  { %4083 = vst.msk [vmem:[#allocation3 + $0x1c0] sm:$0xff] %vm3351_vm4, %v4019_v4  ;;  %7843 = vrot.lane.b32.xlu2 %v7842_v8, %s8168_s28 }
 0x5b0   :  { %v3947_v50 = vadd.f32 %v11188_v11, %v3879_v12  ;;  %7833 = vrot.lane.b32.xlu0 %v7832_v5, %s8171_s27  ;;  %6161 = vmatpush.msra.mxu2 %v6037_v58  ;;  %v6020_v5 = vld [vmem:[%s12553_s4 + $0x58] sm:$0xff] }
 0x5b1   :  { %v11426_v41 = vpop.permute.xlu2 %2299  ;;  %7853 = vrot.lane.b32.xlu1 %v7852_v34, %s8170_s25  ;;  %v6036_v34 = vld [vmem:[%s12553_s4 + $0xd8] sm:$0xff] }
 0x5b2   :  { %v4011_v26 = vmax.f32 %v3947_v50, 0.0  ;;  %v1804_v17 = vpop.permute.xlu0 %1803  ;;  %6162 = vmatpush.msra.mxu2 %v6036_v34  ;;  %v6028_v58 = vld [vmem:[%s12553_s4 + $0x98] sm:$0xff]  ;;  %v12892_v34 = vld [vmem:[#allocation161_spill] sm:$0xff] }
 0x5b3   :  { %v2316_v60 = vpop.permute.xlu1 %2315  ;;  %v3153_v23 = vsel %vm3091_vm7, %v3088_v59, %v1804_v17  ;;  %v8129_v59 = vld [vmem:[#allocation2 + $0x2a8] sm:$0xff] }
 0x5b4   :  { %4075 = vst.msk [vmem:[#allocation3 + $0x180] sm:$0xff] %vm3351_vm4, %v4011_v26  ;;  %v3218_v57 = vsel %vm3156_vm8, %v3153_v23, %v11363_v47  ;;  %6163 = vmatpush.msra.mxu2 %v6035_v46  ;;  %v12890_v23 = vld [vmem:[#allocation46_spill] sm:$0xff] }
 0x5b5   :  { %v3283_v2 = vsel %vm3221_vm9, %v3218_v57, %v2316_v60  ;;  %v12891_v57 = vld [vmem:[#allocation110_spill] sm:$0xff] }
 0x5b6   :  { %6164 = vmatpush.msra.mxu2 %v6034_v55 }
 0x5b8   :  { %7848 = vrot.lane.b32.xlu0 %v7847_v51, %s8171_s27  ;;  %6165 = vmatpush.msra.mxu2 %v6033_v33 }
 0x5b9   :  { %v11441_v40 = vpop.permute.xlu2 %2317 }
 0x5ba   :  { %v2554_v22 = vpop.permute.xlu0 %2553  ;;  %6166 = vmatpush.msra.mxu2 %v6032_v36  ;;  %v6041_v36 = vld [vmem:[%s12553_s4 + $0x100] sm:$0xff] }
 0x5bb   :  { %v3339_v37 = vsel %vm3286_vm10, %v3274_v44, %v2554_v22  ;;  %v2828_v13 = vpop.permute.xlu1 %2827  ;;  %v6015_v44 = vld [vmem:[%s12553_s4 + $0x30] sm:$0xff] }
 0x5bc   :  { %v3404_v53 = vsel %vm3351_vm4, %v3339_v37, %v11383_v39  ;;  %v6022_v39 = vld [vmem:[%s12553_s4 + $0x68] sm:$0xff]  ;;  %v6031_v22 = vld [vmem:[%s12553_s4 + $0xb0] sm:$0xff] }
 0x5bd   :  { %7510 = vmatmul.msk.f32.gmra.mxu1 %vm3421_vm11, %v3404_v53  ;;  %6167 = vmatpush.msra.mxu2 %v6031_v22  ;;  %v12888_v37 = vld [vmem:[#allocation116_spill] sm:$0xff]  ;;  %v6044_v53 = vld [vmem:[%s12553_s4 + $0x118] sm:$0xff] }
 0x5be   :  { %6095 = vmatpush.msrb.mxu1 %v6022_v39  ;;  %v3024_v31 = vsel %vm2961_vm6, %v2959_v29, %v12888_v37  ;;  %6235 = vmatpush.msrb.mxu3 %v6044_v53  ;;  %v6025_v22 = vld [vmem:[%s12553_s4 + $0x80] sm:$0xff] }
 0x5bf   :  { %6168 = vmatpush.msra.mxu2 %v6030_v61  ;;  %v3089_v1 = vsel %vm3026_vm5, %v3024_v31, %v12889_v15  ;;  %v12894_v53 = vld [vmem:[#allocation115_spill] sm:$0xff] }
 0x5c0   :  { %7863 = vrot.lane.b32.xlu0 %v7862_v0, %s8171_s27  ;;  %6096 = vmatpush.msrb.mxu1 %v6021_v18  ;;  %v2950_v0 = vsel %vm55_vm0, %v8129_v59, %v12890_v23  ;;  %v6012_v18 = vld [vmem:[%s12553_s4 + $0x18] sm:$0xff]  ;;  %v4174_v59 = vld [vmem:[#allocation3 + $0x100] sm:$0xff] }
 0x5c1   :  { %v3737_v38 = vpop.f32.mrf.mxu0  ;;  %v11485_v4 = vpop.permute.xlu2 %2829  ;;  %6169 = vmatpush.msra.mxu2 %v6029_v32 }
 0x5c2   :  { %v3865_v8 = vmul.f32 %v11178_v49, %v3737_v38  ;;  %v2572_v12 = vpop.permute.xlu0 %2571  ;;  %6097 = vmatpush.msrb.mxu1 %v6020_v5  ;;  %v3015_v38 = vsel %vm2961_vm6, %v2950_v0, %v12891_v57  ;;  %v6043_v5 = vld [vmem:[%s12553_s4 + $0x110] sm:$0xff] }
 0x5c3   :  { %v3348_v47 = vsel %vm3286_vm10, %v3283_v2, %v2572_v12  ;;  %v1806_v50 = vpop.permute.xlu1 %1805  ;;  %6170 = vmatpush.msra.mxu2 %v6028_v58  ;;  %6236 = vmatpush.msrb.mxu3 %v6043_v5 }
 0x5c4   :  { %v3933_v26 = vadd.f32 %v11188_v11, %v3865_v8  ;;  %v3413_v17 = vsel %vm3351_vm4, %v3348_v47, %v2828_v13  ;;  %6098 = vmatpush.msrb.mxu1 %v6019_v52  ;;  %v3154_v39 = vsel %vm3091_vm7, %v3089_v1, %v1806_v50  ;;  %v3080_v47 = vsel %vm3026_vm5, %v3015_v38, %v12892_v34  ;;  %v6011_v50 = vld [vmem:[%s12553_s4 + $0x10] sm:$0xff] }
 0x5c5   :  { %7519 = vmatmul.msk.f32.gmra.mxu3 %vm3421_vm11, %v3413_v17  ;;  %v6042_v17 = vld [vmem:[%s12553_s4 + $0x108] sm:$0xff]  ;;  %v3145_v52 = vsel %vm3091_vm7, %v3080_v47, %v11409_v10  ;;  %v12895_v1 = vld [vmem:[#allocation162_spill] sm:$0xff] }
 0x5c6   :  { %v3997_v60 = vmax.f32 %v3933_v26, 0.0  ;;  %6099 = vmatpush.msrb.mxu1 %v6018_v20  ;;  %v6027_v26 = vld [vmem:[%s12553_s4 + $0x90] sm:$0xff]  ;;  %6237 = vmatpush.msrb.mxu3 %v6042_v17  ;;  %v6026_v10 = vld [vmem:[%s12553_s4 + $0x88] sm:$0xff] }
 0x5c7   :  { %6171 = vmatpush.msra.mxu2 %v6027_v26 }
 0x5c8   :  { %4061 = vst.msk [vmem:[#allocation3 + $0x110] sm:$0xff] %vm3351_vm4, %v3997_v60  ;;  %6100 = vmatpush.msrb.mxu1 %v6017_v16  ;;  %v6010_v16 = vld [vmem:[%s12553_s4 + $0x8] sm:$0xff]  ;;  %6238 = vmatpush.msrb.mxu3 %v6041_v36 }
 0x5c9   :  { %v11524_v51 = vpop.permute.xlu2 %2319  ;;  %6172 = vmatpush.msra.mxu2 %v6026_v10  ;;  %v5382_v10 = vld [vmem:[#allocation4] sm:$0xff] }
 0x5ca   :  { %v2044_v6 = vpop.permute.xlu0 %2043  ;;  %6101 = vmatpush.msrb.mxu1 %v6016_v42 }
 0x5cb   :  { %v11526_v9 = vpop.permute.xlu1 %2555  ;;  %v3210_v60 = vsel %vm3156_vm8, %v3145_v52, %v2044_v6  ;;  %6173 = vmatpush.msra.mxu2 %v6025_v22 }
 0x5cc   :  { %6102 = vmatpush.msrb.mxu1 %v6015_v44  ;;  %v6009_v44 = vld [vmem:[%s12553_s4] sm:$0xff] }
 0x5ce   :  { %6103 = vmatpush.msrb.mxu1 %v6014_v43  ;;  %v3275_v43 = vsel %vm3221_vm9, %v3210_v60, %v11426_v41  ;;  %v8130_v41 = vld [vmem:[#allocation2 + $0x320] sm:$0xff] }
 0x5cf   :  { %v4176_v32 = vld [vmem:[#allocation3 + $0x110] sm:$0xff] }
 0x5d0   :  { %v3806_v13 = vpop.f32.mrf.mxu3  ;;  %6104 = vmatpush.msrb.mxu1 %v6013_v30  ;;  %v4222_v0 = vmax.f32 %v4174_v59, %v4176_v32 }
 0x5d1   :  { %v3888_v24 = vmul.f32 %v11178_v49, %v3806_v13  ;;  %v11585_v20 = vpop.permute.xlu2 %7738  ;;  %v12893_v13 = vld [vmem:[#allocation63_spill] sm:$0xff] }
 0x5d2   :  { %v2062_v7 = vpop.permute.xlu0 %2061  ;;  %6105 = vmatpush.msrb.mxu1 %v6012_v18  ;;  %v2960_v30 = vsel %vm55_vm0, %v8130_v41, %v12893_v13  ;;  %v4318_v18 = vrot.slane %v4222_v0, 2  ;;  %v4320_v17 = vrot.slane %v4222_v0, 6  ;;  %v7586_v52 = vrot.slane %v4222_v0, 9 }
 0x5d3   :  { %v3956_v2 = vadd.f32 %v11188_v11, %v3888_v24  ;;  %v3219_v8 = vsel %vm3156_vm8, %v3154_v39, %v2062_v7  ;;  %v2574_v12 = vpop.permute.xlu1 %2573  ;;  %vm5927_vm0 = vcmask 523264  }
 0x5d4   :  { %v3284_v33 = vsel %vm3221_vm9, %v3219_v8, %v11441_v40  ;;  %6106 = vmatpush.msrb.mxu1 %v6011_v50  ;;  %v7587_v47 = vrot.slane %v4318_v18, 9  ;;  %v4910_v36 = vmax.f32 %v4222_v0, %v7586_v52 }
 0x5d5   :  { %v4020_v46 = vmax.f32 %v3956_v2, 0.0  ;;  %v3782_v55 = vpop.f32.mrf.mxu1  ;;  %v3349_v40 = vsel %vm3286_vm10, %v3284_v33, %v2574_v12  ;;  %v4319_v12 = vrot.slane %v4222_v0, 4  ;;  %v7741_v33 = vunpack.i.h.bf16 %v11585_v20 }
 0x5d6   :  { %v3880_v42 = vmul.f32 %v11178_v49, %v3782_v55  ;;  %v3414_v6 = vsel %vm3351_vm4, %v3349_v40, %v11485_v4  ;;  %6107 = vmatpush.msrb.mxu1 %v6010_v16  ;;  %v3340_v4 = vsel %vm3286_vm10, %v3275_v43, %v11526_v9  ;;  %v3025_v9 = vsel %vm2961_vm6, %v2960_v30, %v12894_v53  ;;  %v4175_v53 = vld [vmem:[#allocation3 + $0x108] sm:$0xff]  ;;  %vm12896_vm6 = vmmov %vm12770_vm13 }
 0x5d7   :  { %4084 = vst.msk [vmem:[#allocation3 + $0x1c8] sm:$0xff] %vm3351_vm4, %v4020_v46  ;;  %7520 = vmatmul.msk.f32.gmra.mxu3 %vm3421_vm11, %v3414_v6  ;;  %v3090_v24 = vsel %vm3026_vm5, %v3025_v9, %v12895_v1  ;;  %v7588_v55 = vrot.slane %v4319_v12, 9  ;;  %v4911_v60 = vmax.f32 %v4318_v18, %v7587_v47  ;;  %v7589_v16 = vrot.slane %v4320_v17, 9  ;;  %v5447_v47 = vld [vmem:[#allocation4 + $0x21] sm:$0xff]  ;;  %vm12902_vm13 = vmmov %vm12896_vm6 }
 0x5d8   :  { %v3948_v61 = vadd.f32 %v11188_v11, %v3880_v42  ;;  %6108 = vmatpush.msrb.mxu1 %v6009_v44  ;;  %vm5944_vm5 = vcmask 785408   ;;  %v5166_v13 = vperm.slane %v4910_v36, 0 }
 0x5d9   :  { %v11619_v31 = vpop.permute.xlu2 %7753  ;;  %v4912_v44 = vmax.f32 %v4319_v12, %v7588_v55 }
 0x5da   :  { %v2812_v48 = vpop.permute.xlu0 %2811  ;;  %v4012_v3 = vmax.f32 %v3948_v61, 0.0  ;;  %v7755_v1 = vunpack.i.l.bf16 %v11619_v31 }
 0x5db   :  { %v3405_v29 = vsel %vm3351_vm4, %v3340_v4, %v2812_v48  ;;  %v2064_v37 = vpop.permute.xlu1 %2063  ;;  %v5167_v48 = vperm.slane %v4911_v60, 0  ;;  %v5168_v9 = vperm.slane %v4912_v44, 0 }
 0x5dc   :  { %7511 = vmatmul.msk.f32.gmra.mxu1 %vm3421_vm11, %v3405_v29  ;;  %4076 = vst.msk [vmem:[#allocation3 + $0x188] sm:$0xff] %vm3351_vm4, %v4012_v3  ;;  %v5911_v3 = vsel %vm3351_vm4, %v5382_v10, %v7741_v33  ;;  %v4913_v29 = vmax.f32 %v4320_v17, %v7589_v16 }
 0x5dd   :  { %v5293_v59 = vsel %vm5230_vm14, %v5167_v48, %v5166_v13 }
 0x5e1   :  { %v11629_v58 = vpop.permute.xlu2 %7768 }
 0x5e2   :  { %v1808_v15 = vpop.permute.xlu0 %1807  ;;  %v7770_v44 = vunpack.i.l.bf16 %v11629_v58 }
 0x5e3   :  { %v2832_v23 = vpop.permute.xlu1 %2831  ;;  %v3155_v39 = vsel %vm3091_vm7, %v3090_v24, %v1808_v15  ;;  %vm12897_vm7 = vmmov %vm12761_vm12 }
 0x5e4   :  { %v3220_v7 = vsel %vm3156_vm8, %v3155_v39, %v2064_v37  ;;  %vm12898_vm8 = vmmov %vm12896_vm6 }
 0x5e5   :  { %v3285_v2 = vsel %vm3221_vm9, %v3220_v7, %v11524_v51  ;;  %v7740_v51 = vunpack.i.l.bf16 %v11585_v20  ;;  %vm12899_vm9 = vmmov %vm12897_vm7 }
 0x5e6   :  { %vm12903_vm12 = vmmov %vm12897_vm7 }
 0x5e7   :  { %v5961_v20 = vsel %vm3351_vm4, %v11263_v63, %v7740_v51  ;;  %v7756_v63 = vunpack.i.h.bf16 %v11619_v31 }
 0x5e9   :  { %v3740_v57 = vpop.f32.mrf.mxu0  ;;  %v11641_v22 = vpop.permute.xlu2 %7783 }
 0x5ea   :  { %v3866_v38 = vmul.f32 %v11178_v49, %v3740_v57  ;;  %v2576_v8 = vpop.permute.xlu0 %2575 }
 0x5eb   :  { %v3350_v5 = vsel %vm3286_vm10, %v3285_v2, %v2576_v8  ;;  %v7749_v34 = vpop.permute.xlu1 %7748  ;;  %vm12900_vm10 = vmmov %vm12896_vm6 }
 0x5ec   :  { %v3934_v50 = vadd.f32 %v11188_v11, %v3866_v38  ;;  %v3415_v26 = vsel %vm3351_vm4, %v3350_v5, %v2832_v23  ;;  %v7751_v42 = vunpack.i.h.bf16 %v7749_v34  ;;  %v7750_v40 = vunpack.i.l.bf16 %v7749_v34  ;;  %v5383_v34 = vld [vmem:[#allocation4 + $0x10] sm:$0xff] }
 0x5ed   :  { %7521 = vmatmul.msk.f32.gmra.mxu3 %vm3421_vm11, %v3415_v26  ;;  %v5169_v23 = vperm.slane %v4913_v29, 0  ;;  %v5912_v52 = vsel %vm3351_vm4, %v5383_v34, %v7756_v63  ;;  %vm12901_vm11 = vmmov %vm12897_vm7 }
 0x5ee   :  { %v3998_v46 = vmax.f32 %v3934_v50, 0.0  ;;  %v5294_v50 = vsel %vm12896_vm6, %v5168_v9, %v5293_v59 }
 0x5f0   :  { %4062 = vst.msk [vmem:[#allocation3 + $0x118] sm:$0xff] %vm3351_vm4, %v3998_v46 }
 0x5f1   :  { %v11660_v46 = vpop.permute.xlu2 %7798 }
 0x5f2   :  { %v7744_v6 = vpop.permute.xlu0 %7743 }
 0x5f3   :  { %v7746_v43 = vunpack.i.h.bf16 %v7744_v6  ;;  %v7745_v61 = vunpack.i.l.bf16 %v7744_v6  ;;  %v7764_v4 = vpop.permute.xlu1 %7763  ;;  %v5295_v6 = vsel %vm12897_vm7, %v5169_v23, %v5294_v50  ;;  %v5385_v50 = vld [vmem:[#allocation4 + $0x30] sm:$0xff]  ;;  %vm6381_vm7 = vcmask 258048  }
 0x5f4   :  { %v7766_v39 = vunpack.i.h.bf16 %v7764_v4  ;;  %v7765_v38 = vunpack.i.l.bf16 %v7764_v4  ;;  %6383 = vst.msk [vmem:[#allocation6 + $0x15] sm:$0x1f] %vm6381_vm7, %v12745_v14 }
 0x5f5   :  { %7650 = vmatmul.msk.f32.vlgmr.msrb.gmra.mxu3 %vm3351_vm4, %v11261_v56  ;;  %v5928_v37 = vsel %vm5927_vm0, %v5911_v3, %v7746_v43  ;;  %v5977_v41 = vsel %vm5927_vm0, %v5961_v20, %v7745_v61  ;;  %6384 = vst.msk [vmem:[#allocation6 + $0x25] sm:$0x1f] %vm6381_vm7, %v12745_v14 }
 0x5f6   :  { %v5945_v30 = vsel %vm5944_vm5, %v5928_v37, %v7751_v42  ;;  %v5993_v32 = vsel %vm5944_vm5, %v5977_v41, %v7750_v40  ;;  %6382 = vst.msk [vmem:[#allocation6 + $0x5] sm:$0x1f] %vm6381_vm7, %v12745_v14 }
 0x5f7   :  { %v4177_v15 = vld [vmem:[#allocation3 + $0x118] sm:$0xff]  ;;  %6109 = vmatmul.f32.vlgmr.msrb.gmra.mxu1 %v5945_v30  ;;  %6174 = vmatmul.f32.vlgmr.msra.gmra.mxu2 %v5993_v32  ;;  %v5384_v30 = vld [vmem:[#allocation4 + $0x20] sm:$0xff]  ;;  %6385 = vst.msk [vmem:[#allocation6 + $0x35] sm:$0x1f] %vm6381_vm7, %v12745_v14 }
 0x5f8   :  { %v4223_v24 = vmax.f32 %v4175_v53, %v4177_v15  ;;  %v3809_v56 = vpop.f32.mrf.mxu3  ;;  %6386 = vst.msk [vmem:[#allocation6 + $0x45] sm:$0x1f] %vm6381_vm7, %v12745_v14 }
 0x5f9   :  { %v3889_v0 = vmul.f32 %v11178_v49, %v3809_v56  ;;  %v5962_v49 = vsel %vm3351_vm4, %v5447_v47, %v7755_v1  ;;  %6387 = vst.msk [vmem:[#allocation6 + $0x55] sm:$0x1f] %vm6381_vm7, %v12745_v14 }
 0x5fa   :  { %v4321_v7 = vrot.slane %v4223_v24, 2  ;;  %v4322_v18 = vrot.slane %v4223_v24, 4  ;;  %v7590_v57 = vrot.slane %v4223_v24, 9  ;;  %v7759_v2 = vpop.permute.xlu0 %7758  ;;  %v4323_v33 = vrot.slane %v4223_v24, 6  ;;  %6388 = vst.msk [vmem:[#allocation6 + $0x65] sm:$0x1f] %vm6381_vm7, %v12745_v14 }
 0x5fb   :  { %v3957_v8 = vadd.f32 %v11188_v11, %v3889_v0  ;;  %v7761_v12 = vunpack.i.h.bf16 %v7759_v2  ;;  %v7760_v5 = vunpack.i.l.bf16 %v7759_v2  ;;  %v7779_v31 = vpop.permute.xlu1 %7778  ;;  %6389 = vst.msk [vmem:[#allocation6 + $0x75] sm:$0x1f] %vm6381_vm7, %v12745_v14 }
 0x5fc   :  { %v7591_v26 = vrot.slane %v4321_v7, 9  ;;  %v4914_v17 = vmax.f32 %v4223_v24, %v7590_v57  ;;  %v7592_v36 = vrot.slane %v4322_v18, 9  ;;  %v7593_v42 = vrot.slane %v4323_v33, 9  ;;  %6390 = vst.msk [vmem:[#allocation6 + $0x85] sm:$0x1f] %vm6381_vm7, %v12745_v14 }
 0x5fd   :  { %v4021_v55 = vmax.f32 %v3957_v8, 0.0  ;;  %7651 = vmatmul.msk.f32.gmra.mxu3 %vm3351_vm4, %v11285_v62  ;;  %v5929_v11 = vsel %vm5927_vm0, %v5912_v52, %v7761_v12  ;;  %v5978_v60 = vsel %vm5927_vm0, %v5962_v49, %v7760_v5  ;;  %v7771_v62 = vunpack.i.h.bf16 %v11629_v58  ;;  %6391 = vst.msk [vmem:[#allocation6 + $0x95] sm:$0x1f] %vm6381_vm7, %v12745_v14 }
 0x5fe   :  { %v5170_v51 = vperm.slane %v4914_v17, 0  ;;  %v5946_v16 = vsel %vm5944_vm5, %v5929_v11, %v7766_v39  ;;  %v5994_v10 = vsel %vm5944_vm5, %v5978_v60, %v7765_v38  ;;  %v4915_v40 = vmax.f32 %v4321_v7, %v7591_v26  ;;  %v11686_v39 = vpop.permute.xlu2 %7813  ;;  %v11695_v38 = vld [vmem:[%s12551_s2] ss:$0 sm:$0xff]  ;;  %v5406_v26 = vld [vmem:[#allocation4 + $0xa1] sm:$0xff]  ;;  %6392 = vst.msk [vmem:[#allocation6 + $0xa5] sm:$0x1f] %vm6381_vm7, %v12745_v14 }
 0x5ff   :  { %4085 = vst.msk [vmem:[#allocation3 + $0x1d0] sm:$0xff] %vm3351_vm4, %v4021_v55  ;;  %6112 = vmatmul.f32.gmra.mxu1 %v5946_v16  ;;  %6177 = vmatmul.f32.gmra.mxu2 %v5994_v10  ;;  %v4916_v43 = vmax.f32 %v4322_v18, %v7592_v36  ;;  %v4917_v4 = vmax.f32 %v4323_v33, %v7593_v42  ;;  %v7781_v3 = vunpack.i.h.bf16 %v7779_v31  ;;  %v7780_v20 = vunpack.i.l.bf16 %v7779_v31 }
 0x600   :  { %v5296_v61 = vsel %vm5236_vm2, %v5170_v51, %v5295_v6  ;;  %v5171_v48 = vperm.slane %v4915_v40, 0  ;;  %v5913_v15 = vsel %vm3351_vm4, %v5384_v30, %v7771_v62  ;;  %v5963_v58 = vsel %vm3351_vm4, %v11265_v28, %v7770_v44  ;;  %v4198_v28 = vld [vmem:[#allocation3 + $0x1c0] sm:$0xff]  ;;  %v11719_v62 = vld [vmem:[#allocation4 + $0xd0] sm:$0xff]  ;;  %6393 = vst.msk [vmem:[#allocation6 + $0xb5] sm:$0x1f] %vm6381_vm7, %v12745_v14 }
 0x601   :  { %v5172_v37 = vperm.slane %v4916_v43, 0  ;;  %v5173_v53 = vperm.slane %v4917_v4, 0  ;;  %v7785_v7 = vunpack.i.l.bf16 %v11641_v22  ;;  %v11717_v6 = vld [vmem:[#allocation4 + $0xc1] sm:$0xff]  ;;  %v7801_v44 = vunpack.i.h.bf16 %v11660_v46 }
 0x602   :  { %v7774_v29 = vpop.permute.xlu0 %7773  ;;  %v5297_v9 = vsel %vm5238_vm3, %v5171_v48, %v5296_v61  ;;  %v7800_v4 = vunpack.i.l.bf16 %v11660_v46  ;;  %v5386_v30 = vld [vmem:[#allocation4 + $0x40] sm:$0xff] }
 0x603   :  { %v7776_v41 = vunpack.i.h.bf16 %v7774_v29  ;;  %v7775_v13 = vunpack.i.l.bf16 %v7774_v29  ;;  %v7794_v32 = vpop.permute.xlu1 %7793  ;;  %v5298_v63 = vsel %vm5240_vm15, %v5172_v37, %v5297_v9  ;;  %v5964_v55 = vsel %vm3351_vm4, %v11297_v45, %v7785_v7 }
 0x604   :  { %v5299_v56 = vsel %vm5242_vm1, %v5173_v53, %v5298_v63  ;;  %v7796_v8 = vunpack.i.h.bf16 %v7794_v32  ;;  %v7795_v12 = vunpack.i.l.bf16 %v7794_v32 }
 0x605   :  { %7652 = vmatmul.msk.f32.gmra.mxu3 %vm3351_vm4, %v11321_v27  ;;  %v5930_v1 = vsel %vm5927_vm0, %v5913_v15, %v7776_v41  ;;  %v5979_v24 = vsel %vm5927_vm0, %v5963_v58, %v7775_v13  ;;  %5374 = vst.msk [vmem:[#allocation4 + $0xb1] sm:$0xff] %vm3351_vm4, %v5299_v56  ;;  %v7786_v27 = vunpack.i.h.bf16 %v11641_v22  ;;  %v11701_v22 = vld [vmem:[%s12552_s3] ss:$0 sm:$0xff]  ;;  %v5915_v15 = vsel %vm3351_vm4, %v5386_v30, %v7801_v44  ;;  %v5450_v58 = vld [vmem:[#allocation4 + $0x51] sm:$0xff] }
 0x606   :  { %v4200_v59 = vld [vmem:[#allocation3 + $0x1d0] sm:$0xff]  ;;  %v5947_v23 = vsel %vm5944_vm5, %v5930_v1, %v7781_v3  ;;  %v5995_v0 = vsel %vm5944_vm5, %v5979_v24, %v7780_v20  ;;  %v11730_v3 = vpop.permute.xlu2 %7828  ;;  %v7816_v24 = vunpack.i.h.bf16 %v11686_v39  ;;  %v7815_v56 = vunpack.i.l.bf16 %v11686_v39 }
 0x607   :  { %6115 = vmatmul.f32.gmra.mxu1 %v5947_v23  ;;  %6180 = vmatmul.f32.gmra.mxu2 %v5995_v0  ;;  %v11690_v18 = vmax.f32 %v4198_v28, %v4200_v59  ;;  %v5914_v49 = vsel %vm3351_vm4, %v5385_v50, %v7786_v27  ;;  %v5965_v59 = vsel %vm3351_vm4, %v5450_v58, %v7800_v4  ;;  %v11745_v23 = vld [vmem:[#allocation4 + $0xd1] sm:$0xff]  ;;  %v11747_v0 = vld [vmem:[#allocation4 + $0xc2] sm:$0xff] }
 0x608   :  { %v11749_v28 = vld [vmem:[#allocation4 + $0xe0] sm:$0xff]  ;;  %v7882_v50 = vpack.i.bf16 %v11453_v21, %v11745_v23 }
 0x609   :  { %v3785_v57 = vpop.f32.mrf.mxu1  ;;  %v4354_v60 = vrot.slane %v11690_v18, 2  ;;  %v4355_v48 = vrot.slane %v11690_v18, 4  ;;  %v4356_v46 = vrot.slane %v11690_v18, 6  ;;  %v7634_v1 = vrot.slane %v11690_v18, 9 }
 0x60a   :  { %v3881_v2 = vmul.f32 %v11695_v38, %v3785_v57  ;;  %v7789_v5 = vpop.permute.xlu0 %7788  ;;  %v3812_v34 = vpop.f32.mrf.mxu3 }
 0x60b   :  { %v7791_v47 = vunpack.i.h.bf16 %v7789_v5  ;;  %v7790_v31 = vunpack.i.l.bf16 %v7789_v5  ;;  %v7809_v17 = vpop.permute.xlu1 %7808  ;;  %v3890_v11 = vmul.f32 %v11695_v38, %v3812_v34  ;;  %v7635_v29 = vrot.slane %v4354_v60, 9  ;;  %v11761_v5 = vld [vmem:[#allocation4 + $0xe1] sm:$0xff] }
 0x60c   :  { %v3949_v52 = vadd.f32 %v11701_v22, %v3881_v2  ;;  %v5470_v16 = vld [vmem:[#allocation4 + $0xb2] sm:$0xff]  ;;  %v7811_v37 = vunpack.i.h.bf16 %v7809_v17  ;;  %v7810_v41 = vunpack.i.l.bf16 %v7809_v17  ;;  %v7636_v39 = vrot.slane %v4355_v48, 9 }
 0x60d   :  { %7653 = vmatmul.msk.f32.gmra.mxu3 %vm3351_vm4, %v11341_v25  ;;  %v5931_v33 = vsel %vm5927_vm0, %v5914_v49, %v7791_v47  ;;  %v5980_v51 = vsel %vm5927_vm0, %v5964_v55, %v7790_v31  ;;  %v11713_v10 = vld [vmem:[#allocation4 + $0xb0] sm:$0xff]  ;;  %v7857_v45 = vpack.i.bf16 %v5406_v26, %v5470_v16  ;;  %v7877_v43 = vpack.i.bf16 %v5470_v16, %v11719_v62  ;;  %v4190_v31 = vld [vmem:[#allocation3 + $0x180] sm:$0xff] }
 0x60e   :  { %v4013_v36 = vmax.f32 %v3949_v52, 0.0  ;;  %v5948_v42 = vsel %vm5944_vm5, %v5931_v33, %v7796_v8  ;;  %v5996_v40 = vsel %vm5944_vm5, %v5980_v51, %v7795_v12  ;;  %v7867_v25 = vpack.i.bf16 %v11713_v10, %v11717_v6  ;;  %v11734_v32 = vld [vmem:[#allocation4 + $0xb1] sm:$0xff]  ;;  %v5451_v33 = vld [vmem:[#allocation4 + $0x61] sm:$0xff] }
 0x60f   :  { %6118 = vmatmul.f32.gmra.mxu1 %v5948_v42  ;;  %6183 = vmatmul.f32.gmra.mxu2 %v5996_v40  ;;  %v3958_v61 = vadd.f32 %v11701_v22, %v3890_v11  ;;  %v7872_v57 = vpack.i.bf16 %v11734_v32, %v11747_v0  ;;  %v11757_v2 = vld [vmem:[#allocation4 + $0xd2] sm:$0xff]  ;;  %v7637_v34 = vrot.slane %v4356_v46, 9  ;;  %v4959_v47 = vmax.f32 %v4354_v60, %v7635_v29  ;;  %v5388_v29 = vld [vmem:[#allocation4 + $0x60] sm:$0xff] }
 0x610   :  { %4077 = vst.msk [vmem:[#allocation3 + $0x190] sm:$0xff] %vm3351_vm4, %v4013_v36  ;;  %7858 = vrot.lane.b32.xlu2 %v7857_v45, %s8168_s28  ;;  %7868 = vrot.lane.b32.xlu1 %v7867_v25, %s8170_s25  ;;  %v7892_v26 = vpack.i.bf16 %v11747_v0, %v11749_v28  ;;  %v7831_v17 = vunpack.i.h.bf16 %v11730_v3  ;;  %v7830_v52 = vunpack.i.l.bf16 %v11730_v3  ;;  %v5387_v55 = vld [vmem:[#allocation4 + $0x50] sm:$0xff]  ;;  %v7887_v11 = vpack.i.bf16 %v11717_v6, %v11757_v2  ;;  %v4199_v25 = vld [vmem:[#allocation3 + $0x1c8] sm:$0xff] }
 0x611   :  { %7878 = vrot.lane.b32.xlu0 %v7877_v43, %s8171_s27  ;;  %v4022_v20 = vmax.f32 %v3958_v61, 0.0  ;;  %v4958_v60 = vmax.f32 %v11690_v18, %v7634_v1  ;;  %v5916_v21 = vsel %vm3351_vm4, %v5387_v55, %v7816_v24  ;;  %v7897_v51 = vpack.i.bf16 %v11719_v62, %v11761_v5  ;;  %v11783_v18 = vpop.permute.xlu2 %7843  ;;  %v5452_v62 = vld [vmem:[#allocation4 + $0x71] sm:$0xff] }
 0x612   :  { %v7804_v13 = vpop.permute.xlu0 %7803  ;;  %v5966_v42 = vsel %vm3351_vm4, %v5451_v33, %v7815_v56  ;;  %v4960_v40 = vmax.f32 %v4355_v48, %v7636_v39  ;;  %v11781_v45 = vmax.f32 %v4356_v46, %v7637_v34  ;;  %v5215_v44 = vperm.slane %v4959_v47, 0 }
 0x613   :  { %4086 = vst.msk [vmem:[#allocation3 + $0x1d8] sm:$0xff] %vm3351_vm4, %v4022_v20  ;;  %v7806_v53 = vunpack.i.h.bf16 %v7804_v13  ;;  %v7805_v9 = vunpack.i.l.bf16 %v7804_v13  ;;  %v11739_v63 = vpop.permute.xlu1 %7823  ;;  %v5917_v48 = vsel %vm3351_vm4, %v5388_v29, %v7831_v17  ;;  %v5967_v13 = vsel %vm3351_vm4, %v5452_v62, %v7830_v52 }
 0x614   :  { %v7826_v43 = vunpack.i.h.bf16 %v11739_v63  ;;  %v7825_v61 = vunpack.i.l.bf16 %v11739_v63  ;;  %v5214_v30 = vperm.slane %v4958_v60, 0  ;;  %v7846_v58 = vunpack.i.h.bf16 %v11783_v18 }
 0x615   :  { %7654 = vmatmul.msk.f32.gmra.mxu3 %vm3351_vm4, %v11359_v35  ;;  %v5932_v27 = vsel %vm5927_vm0, %v5915_v15, %v7806_v53  ;;  %v5981_v7 = vsel %vm5927_vm0, %v5965_v59, %v7805_v9  ;;  %v7845_v63 = vunpack.i.l.bf16 %v11783_v18  ;;  %v5216_v1 = vperm.slane %v4960_v40, 0 }
 0x616   :  { %v5949_v8 = vsel %vm5944_vm5, %v5932_v27, %v7811_v37  ;;  %v5997_v12 = vsel %vm5944_vm5, %v5981_v7, %v7810_v41  ;;  %v5217_v24 = vperm.slane %v11781_v45, 0  ;;  %v5335_v27 = vsel %vm5230_vm14, %v5215_v44, %v5214_v30 }
 0x617   :  { %v4192_v35 = vld [vmem:[#allocation3 + $0x190] sm:$0xff]  ;;  %6121 = vmatmul.f32.gmra.mxu1 %v5949_v8  ;;  %6186 = vmatmul.f32.gmra.mxu2 %v5997_v12  ;;  %v5336_v52 = vsel %vm12898_vm8, %v5216_v1, %v5335_v27  ;;  %v4191_v1 = vld [vmem:[#allocation3 + $0x188] sm:$0xff]  ;;  %vm12904_vm8 = vmmov %vm12899_vm9 }
 0x618   :  { %v11769_v49 = vmax.f32 %v4190_v31, %v4192_v35  ;;  %7873 = vrot.lane.b32.xlu2 %v7872_v57, %s8168_s28  ;;  %7883 = vrot.lane.b32.xlu1 %v7882_v50, %s8170_s25  ;;  %v5518_v27 = vld [vmem:[#allocation4 + $0x92] sm:$0xff] }
 0x619   :  { %7893 = vrot.lane.b32.xlu0 %v7892_v26, %s8171_s27 }
 0x61a   :  { %v4201_v16 = vld [vmem:[#allocation3 + $0x1d8] sm:$0xff]  ;;  %v7819_v36 = vpop.permute.xlu0 %7818  ;;  %v4342_v37 = vrot.slane %v11769_v49, 2  ;;  %v4343_v7 = vrot.slane %v11769_v49, 4  ;;  %v7618_v57 = vrot.slane %v11769_v49, 9  ;;  %v4344_v55 = vrot.slane %v11769_v49, 6 }
 0x61b   :  { %v7821_v4 = vunpack.i.h.bf16 %v7819_v36  ;;  %v7820_v3 = vunpack.i.l.bf16 %v7819_v36  ;;  %v3788_v20 = vpop.f32.mrf.mxu1  ;;  %v4235_v41 = vmax.f32 %v4199_v25, %v4201_v16  ;;  %v7839_v15 = vpop.permute.xlu1 %7838  ;;  %v11810_v36 = vld [vmem:[#allocation4 + $0xe2] sm:$0xff] }
 0x61c   :  { %v3882_v9 = vmul.f32 %v11695_v38, %v3788_v20  ;;  %v7619_v39 = vrot.slane %v4342_v37, 9  ;;  %v7841_v35 = vunpack.i.h.bf16 %v7839_v15  ;;  %v7840_v50 = vunpack.i.l.bf16 %v7839_v15 }
 0x61d   :  { %7655 = vmatmul.msk.f32.gmra.mxu3 %vm3351_vm4, %v11389_v54  ;;  %v5933_v46 = vsel %vm5927_vm0, %v5916_v21, %v7821_v4  ;;  %v5982_v53 = vsel %vm5927_vm0, %v5966_v42, %v7820_v3  ;;  %v4357_v8 = vrot.slane %v4235_v41, 2  ;;  %v4358_v34 = vrot.slane %v4235_v41, 4 }
 0x61e   :  { %v5950_v56 = vsel %vm5944_vm5, %v5933_v46, %v7826_v43  ;;  %v5998_v59 = vsel %vm5944_vm5, %v5982_v53, %v7825_v61  ;;  %v3950_v54 = vadd.f32 %v11701_v22, %v3882_v9  ;;  %v4359_v47 = vrot.slane %v4235_v41, 6 }
 0x61f   :  { %6124 = vmatmul.f32.gmra.mxu1 %v5950_v56  ;;  %6189 = vmatmul.f32.gmra.mxu2 %v5998_v59  ;;  %v7638_v31 = vrot.slane %v4235_v41, 9  ;;  %v7639_v17 = vrot.slane %v4357_v8, 9  ;;  %v7640_v33 = vrot.slane %v4358_v34, 9  ;;  %v4943_v16 = vmax.f32 %v4342_v37, %v7619_v39 }
 0x620   :  { %7898 = vrot.lane.b32.xlu1 %v7897_v51, %s8170_s25  ;;  %7888 = vrot.lane.b32.xlu2 %v7887_v11, %s8168_s28  ;;  %v4014_v12 = vmax.f32 %v3950_v54, 0.0  ;;  %v7620_v51 = vrot.slane %v4343_v7, 9  ;;  %v4942_v11 = vmax.f32 %v11769_v49, %v7618_v57  ;;  %v7641_v42 = vrot.slane %v4359_v47, 9 }
 0x621   :  { %v4962_v44 = vmax.f32 %v4235_v41, %v7638_v31  ;;  %v4963_v25 = vmax.f32 %v4357_v8, %v7639_v17  ;;  %v4964_v61 = vmax.f32 %v4358_v34, %v7640_v33  ;;  %v7902_v49 = vpack.i.bf16 %v11745_v23, %v11810_v36  ;;  %v5389_v41 = vld [vmem:[#allocation4 + $0x70] sm:$0xff] }
 0x622   :  { %v7834_v26 = vpop.permute.xlu0 %7833  ;;  %4078 = vst.msk [vmem:[#allocation3 + $0x198] sm:$0xff] %vm3351_vm4, %v4014_v12  ;;  %v4965_v4 = vmax.f32 %v4359_v47, %v7641_v42  ;;  %v7621_v62 = vrot.slane %v4344_v55, 9  ;;  %v4944_v37 = vmax.f32 %v4343_v7, %v7620_v51  ;;  %v5198_v46 = vperm.slane %v4942_v11, 0 }
 0x623   :  { %v7836_v60 = vunpack.i.h.bf16 %v7834_v26  ;;  %v7835_v21 = vunpack.i.l.bf16 %v7834_v26  ;;  %v7854_v3 = vpop.permute.xlu1 %7853  ;;  %v5218_v20 = vperm.slane %v4962_v44, 0  ;;  %v5219_v29 = vperm.slane %v4963_v25, 0 }
 0x624   :  { %v5220_v30 = vperm.slane %v4964_v61, 0  ;;  %v5918_v53 = vsel %vm3351_vm4, %v5389_v41, %v7846_v58  ;;  %v7856_v59 = vunpack.i.h.bf16 %v7854_v3  ;;  %v7855_v54 = vunpack.i.l.bf16 %v7854_v3 }
 0x625   :  { %7656 = vmatmul.msk.f32.gmra.mxu3 %vm3351_vm4, %v11414_v19  ;;  %v5934_v40 = vsel %vm5927_vm0, %v5917_v48, %v7836_v60  ;;  %v5983_v45 = vsel %vm5927_vm0, %v5967_v13, %v7835_v21  ;;  %v5337_v19 = vsel %vm12899_vm9, %v5217_v24, %v5336_v52  ;;  %v5199_v48 = vperm.slane %v4943_v16, 0  ;;  %v5453_v13 = vld [vmem:[#allocation4 + $0x81] sm:$0xff] }
 0x626   :  { %v5951_v18 = vsel %vm5944_vm5, %v5934_v40, %v7841_v35  ;;  %v5999_v43 = vsel %vm5944_vm5, %v5983_v45, %v7840_v50  ;;  %v5968_v9 = vsel %vm3351_vm4, %v5453_v13, %v7845_v63  ;;  %v5338_v15 = vsel %vm5236_vm2, %v5218_v20, %v5337_v19 }
 0x627   :  { %6127 = vmatmul.f32.gmra.mxu1 %v5951_v18  ;;  %6192 = vmatmul.f32.gmra.mxu2 %v5999_v43  ;;  %v5221_v7 = vperm.slane %v4965_v4, 0  ;;  %v5339_v57 = vsel %vm5238_vm3, %v5219_v29, %v5338_v15  ;;  %v4945_v47 = vmax.f32 %v4344_v55, %v7621_v62  ;;  %v5200_v58 = vperm.slane %v4944_v37, 0 }
 0x628   :  { %7903 = vrot.lane.b32.xlu2 %v7902_v49, %s8168_s28  ;;  %v5340_v34 = vsel %vm5240_vm15, %v5220_v30, %v5339_v57  ;;  %v5321_v63 = vsel %vm5230_vm14, %v5199_v48, %v5198_v46 }
 0x629   :  { %v4193_v56 = vld [vmem:[#allocation3 + $0x198] sm:$0xff]  ;;  %v5341_v31 = vsel %vm5242_vm1, %v5221_v7, %v5340_v34  ;;  %v5322_v45 = vsel %vm12900_vm10, %v5200_v58, %v5321_v63  ;;  %v5201_v44 = vperm.slane %v4945_v47, 0 }
 0x62a   :  { %v7849_v24 = vpop.permute.xlu0 %7848  ;;  %v4231_v39 = vmax.f32 %v4191_v1, %v4193_v56  ;;  %5380 = vst.msk [vmem:[#allocation4 + $0x111] sm:$0xff] %vm3351_vm4, %v5341_v31 }
 0x62b   :  { %v7851_v8 = vunpack.i.h.bf16 %v7849_v24  ;;  %v7850_v12 = vunpack.i.l.bf16 %v7849_v24  ;;  %v5323_v20 = vsel %vm12901_vm11, %v5201_v44, %v5322_v45 }
 0x62c   :  { %v4345_v35 = vrot.slane %v4231_v39, 2  ;;  %v4346_v50 = vrot.slane %v4231_v39, 4  ;;  %v7622_v26 = vrot.slane %v4231_v39, 9  ;;  %v4347_v21 = vrot.slane %v4231_v39, 6 }
 0x62d   :  { %7657 = vmatmul.msk.f32.gmra.mxu3 %vm3351_vm4, %v5518_v27  ;;  %v5935_v17 = vsel %vm5927_vm0, %v5918_v53, %v7851_v8  ;;  %v5984_v60 = vsel %vm5927_vm0, %v5968_v9, %v7850_v12  ;;  %v4196_v27 = vld [vmem:[#allocation3 + $0x1b0] sm:$0xff] }
 0x62e   :  { %v5952_v52 = vsel %vm5944_vm5, %v5935_v17, %v7856_v59  ;;  %v7623_v55 = vrot.slane %v4345_v35, 9  ;;  %v4946_v33 = vmax.f32 %v4231_v39, %v7622_v26  ;;  %v6000_v11 = vsel %vm5944_vm5, %v5984_v60, %v7855_v54 }
 0x62f   :  { %v3815_v51 = vpop.f32.mrf.mxu3  ;;  %v7624_v16 = vrot.slane %v4346_v50, 9  ;;  %6130 = vmatmul.f32.gmra.mxu1 %v5952_v52  ;;  %6195 = vmatmul.f32.gmra.mxu2 %v6000_v11  ;;  %v7625_v40 = vrot.slane %v4347_v21, 9 }
 0x630   :  { %v3891_v42 = vmul.f32 %v11695_v38, %v3815_v51  ;;  %v5202_v25 = vperm.slane %v4946_v33, 0  ;;  %v4947_v18 = vmax.f32 %v4345_v35, %v7623_v55 }
 0x631   :  { %v4948_v43 = vmax.f32 %v4346_v50, %v7624_v16  ;;  %v4949_v4 = vmax.f32 %v4347_v21, %v7625_v40  ;;  %v4197_v16 = vld [vmem:[#allocation3 + $0x1b8] sm:$0xff] }
 0x632   :  { %v3959_v61 = vadd.f32 %v11701_v22, %v3891_v42  ;;  %v5203_v49 = vperm.slane %v4947_v18, 0  ;;  %v5324_v19 = vsel %vm5236_vm2, %v5202_v25, %v5323_v20 }
 0x633   :  { %v5204_v3 = vperm.slane %v4948_v43, 0  ;;  %v5205_v62 = vperm.slane %v4949_v4, 0 }
 0x634   :  { %v4023_v29 = vmax.f32 %v3959_v61, 0.0  ;;  %v5325_v37 = vsel %vm5238_vm3, %v5203_v49, %v5324_v19 }
 0x635   :  { %7658 = vmatmul.msk.f32.gmra.mxu3 %vm3351_vm4, %v11747_v0  ;;  %v5326_v48 = vsel %vm5240_vm15, %v5204_v3, %v5325_v37 }
 0x636   :  { %4087 = vst.msk [vmem:[#allocation3 + $0x1e0] sm:$0xff] %vm3351_vm4, %v4023_v29  ;;  %v5327_v41 = vsel %vm5242_vm1, %v5205_v62, %v5326_v48 }
 0x637   :  { %5378 = vst.msk [vmem:[#allocation4 + $0xf1] sm:$0xff] %vm3351_vm4, %v5327_v41 }
 0x63a   :  { %v3791_v13 = vpop.f32.mrf.mxu1 }
 0x63b   :  { %v3883_v30 = vmul.f32 %v11695_v38, %v3791_v13 }
 0x63d   :  { %v3951_v46 = vadd.f32 %v11701_v22, %v3883_v30  ;;  %7659 = vmatmul.msk.f32.gmra.mxu3 %vm3351_vm4, %v11757_v2  ;;  %v4202_v37 = vld [vmem:[#allocation3 + $0x1e0] sm:$0xff] }
 0x63e   :  { %v11851_v53 = vld [vmem:[#allocation4 + $0xf1] sm:$0xff] }
 0x63f   :  { %v4015_v0 = vmax.f32 %v3951_v46, 0.0  ;;  %v11853_v9 = vld [vmem:[#allocation4 + $0xf0] sm:$0xff]  ;;  %v7912_v1 = vpack.i.bf16 %v11749_v28, %v11851_v53 }
 0x640   :  { %v11855_v15 = vld [vmem:[#allocation4 + $0xf2] sm:$0xff]  ;;  %v7907_v56 = vpack.i.bf16 %v11757_v2, %v11853_v9 }
 0x641   :  { %v7917_v24 = vpack.i.bf16 %v11761_v5, %v11855_v15  ;;  %4079 = vst.msk [vmem:[#allocation3 + $0x1a0] sm:$0xff] %vm3351_vm4, %v4015_v0  ;;  %7913 = vrot.lane.b32.xlu1 %v7912_v1, %s8170_s25 }
 0x642   :  { %7908 = vrot.lane.b32.xlu0 %v7907_v56, %s8171_s27 }
 0x643   :  { %7918 = vrot.lane.b32.xlu2 %v7917_v24, %s8168_s28 }
 0x645   :  { %7660 = vmatmul.msk.f32.gmra.mxu3 %vm3351_vm4, %v11810_v36 }
 0x648   :  { %v3818_v59 = vpop.f32.mrf.mxu3  ;;  %v4194_v5 = vld [vmem:[#allocation3 + $0x1a0] sm:$0xff] }
 0x649   :  { %v3892_v28 = vmul.f32 %v11695_v38, %v3818_v59  ;;  %v4232_v7 = vmax.f32 %v4194_v5, %v4196_v27 }
 0x64b   :  { %v3960_v54 = vadd.f32 %v11701_v22, %v3892_v28  ;;  %v4348_v57 = vrot.slane %v4232_v7, 2  ;;  %v4349_v12 = vrot.slane %v4232_v7, 4  ;;  %v7626_v31 = vrot.slane %v4232_v7, 9 }
 0x64c   :  { %v4350_v52 = vrot.slane %v4232_v7, 6 }
 0x64d   :  { %7661 = vmatmul.msk.f32.gmra.mxu3 %vm3351_vm4, %v11855_v15  ;;  %v4024_v2 = vmax.f32 %v3960_v54, 0.0  ;;  %v7627_v34 = vrot.slane %v4348_v57, 9  ;;  %v7628_v50 = vrot.slane %v4349_v12, 9  ;;  %v4950_v21 = vmax.f32 %v4232_v7, %v7626_v31 }
 0x64e   :  { %v7629_v51 = vrot.slane %v4350_v52, 9 }
 0x64f   :  { %4088 = vst.msk [vmem:[#allocation3 + $0x1e8] sm:$0xff] %vm3351_vm4, %v4024_v2  ;;  %v4951_v17 = vmax.f32 %v4348_v57, %v7627_v34  ;;  %v4952_v55 = vmax.f32 %v4349_v12, %v7628_v50  ;;  %v5206_v11 = vperm.slane %v4950_v21, 0  ;;  %v11902_v21 = vld [vmem:[%s12554_s5] ss:$0 sm:$0xff] }
 0x650   :  { %v4953_v25 = vmax.f32 %v4350_v52, %v7629_v51  ;;  %v5390_v52 = vld [vmem:[#allocation4 + $0xa0] sm:$0xff] }
 0x651   :  { %v5207_v33 = vperm.slane %v4951_v17, 0  ;;  %v5208_v40 = vperm.slane %v4952_v55, 0  ;;  %v11909_v51 = vld [vmem:[%s12555_s6] ss:$0 sm:$0xff] }
 0x652   :  { %v5209_v48 = vperm.slane %v4953_v25, 0 }
 0x653   :  { %v5328_v44 = vsel %vm5230_vm14, %v5207_v33, %v5206_v11 }
 0x654   :  { %v5329_v3 = vsel %vm12902_vm13, %v5208_v40, %v5328_v44 }
 0x655   :  { %v5330_v1 = vsel %vm12903_vm12, %v5209_v48, %v5329_v3 }
 0x659   :  { %v3794_v39 = vpop.f32.mrf.mxu1 }
 0x65a   :  { %v3884_v8 = vmul.f32 %v11695_v38, %v3794_v39  ;;  %v3821_v58 = vpop.f32.mrf.mxu3 }
 0x65b   :  { %v3893_v63 = vmul.f32 %v11695_v38, %v3821_v58 }
 0x65c   :  { %v3952_v47 = vadd.f32 %v11701_v22, %v3884_v8 }
 0x65d   :  { %v3961_v26 = vadd.f32 %v11701_v22, %v3893_v63 }
 0x65e   :  { %v4016_v35 = vmax.f32 %v3952_v47, 0.0 }
 0x65f   :  { %v4025_v60 = vmax.f32 %v3961_v26, 0.0 }
 0x660   :  { %4080 = vst.msk [vmem:[#allocation3 + $0x1a8] sm:$0xff] %vm3351_vm4, %v4016_v35 }
 0x661   :  { %4089 = vst.msk [vmem:[#allocation3 + $0x1f0] sm:$0xff] %vm3351_vm4, %v4025_v60 }
 0x667   :  { %v4195_v42 = vld [vmem:[#allocation3 + $0x1a8] sm:$0xff] }
 0x668   :  { %v4233_v45 = vmax.f32 %v4195_v42, %v4197_v16  ;;  %v4204_v49 = vld [vmem:[#allocation3 + $0x1f0] sm:$0xff] }
 0x669   :  { %v11882_v41 = vmax.f32 %v4202_v37, %v4204_v49 }
 0x66a   :  { %v4351_v18 = vrot.slane %v4233_v45, 2  ;;  %v4352_v43 = vrot.slane %v4233_v45, 4  ;;  %v4353_v61 = vrot.slane %v4233_v45, 6  ;;  %v7630_v4 = vrot.slane %v4233_v45, 9  ;;  %v7859_v12 = vpop.permute.xlu2 %7858 }
 0x66b   :  { %v4360_v2 = vrot.slane %v11882_v41, 2  ;;  %v4361_v57 = vrot.slane %v11882_v41, 4  ;;  %v4362_v35 = vrot.slane %v11882_v41, 6  ;;  %v7861_v50 = vunpack.i.h.bf16 %v7859_v12 }
 0x66c   :  { %v7631_v20 = vrot.slane %v4351_v18, 9  ;;  %v7632_v29 = vrot.slane %v4352_v43, 9  ;;  %v7633_v19 = vrot.slane %v4353_v61, 9  ;;  %v4954_v62 = vmax.f32 %v4233_v45, %v7630_v4 }
 0x66d   :  { %v7643_v58 = vrot.slane %v4360_v2, 9  ;;  %v7644_v63 = vrot.slane %v4361_v57, 9  ;;  %v7860_v42 = vunpack.i.l.bf16 %v7859_v12 }
 0x66e   :  { %v4955_v13 = vmax.f32 %v4351_v18, %v7631_v20  ;;  %v4956_v30 = vmax.f32 %v4352_v43, %v7632_v29  ;;  %v5210_v46 = vperm.slane %v4954_v62, 0  ;;  %v4957_v0 = vmax.f32 %v4353_v61, %v7633_v19  ;;  %v4203_v61 = vld [vmem:[#allocation3 + $0x1e8] sm:$0xff] }
 0x66f   :  { %v4967_v26 = vmax.f32 %v4360_v2, %v7643_v58  ;;  %v4968_v16 = vmax.f32 %v4361_v57, %v7644_v63  ;;  %v5919_v18 = vsel %vm3351_vm4, %v5390_v52, %v7861_v50  ;;  %v7645_v43 = vrot.slane %v4362_v35, 9 }
 0x670   :  { %v3824_v56 = vpop.f32.mrf.mxu3  ;;  %v5211_v24 = vperm.slane %v4955_v13, 0  ;;  %v5212_v59 = vperm.slane %v4956_v30, 0  ;;  %v5331_v28 = vsel %vm5236_vm2, %v5210_v46, %v5330_v1  ;;  %v5213_v7 = vperm.slane %v4957_v0, 0 }
 0x671   :  { %v3894_v54 = vmul.f32 %v11695_v38, %v3824_v56  ;;  %v7642_v38 = vrot.slane %v11882_v41, 9  ;;  %v5223_v4 = vperm.slane %v4967_v26, 0  ;;  %v5224_v0 = vperm.slane %v4968_v16, 0 }
 0x672   :  { %v5332_v5 = vsel %vm5238_vm3, %v5211_v24, %v5331_v28  ;;  %v11927_v37 = vpop.permute.xlu2 %7873  ;;  %v5969_v2 = vsel %vm3351_vm4, %v11734_v32, %v7860_v42 }
 0x673   :  { %v3962_v27 = vadd.f32 %v11701_v22, %v3894_v54  ;;  %v5333_v8 = vsel %vm5240_vm15, %v5212_v59, %v5332_v5  ;;  %v11896_v22 = vpop.permute.xlu0 %7863  ;;  %v4966_v33 = vmax.f32 %v11882_v41, %v7642_v38  ;;  %v11930_v41 = vld [vmem:[#allocation4 + $0x110] sm:$0xff]  ;;  %v7876_v28 = vunpack.i.h.bf16 %v11927_v37 }
 0x674   :  { %v6110_v39 = vpop.f32.mrf.mxu1  ;;  %v5334_v47 = vsel %vm5242_vm1, %v5213_v7, %v5333_v8  ;;  %v7866_v55 = vunpack.i.h.bf16 %v11896_v22  ;;  %v7865_v19 = vunpack.i.l.bf16 %v11896_v22  ;;  %v7937_v46 = vpack.i.bf16 %v11855_v15, %v11930_v41  ;;  %v11946_v22 = vld [vmem:[#allocation4 + $0x112] sm:$0xff] }
 0x675   :  { %v4026_v34 = vmax.f32 %v3962_v27, 0.0  ;;  %5379 = vst.msk [vmem:[#allocation4 + $0x101] sm:$0xff] %vm3351_vm4, %v5334_v47  ;;  %v5222_v13 = vperm.slane %v4966_v33, 0  ;;  %v4969_v5 = vmax.f32 %v4362_v35, %v7645_v43  ;;  %v7875_v12 = vunpack.i.l.bf16 %v11927_v37  ;;  %v11948_v35 = vld [vmem:[#allocation4 + $0x111] sm:$0xff] }
 0x676   :  { %v5985_v32 = vsel %vm5927_vm0, %v5969_v2, %v7865_v19 }
 0x677   :  { %4090 = vst.msk [vmem:[#allocation3 + $0x1f8] sm:$0xff] %vm3351_vm4, %v4026_v34  ;;  %v5342_v27 = vsel %vm5230_vm14, %v5223_v4, %v5222_v13  ;;  %v5225_v42 = vperm.slane %v4969_v5, 0 }
 0x678   :  { %v6240_v31 = vpop.f32.mrf.mxu3  ;;  %v5343_v26 = vsel %vm12896_vm6, %v5224_v0, %v5342_v27 }
 0x67a   :  { %v6175_v17 = vpop.f32.mrf.mxu2 }
 0x67b   :  { %v6176_v60 = vadd.f32 %v6175_v17, %v6110_v39 }
 0x67c   :  { %v6113_v11 = vpop.f32.mrf.mxu1  ;;  %v11911_v45 = vld [vmem:[#allocation4 + $0x102] sm:$0xff] }
 0x67d   :  { %v6241_v40 = vadd.f32 %v6240_v31, %v6176_v60  ;;  %v11913_v44 = vld [vmem:[#allocation4 + $0x101] sm:$0xff]  ;;  %7662 = vmatmul.msk.f32.gmra.mxu3 %vm3351_vm4, %v11911_v45  ;;  %v7932_v29 = vpack.i.bf16 %v11851_v53, %v11911_v45 }
 0x67e   :  { %v11915_v25 = vld [vmem:[#allocation4 + $0x100] sm:$0xff]  ;;  %v4205_v49 = vld [vmem:[#allocation3 + $0x1f8] sm:$0xff]  ;;  %v7927_v3 = vpack.i.bf16 %v11853_v9, %v11913_v44 }
 0x67f   :  { %v7922_v20 = vpack.i.bf16 %v11810_v36, %v11915_v25  ;;  %v4237_v62 = vmax.f32 %v4203_v61, %v4205_v49  ;;  %v6292_v48 = vmul.f32 %v11902_v21, %v6241_v40  ;;  %v5936_v36 = vsel %vm5927_vm0, %v5919_v18, %v7866_v55  ;;  %7933 = vrot.lane.b32.xlu2 %v7932_v29, %s8168_s28 }
 0x680   :  { %7928 = vrot.lane.b32.xlu1 %v7927_v3, %s8170_s25  ;;  %v6243_v30 = vpop.f32.mrf.mxu3  ;;  %v7942_v60 = vpack.i.bf16 %v11915_v25, %v11948_v35  ;;  %v7947_v55 = vpack.i.bf16 %v11913_v44, %v11946_v22 }
 0x681   :  { %7923 = vrot.lane.b32.xlu0 %v7922_v20, %s8171_s27  ;;  %v6312_v1 = vadd.f32 %v11909_v51, %v6292_v48  ;;  %v4363_v56 = vrot.slane %v4237_v62, 2  ;;  %v4364_v24 = vrot.slane %v4237_v62, 4  ;;  %v4365_v59 = vrot.slane %v4237_v62, 6 }
 0x682   :  { %v6178_v54 = vpop.f32.mrf.mxu2  ;;  %v7869_v57 = vpop.permute.xlu1 %7868  ;;  %v7646_v39 = vrot.slane %v4237_v62, 9 }
 0x683   :  { %v6328_v7 = vmax.f32 %v6312_v1, 0.0  ;;  %v6179_v15 = vadd.f32 %v6178_v54, %v6113_v11  ;;  %v7647_v8 = vrot.slane %v4363_v56, 9  ;;  %v7871_v34 = vunpack.i.h.bf16 %v7869_v57  ;;  %v7879_v58 = vpop.permute.xlu0 %7878 }
 0x684   :  { %v7870_v47 = vunpack.i.l.bf16 %v7869_v57  ;;  %v6116_v38 = vpop.f32.mrf.mxu1  ;;  %v7648_v63 = vrot.slane %v4364_v24, 9  ;;  %v7649_v50 = vrot.slane %v4365_v59, 9  ;;  %v4970_v11 = vmax.f32 %v4237_v62, %v7646_v39 }
 0x685   :  { %6344 = vst.msk [vmem:[#allocation5] sm:$0xff] %vm3351_vm4, %v6328_v7  ;;  %v6244_v31 = vadd.f32 %v6243_v30, %v6179_v15  ;;  %v5953_v17 = vsel %vm5944_vm5, %v5936_v36, %v7871_v34  ;;  %7663 = vmatmul.msk.f32.gmra.mxu3 %vm3351_vm4, %v11946_v22  ;;  %v4971_v16 = vmax.f32 %v4363_v56, %v7647_v8  ;;  %v7881_v40 = vunpack.i.h.bf16 %v7879_v58 }
 0x686   :  { %v6001_v52 = vsel %vm5944_vm5, %v5985_v32, %v7870_v47  ;;  %6133 = vmatmul.f32.gmra.mxu1 %v5953_v17  ;;  %v7880_v18 = vunpack.i.l.bf16 %v7879_v58  ;;  %v4972_v61 = vmax.f32 %v4364_v24, %v7648_v63  ;;  %v4973_v49 = vmax.f32 %v4365_v59, %v7649_v50  ;;  %v7889_v59 = vpop.permute.xlu2 %7888  ;;  %v5392_v50 = vld [vmem:[#allocation4 + $0xc0] sm:$0xff] }
 0x687   :  { %v6293_v33 = vmul.f32 %v11902_v21, %v6244_v31  ;;  %6198 = vmatmul.f32.gmra.mxu2 %v6001_v52  ;;  %7948 = vrot.lane.b32.xlu2 %v7947_v55, %s8168_s28  ;;  %v5226_v3 = vperm.slane %v4970_v11, 0  ;;  %v5227_v20 = vperm.slane %v4971_v16, 0  ;;  %v5344_v62 = vsel %vm12904_vm8, %v5225_v42, %v5343_v26 }
 0x688   :  { %7943 = vrot.lane.b32.xlu1 %v7942_v60, %s8170_s25  ;;  %v6246_v43 = vpop.f32.mrf.mxu3  ;;  %v5228_v19 = vperm.slane %v4972_v61, 0  ;;  %v5920_v30 = vsel %vm3351_vm4, %v11713_v10, %v7876_v28  ;;  %v5970_v24 = vsel %vm3351_vm4, %v11717_v6, %v7875_v12  ;;  %v5229_v54 = vperm.slane %v4973_v49, 0 }
 0x689   :  { %7938 = vrot.lane.b32.xlu0 %v7937_v46, %s8171_s27  ;;  %v6313_v4 = vadd.f32 %v11909_v51, %v6293_v33  ;;  %v5345_v36 = vsel %vm5236_vm2, %v5226_v3, %v5344_v62  ;;  %v5937_v56 = vsel %vm5927_vm0, %v5920_v30, %v7881_v40  ;;  %v5986_v28 = vsel %vm5927_vm0, %v5970_v24, %v7880_v18  ;;  %vm12906_vm2 = vmmov %vm12904_vm8 }
 0x68a   :  { %v6181_v29 = vpop.f32.mrf.mxu2  ;;  %v7884_v48 = vpop.permute.xlu1 %7883  ;;  %v5346_v2 = vsel %vm5238_vm3, %v5227_v20, %v5345_v36  ;;  %v7891_v39 = vunpack.i.h.bf16 %v7889_v59  ;;  %v7890_v8 = vunpack.i.l.bf16 %v7889_v59  ;;  %vm12908_vm9 = vmmov %vm12906_vm2 }
 0x68b   :  { %v6329_v37 = vmax.f32 %v6313_v4, 0.0  ;;  %v6182_v13 = vadd.f32 %v6181_v29, %v6116_v38  ;;  %v7886_v46 = vunpack.i.h.bf16 %v7884_v48  ;;  %v7885_v0 = vunpack.i.l.bf16 %v7884_v48  ;;  %v7894_v5 = vpop.permute.xlu0 %7893  ;;  %vm12910_vm11 = vmmov %vm12906_vm2 }
 0x68c   :  { %v6119_v1 = vpop.f32.mrf.mxu1  ;;  %v5347_v57 = vsel %vm5240_vm15, %v5228_v19, %v5346_v2  ;;  %v7896_v34 = vunpack.i.h.bf16 %v7894_v5  ;;  %v7895_v47 = vunpack.i.l.bf16 %v7894_v5  ;;  %v6394_v26 = vld [vmem:[#allocation5] sm:$0xff]  ;;  %v5921_v55 = vsel %vm3351_vm4, %v5392_v50, %v7891_v39  ;;  %vm12912_vm12 = vmmov %vm12906_vm2 }
 0x68d   :  { %6345 = vst.msk [vmem:[#allocation5 + $0x8] sm:$0xff] %vm3351_vm4, %v6329_v37  ;;  %v6247_v10 = vadd.f32 %v6246_v43, %v6182_v13  ;;  %v5954_v27 = vsel %vm5944_vm5, %v5937_v56, %v7886_v46  ;;  %v6002_v7 = vsel %vm5944_vm5, %v5986_v28, %v7885_v0  ;;  %v5348_v15 = vsel %vm5242_vm1, %v5229_v54, %v5347_v57  ;;  %vm12905_vm1 = vmmov %vm12896_vm6 }
 0x68e   :  { %6136 = vmatmul.f32.gmra.mxu1 %v5954_v27  ;;  %5381 = vst.msk [vmem:[#allocation4 + $0x121] sm:$0xff] %vm3351_vm4, %v5348_v15  ;;  %v5971_v33 = vsel %vm3351_vm4, %v11745_v23, %v7890_v8  ;;  %v5938_v40 = vsel %vm5927_vm0, %v5921_v55, %v7896_v34  ;;  %v5510_v15 = vld [vmem:[#allocation4 + $0x131] sm:$0xff]  ;;  %vm6699_vm15 = vcmask 257024   ;;  %vm12907_vm3 = vmmov %vm12905_vm1 }
 0x68f   :  { %v6294_v6 = vmul.f32 %v11902_v21, %v6247_v10  ;;  %6201 = vmatmul.f32.gmra.mxu2 %v6002_v7  ;;  %v5987_v18 = vsel %vm5927_vm0, %v5971_v33, %v7895_v47  ;;  %vm12909_vm10 = vmmov %vm12905_vm1 }
 0x690   :  { %v6249_v12 = vpop.f32.mrf.mxu3  ;;  %vm12911_vm13 = vmmov %vm12905_vm1 }
 0x691   :  { %v6314_v58 = vadd.f32 %v11909_v51, %v6294_v6  ;;  %v5494_v6 = vld [vmem:[#allocation4 + $0x130] sm:$0xff]  ;;  %vm12913_vm6 = vmmov %vm12905_vm1 }
 0x692   :  { %v6184_v38 = vpop.f32.mrf.mxu2  ;;  %v7899_v31 = vpop.permute.xlu1 %7898  ;;  %vm12914_vm7 = vmmov %vm12906_vm2 }
 0x693   :  { %v6330_v63 = vmax.f32 %v6314_v58, 0.0  ;;  %v6185_v32 = vadd.f32 %v6184_v38, %v6119_v1  ;;  %v7901_v52 = vunpack.i.h.bf16 %v7899_v31  ;;  %v7900_v60 = vunpack.i.l.bf16 %v7899_v31  ;;  %vm12915_vm8 = vmmov %vm12905_vm1 }
 0x694   :  { %v6395_v17 = vld [vmem:[#allocation5 + $0x8] sm:$0xff]  ;;  %v6122_v42 = vpop.f32.mrf.mxu1 }
 0x695   :  { %v6410_v11 = vmax.f32 %v6394_v26, %v6395_v17  ;;  %6346 = vst.msk [vmem:[#allocation5 + $0x10] sm:$0xff] %vm3351_vm4, %v6330_v63  ;;  %v6250_v16 = vadd.f32 %v6249_v12, %v6185_v32  ;;  %v5955_v43 = vsel %vm5944_vm5, %v5938_v40, %v7901_v52  ;;  %v6003_v61 = vsel %vm5944_vm5, %v5987_v18, %v7900_v60  ;;  %v5525_v4 = vld [vmem:[#allocation4 + $0x122] sm:$0xff] }
 0x696   :  { %6139 = vmatmul.f32.gmra.mxu1 %v5955_v43  ;;  %v12012_v49 = vld [vmem:[#allocation4 + $0x121] sm:$0xff]  ;;  %7664 = vmatmul.msk.f32.gmra.mxu3 %vm3351_vm4, %v5525_v4  ;;  %v7962_v48 = vpack.i.bf16 %v11948_v35, %v5525_v4 }
 0x697   :  { %v6295_v23 = vmul.f32 %v11902_v21, %v6250_v16  ;;  %6204 = vmatmul.f32.gmra.mxu2 %v6003_v61  ;;  %v12014_v3 = vld [vmem:[#allocation4 + $0x120] sm:$0xff]  ;;  %v6426_v20 = vrot.slane %v6410_v11, 2  ;;  %v6427_v29 = vrot.slane %v6410_v11, 4  ;;  %v6428_v19 = vrot.slane %v6410_v11, 6 }
 0x698   :  { %v7957_v62 = vpack.i.bf16 %v11930_v41, %v12012_v49  ;;  %v7952_v37 = vpack.i.bf16 %v11911_v45, %v12014_v3  ;;  %v6252_v13 = vpop.f32.mrf.mxu3  ;;  %v7666_v30 = vrot.slane %v6410_v11, 9  ;;  %7963 = vrot.lane.b32.xlu2 %v7962_v48, %s8168_s28 }
 0x699   :  { %v6315_v36 = vadd.f32 %v11909_v51, %v6295_v23  ;;  %v7667_v46 = vrot.slane %v6426_v20, 9  ;;  %v7668_v0 = vrot.slane %v6427_v29, 9  ;;  %v7669_v1 = vrot.slane %v6428_v19, 9 }
 0x69a   :  { %7958 = vrot.lane.b32.xlu1 %v7957_v62, %s8170_s25  ;;  %7953 = vrot.lane.b32.xlu0 %v7952_v37, %s8171_s27  ;;  %v6187_v56 = vpop.f32.mrf.mxu2  ;;  %v6570_v24 = vmax.f32 %v6410_v11, %v7666_v30 }
 0x69b   :  { %v6331_v59 = vmax.f32 %v6315_v36, 0.0  ;;  %v6188_v45 = vadd.f32 %v6187_v56, %v6122_v42  ;;  %v6571_v10 = vmax.f32 %v6426_v20, %v7667_v46  ;;  %v6572_v28 = vmax.f32 %v6427_v29, %v7668_v0  ;;  %v7904_v36 = vpop.permute.xlu2 %7903 }
 0x69c   :  { %v6573_v54 = vmax.f32 %v6428_v19, %v7669_v1  ;;  %v6634_v2 = vperm.slane %v6570_v24, 0  ;;  %v6125_v57 = vpop.f32.mrf.mxu1  ;;  %v6396_v31 = vld [vmem:[#allocation5 + $0x10] sm:$0xff]  ;;  %v7906_v24 = vunpack.i.h.bf16 %v7904_v36 }
 0x69d   :  { %6347 = vst.msk [vmem:[#allocation5 + $0x18] sm:$0xff] %vm3351_vm4, %v6331_v59  ;;  %v6253_v14 = vadd.f32 %v6252_v13, %v6188_v45  ;;  %v6635_v5 = vperm.slane %v6571_v10, 0  ;;  %v6636_v27 = vperm.slane %v6572_v28, 0  ;;  %v7905_v59 = vunpack.i.l.bf16 %v7904_v36 }
 0x69e   :  { %v6637_v39 = vperm.slane %v6573_v54, 0 }
 0x69f   :  { %v6296_v7 = vmul.f32 %v11902_v21, %v6253_v14  ;;  %v6666_v8 = vsel %vm5230_vm14, %v6635_v5, %v6634_v2 }
 0x6a0   :  { %v6667_v12 = vsel %vm12905_vm1, %v6636_v27, %v6666_v8  ;;  %v6255_v47 = vpop.f32.mrf.mxu3  ;;  %5637 = vrot.lane.b32.xlu2 %v11946_v22, %s8171_s27  ;;  %v5393_v27 = vld [vmem:[#allocation4 + $0xd0] sm:$0xff]  ;;  %vm12916_vm1 = vmmov %vm12906_vm2 }
 0x6a1   :  { %v6316_v34 = vadd.f32 %v11909_v51, %v6296_v7  ;;  %v6668_v58 = vsel %vm12906_vm2, %v6637_v39, %v6667_v12  ;;  %vm12917_vm2 = vmmov %vm12907_vm3 }
 0x6a2   :  { %5829 = vrot.lane.b32.xlu0 %v5494_v6, %s8171_s27  ;;  %5893 = vrot.lane.b32.xlu1 %v5510_v15, %s8170_s25  ;;  %6700 = vst.msk [vmem:[#allocation6 + $0x11] sm:$0xf] %vm6699_vm15, %v6668_v58  ;;  %v6190_v63 = vpop.f32.mrf.mxu2 }
 0x6a3   :  { %v6332_v38 = vmax.f32 %v6316_v34, 0.0  ;;  %v6191_v50 = vadd.f32 %v6190_v63, %v6125_v57  ;;  %v5457_v34 = vld [vmem:[#allocation4 + $0xe1] sm:$0xff] }
 0x6a4   :  { %v6397_v32 = vld [vmem:[#allocation5 + $0x18] sm:$0xff]  ;;  %v6128_v16 = vpop.f32.mrf.mxu1  ;;  %v5972_v63 = vsel %vm3351_vm4, %v5457_v34, %v7905_v59 }
 0x6a5   :  { %v6411_v26 = vmax.f32 %v6396_v31, %v6397_v32  ;;  %6348 = vst.msk [vmem:[#allocation5 + $0x20] sm:$0xff] %vm3351_vm4, %v6332_v38  ;;  %v6256_v17 = vadd.f32 %v6255_v47, %v6191_v50  ;;  %v5922_v38 = vsel %vm3351_vm4, %v5393_v27, %v7906_v24 }
 0x6a7   :  { %v6429_v52 = vrot.slane %v6411_v26, 2  ;;  %v6430_v60 = vrot.slane %v6411_v26, 4  ;;  %v6431_v55 = vrot.slane %v6411_v26, 6  ;;  %v7670_v33 = vrot.slane %v6411_v26, 9 }
 0x6a8   :  { %v6297_v11 = vmul.f32 %v11902_v21, %v6256_v17  ;;  %v6258_v61 = vpop.f32.mrf.mxu3 }
 0x6a9   :  { %v7671_v42 = vrot.slane %v6429_v52, 9  ;;  %v7672_v40 = vrot.slane %v6430_v60, 9  ;;  %v7673_v18 = vrot.slane %v6431_v55, 9  ;;  %v6574_v43 = vmax.f32 %v6411_v26, %v7670_v33 }
 0x6aa   :  { %v6317_v22 = vadd.f32 %v11909_v51, %v6297_v11  ;;  %5701 = vrot.lane.b32.xlu0 %v12014_v3, %s8170_s25  ;;  %v6193_v23 = vpop.f32.mrf.mxu2 }
 0x6ab   :  { %v6575_v4 = vmax.f32 %v6429_v52, %v7671_v42  ;;  %v6576_v20 = vmax.f32 %v6430_v60, %v7672_v40  ;;  %v6577_v29 = vmax.f32 %v6431_v55, %v7673_v18  ;;  %v6194_v62 = vadd.f32 %v6193_v23, %v6128_v16  ;;  %v12059_v60 = vld [vmem:[#allocation6 + $0x12] sm:$0xff] }
 0x6ac   :  { %v6333_v19 = vmax.f32 %v6317_v22, 0.0  ;;  %v6638_v37 = vperm.slane %v6574_v43, 0  ;;  %v6131_v10 = vpop.f32.mrf.mxu1  ;;  %v6398_v7 = vld [vmem:[#allocation5 + $0x20] sm:$0xff] }
 0x6ad   :  { %v6639_v48 = vperm.slane %v6575_v4, 0  ;;  %v6640_v13 = vperm.slane %v6576_v20, 0  ;;  %v6259_v30 = vadd.f32 %v6258_v61, %v6194_v62  ;;  %v6641_v46 = vperm.slane %v6577_v29, 0 }
 0x6ae   :  { %6349 = vst.msk [vmem:[#allocation5 + $0x28] sm:$0xff] %vm3351_vm4, %v6333_v19 }
 0x6af   :  { %v6669_v0 = vsel %vm5230_vm14, %v6639_v48, %v6638_v37  ;;  %v6298_v1 = vmul.f32 %v11902_v21, %v6259_v30 }
 0x6b0   :  { %v6670_v3 = vsel %vm12907_vm3, %v6640_v13, %v6669_v0  ;;  %v6261_v6 = vpop.f32.mrf.mxu3  ;;  %vm12918_vm3 = vmmov %vm12916_vm1 }
 0x6b1   :  { %v6671_v56 = vsel %vm12908_vm9, %v6641_v46, %v6670_v3  ;;  %v6318_v45 = vadd.f32 %v11909_v51, %v6298_v1  ;;  %vm12919_vm9 = vmmov %vm12917_vm2 }
 0x6b2   :  { %6701 = vst.msk [vmem:[#allocation6 + $0x21] sm:$0xf] %vm6699_vm15, %v6671_v56  ;;  %v6196_v28 = vpop.f32.mrf.mxu2 }
 0x6b3   :  { %v6334_v54 = vmax.f32 %v6318_v45, 0.0  ;;  %v6197_v14 = vadd.f32 %v6196_v28, %v6131_v10  ;;  %v7914_v2 = vpop.permute.xlu1 %7913 }
 0x6b4   :  { %v7909_v5 = vpop.permute.xlu0 %7908  ;;  %v7916_v15 = vunpack.i.h.bf16 %v7914_v2  ;;  %v7915_v39 = vunpack.i.l.bf16 %v7914_v2 }
 0x6b5   :  { %v6399_v57 = vld [vmem:[#allocation5 + $0x28] sm:$0xff]  ;;  %v7911_v8 = vunpack.i.h.bf16 %v7909_v5  ;;  %v7910_v12 = vunpack.i.l.bf16 %v7909_v5  ;;  %6350 = vst.msk [vmem:[#allocation5 + $0x30] sm:$0xff] %vm3351_vm4, %v6334_v54  ;;  %v6262_v58 = vadd.f32 %v6261_v6, %v6197_v14 }
 0x6b6   :  { %v6412_v47 = vmax.f32 %v6398_v7, %v6399_v57 }
 0x6b7   :  { %v5939_v31 = vsel %vm5927_vm0, %v5922_v38, %v7911_v8  ;;  %v5988_v32 = vsel %vm5927_vm0, %v5972_v63, %v7910_v12  ;;  %v6299_v50 = vmul.f32 %v11902_v21, %v6262_v58 }
 0x6b8   :  { %v5956_v26 = vsel %vm5944_vm5, %v5939_v31, %v7916_v15  ;;  %v6004_v17 = vsel %vm5944_vm5, %v5988_v32, %v7915_v39  ;;  %v6432_v52 = vrot.slane %v6412_v47, 2  ;;  %v6433_v33 = vrot.slane %v6412_v47, 4  ;;  %v6768_v31 = vld [vmem:[#allocation6 + $0x51] sm:$0xff] }
 0x6b9   :  { %v12061_v55 = vld [vmem:[#allocation6 + $0x22] sm:$0xff]  ;;  %6142 = vmatmul.f32.gmra.mxu1 %v5956_v26  ;;  %6207 = vmatmul.f32.gmra.mxu2 %v6004_v17  ;;  %v6434_v11 = vrot.slane %v6412_v47, 6  ;;  %v7674_v16 = vrot.slane %v6412_v47, 9  ;;  %v6319_v42 = vadd.f32 %v11909_v51, %v6299_v50  ;;  %v6760_v32 = vld [vmem:[#allocation6 + $0x50] sm:$0xff] }
 0x6ba   :  { %v7967_v40 = vpack.i.bf16 %v12061_v55, %v12059_v60  ;;  %v7675_v18 = vrot.slane %v6432_v52, 9  ;;  %v7676_v43 = vrot.slane %v6433_v33, 9  ;;  %v12072_v45 = vld [vmem:[#allocation6 + $0x21] sm:$0xff] }
 0x6bb   :  { %v7677_v22 = vrot.slane %v6434_v11, 9  ;;  %v6578_v61 = vmax.f32 %v6412_v47, %v7674_v16  ;;  %v6335_v23 = vmax.f32 %v6319_v42, 0.0  ;;  %v12076_v28 = vld [vmem:[#allocation6 + $0x20] sm:$0xff]  ;;  %v7919_v42 = vpop.permute.xlu2 %7918 }
 0x6bc   :  { %7968 = vrot.lane.b32.xlu1 %v7967_v40, %s8168_s28  ;;  %v6579_v4 = vmax.f32 %v6432_v52, %v7675_v18  ;;  %v6580_v20 = vmax.f32 %v6433_v33, %v7676_v43  ;;  %v6400_v46 = vld [vmem:[#allocation5 + $0x30] sm:$0xff]  ;;  %v7921_v40 = vunpack.i.h.bf16 %v7919_v42  ;;  %v7920_v18 = vunpack.i.l.bf16 %v7919_v42  ;;  %v7049_v42 = vld [vmem:[%s12556_s7 + $0xe0] sm:$0xff] }
 0x6bd   :  { %v6581_v29 = vmax.f32 %v6434_v11, %v7677_v22  ;;  %6351 = vst.msk [vmem:[#allocation5 + $0x38] sm:$0xff] %vm3351_vm4, %v6335_v23  ;;  %v6642_v19 = vperm.slane %v6578_v61, 0 }
 0x6be   :  { %v6643_v62 = vperm.slane %v6579_v4, 0  ;;  %v6644_v37 = vperm.slane %v6580_v20, 0 }
 0x6bf   :  { %v6645_v48 = vperm.slane %v6581_v29, 0  ;;  %v5394_v29 = vld [vmem:[#allocation4 + $0xe0] sm:$0xff] }
 0x6c0   :  { %v6672_v13 = vsel %vm5230_vm14, %v6643_v62, %v6642_v19  ;;  %v5923_v19 = vsel %vm3351_vm4, %v5394_v29, %v7921_v40  ;;  %v5973_v62 = vsel %vm3351_vm4, %v11851_v53, %v7920_v18 }
 0x6c1   :  { %v6673_v30 = vsel %vm12909_vm10, %v6644_v37, %v6672_v13  ;;  %vm12920_vm10 = vmmov %vm12916_vm1 }
 0x6c2   :  { %v6674_v36 = vsel %vm12910_vm11, %v6645_v48, %v6673_v30  ;;  %vm7435_vm11 = vcmask 1024  }
 0x6c3   :  { %6702 = vst.msk [vmem:[#allocation6 + $0x31] sm:$0xf] %vm6699_vm15, %v6674_v36 }
 0x6c4   :  { %v6401_v0 = vld [vmem:[#allocation5 + $0x38] sm:$0xff] }
 0x6c5   :  { %v6413_v1 = vmax.f32 %v6400_v46, %v6401_v0 }
 0x6c7   :  { %v6435_v3 = vrot.slane %v6413_v1, 2  ;;  %v6436_v56 = vrot.slane %v6413_v1, 4  ;;  %v6437_v24 = vrot.slane %v6413_v1, 6  ;;  %v7678_v59 = vrot.slane %v6413_v1, 9 }
 0x6c9   :  { %v7679_v14 = vrot.slane %v6435_v3, 9  ;;  %v7680_v2 = vrot.slane %v6436_v56, 9  ;;  %v7681_v5 = vrot.slane %v6437_v24, 9  ;;  %v6582_v27 = vmax.f32 %v6413_v1, %v7678_v59 }
 0x6ca   :  { %v12074_v10 = vld [vmem:[#allocation6 + $0x31] sm:$0xff] }
 0x6cb   :  { %v12078_v54 = vld [vmem:[#allocation6 + $0x30] sm:$0xff]  ;;  %v12082_v7 = vpack.i.bf16 %v12074_v10, %v12072_v45  ;;  %v6583_v6 = vmax.f32 %v6435_v3, %v7679_v14  ;;  %v6584_v15 = vmax.f32 %v6436_v56, %v7680_v2  ;;  %v6585_v39 = vmax.f32 %v6437_v24, %v7681_v5 }
 0x6cc   :  { %v7972_v57 = vpack.i.bf16 %v12078_v54, %v12076_v28  ;;  %v6646_v8 = vperm.slane %v6582_v27, 0  ;;  %v12093_v50 = vld [vmem:[#allocation6 + $0x32] sm:$0xff] }
 0x6cd   :  { %7978 = vrot.lane.b32.xlu0 %v12082_v7, %s8170_s25  ;;  %v6647_v12 = vperm.slane %v6583_v6, 0  ;;  %v6648_v34 = vperm.slane %v6584_v15, 0  ;;  %v6649_v47 = vperm.slane %v6585_v39, 0 }
 0x6ce   :  { %7973 = vrot.lane.b32.xlu2 %v7972_v57, %s8171_s27  ;;  %v5526_v57 = vld [vmem:[#allocation4 + $0x132] sm:$0xff] }
 0x6cf   :  { %v6675_v58 = vsel %vm5230_vm14, %v6647_v12, %v6646_v8  ;;  %7665 = vmatmul.msk.f32.gmra.mxu3 %vm3351_vm4, %v5526_v57  ;;  %v6264_v12 = vpop.f32.mrf.mxu3 }
 0x6d0   :  { %v6676_v38 = vsel %vm12911_vm13, %v6648_v34, %v6675_v58 }
 0x6d1   :  { %v6677_v63 = vsel %vm12912_vm12, %v6649_v47, %v6676_v38  ;;  %v7051_v38 = vld [vmem:[%s12556_s7 + $0xf0] sm:$0xff] }
 0x6d2   :  { %6703 = vst.msk [vmem:[#allocation6 + $0x41] sm:$0xf] %vm6699_vm15, %v6677_v63 }
 0x6d9   :  { %v6751_v26 = vld [vmem:[#allocation6 + $0x42] sm:$0xff]  ;;  %v7934_v37 = vpop.permute.xlu2 %7933 }
 0x6da   :  { %v12095_v17 = vld [vmem:[#allocation6 + $0x41] sm:$0xff]  ;;  %v7982_v33 = vpack.i.bf16 %v6751_v26, %v12093_v50  ;;  %v7936_v46 = vunpack.i.h.bf16 %v7934_v37  ;;  %v7935_v0 = vunpack.i.l.bf16 %v7934_v37 }
 0x6db   :  { %v12097_v52 = vld [vmem:[#allocation6 + $0x40] sm:$0xff]  ;;  %v7992_v11 = vpack.i.bf16 %v6768_v31, %v12095_v17 }
 0x6dc   :  { %v7987_v16 = vpack.i.bf16 %v6760_v32, %v12097_v52  ;;  %7983 = vrot.lane.b32.xlu1 %v7982_v33, %s8168_s28  ;;  %v5924_v53 = vsel %vm3351_vm4, %v11853_v9, %v7936_v46  ;;  %v5974_v2 = vsel %vm3351_vm4, %v11913_v44, %v7935_v0  ;;  %v7052_v9 = vld [vmem:[%s12556_s7 + $0xf8] sm:$0xff]  ;;  %v7050_v32 = vld [vmem:[%s12556_s7 + $0xe8] sm:$0xff] }
 0x6dd   :  { %7993 = vrot.lane.b32.xlu0 %v7992_v11, %s8170_s25  ;;  %7122 = vmatpush.msrb.mxu2 %v7052_v9  ;;  %v7046_v0 = vld [vmem:[%s12556_s7 + $0xc8] sm:$0xff] }
 0x6de   :  { %7988 = vrot.lane.b32.xlu2 %v7987_v16, %s8171_s27 }
 0x6df   :  { %7123 = vmatpush.msrb.mxu2 %v7051_v38 }
 0x6e1   :  { %v7949_v39 = vpop.permute.xlu2 %7948  ;;  %7124 = vmatpush.msrb.mxu2 %v7050_v32 }
 0x6e2   :  { %v7951_v44 = vunpack.i.h.bf16 %v7949_v39  ;;  %v7950_v47 = vunpack.i.l.bf16 %v7949_v39 }
 0x6e3   :  { %7125 = vmatpush.msrb.mxu2 %v7049_v42  ;;  %v7038_v42 = vld [vmem:[%s12556_s7 + $0x88] sm:$0xff] }
 0x6f2   :  { %v7929_v43 = vpop.permute.xlu1 %7928  ;;  %v7964_v40 = vpop.permute.xlu2 %7963 }
 0x6f3   :  { %v7924_v22 = vpop.permute.xlu0 %7923  ;;  %v7931_v61 = vunpack.i.h.bf16 %v7929_v43  ;;  %v7930_v23 = vunpack.i.l.bf16 %v7929_v43  ;;  %v5925_v43 = vsel %vm3351_vm4, %v11915_v25, %v7951_v44 }
 0x6f4   :  { %v7926_v4 = vunpack.i.h.bf16 %v7924_v22  ;;  %v7925_v20 = vunpack.i.l.bf16 %v7924_v22 }
 0x6f6   :  { %v5940_v48 = vsel %vm5927_vm0, %v5923_v19, %v7926_v4  ;;  %v5989_v13 = vsel %vm5927_vm0, %v5973_v62, %v7925_v20  ;;  %v7048_v19 = vld [vmem:[%s12556_s7 + $0xd8] sm:$0xff]  ;;  %v7965_v62 = vunpack.i.l.bf16 %v7964_v40 }
 0x6f7   :  { %v5957_v30 = vsel %vm5944_vm5, %v5940_v48, %v7931_v61  ;;  %v6005_v36 = vsel %vm5944_vm5, %v5989_v13, %v7930_v23  ;;  %v5975_v23 = vsel %vm3351_vm4, %v11948_v35, %v7950_v47  ;;  %v6267_v48 = vpop.f32.mrf.mxu3  ;;  %v7047_v35 = vld [vmem:[%s12556_s7 + $0xd0] sm:$0xff]  ;;  %7126 = vmatpush.msrb.mxu2 %v7048_v19  ;;  %v7042_v47 = vld [vmem:[%s12556_s7 + $0xa8] sm:$0xff] }
 0x6f8   :  { %6145 = vmatmul.f32.gmra.mxu1 %v5957_v30  ;;  %6210 = vmatmul.f32.gmra.mxu2 %v6005_v36 }
 0x6f9   :  { %7127 = vmatpush.msrb.mxu2 %v7047_v35 }
 0x6fa   :  { %v7944_v1 = vpop.permute.xlu1 %7943 }
 0x6fb   :  { %v7939_v3 = vpop.permute.xlu0 %7938  ;;  %v7946_v56 = vunpack.i.h.bf16 %v7944_v1  ;;  %v7945_v24 = vunpack.i.l.bf16 %v7944_v1  ;;  %v5976_v1 = vsel %vm3351_vm4, %v12012_v49, %v7965_v62  ;;  %7128 = vmatpush.msrb.mxu2 %v7046_v0 }
 0x6fc   :  { %v7941_v59 = vunpack.i.h.bf16 %v7939_v3  ;;  %v7940_v14 = vunpack.i.l.bf16 %v7939_v3 }
 0x6fe   :  { %v5941_v5 = vsel %vm5927_vm0, %v5924_v53, %v7941_v59  ;;  %v5990_v27 = vsel %vm5927_vm0, %v5974_v2, %v7940_v14  ;;  %v7045_v59 = vld [vmem:[%s12556_s7 + $0xc0] sm:$0xff]  ;;  %v7966_v14 = vunpack.i.h.bf16 %v7964_v40  ;;  %v7044_v2 = vld [vmem:[%s12556_s7 + $0xb8] sm:$0xff] }
 0x6ff   :  { %v5958_v6 = vsel %vm5944_vm5, %v5941_v5, %v7946_v56  ;;  %v6006_v15 = vsel %vm5944_vm5, %v5990_v27, %v7945_v24  ;;  %v5638_v5 = vpop.permute.xlu2 %5637  ;;  %7129 = vmatpush.msrb.mxu2 %v7045_v59  ;;  %v6270_v9 = vpop.f32.mrf.mxu3 }
 0x700   :  { %6148 = vmatmul.f32.gmra.mxu1 %v5958_v6  ;;  %6213 = vmatmul.f32.gmra.mxu2 %v6006_v15  ;;  %v7043_v15 = vld [vmem:[%s12556_s7 + $0xb0] sm:$0xff]  ;;  %v5926_v39 = vsel %vm3351_vm4, %v11930_v41, %v7966_v14  ;;  %v7041_v41 = vld [vmem:[%s12556_s7 + $0xa0] sm:$0xff] }
 0x701   :  { %7130 = vmatpush.msrb.mxu2 %v7044_v2  ;;  %v5943_v44 = vsel %vm5927_vm0, %v5926_v39, %v5638_v5 }
 0x703   :  { %v6134_v8 = vpop.f32.mrf.mxu1  ;;  %7131 = vmatpush.msrb.mxu2 %v7043_v15 }
 0x705   :  { %7132 = vmatpush.msrb.mxu2 %v7042_v47 }
 0x707   :  { %7133 = vmatpush.msrb.mxu2 %v7041_v41  ;;  %v6273_v2 = vpop.f32.mrf.mxu3 }
 0x70a   :  { %v6199_v34 = vpop.f32.mrf.mxu2 }
 0x70b   :  { %v6200_v58 = vadd.f32 %v6199_v34, %v6134_v8  ;;  %v6137_v4 = vpop.f32.mrf.mxu1 }
 0x70c   :  { %v7959_v63 = vpop.permute.xlu1 %7958  ;;  %v7954_v31 = vpop.permute.xlu0 %7953 }
 0x70d   :  { %v7961_v26 = vunpack.i.h.bf16 %v7959_v63  ;;  %v7960_v33 = vunpack.i.l.bf16 %v7959_v63  ;;  %v6265_v11 = vadd.f32 %v6264_v12, %v6200_v58  ;;  %v7956_v16 = vunpack.i.h.bf16 %v7954_v31 }
 0x70e   :  { %v7955_v18 = vunpack.i.l.bf16 %v7954_v31  ;;  %v7040_v31 = vld [vmem:[%s12556_s7 + $0x98] sm:$0xff] }
 0x70f   :  { %v6300_v22 = vmul.f32 %v11902_v21, %v6265_v11  ;;  %v5942_v61 = vsel %vm5927_vm0, %v5925_v43, %v7956_v16  ;;  %7134 = vmatpush.msrb.mxu2 %v7040_v31 }
 0x710   :  { %v5959_v20 = vsel %vm5944_vm5, %v5942_v61, %v7961_v26  ;;  %v5991_v29 = vsel %vm5927_vm0, %v5975_v23, %v7955_v18  ;;  %v7039_v26 = vld [vmem:[%s12556_s7 + $0x90] sm:$0xff]  ;;  %v7037_v18 = vld [vmem:[%s12556_s7 + $0x80] sm:$0xff] }
 0x711   :  { %v6320_v25 = vadd.f32 %v11909_v51, %v6300_v22  ;;  %6151 = vmatmul.f32.gmra.mxu1 %v5959_v20  ;;  %v6007_v37 = vsel %vm5944_vm5, %v5991_v29, %v7960_v33  ;;  %7135 = vmatpush.msrb.mxu2 %v7039_v26 }
 0x712   :  { %6216 = vmatmul.f32.gmra.mxu2 %v6007_v37  ;;  %v6202_v13 = vpop.f32.mrf.mxu2 }
 0x713   :  { %v6336_v30 = vmax.f32 %v6320_v25, 0.0  ;;  %v6203_v36 = vadd.f32 %v6202_v13, %v6137_v4  ;;  %v6140_v57 = vpop.f32.mrf.mxu1  ;;  %7136 = vmatpush.msrb.mxu2 %v7038_v42 }
 0x714   :  { %v5830_v46 = vpop.permute.xlu0 %5829  ;;  %v5894_v24 = vpop.permute.xlu1 %5893 }
 0x715   :  { %6352 = vst.msk [vmem:[#allocation5 + $0x40] sm:$0xff] %vm3351_vm4, %v6336_v30  ;;  %v6268_v3 = vadd.f32 %v6267_v48, %v6203_v36  ;;  %v5992_v56 = vsel %vm5927_vm0, %v5976_v1, %v5830_v46  ;;  %7137 = vmatpush.msrb.mxu2 %v7037_v18 }
 0x716   :  { %v6008_v27 = vsel %vm5944_vm5, %v5992_v56, %v5894_v24 }
 0x717   :  { %v6301_v53 = vmul.f32 %v11902_v21, %v6268_v3 }
 0x719   :  { %v6321_v49 = vadd.f32 %v11909_v51, %v6301_v53  ;;  %v12198_v53 = vld [vmem:[#allocation6 + $0x11] sm:$0xff] }
 0x71a   :  { %6219 = vmatmul.f32.gmra.mxu2 %v6008_v27  ;;  %v6205_v6 = vpop.f32.mrf.mxu2 }
 0x71b   :  { %v6337_v8 = vmax.f32 %v6321_v49, 0.0  ;;  %v6206_v12 = vadd.f32 %v6205_v6, %v6140_v57 }
 0x71c   :  { %v5702_v34 = vpop.permute.xlu0 %5701  ;;  %v6402_v11 = vld [vmem:[#allocation5 + $0x40] sm:$0xff] }
 0x71d   :  { %6353 = vst.msk [vmem:[#allocation5 + $0x48] sm:$0xff] %vm3351_vm4, %v6337_v8  ;;  %v6271_v58 = vadd.f32 %v6270_v9, %v6206_v12  ;;  %v5960_v38 = vsel %vm5944_vm5, %v5943_v44, %v5702_v34 }
 0x71e   :  { %6154 = vmatmul.f32.gmra.mxu1 %v5960_v38 }
 0x71f   :  { %v6302_v63 = vmul.f32 %v11902_v21, %v6271_v58 }
 0x721   :  { %v6322_v32 = vadd.f32 %v11909_v51, %v6302_v63 }
 0x723   :  { %v6338_v33 = vmax.f32 %v6322_v32, 0.0 }
 0x724   :  { %v6403_v16 = vld [vmem:[#allocation5 + $0x48] sm:$0xff] }
 0x725   :  { %v6414_v40 = vmax.f32 %v6402_v11, %v6403_v16  ;;  %6354 = vst.msk [vmem:[#allocation5 + $0x50] sm:$0xff] %vm3351_vm4, %v6338_v33 }
 0x727   :  { %v6438_v43 = vrot.slane %v6414_v40, 2  ;;  %v6439_v22 = vrot.slane %v6414_v40, 4  ;;  %v6440_v61 = vrot.slane %v6414_v40, 6  ;;  %v7682_v23 = vrot.slane %v6414_v40, 9 }
 0x728   :  { %v7974_v56 = vpop.permute.xlu2 %7973 }
 0x729   :  { %v7683_v4 = vrot.slane %v6438_v43, 9  ;;  %v7684_v20 = vrot.slane %v6439_v22, 9  ;;  %v7685_v29 = vrot.slane %v6440_v61, 9  ;;  %v6586_v19 = vmax.f32 %v6414_v40, %v7682_v23 }
 0x72a   :  { %v7975_v49 = vunpack.i.l.bf16 %v7974_v56  ;;  %v7976_v58 = vunpack.i.h.bf16 %v7974_v56 }
 0x72b   :  { %v6587_v62 = vmax.f32 %v6438_v43, %v7683_v4  ;;  %v6588_v25 = vmax.f32 %v6439_v22, %v7684_v20  ;;  %v6589_v37 = vmax.f32 %v6440_v61, %v7685_v29  ;;  %v6650_v48 = vperm.slane %v6586_v19, 0 }
 0x72c   :  { %v6404_v63 = vld [vmem:[#allocation5 + $0x50] sm:$0xff] }
 0x72d   :  { %v6651_v13 = vperm.slane %v6587_v62, 0  ;;  %v6652_v35 = vperm.slane %v6588_v25, 0  ;;  %v6653_v30 = vperm.slane %v6589_v37, 0 }
 0x72e   :  { %v7969_v1 = vpop.permute.xlu1 %7968 }
 0x72f   :  { %v6678_v36 = vsel %vm5230_vm14, %v6651_v13, %v6650_v48  ;;  %v7970_v3 = vunpack.i.l.bf16 %v7969_v1  ;;  %v7971_v8 = vunpack.i.h.bf16 %v7969_v1 }
 0x730   :  { %v6679_v46 = vsel %vm12913_vm6, %v6652_v35, %v6678_v36 }
 0x731   :  { %v6680_v0 = vsel %vm12914_vm7, %v6653_v30, %v6679_v46  ;;  %v6997_v5 = vsel %vm3351_vm4, %v12198_v53, %v7970_v3  ;;  %v6998_v47 = vsel %vm3351_vm4, %v12072_v45, %v7971_v8 }
 0x732   :  { %6704 = vst.msk [vmem:[#allocation6 + $0x71] sm:$0xf] %vm6699_vm15, %v6680_v0  ;;  %v7005_v39 = vsel %vm5927_vm0, %v6997_v5, %v7975_v49  ;;  %v7006_v38 = vsel %vm5927_vm0, %v6998_v47, %v7976_v58  ;;  %v6276_v5 = vpop.f32.mrf.mxu3 }
 0x736   :  { %v6143_v24 = vpop.f32.mrf.mxu1 }
 0x738   :  { %v7989_v41 = vpop.permute.xlu2 %7988 }
 0x739   :  { %v7990_v33 = vunpack.i.l.bf16 %v7989_v41  ;;  %v7991_v13 = vunpack.i.h.bf16 %v7989_v41 }
 0x73a   :  { %v6279_v47 = vpop.f32.mrf.mxu3 }
 0x73c   :  { %v6208_v59 = vpop.f32.mrf.mxu2 }
 0x73d   :  { %v6209_v14 = vadd.f32 %v6208_v59, %v6143_v24 }
 0x73f   :  { %v7979_v27 = vpop.permute.xlu0 %7978  ;;  %v6274_v57 = vadd.f32 %v6273_v2, %v6209_v14 }
 0x740   :  { %v7980_v6 = vunpack.i.l.bf16 %v7979_v27  ;;  %v7981_v34 = vunpack.i.h.bf16 %v7979_v27 }
 0x741   :  { %v6303_v15 = vmul.f32 %v11902_v21, %v6274_v57 }
 0x742   :  { %v7013_v12 = vsel %vm5944_vm5, %v7005_v39, %v7980_v6  ;;  %v7014_v21 = vsel %vm5944_vm5, %v7006_v38, %v7981_v34  ;;  %v8133_v6 = vld [vmem:[%s12554_s5] ss:$0 sm:$0xff] }
 0x743   :  { %v6323_v9 = vadd.f32 %v11909_v51, %v6303_v15  ;;  %7138 = vmatmul.f32.vlgmr.msrb.gmra.mxu2 %v7013_v12  ;;  %v8134_v39 = vld [vmem:[%s12555_s6] ss:$0 sm:$0xff] }
 0x745   :  { %v6339_v44 = vmax.f32 %v6323_v9, 0.0 }
 0x747   :  { %6355 = vst.msk [vmem:[#allocation5 + $0x58] sm:$0xff] %vm3351_vm4, %v6339_v44 }
 0x74b   :  { %7141 = vmatmul.f32.gmra.mxu2 %v7014_v21 }
 0x74e   :  { %v6405_v31 = vld [vmem:[#allocation5 + $0x58] sm:$0xff]  ;;  %v7984_v26 = vpop.permute.xlu1 %7983 }
 0x74f   :  { %v6415_v32 = vmax.f32 %v6404_v63, %v6405_v31  ;;  %v7994_v51 = vpop.permute.xlu0 %7993  ;;  %v7985_v11 = vunpack.i.l.bf16 %v7984_v26  ;;  %v7986_v18 = vunpack.i.h.bf16 %v7984_v26  ;;  %v6282_v26 = vpop.f32.mrf.mxu3 }
 0x750   :  { %v7995_v43 = vunpack.i.l.bf16 %v7994_v51  ;;  %v7996_v1 = vunpack.i.h.bf16 %v7994_v51 }
 0x751   :  { %v6441_v16 = vrot.slane %v6415_v32, 2  ;;  %v6442_v42 = vrot.slane %v6415_v32, 4  ;;  %v6443_v40 = vrot.slane %v6415_v32, 6  ;;  %v7686_v45 = vrot.slane %v6415_v32, 9 }
 0x752   :  { %v6999_v22 = vsel %vm3351_vm4, %v12074_v10, %v7985_v11  ;;  %v7000_v37 = vsel %vm3351_vm4, %v12095_v17, %v7986_v18  ;;  %v12223_v17 = vld [vmem:[#allocation6 + $0x72] sm:$0xff] }
 0x753   :  { %v7007_v61 = vsel %vm5927_vm0, %v6999_v22, %v7990_v33  ;;  %v7687_v23 = vrot.slane %v6441_v16, 9  ;;  %v7688_v4 = vrot.slane %v6442_v42, 9  ;;  %v7689_v29 = vrot.slane %v6443_v40, 9 }
 0x754   :  { %v7015_v20 = vsel %vm5944_vm5, %v7007_v61, %v7995_v43  ;;  %v6590_v19 = vmax.f32 %v6415_v32, %v7686_v45  ;;  %v7008_v10 = vsel %vm5927_vm0, %v7000_v37, %v7991_v13 }
 0x755   :  { %7144 = vmatmul.f32.gmra.mxu2 %v7015_v20  ;;  %v6591_v62 = vmax.f32 %v6441_v16, %v7687_v23  ;;  %v6592_v25 = vmax.f32 %v6442_v42, %v7688_v4  ;;  %v6593_v48 = vmax.f32 %v6443_v40, %v7689_v29  ;;  %v7016_v24 = vsel %vm5944_vm5, %v7008_v10, %v7996_v1 }
 0x756   :  { %v6654_v35 = vperm.slane %v6590_v19, 0 }
 0x757   :  { %v6655_v30 = vperm.slane %v6591_v62, 0  ;;  %v6656_v36 = vperm.slane %v6592_v25, 0  ;;  %v6657_v46 = vperm.slane %v6593_v48, 0  ;;  %v6285_v48 = vpop.f32.mrf.mxu3 }
 0x759   :  { %v6681_v0 = vsel %vm5230_vm14, %v6655_v30, %v6654_v35 }
 0x75a   :  { %v6682_v3 = vsel %vm12915_vm8, %v6656_v36, %v6681_v0 }
 0x75b   :  { %v6683_v56 = vsel %vm12916_vm1, %v6657_v46, %v6682_v3 }
 0x75c   :  { %6705 = vst.msk [vmem:[#allocation6 + $0x81] sm:$0xf] %vm6699_vm15, %v6683_v56 }
 0x75d   :  { %7147 = vmatmul.f32.gmra.mxu2 %v7016_v24 }
 0x763   :  { %v12225_v59 = vld [vmem:[#allocation6 + $0x82] sm:$0xff] }
 0x764   :  { %v7997_v14 = vpack.i.bf16 %v12225_v59, %v12223_v17 }
 0x766   :  { %7998 = vrot.lane.b32.xlu1 %v7997_v14, %s8168_s28 }
 0x775   :  { %v6146_v2 = vpop.f32.mrf.mxu1 }
 0x77b   :  { %v6211_v49 = vpop.f32.mrf.mxu2 }
 0x77c   :  { %v6212_v27 = vadd.f32 %v6211_v49, %v6146_v2  ;;  %v7036_v49 = vld [vmem:[%s12556_s7 + $0x78] sm:$0xff] }
 0x77d   :  { %v6149_v12 = vpop.f32.mrf.mxu1  ;;  %7081 = vmatpush.msra.mxu3 %v7036_v49  ;;  %v7024_v49 = vld [vmem:[%s12556_s7 + $0x18] sm:$0xff] }
 0x77e   :  { %v6277_v57 = vadd.f32 %v6276_v5, %v6212_v27  ;;  %v12244_v5 = vld [vmem:[#allocation6 + $0x81] sm:$0xff] }
 0x780   :  { %v6304_v15 = vmul.f32 %v8133_v6, %v6277_v57  ;;  %v12251_v57 = vld [vmem:[#allocation6 + $0x80] sm:$0xff] }
 0x782   :  { %v6324_v8 = vadd.f32 %v8134_v39, %v6304_v15 }
 0x783   :  { %v6214_v9 = vpop.f32.mrf.mxu2 }
 0x784   :  { %v6340_v44 = vmax.f32 %v6324_v8, 0.0  ;;  %v6215_v34 = vadd.f32 %v6214_v9, %v6149_v12 }
 0x786   :  { %6356 = vst.msk [vmem:[#allocation5 + $0x60] sm:$0xff] %vm3351_vm4, %v6340_v44  ;;  %v6280_v58 = vadd.f32 %v6279_v47, %v6215_v34  ;;  %v7035_v44 = vld [vmem:[%s12556_s7 + $0x70] sm:$0xff] }
 0x787   :  { %7082 = vmatpush.msra.mxu3 %v7035_v44  ;;  %v7022_v44 = vld [vmem:[%s12556_s7 + $0x8] sm:$0xff] }
 0x788   :  { %v6305_v38 = vmul.f32 %v8133_v6, %v6280_v58 }
 0x78a   :  { %v6325_v21 = vadd.f32 %v8134_v39, %v6305_v38 }
 0x78c   :  { %v6341_v41 = vmax.f32 %v6325_v21, 0.0 }
 0x78d   :  { %v6406_v31 = vld [vmem:[#allocation5 + $0x60] sm:$0xff] }
 0x78e   :  { %6357 = vst.msk [vmem:[#allocation5 + $0x68] sm:$0xff] %vm3351_vm4, %v6341_v41  ;;  %v6152_v63 = vpop.f32.mrf.mxu1 }
 0x795   :  { %v6407_v32 = vld [vmem:[#allocation5 + $0x68] sm:$0xff]  ;;  %v6217_v33 = vpop.f32.mrf.mxu2 }
 0x796   :  { %v6416_v51 = vmax.f32 %v6406_v31, %v6407_v32  ;;  %v6218_v11 = vadd.f32 %v6217_v33, %v6152_v63 }
 0x798   :  { %v6444_v16 = vrot.slane %v6416_v51, 2  ;;  %v6445_v42 = vrot.slane %v6416_v51, 4  ;;  %v6446_v40 = vrot.slane %v6416_v51, 6  ;;  %v7690_v45 = vrot.slane %v6416_v51, 9 }
 0x799   :  { %v6283_v18 = vadd.f32 %v6282_v26, %v6218_v11 }
 0x79a   :  { %v7691_v43 = vrot.slane %v6444_v16, 9  ;;  %v7692_v22 = vrot.slane %v6445_v42, 9  ;;  %v7693_v61 = vrot.slane %v6446_v40, 9  ;;  %v6594_v23 = vmax.f32 %v6416_v51, %v7690_v45 }
 0x79b   :  { %v6306_v4 = vmul.f32 %v8133_v6, %v6283_v18  ;;  %v6155_v20 = vpop.f32.mrf.mxu1 }
 0x79c   :  { %v6595_v29 = vmax.f32 %v6444_v16, %v7691_v43  ;;  %v6596_v19 = vmax.f32 %v6445_v42, %v7692_v22  ;;  %v6597_v62 = vmax.f32 %v6446_v40, %v7693_v61  ;;  %v6658_v13 = vperm.slane %v6594_v23, 0  ;;  %v7034_v42 = vld [vmem:[%s12556_s7 + $0x68] sm:$0xff]  ;;  %v7033_v22 = vld [vmem:[%s12556_s7 + $0x60] sm:$0xff]  ;;  %v6772_v61 = vld [vmem:[#allocation6 + $0xb1] sm:$0xff] }
 0x79d   :  { %v6326_v25 = vadd.f32 %v8134_v39, %v6306_v4  ;;  %v6220_v37 = vpop.f32.mrf.mxu2  ;;  %7083 = vmatpush.msra.mxu3 %v7034_v42  ;;  %v6764_v23 = vld [vmem:[#allocation6 + $0xb0] sm:$0xff] }
 0x79e   :  { %v6659_v35 = vperm.slane %v6595_v29, 0  ;;  %v6660_v30 = vperm.slane %v6596_v19, 0  ;;  %v6221_v10 = vadd.f32 %v6220_v37, %v6155_v20  ;;  %v6661_v46 = vperm.slane %v6597_v62, 0 }
 0x79f   :  { %v6342_v36 = vmax.f32 %v6326_v25, 0.0  ;;  %7084 = vmatpush.msra.mxu3 %v7033_v22 }
 0x7a0   :  { %v6684_v0 = vsel %vm5230_vm14, %v6659_v35, %v6658_v13  ;;  %v6286_v1 = vadd.f32 %v6285_v48, %v6221_v10  ;;  %v7032_v48 = vld [vmem:[%s12556_s7 + $0x58] sm:$0xff]  ;;  %v6724_v13 = vld [vmem:[#allocation6 + $0x2] sm:$0xff] }
 0x7a1   :  { %6358 = vst.msk [vmem:[#allocation5 + $0x70] sm:$0xff] %vm3351_vm4, %v6342_v36  ;;  %v6685_v3 = vsel %vm12917_vm2, %v6660_v30, %v6684_v0  ;;  %7085 = vmatpush.msra.mxu3 %v7032_v48  ;;  %v6716_v35 = vld [vmem:[#allocation6 + $0x1] sm:$0xff]  ;;  %v12289_v30 = vld [vmem:[#allocation6 + $0x10] sm:$0xff]  ;;  %v8032_v10 = vpack.i.bf16 %v12059_v60, %v6724_v13 }
 0x7a2   :  { %v6686_v56 = vsel %vm12918_vm3, %v6661_v46, %v6685_v3  ;;  %v6307_v24 = vmul.f32 %v8133_v6, %v6286_v1  ;;  %v8037_v36 = vpack.i.bf16 %v12076_v28, %v12289_v30  ;;  %v8027_v46 = vpack.i.bf16 %v12198_v53, %v6716_v35  ;;  %v7031_v0 = vld [vmem:[%s12556_s7 + $0x50] sm:$0xff]  ;;  %v7030_v60 = vld [vmem:[%s12556_s7 + $0x48] sm:$0xff]  ;;  %v7029_v28 = vld [vmem:[%s12556_s7 + $0x40] sm:$0xff] }
 0x7a3   :  { %6706 = vst.msk [vmem:[#allocation6 + $0x91] sm:$0xf] %vm6699_vm15, %v6686_v56  ;;  %7086 = vmatpush.msra.mxu3 %v7031_v0  ;;  %v8047_v1 = vpack.i.bf16 %v12093_v50, %v12061_v55  ;;  %v6720_v53 = vld [vmem:[#allocation6 + $0x61] sm:$0xff]  ;;  %v6721_v3 = vld [vmem:[#allocation6 + $0x71] sm:$0xff] }
 0x7a4   :  { %v6327_v14 = vadd.f32 %v8134_v39, %v6307_v24  ;;  %v6728_v55 = vld [vmem:[#allocation6 + $0x62] sm:$0xff]  ;;  %v8052_v56 = vpack.i.bf16 %v6721_v3, %v6720_v53  ;;  %v7056_v24 = vld [vmem:[%s12556_s7 + $0x118] sm:$0xff] }
 0x7a5   :  { %7087 = vmatpush.msra.mxu3 %v7030_v60  ;;  %7175 = vmatpush.msra.mxu2 %v7056_v24  ;;  %v6708_v13 = vld [vmem:[#allocation6] sm:$0xff] }
 0x7a6   :  { %v6343_v2 = vmax.f32 %v6327_v14, 0.0  ;;  %v7026_v14 = vld [vmem:[%s12556_s7 + $0x28] sm:$0xff] }
 0x7a7   :  { %7088 = vmatpush.msra.mxu3 %v7029_v28 }
 0x7a8   :  { %6359 = vst.msk [vmem:[#allocation5 + $0x78] sm:$0xff] %vm3351_vm4, %v6343_v2  ;;  %v6408_v8 = vld [vmem:[#allocation5 + $0x70] sm:$0xff]  ;;  %v7025_v2 = vld [vmem:[%s12556_s7 + $0x20] sm:$0xff] }
 0x7aa   :  { %v12249_v27 = vld [vmem:[#allocation6 + $0x91] sm:$0xff] }
 0x7ab   :  { %v12253_v15 = vld [vmem:[#allocation6 + $0x90] sm:$0xff]  ;;  %v8007_v6 = vpack.i.bf16 %v12249_v27, %v12244_v5 }
 0x7ac   :  { %v8002_v39 = vpack.i.bf16 %v12253_v15, %v12251_v57  ;;  %v12274_v4 = vld [vmem:[#allocation6 + $0x92] sm:$0xff] }
 0x7ad   :  { %8008 = vrot.lane.b32.xlu0 %v8007_v6, %s8170_s25  ;;  %v7054_v6 = vld [vmem:[%s12556_s7 + $0x108] sm:$0xff] }
 0x7ae   :  { %8003 = vrot.lane.b32.xlu2 %v8002_v39, %s8171_s27  ;;  %v7023_v39 = vld [vmem:[%s12556_s7 + $0x10] sm:$0xff] }
 0x7af   :  { %v6409_v12 = vld [vmem:[#allocation5 + $0x78] sm:$0xff] }
 0x7b0   :  { %v6417_v9 = vmax.f32 %v6408_v8, %v6409_v12 }
 0x7b2   :  { %v6447_v34 = vrot.slane %v6417_v9, 2  ;;  %v7694_v47 = vrot.slane %v6417_v9, 9  ;;  %v6448_v58 = vrot.slane %v6417_v9, 4  ;;  %v6449_v38 = vrot.slane %v6417_v9, 6 }
 0x7b4   :  { %v7695_v21 = vrot.slane %v6447_v34, 9  ;;  %v7696_v41 = vrot.slane %v6448_v58, 9  ;;  %v7697_v63 = vrot.slane %v6449_v38, 9  ;;  %v6598_v31 = vmax.f32 %v6417_v9, %v7694_v47 }
 0x7b6   :  { %v6599_v32 = vmax.f32 %v6447_v34, %v7695_v21  ;;  %v6600_v26 = vmax.f32 %v6448_v58, %v7696_v41  ;;  %v6601_v51 = vmax.f32 %v6449_v38, %v7697_v63  ;;  %v6662_v33 = vperm.slane %v6598_v31, 0  ;;  %v7053_v41 = vld [vmem:[%s12556_s7 + $0x100] sm:$0xff] }
 0x7b8   :  { %v6663_v11 = vperm.slane %v6599_v32, 0  ;;  %v6664_v16 = vperm.slane %v6600_v26, 0  ;;  %v6665_v40 = vperm.slane %v6601_v51, 0  ;;  %v7021_v51 = vld [vmem:[%s12556_s7] sm:$0xff] }
 0x7ba   :  { %v6687_v45 = vsel %vm5230_vm14, %v6663_v11, %v6662_v33 }
 0x7bb   :  { %v6688_v18 = vsel %vm12919_vm9, %v6664_v16, %v6687_v45 }
 0x7bc   :  { %v6689_v43 = vsel %vm12920_vm10, %v6665_v40, %v6688_v18 }
 0x7bd   :  { %6707 = vst.msk [vmem:[#allocation6 + $0xa1] sm:$0xf] %vm6699_vm15, %v6689_v43 }
 0x7c4   :  { %v12276_v20 = vld [vmem:[#allocation6 + $0xa1] sm:$0xff] }
 0x7c5   :  { %v6763_v29 = vld [vmem:[#allocation6 + $0xa0] sm:$0xff]  ;;  %v8022_v62 = vpack.i.bf16 %v6772_v61, %v12276_v20 }
 0x7c6   :  { %v12278_v19 = vld [vmem:[#allocation6 + $0xa2] sm:$0xff]  ;;  %v8017_v25 = vpack.i.bf16 %v6764_v23, %v6763_v29 }
 0x7c7   :  { %v8012_v37 = vpack.i.bf16 %v12278_v19, %v12274_v4  ;;  %8023 = vrot.lane.b32.xlu0 %v8022_v62, %s8170_s25 }
 0x7c8   :  { %8018 = vrot.lane.b32.xlu2 %v8017_v25, %s8171_s27 }
 0x7c9   :  { %8013 = vrot.lane.b32.xlu1 %v8012_v37, %s8168_s28 }
 0x7cf   :  { %8038 = vrot.lane.b32.xlu0 %v8037_v36, %s8170_s25 }
 0x7d0   :  { %8033 = vrot.lane.b32.xlu2 %v8032_v10, %s8171_s27 }
 0x7d1   :  { %8028 = vrot.lane.b32.xlu1 %v8027_v46, %s8168_s28 }
 0x7d7   :  { %6857 = vrot.lane.b32.xlu0 %v12078_v54, %s8170_s25  ;;  %v12322_v54 = vld [vmem:[#allocation6 + $0x70] sm:$0xff] }
 0x7d8   :  { %8048 = vrot.lane.b32.xlu2 %v8047_v1, %s8171_s27  ;;  %v7999_v8 = vpop.permute.xlu1 %7998 }
 0x7d9   :  { %8043 = vrot.lane.b32.xlu1 %v12082_v7, %s8168_s28  ;;  %v7028_v7 = vld [vmem:[%s12556_s7 + $0x38] sm:$0xff]  ;;  %v8000_v9 = vunpack.i.l.bf16 %v7999_v8  ;;  %v8001_v31 = vunpack.i.h.bf16 %v7999_v8 }
 0x7da   :  { %7089 = vmatpush.msra.mxu3 %v7028_v7 }
 0x7db   :  { %v7001_v38 = vsel %vm3351_vm4, %v6721_v3, %v8000_v9  ;;  %v7002_v33 = vsel %vm3351_vm4, %v12244_v5, %v8001_v31 }
 0x7df   :  { %6829 = vrot.lane.b32.xlu0 %v6728_v55, %s8171_s27 }
 0x7e0   :  { %8053 = vrot.lane.b32.xlu2 %v8052_v56, %s8168_s28 }
 0x7e1   :  { %6859 = vrot.lane.b32.xlu1 %v12097_v52, %s8170_s25  ;;  %v7027_v52 = vld [vmem:[%s12556_s7 + $0x30] sm:$0xff] }
 0x7e2   :  { %7090 = vmatpush.msra.mxu3 %v7027_v52 }
 0x7e4   :  { %7091 = vmatpush.msra.mxu3 %v7026_v14 }
 0x7e6   :  { %7092 = vmatpush.msra.mxu3 %v7025_v2  ;;  %v6773_v2 = vld [vmem:[#allocation6 + $0x22] sm:$0xff] }
 0x7e7   :  { %6863 = vrot.lane.b32.xlu0 %v12251_v57, %s8170_s25 }
 0x7e8   :  { %6831 = vrot.lane.b32.xlu2 %v12223_v17, %s8171_s27  ;;  %v7055_v17 = vld [vmem:[%s12556_s7 + $0x110] sm:$0xff]  ;;  %7093 = vmatpush.msra.mxu3 %v7024_v49  ;;  %v6710_v49 = vld [vmem:[#allocation6 + $0x20] sm:$0xff]  ;;  %s8172_s7 = smov [#allocation9]  }
 0x7e9   :  { %6861 = vrot.lane.b32.xlu1 %v12322_v54, %s8170_s25  ;;  %7176 = vmatpush.msra.mxu2 %v7055_v17  ;;  %s7444_s24 = sshll.u32 %s8172_s7, 4  ;;  %s7445_s24 = int_to_ptr.vmem [resolvable:$true] %s7444_s24 }
 0x7ea   :  { %7094 = vmatpush.msra.mxu3 %v7023_v39 }
 0x7eb   :  { %7177 = vmatpush.msra.mxu2 %v7054_v6 }
 0x7ec   :  { %7095 = vmatpush.msra.mxu3 %v7022_v44 }
 0x7ed   :  { %7178 = vmatpush.msra.mxu2 %v7053_v41 }
 0x7ee   :  { %7096 = vmatpush.msra.mxu3 %v7021_v51 }
 0x7ef   :  { %6865 = vrot.lane.b32.xlu0 %v12253_v15, %s8170_s25 }
 0x7f0   :  { %6833 = vrot.lane.b32.xlu2 %v12225_v59, %s8171_s27 }
 0x7f1   :  { %6801 = vrot.lane.b32.xlu1 %v12244_v5, %s8168_s28 }
 0x7f7   :  { %6867 = vrot.lane.b32.xlu0 %v6763_v29, %s8170_s25 }
 0x7f8   :  { %6835 = vrot.lane.b32.xlu2 %v12274_v4, %s8171_s27 }
 0x7f9   :  { %6803 = vrot.lane.b32.xlu1 %v12249_v27, %s8168_s28 }
 0x808   :  { %v8004_v12 = vpop.permute.xlu2 %8003 }
 0x809   :  { %v8005_v34 = vunpack.i.l.bf16 %v8004_v12  ;;  %v8006_v32 = vunpack.i.h.bf16 %v8004_v12 }
 0x80b   :  { %v7009_v21 = vsel %vm5927_vm0, %v7001_v38, %v8005_v34  ;;  %v7010_v11 = vsel %vm5927_vm0, %v7002_v33, %v8006_v32  ;;  %v6711_v34 = vld [vmem:[#allocation6 + $0x30] sm:$0xff] }
 0x81f   :  { %v8009_v47 = vpop.permute.xlu0 %8008 }
 0x820   :  { %v8010_v58 = vunpack.i.l.bf16 %v8009_v47  ;;  %v8011_v26 = vunpack.i.h.bf16 %v8009_v47 }
 0x822   :  { %v7017_v63 = vsel %vm5944_vm5, %v7009_v21, %v8010_v58  ;;  %v7018_v16 = vsel %vm5944_vm5, %v7010_v11, %v8011_v26  ;;  %v8019_v42 = vpop.permute.xlu2 %8018  ;;  %v6712_v26 = vld [vmem:[#allocation6 + $0x60] sm:$0xff] }
 0x823   :  { %7150 = vmatmul.f32.gmra.mxu2 %v7017_v63  ;;  %v8020_v43 = vunpack.i.l.bf16 %v8019_v42  ;;  %v8021_v37 = vunpack.i.h.bf16 %v8019_v42  ;;  %v6775_v63 = vld [vmem:[#allocation6 + $0x42] sm:$0xff] }
 0x82a   :  { %v8034_v5 = vpop.permute.xlu2 %8033 }
 0x82b   :  { %7153 = vmatmul.f32.gmra.mxu2 %v7018_v16  ;;  %v8035_v10 = vunpack.i.l.bf16 %v8034_v5  ;;  %v8036_v55 = vunpack.i.h.bf16 %v8034_v5 }
 0x832   :  { %v8049_v17 = vpop.permute.xlu2 %8048 }
 0x833   :  { %v8050_v39 = vunpack.i.l.bf16 %v8049_v17  ;;  %v8051_v58 = vunpack.i.h.bf16 %v8049_v17 }
 0x839   :  { %v8024_v40 = vpop.permute.xlu0 %8023 }
 0x83a   :  { %v8025_v22 = vunpack.i.l.bf16 %v8024_v40  ;;  %v8026_v0 = vunpack.i.h.bf16 %v8024_v40  ;;  %v8054_v38 = vpop.permute.xlu2 %8053 }
 0x83b   :  { %v8014_v45 = vpop.permute.xlu1 %8013  ;;  %v8055_v32 = vunpack.i.l.bf16 %v8054_v38  ;;  %v8056_v40 = vunpack.i.h.bf16 %v8054_v38 }
 0x83c   :  { %v8015_v18 = vunpack.i.l.bf16 %v8014_v45  ;;  %v8016_v61 = vunpack.i.h.bf16 %v8014_v45 }
 0x83d   :  { %v6977_v33 = vsel %vm3351_vm4, %v6712_v26, %v8055_v32 }
 0x83e   :  { %v7003_v23 = vsel %vm3351_vm4, %v12249_v27, %v8015_v18  ;;  %v7004_v25 = vsel %vm3351_vm4, %v12276_v20, %v8016_v61 }
 0x83f   :  { %v7011_v29 = vsel %vm5927_vm0, %v7003_v23, %v8020_v43  ;;  %v7012_v46 = vsel %vm5927_vm0, %v7004_v25, %v8021_v37  ;;  %v6978_v43 = vsel %vm3351_vm4, %v12322_v54, %v8056_v40 }
 0x840   :  { %v7019_v62 = vsel %vm5944_vm5, %v7011_v29, %v8025_v22  ;;  %v7020_v3 = vsel %vm5944_vm5, %v7012_v46, %v8026_v0 }
 0x841   :  { %7156 = vmatmul.f32.gmra.mxu2 %v7019_v62  ;;  %v8039_v48 = vpop.permute.xlu0 %8038 }
 0x842   :  { %v8040_v1 = vunpack.i.l.bf16 %v8039_v48  ;;  %v8041_v24 = vunpack.i.h.bf16 %v8039_v48  ;;  %v6832_v16 = vpop.permute.xlu2 %6831 }
 0x843   :  { %v8029_v35 = vpop.permute.xlu1 %8028  ;;  %v6986_v22 = vsel %vm5927_vm0, %v6978_v43, %v6832_v16 }
 0x844   :  { %v8030_v36 = vunpack.i.l.bf16 %v8029_v35  ;;  %v8031_v27 = vunpack.i.h.bf16 %v8029_v35 }
 0x846   :  { %v6973_v60 = vsel %vm3351_vm4, %v6708_v13, %v8030_v36  ;;  %v6974_v20 = vsel %vm3351_vm4, %v12289_v30, %v8031_v27  ;;  %v7139_v36 = vpop.f32.mrf.mxu2 }
 0x847   :  { %v6981_v28 = vsel %vm5927_vm0, %v6973_v60, %v8035_v10  ;;  %v6982_v7 = vsel %vm5927_vm0, %v6974_v20, %v8036_v55  ;;  %v12438_v55 = vld [vmem:[%s12558_s9] ss:$0 sm:$0xff] }
 0x848   :  { %v6989_v53 = vsel %vm5944_vm5, %v6981_v28, %v8040_v1  ;;  %v6990_v14 = vsel %vm5944_vm5, %v6982_v7, %v8041_v24 }
 0x849   :  { %7097 = vmatmul.f32.vlgmr.msra.gmra.mxu3 %v6989_v53  ;;  %7159 = vmatmul.f32.gmra.mxu2 %v7020_v3  ;;  %v6858_v30 = vpop.permute.xlu0 %6857  ;;  %v12433_v53 = vld [vmem:[%s12557_s8] ss:$0 sm:$0xff] }
 0x84a   :  { %v6834_v23 = vpop.permute.xlu2 %6833 }
 0x84b   :  { %v8044_v56 = vpop.permute.xlu1 %8043 }
 0x84c   :  { %v8045_v52 = vunpack.i.l.bf16 %v8044_v56  ;;  %v8046_v12 = vunpack.i.h.bf16 %v8044_v56 }
 0x84e   :  { %v6975_v6 = vsel %vm3351_vm4, %v6710_v49, %v8045_v52  ;;  %v6976_v47 = vsel %vm3351_vm4, %v6711_v34, %v8046_v12  ;;  %v7142_v10 = vpop.f32.mrf.mxu2 }
 0x84f   :  { %v6983_v8 = vsel %vm5927_vm0, %v6975_v6, %v8050_v39  ;;  %v6984_v21 = vsel %vm5927_vm0, %v6976_v47, %v8051_v58 }
 0x850   :  { %v6991_v9 = vsel %vm5944_vm5, %v6983_v8, %v6858_v30 }
 0x851   :  { %7100 = vmatmul.f32.gmra.mxu3 %v6990_v14  ;;  %7698 = vmatmul.msk.f32.vlgmr.msra.gmra.mxu2 %vm3351_vm4, %v6773_v2  ;;  %v6830_v31 = vpop.permute.xlu0 %6829 }
 0x852   :  { %v6985_v11 = vsel %vm5927_vm0, %v6977_v33, %v6830_v31  ;;  %v6836_v48 = vpop.permute.xlu2 %6835 }
 0x853   :  { %v6860_v44 = vpop.permute.xlu1 %6859 }
 0x854   :  { %v6992_v41 = vsel %vm5944_vm5, %v6984_v21, %v6860_v44 }
 0x856   :  { %v7145_v46 = vpop.f32.mrf.mxu2 }
 0x859   :  { %7103 = vmatmul.f32.gmra.mxu3 %v6991_v9  ;;  %7699 = vmatmul.msk.f32.gmra.mxu2 %vm3351_vm4, %v12093_v50  ;;  %v6776_v50 = vld [vmem:[#allocation6 + $0x52] sm:$0xff]  ;;  %v6864_v45 = vpop.permute.xlu0 %6863 }
 0x85a   :  { %v6994_v61 = vsel %vm5944_vm5, %v6986_v22, %v6864_v45 }
 0x85b   :  { %v6862_v51 = vpop.permute.xlu1 %6861 }
 0x85c   :  { %v6993_v42 = vsel %vm5944_vm5, %v6985_v11, %v6862_v51 }
 0x861   :  { %7106 = vmatmul.f32.gmra.mxu3 %v6992_v41  ;;  %7700 = vmatmul.msk.f32.gmra.mxu2 %vm3351_vm4, %v6775_v63  ;;  %v6866_v62 = vpop.permute.xlu0 %6865 }
 0x863   :  { %v6802_v18 = vpop.permute.xlu1 %6801 }
 0x864   :  { %v6979_v29 = vsel %vm3351_vm4, %v12251_v57, %v6802_v18  ;;  %v6780_v57 = vld [vmem:[#allocation6 + $0xb2] sm:$0xff] }
 0x865   :  { %v6987_v5 = vsel %vm5927_vm0, %v6979_v29, %v6834_v23 }
 0x866   :  { %v6995_v37 = vsel %vm5944_vm5, %v6987_v5, %v6866_v62 }
 0x869   :  { %7109 = vmatmul.f32.gmra.mxu3 %v6993_v42  ;;  %7701 = vmatmul.msk.f32.gmra.mxu2 %vm3351_vm4, %v6776_v50  ;;  %v6868_v13 = vpop.permute.xlu0 %6867 }
 0x86b   :  { %v6804_v25 = vpop.permute.xlu1 %6803 }
 0x86c   :  { %v6980_v54 = vsel %vm3351_vm4, %v12253_v15, %v6804_v25 }
 0x871   :  { %7112 = vmatmul.f32.gmra.mxu3 %v6994_v61  ;;  %7702 = vmatmul.msk.f32.gmra.mxu2 %vm3351_vm4, %v12225_v59  ;;  %v6988_v59 = vsel %vm5927_vm0, %v6980_v54, %v6836_v48 }
 0x872   :  { %v6996_v35 = vsel %vm5944_vm5, %v6988_v59, %v6868_v13  ;;  %v7348_v13 = vld [vmem:[%s12559_s10 + $0x78] sm:$0xff] }
 0x873   :  { %7349 = vmatpush.msrb.mxu3 %v7348_v13  ;;  %v7333_v13 = vld [vmem:[%s12559_s10] sm:$0xff] }
 0x879   :  { %7115 = vmatmul.f32.gmra.mxu3 %v6995_v37  ;;  %7703 = vmatmul.msk.f32.gmra.mxu2 %vm3351_vm4, %v12274_v4  ;;  %v7148_v4 = vpop.f32.mrf.mxu2 }
 0x881   :  { %7118 = vmatmul.f32.gmra.mxu3 %v6996_v35  ;;  %7704 = vmatmul.msk.f32.gmra.mxu2 %vm3351_vm4, %v12278_v19  ;;  %v7347_v35 = vld [vmem:[%s12559_s10 + $0x70] sm:$0xff] }
 0x882   :  { %7350 = vmatpush.msrb.mxu3 %v7347_v35  ;;  %v7384_v35 = vld [vmem:[%s12562_s13 + $0x18] sm:$0xff] }
 0x889   :  { %7705 = vmatmul.msk.f32.gmra.mxu2 %vm3351_vm4, %v6780_v57 }
 0x8a6   :  { %v7151_v0 = vpop.f32.mrf.mxu2 }
 0x8ae   :  { %v7154_v1 = vpop.f32.mrf.mxu2 }
 0x8c4   :  { %v7157_v15 = vpop.f32.mrf.mxu2 }
 0x8cc   :  { %v7098_v27 = vpop.f32.mrf.mxu3  ;;  %v12428_v60 = vpop.f32.mrf.mxu2 }
 0x8cd   :  { %v7140_v28 = vadd.f32 %v7139_v36, %v7098_v27 }
 0x8d4   :  { %v7101_v19 = vpop.f32.mrf.mxu3  ;;  %v7180_v3 = vpop.f32.mrf.mxu2 }
 0x8d5   :  { %v7181_v20 = vadd.f32 %v7180_v3, %v7140_v28  ;;  %v7143_v24 = vadd.f32 %v7142_v10, %v7101_v19  ;;  %v7346_v10 = vld [vmem:[%s12559_s10 + $0x68] sm:$0xff]  ;;  %v7345_v28 = vld [vmem:[%s12559_s10 + $0x60] sm:$0xff] }
 0x8d6   :  { %7351 = vmatpush.msrb.mxu3 %v7346_v10 }
 0x8d7   :  { %v7208_v56 = vmul.f32 %v12433_v53, %v7181_v20 }
 0x8d8   :  { %7352 = vmatpush.msrb.mxu3 %v7345_v28  ;;  %v8063_v28 = vld [vmem:[%s12560_s11] ss:$0 sm:$0xff] }
 0x8d9   :  { %v7220_v7 = vadd.f32 %v12438_v55, %v7208_v56 }
 0x8db   :  { %v7228_v52 = vmax.f32 %v7220_v7, 0.0 }
 0x8dc   :  { %v7104_v17 = vpop.f32.mrf.mxu3  ;;  %v7183_v14 = vpop.f32.mrf.mxu2 }
 0x8dd   :  { %7236 = vst.msk [vmem:[#allocation7] sm:$0xff] %vm3351_vm4, %v7228_v52  ;;  %v7184_v2 = vadd.f32 %v7183_v14, %v7143_v24  ;;  %v7146_v39 = vadd.f32 %v7145_v46, %v7104_v17  ;;  %v7343_v17 = vld [vmem:[%s12559_s10 + $0x50] sm:$0xff] }
 0x8df   :  { %v7209_v49 = vmul.f32 %v12433_v53, %v7184_v2 }
 0x8e1   :  { %v7221_v6 = vadd.f32 %v12438_v55, %v7209_v49 }
 0x8e3   :  { %v7229_v8 = vmax.f32 %v7221_v6, 0.0 }
 0x8e4   :  { %v7107_v30 = vpop.f32.mrf.mxu3  ;;  %v7186_v12 = vpop.f32.mrf.mxu2  ;;  %v7244_v25 = vld [vmem:[#allocation7] sm:$0xff] }
 0x8e5   :  { %7237 = vst.msk [vmem:[#allocation7 + $0x8] sm:$0xff] %vm3351_vm4, %v7229_v8  ;;  %v7187_v9 = vadd.f32 %v7186_v12, %v7146_v39  ;;  %v7149_v47 = vadd.f32 %v7148_v4, %v7107_v30  ;;  %v7342_v8 = vld [vmem:[%s12559_s10 + $0x48] sm:$0xff] }
 0x8e7   :  { %v7210_v44 = vmul.f32 %v12433_v53, %v7187_v9 }
 0x8e9   :  { %v7222_v34 = vadd.f32 %v12438_v55, %v7210_v44 }
 0x8eb   :  { %v7230_v58 = vmax.f32 %v7222_v34, 0.0  ;;  %v7341_v34 = vld [vmem:[%s12559_s10 + $0x40] sm:$0xff] }
 0x8ec   :  { %v7110_v38 = vpop.f32.mrf.mxu3  ;;  %v7189_v21 = vpop.f32.mrf.mxu2  ;;  %v7245_v23 = vld [vmem:[#allocation7 + $0x8] sm:$0xff] }
 0x8ed   :  { %7238 = vst.msk [vmem:[#allocation7 + $0x10] sm:$0xff] %vm3351_vm4, %v7230_v58  ;;  %v7190_v41 = vadd.f32 %v7189_v21, %v7149_v47  ;;  %v7152_v32 = vadd.f32 %v7151_v0, %v7110_v38  ;;  %v7252_v54 = vmax.f32 %v7244_v25, %v7245_v23  ;;  %v7340_v21 = vld [vmem:[%s12559_s10 + $0x38] sm:$0xff]  ;;  %v7338_v25 = vld [vmem:[%s12559_s10 + $0x28] sm:$0xff] }
 0x8ef   :  { %v7211_v63 = vmul.f32 %v12433_v53, %v7190_v41  ;;  %v7260_v36 = vrot.slane %v7252_v54, 2  ;;  %v7706_v0 = vrot.slane %v7252_v54, 9 }
 0x8f1   :  { %v7223_v31 = vadd.f32 %v12438_v55, %v7211_v63  ;;  %v7707_v20 = vrot.slane %v7260_v36, 9  ;;  %v7292_v52 = vmax.f32 %v7252_v54, %v7706_v0  ;;  %v7339_v63 = vld [vmem:[%s12559_s10 + $0x30] sm:$0xff]  ;;  %v7336_v54 = vld [vmem:[%s12559_s10 + $0x18] sm:$0xff] }
 0x8f3   :  { %v7231_v26 = vmax.f32 %v7223_v31, 0.0  ;;  %v7293_v49 = vmax.f32 %v7260_v36, %v7707_v20  ;;  %v7302_v12 = vperm.slane %v7292_v52, 0 }
 0x8f4   :  { %v7113_v51 = vpop.f32.mrf.mxu3  ;;  %v7192_v33 = vpop.f32.mrf.mxu2  ;;  %v7246_v44 = vld [vmem:[#allocation7 + $0x10] sm:$0xff] }
 0x8f5   :  { %7239 = vst.msk [vmem:[#allocation7 + $0x18] sm:$0xff] %vm3351_vm4, %v7231_v26  ;;  %v7193_v50 = vadd.f32 %v7192_v33, %v7152_v32  ;;  %v7155_v42 = vadd.f32 %v7154_v1, %v7113_v51 }
 0x8f7   :  { %v7212_v11 = vmul.f32 %v12433_v53, %v7193_v50 }
 0x8f9   :  { %v7224_v16 = vadd.f32 %v12438_v55, %v7212_v11 }
 0x8fb   :  { %v7232_v40 = vmax.f32 %v7224_v16, 0.0 }
 0x8fc   :  { %v7195_v45 = vpop.f32.mrf.mxu2  ;;  %v7116_v43 = vpop.f32.mrf.mxu3  ;;  %v7247_v39 = vld [vmem:[#allocation7 + $0x18] sm:$0xff] }
 0x8fd   :  { %7240 = vst.msk [vmem:[#allocation7 + $0x20] sm:$0xff] %vm3351_vm4, %v7232_v40  ;;  %v7196_v18 = vadd.f32 %v7195_v45, %v7155_v42  ;;  %v7158_v29 = vadd.f32 %v7157_v15, %v7116_v43  ;;  %v7253_v58 = vmax.f32 %v7246_v44, %v7247_v39 }
 0x8ff   :  { %v7213_v22 = vmul.f32 %v12433_v53, %v7196_v18  ;;  %v7261_v31 = vrot.slane %v7253_v58, 2  ;;  %v7708_v32 = vrot.slane %v7253_v58, 9 }
 0x901   :  { %v7225_v61 = vadd.f32 %v12438_v55, %v7213_v22  ;;  %v7709_v50 = vrot.slane %v7261_v31, 9  ;;  %v7294_v16 = vmax.f32 %v7253_v58, %v7708_v32 }
 0x903   :  { %v7233_v62 = vmax.f32 %v7225_v61, 0.0  ;;  %v7295_v18 = vmax.f32 %v7261_v31, %v7709_v50  ;;  %v7316_v43 = vperm.slane %v7294_v16, 0 }
 0x904   :  { %v7198_v5 = vpop.f32.mrf.mxu2  ;;  %v7119_v59 = vpop.f32.mrf.mxu3  ;;  %v7248_v15 = vld [vmem:[#allocation7 + $0x20] sm:$0xff] }
 0x905   :  { %7241 = vst.msk [vmem:[#allocation7 + $0x28] sm:$0xff] %vm3351_vm4, %v7233_v62  ;;  %v7199_v37 = vadd.f32 %v7198_v5, %v7158_v29  ;;  %v7161_v46 = vadd.f32 %v12428_v60, %v7119_v59  ;;  %v7344_v60 = vld [vmem:[%s12559_s10 + $0x58] sm:$0xff]  ;;  %v7324_v29 = vperm.slane %v7295_v18, 0  ;;  %v7334_v59 = vld [vmem:[%s12559_s10 + $0x8] sm:$0xff] }
 0x906   :  { %7353 = vmatpush.msrb.mxu3 %v7344_v60 }
 0x907   :  { %v7214_v48 = vmul.f32 %v12433_v53, %v7199_v37  ;;  %v7337_v37 = vld [vmem:[%s12559_s10 + $0x20] sm:$0xff] }
 0x908   :  { %7354 = vmatpush.msrb.mxu3 %v7343_v17 }
 0x909   :  { %v7226_v57 = vadd.f32 %v12438_v55, %v7214_v48  ;;  %v7335_v48 = vld [vmem:[%s12559_s10 + $0x10] sm:$0xff] }
 0x90a   :  { %7355 = vmatpush.msrb.mxu3 %v7342_v8 }
 0x90b   :  { %v7234_v4 = vmax.f32 %v7226_v57, 0.0 }
 0x90c   :  { %v7201_v1 = vpop.f32.mrf.mxu2  ;;  %v7249_v27 = vld [vmem:[#allocation7 + $0x28] sm:$0xff]  ;;  %7356 = vmatpush.msrb.mxu3 %v7341_v34 }
 0x90d   :  { %7242 = vst.msk [vmem:[#allocation7 + $0x30] sm:$0xff] %vm3351_vm4, %v7234_v4  ;;  %v7202_v19 = vadd.f32 %v7201_v1, %v7161_v46  ;;  %v7254_v3 = vmax.f32 %v7248_v15, %v7249_v27  ;;  %v7383_v1 = vld [vmem:[%s12562_s13 + $0x10] sm:$0xff]  ;;  %v7382_v15 = vld [vmem:[%s12562_s13 + $0x8] sm:$0xff]  ;;  %v7381_v27 = vld [vmem:[%s12562_s13] sm:$0xff] }
 0x90e   :  { %7357 = vmatpush.msrb.mxu3 %v7340_v21 }
 0x90f   :  { %v7215_v56 = vmul.f32 %v12433_v53, %v7202_v19  ;;  %v7262_v7 = vrot.slane %v7254_v3, 2  ;;  %v7710_v24 = vrot.slane %v7254_v3, 9  ;;  %v8064_v19 = vld [vmem:[%s12561_s12] ss:$0 sm:$0xff] }
 0x910   :  { %7358 = vmatpush.msrb.mxu3 %v7339_v63 }
 0x911   :  { %v7227_v14 = vadd.f32 %v12438_v55, %v7215_v56  ;;  %v7711_v2 = vrot.slane %v7262_v7, 9  ;;  %v7296_v6 = vmax.f32 %v7254_v3, %v7710_v24  ;;  %v7308_v55 = vperm.slane %v7293_v49, 0 }
 0x912   :  { %7359 = vmatpush.msrb.mxu3 %v7338_v25 }
 0x913   :  { %v7235_v53 = vmax.f32 %v7227_v14, 0.0  ;;  %v7297_v30 = vmax.f32 %v7262_v7, %v7711_v2  ;;  %v7303_v9 = vperm.slane %v7296_v6, 0  ;;  %v8065_v7 = vld [vmem:[#allocation8] ss:$0 sm:$0xff] }
 0x914   :  { %v7250_v26 = vld [vmem:[#allocation7 + $0x30] sm:$0xff]  ;;  %7360 = vmatpush.msrb.mxu3 %v7337_v37 }
 0x915   :  { %7243 = vst.msk [vmem:[#allocation7 + $0x38] sm:$0xff] %vm3351_vm4, %v7235_v53  ;;  %v7309_v47 = vperm.slane %v7297_v30, 0  ;;  %v7304_v38 = vsel %vm5230_vm14, %v7303_v9, %v7302_v12 }
 0x916   :  { %7361 = vmatpush.msrb.mxu3 %v7336_v54 }
 0x917   :  { %v7310_v41 = vsel %vm5230_vm14, %v7309_v47, %v7308_v55 }
 0x918   :  { %7311 = vrot.lane.b32.xlu1 %v7310_v41, %s8168_s28  ;;  %7362 = vmatpush.msrb.mxu3 %v7335_v48 }
 0x91a   :  { %7363 = vmatpush.msrb.mxu3 %v7334_v59 }
 0x91c   :  { %v7251_v51 = vld [vmem:[#allocation7 + $0x38] sm:$0xff]  ;;  %7364 = vmatpush.msrb.mxu3 %v7333_v13 }
 0x91d   :  { %v7255_v33 = vmax.f32 %v7250_v26, %v7251_v51 }
 0x91e   :  { %7404 = vmatpush.msra.mxu3 %v7384_v35 }
 0x91f   :  { %v7712_v11 = vrot.slane %v7255_v33, 9  ;;  %v7263_v42 = vrot.slane %v7255_v33, 2 }
 0x920   :  { %7405 = vmatpush.msra.mxu3 %v7383_v1 }
 0x921   :  { %v7298_v40 = vmax.f32 %v7255_v33, %v7712_v11  ;;  %v7713_v45 = vrot.slane %v7263_v42, 9 }
 0x922   :  { %7406 = vmatpush.msra.mxu3 %v7382_v15 }
 0x923   :  { %v7317_v22 = vperm.slane %v7298_v40, 0  ;;  %v7299_v61 = vmax.f32 %v7263_v42, %v7713_v45 }
 0x924   :  { %7407 = vmatpush.msra.mxu3 %v7381_v27 }
 0x925   :  { %v7318_v23 = vsel %vm5230_vm14, %v7317_v22, %v7316_v43  ;;  %v7325_v62 = vperm.slane %v7299_v61, 0 }
 0x926   :  { %7319 = vrot.lane.b32.xlu2 %v7318_v23, %s8171_s27 }
 0x927   :  { %v7326_v5 = vsel %vm5230_vm14, %v7325_v62, %v7324_v29  ;;  %vm12921_vm14 = vcmask 254976  }
 0x928   :  { %7327 = vrot.lane.b32.xlu0 %v7326_v5, %s8170_s25 }
 0x980   :  { %v7320_v10 = vpop.permute.xlu2 %7319 }
 0x98a   :  { %v7312_v57 = vpop.permute.xlu1 %7311 }
 0x98b   :  { %v7330_v36 = vsel %vm3351_vm4, %v7304_v38, %v7312_v57 }
 0x98c   :  { %v7331_v46 = vsel %vm5927_vm0, %v7330_v36, %v7320_v10 }
 0x99a   :  { %v7328_v4 = vpop.permute.xlu0 %7327 }
 0x99b   :  { %v7332_v0 = vsel %vm5944_vm5, %v7331_v46, %v7328_v4 }
 0x99c   :  { %7365 = vmatmul.f32.vlgmr.msrb.gmra.mxu3 %v7332_v0 }
 0xa1f   :  { %v7366_v3 = vpop.f32.mrf.mxu3 }
 0xa20   :  { %v7373_v20 = vmul.f32 %v8063_v28, %v7366_v3 }
 0xa22   :  { %v7378_v60 = vadd.f32 %v8064_v19, %v7373_v20 }
 0xa24   :  { %v7379_v56 = vmax.f32 %v7378_v60, 0.0 }
 0xa26   :  { %7380 = vst.msk [vmem:[#allocation9] sm:$0x3] %vm12921_vm14, %v7379_v56  ;;  %7714 = vmatmul.msk.f32.vlgmr.msra.gmra.mxu3 %vm3351_vm4, %v7379_v56 }
 0xa27   :  { %7449 = dma.vmem_to_hbm [thread:$0]  %s7445_s24, 32, %s7447_s1, [#allocation10]  }
 0xaa9   :  { %v7409_v24 = vpop.f32.mrf.mxu3 }
 0xaaa   :  { %v7410_v52 = vadd.f32 %v8065_v7, %v7409_v24 }
 0xaac   :  { %v7412_v17 = vand.u32 2147483647, %v7410_v52  ;;  %vm7416_vm13 = vcmp.ge.f32.partialorder %v7410_v52, 0.0 }
 0xaae   :  { %v7413_v14 = vsub.f32 0.0, %v7412_v17 }
 0xab0   :  { %v7414_v2 = vmul.f32 1.442695, %v7413_v14 }
 0xab2   :  { %8066 = vpow2.f32 %v7414_v2 }
 0xab8   :  { %v8067_v49 = vpop.eup %8066 }
 0xab9   :  { %v7417_v6 = vadd.f32 1.0, %v8067_v49 }
 0xabb   :  { %8068 = vrcp.f32 %v7417_v6  ;;  %v7429_v30 = vand.u32 2147483648, %v7417_v6  ;;  %v7427_v9 = vand.u32 2147483647, %v7417_v6  ;;  %vm7423_vm0 = vweird.f32 %v7417_v6 }
 0xabd   :  { %v7430_v34 = vor.u32 1.1754944e-38, %v7429_v30  ;;  %vm7428_vm15 = vcmp.eq.f32.partialorder %v7427_v9, 8.507059e+37 }
 0xac1   :  { %v8069_v39 = vpop.eup %8068 }
 0xac2   :  { %v7419_v8 = vmul.f32 %v8069_v39, %v7417_v6  ;;  %vm7424_vm4 = vweird.f32 %v8069_v39 }
 0xac3   :  { %vm7425_vm5 = vmor %vm7423_vm0, %vm7424_vm4 }
 0xac4   :  { %v7420_v53 = vsub.f32 1.0, %v7419_v8 }
 0xac6   :  { %v7421_v12 = vmul.f32 %v8069_v39, %v7420_v53 }
 0xac8   :  { %v7422_v44 = vadd.f32 %v8069_v39, %v7421_v12 }
 0xaca   :  { %v7426_v55 = vsel %vm7425_vm5, %v8069_v39, %v7422_v44 }
 0xacb   :  { %v7431_v47 = vsel %vm7428_vm15, %v7430_v34, %v7426_v55 }
 0xacc   :  { %v7433_v58 = vmul.f32 %v8067_v49, %v7431_v47 }
 0xace   :  { %v7434_v38 = vsel %vm7416_vm13, %v7431_v47, %v7433_v58 }
 0xacf   :  { %7436 = vst.msk [vmem:[%s12564_s15] sm:$0x3] %vm7435_vm11, %v7434_v38 }
 0xad0   :  { %8159 = dma.done.wait [#allocation10], 32  }
 0xad1   :  { %8160 = vsyncadd [#allocation10], 4294967264 }
 0xad2   :  { %7456 = vsyncpa [#allocation10], 1 }

</bundles_post_ra>
